<compile_context>
chip_gen: v5e
topology: v5e:2x2
jax: 0.10.0
libtpu: 0.0.40
codegen_flags: <defaults>
</compile_context>

<pallas_src>
import jax
import jax.numpy as jnp
from jax.experimental import pallas as pl
from jax.experimental.pallas import tpu as pltpu

BN_EPS = 1e-5   # nn.BatchNorm1d default eps (momentum=0.01 is a running-stat knob only)
TN1 = 256       # output-feature tile for Linear(8192, 1024): 8192*256*2B = 4 MiB bf16 per step


def linbn1_kernel(x_ref, w_ref, b_ref, g_ref, beta_ref, out_ref):
    """One column tile of Linear(8192,1024) + ReLU + BatchNorm1d(1024).

    x_ref:   (B, 8192)  bf16 (full, resident across the grid)
    w_ref:   (8192, tn) bf16 column block
    b/g/beta:(1, tn)    f32
    out_ref: (B, tn)    f32 streamed per tile (lane-dense, multiple of 128)
    BatchNorm1d statistics are per-feature over the batch, so each tile is
    independent -> the grid axis can be marked "parallel".
    """
    h = jnp.dot(x_ref[...], w_ref[...], preferred_element_type=jnp.float32)
    h = h + b_ref[...]
    h = jnp.maximum(h, 0.0)                                   # ReLU
    mu = jnp.mean(h, axis=0, keepdims=True)                   # batch mean
    var = jnp.mean((h - mu) ** 2, axis=0, keepdims=True)      # biased batch variance
    out_ref[...] = (h - mu) * jax.lax.rsqrt(var + BN_EPS) * g_ref[...] + beta_ref[...]


def linbn2_kernel(h_ref, w_ref, b_ref, g_ref, beta_ref, out_ref):
    """Linear(1024,512) + ReLU + BatchNorm1d(512); all operands fit VMEM, single call."""
    y = jnp.dot(h_ref[...].astype(jnp.bfloat16), w_ref[...],
                preferred_element_type=jnp.float32)
    y = y + b_ref[...]
    y = jnp.maximum(y, 0.0)
    mu = jnp.mean(y, axis=0, keepdims=True)
    var = jnp.mean((y - mu) ** 2, axis=0, keepdims=True)
    out_ref[...] = (y - mu) * jax.lax.rsqrt(var + BN_EPS) * g_ref[...] + beta_ref[...]


def init_params(key):
    """PyTorch-default-style init: Linear W,b ~ U(-1/sqrt(fan_in), 1/sqrt(fan_in));
    BatchNorm weight=1, bias=0.  Weights are stored in bfloat16 ONCE here so the
    per-call HBM weight stream is halved; biases/BN params stay f32."""
    dims = [(8192, 1024), (1024, 512)]
    params = {}
    for i, (fi, fo) in enumerate(dims, start=1):
        k = 1.0 / float(fi) ** 0.5
        key, kw, kb = jax.random.split(key, 3)
        w = jax.random.uniform(kw, (fi, fo), jnp.float32, -k, k)
        params[f"w{i}"] = w.astype(jnp.bfloat16)
        params[f"b{i}"] = jax.random.uniform(kb, (1, fo), jnp.float32, -k, k)
        params[f"g{i}"] = jnp.ones((1, fo), jnp.float32)
        params[f"beta{i}"] = jnp.zeros((1, fo), jnp.float32)
    # TODO(synk): classifier_out = Linear(512, num_classes) exists in the module
    # but is never invoked by forward(); it is intentionally not implemented.
    return params


@jax.jit
def modified_classifier(x, params):
    B = x.shape[0]
    # x.view(B, -1); cast the (tiny) activation to bf16 so the big matmul runs
    # bf16 x bf16 on the MXU with an f32 accumulator.
    xf = jnp.reshape(x, (B, -1)).astype(jnp.bfloat16)
    K = xf.shape[1]                   # 8192
    w1, w2 = params["w1"], params["w2"]
    N1 = w1.shape[1]                  # 1024
    N2 = w2.shape[1]                  # 512

    # ---- Kernel 1: Linear(8192,1024) + ReLU + BN1, tiled over output features.
    h = pl.pallas_call(
        linbn1_kernel,
        grid=(N1 // TN1,),
        in_specs=[
            pl.BlockSpec((B, K), lambda n: (0, 0)),        # x, resident
            pl.BlockSpec((K, TN1), lambda n: (0, n)),      # W1 column block (bf16)
            pl.BlockSpec((1, TN1), lambda n: (0, n)),      # b1
            pl.BlockSpec((1, TN1), lambda n: (0, n)),      # gamma1
            pl.BlockSpec((1, TN1), lambda n: (0, n)),      # beta1
        ],
        out_specs=pl.BlockSpec((B, TN1), lambda n: (0, n)),
        out_shape=jax.ShapeDtypeStruct((B, N1), jnp.float32),
        compiler_params=pltpu.CompilerParams(dimension_semantics=("parallel",)),
    )(xf, w1, params["b1"], params["g1"], params["beta1"])

    # ---- Kernel 2: Linear(1024,512) + ReLU + BN2, single invocation, explicit VMEM.
    full_vmem = pl.BlockSpec(memory_space=pltpu.MemorySpace.VMEM)
    out = pl.pallas_call(
        linbn2_kernel,
        in_specs=[full_vmem] * 5,
        out_specs=full_vmem,
        out_shape=jax.ShapeDtypeStruct((B, N2), jnp.float32),
    )(h, w2, params["b2"], params["g2"], params["beta2"])
    return out


if __name__ == "__main__":
    key = jax.random.PRNGKey(0)
    B, C, Hs, Ws = 8, 2, 64, 64           # 2*64*64 = 8192 features, as forward() requires

    k_x, k_p = jax.random.split(key)
    x = jax.random.normal(k_x, (B, C, Hs, Ws), jnp.float32)
    params = init_params(k_p)

    out = modified_classifier(x, params)
    out = jax.block_until_ready(out)

    assert out.shape == (B, 512), out.shape
    assert bool(jnp.all(jnp.isfinite(out)))
    # sanity: final BatchNorm (gamma=1, beta=0) => per-feature batch mean ~ 0 and
    # batch variance <= ~1 (features killed by ReLU legitimately give var 0).
    col_mean = jnp.mean(out, axis=0)
    col_var = jnp.mean((out - col_mean[None, :]) ** 2, axis=0)
    assert bool(jnp.all(jnp.abs(col_mean) < 1e-2))
    assert bool(jnp.all(col_var < 1.2))

    print("KERNEL_OK")
</pallas_src>

<mosaic_0001>
module attributes {stable_mosaic.version = 11 : i64} {
  func.func @linbn2_kernel(%arg0: memref<8x1024xf32, #tpu.memory_space<vmem>>, %arg1: memref<1024x512xbf16, #tpu.memory_space<vmem>>, %arg2: memref<1x512xf32, #tpu.memory_space<vmem>>, %arg3: memref<1x512xf32, #tpu.memory_space<vmem>>, %arg4: memref<1x512xf32, #tpu.memory_space<vmem>>, %arg5: memref<8x512xf32, #tpu.memory_space<vmem>>) attributes {dimension_semantics = [], scalar_prefetch = 0 : i64, scratch_operands = 0 : i64, tpu.core_type = #tpu.core_type<tc>} {
    %c0 = arith.constant 0 : index
    %c0_0 = arith.constant 0 : index
    %0 = vector.load %arg0[%c0, %c0_0] : memref<8x1024xf32, #tpu.memory_space<vmem>>, vector<8x1024xf32>
    %1 = arith.truncf %0 : vector<8x1024xf32> to vector<8x1024xbf16>
    %c0_1 = arith.constant 0 : index
    %c0_2 = arith.constant 0 : index
    %2 = vector.load %arg1[%c0_1, %c0_2] : memref<1024x512xbf16, #tpu.memory_space<vmem>>, vector<1024x512xbf16>
    %cst = arith.constant dense<0.000000e+00> : vector<8x512xf32>
    %3 = tpu.matmul %1, %2, %cst {dimension_numbers = #tpu.dot_dimension_numbers<[1], [0], [0], [1], [0, 0, 1, 1], [], []>} : vector<8x1024xbf16>, vector<1024x512xbf16>, vector<8x512xf32> -> vector<8x512xf32>
    %c0_3 = arith.constant 0 : index
    %c0_4 = arith.constant 0 : index
    %4 = vector.load %arg2[%c0_3, %c0_4] : memref<1x512xf32, #tpu.memory_space<vmem>>, vector<1x512xf32>
    %5 = vector.broadcast %4 : vector<1x512xf32> to vector<8x512xf32>
    %6 = arith.addf %3, %5 : vector<8x512xf32>
    %cst_5 = arith.constant 0.000000e+00 : f32
    %7 = vector.broadcast %cst_5 : f32 to vector<8x512xf32>
    %8 = arith.maximumf %6, %7 : vector<8x512xf32>
    %cst_6 = arith.constant dense<0.000000e+00> : vector<512xf32>
    %9 = vector.multi_reduction <add>, %8, %cst_6 [0] : vector<8x512xf32> to vector<512xf32>
    %10 = vector.shape_cast %9 : vector<512xf32> to vector<1x512xf32>
    %cst_7 = arith.constant 8.000000e+00 : f32
    %11 = vector.broadcast %cst_7 : f32 to vector<1x512xf32>
    %12 = arith.divf %10, %11 : vector<1x512xf32>
    %13 = vector.broadcast %12 : vector<1x512xf32> to vector<8x512xf32>
    %14 = arith.subf %8, %13 : vector<8x512xf32>
    %15 = arith.mulf %14, %14 : vector<8x512xf32>
    %cst_8 = arith.constant dense<0.000000e+00> : vector<512xf32>
    %16 = vector.multi_reduction <add>, %15, %cst_8 [0] : vector<8x512xf32> to vector<512xf32>
    %17 = vector.shape_cast %16 : vector<512xf32> to vector<1x512xf32>
    %cst_9 = arith.constant 8.000000e+00 : f32
    %18 = vector.broadcast %cst_9 : f32 to vector<1x512xf32>
    %19 = arith.divf %17, %18 : vector<1x512xf32>
    %20 = vector.broadcast %12 : vector<1x512xf32> to vector<8x512xf32>
    %21 = arith.subf %8, %20 : vector<8x512xf32>
    %cst_10 = arith.constant 9.99999974E-6 : f32
    %22 = vector.broadcast %cst_10 : f32 to vector<1x512xf32>
    %23 = arith.addf %19, %22 : vector<1x512xf32>
    %24 = math.rsqrt %23 : vector<1x512xf32>
    %25 = vector.broadcast %24 : vector<1x512xf32> to vector<8x512xf32>
    %26 = arith.mulf %21, %25 : vector<8x512xf32>
    %c0_11 = arith.constant 0 : index
    %c0_12 = arith.constant 0 : index
    %27 = vector.load %arg3[%c0_11, %c0_12] : memref<1x512xf32, #tpu.memory_space<vmem>>, vector<1x512xf32>
    %28 = vector.broadcast %27 : vector<1x512xf32> to vector<8x512xf32>
    %29 = arith.mulf %26, %28 : vector<8x512xf32>
    %c0_13 = arith.constant 0 : index
    %c0_14 = arith.constant 0 : index
    %30 = vector.load %arg4[%c0_13, %c0_14] : memref<1x512xf32, #tpu.memory_space<vmem>>, vector<1x512xf32>
    %31 = vector.broadcast %30 : vector<1x512xf32> to vector<8x512xf32>
    %32 = arith.addf %29, %31 : vector<8x512xf32>
    %c0_15 = arith.constant 0 : index
    %c0_16 = arith.constant 0 : index
    %33 = vector.load %arg5[%c0_15, %c0_16] : memref<8x512xf32, #tpu.memory_space<vmem>>, vector<8x512xf32>
    tpu.vector_store %arg5[%c0_15, %c0_16], %32 {strides = array<i32>} : memref<8x512xf32, #tpu.memory_space<vmem>>, vector<8x512xf32>,
    return
  }
}

module attributes {stable_mosaic.version = 11 : i64} {
  func.func @linbn1_kernel(%arg0: i32, %arg1: memref<8x8192xbf16, #tpu.memory_space<vmem>>, %arg2: memref<8192x256xbf16, #tpu.memory_space<vmem>>, %arg3: memref<1x256xf32, #tpu.memory_space<vmem>>, %arg4: memref<1x256xf32, #tpu.memory_space<vmem>>, %arg5: memref<1x256xf32, #tpu.memory_space<vmem>>, %arg6: memref<8x256xf32, #tpu.memory_space<vmem>>) attributes {dimension_semantics = [#tpu.dimension_semantics<parallel>], iteration_bounds = array<i64: 4>, scalar_prefetch = 0 : i64, scratch_operands = 0 : i64, tpu.core_type = #tpu.core_type<tc>, window_params = [{pipeline_mode = #tpu.pipeline_mode<synchronous>, transform_indices = @transform_0, window_bounds = array<i64: 8, 8192>}, {transform_indices = @transform_1, window_bounds = array<i64: 8192, 256>}, {transform_indices = @transform_2, window_bounds = array<i64: 1, 256>}, {transform_indices = @transform_3, window_bounds = array<i64: 1, 256>}, {transform_indices = @transform_4, window_bounds = array<i64: 1, 256>}, {transform_indices = @transform_5, window_bounds = array<i64: 8, 256>}]} {
    %c0 = arith.constant 0 : index
    %c0_0 = arith.constant 0 : index
    %0 = vector.load %arg1[%c0, %c0_0] : memref<8x8192xbf16, #tpu.memory_space<vmem>>, vector<8x8192xbf16>
    %c0_1 = arith.constant 0 : index
    %c0_2 = arith.constant 0 : index
    %1 = vector.load %arg2[%c0_1, %c0_2] : memref<8192x256xbf16, #tpu.memory_space<vmem>>, vector<8192x256xbf16>
    %cst = arith.constant dense<0.000000e+00> : vector<8x256xf32>
    %2 = tpu.matmul %0, %1, %cst {dimension_numbers = #tpu.dot_dimension_numbers<[1], [0], [0], [1], [0, 0, 1, 1], [], []>} : vector<8x8192xbf16>, vector<8192x256xbf16>, vector<8x256xf32> -> vector<8x256xf32>
    %c0_3 = arith.constant 0 : index
    %c0_4 = arith.constant 0 : index
    %3 = vector.load %arg3[%c0_3, %c0_4] : memref<1x256xf32, #tpu.memory_space<vmem>>, vector<1x256xf32>
    %4 = vector.broadcast %3 : vector<1x256xf32> to vector<8x256xf32>
    %5 = arith.addf %2, %4 : vector<8x256xf32>
    %cst_5 = arith.constant 0.000000e+00 : f32
    %6 = vector.broadcast %cst_5 : f32 to vector<8x256xf32>
    %7 = arith.maximumf %5, %6 : vector<8x256xf32>
    %cst_6 = arith.constant dense<0.000000e+00> : vector<256xf32>
    %8 = vector.multi_reduction <add>, %7, %cst_6 [0] : vector<8x256xf32> to vector<256xf32>
    %9 = vector.shape_cast %8 : vector<256xf32> to vector<1x256xf32>
    %cst_7 = arith.constant 8.000000e+00 : f32
    %10 = vector.broadcast %cst_7 : f32 to vector<1x256xf32>
    %11 = arith.divf %9, %10 : vector<1x256xf32>
    %12 = vector.broadcast %11 : vector<1x256xf32> to vector<8x256xf32>
    %13 = arith.subf %7, %12 : vector<8x256xf32>
    %14 = arith.mulf %13, %13 : vector<8x256xf32>
    %cst_8 = arith.constant dense<0.000000e+00> : vector<256xf32>
    %15 = vector.multi_reduction <add>, %14, %cst_8 [0] : vector<8x256xf32> to vector<256xf32>
    %16 = vector.shape_cast %15 : vector<256xf32> to vector<1x256xf32>
    %cst_9 = arith.constant 8.000000e+00 : f32
    %17 = vector.broadcast %cst_9 : f32 to vector<1x256xf32>
    %18 = arith.divf %16, %17 : vector<1x256xf32>
    %19 = vector.broadcast %11 : vector<1x256xf32> to vector<8x256xf32>
    %20 = arith.subf %7, %19 : vector<8x256xf32>
    %cst_10 = arith.constant 9.99999974E-6 : f32
    %21 = vector.broadcast %cst_10 : f32 to vector<1x256xf32>
    %22 = arith.addf %18, %21 : vector<1x256xf32>
    %23 = math.rsqrt %22 : vector<1x256xf32>
    %24 = vector.broadcast %23 : vector<1x256xf32> to vector<8x256xf32>
    %25 = arith.mulf %20, %24 : vector<8x256xf32>
    %c0_11 = arith.constant 0 : index
    %c0_12 = arith.constant 0 : index
    %26 = vector.load %arg4[%c0_11, %c0_12] : memref<1x256xf32, #tpu.memory_space<vmem>>, vector<1x256xf32>
    %27 = vector.broadcast %26 : vector<1x256xf32> to vector<8x256xf32>
    %28 = arith.mulf %25, %27 : vector<8x256xf32>
    %c0_13 = arith.constant 0 : index
    %c0_14 = arith.constant 0 : index
    %29 = vector.load %arg5[%c0_13, %c0_14] : memref<1x256xf32, #tpu.memory_space<vmem>>, vector<1x256xf32>
    %30 = vector.broadcast %29 : vector<1x256xf32> to vector<8x256xf32>
    %31 = arith.addf %28, %30 : vector<8x256xf32>
    %c0_15 = arith.constant 0 : index
    %c0_16 = arith.constant 0 : index
    %32 = vector.load %arg6[%c0_15, %c0_16] : memref<8x256xf32, #tpu.memory_space<vmem>>, vector<8x256xf32>
    tpu.vector_store %arg6[%c0_15, %c0_16], %31 {strides = array<i32>} : memref<8x256xf32, #tpu.memory_space<vmem>>, vector<8x256xf32>,
    return
  }
  func.func @transform_0(%arg0: i32) -> (i32, i32) {
    %c0_i32 = arith.constant 0 : i32
    %c0_i32_0 = arith.constant 0 : i32
    %c0_i32_1 = arith.constant 0 : i32
    return %c0_i32, %c0_i32_0 : i32, i32
  }
  func.func @transform_1(%arg0: i32) -> (i32, i32) {
    %c0_i32 = arith.constant 0 : i32
    %c0_i32_0 = arith.constant 0 : i32
    return %c0_i32, %arg0 : i32, i32
  }
  func.func @transform_2(%arg0: i32) -> (i32, i32) {
    %c0_i32 = arith.constant 0 : i32
    %c0_i32_0 = arith.constant 0 : i32
    return %c0_i32, %arg0 : i32, i32
  }
  func.func @transform_3(%arg0: i32) -> (i32, i32) {
    %c0_i32 = arith.constant 0 : i32
    %c0_i32_0 = arith.constant 0 : i32
    return %c0_i32, %arg0 : i32, i32
  }
  func.func @transform_4(%arg0: i32) -> (i32, i32) {
    %c0_i32 = arith.constant 0 : i32
    %c0_i32_0 = arith.constant 0 : i32
    return %c0_i32, %arg0 : i32, i32
  }
  func.func @transform_5(%arg0: i32) -> (i32, i32) {
    %c0_i32 = arith.constant 0 : i32
    %c0_i32_0 = arith.constant 0 : i32
    return %c0_i32, %arg0 : i32, i32
  }
}

</mosaic_0001>

<bundles_post_ra>
// kernel: modified_classifier.3
= control target key start
LH: loop header
LB: loop body
LE: loop exit
PB: predicated region body
PF: predicated region fallthrough
CT: control target
= control target key end

     0   :  { %10 = vsyncpa [#allocation3], 0  ;;  %s3847_s0 = inlined_call_operand.vmem [shape: f32[8,1024], index: 0, kind: input, shape index: {}]   ;;  %s3848_s1 = inlined_call_operand.hbm [shape: bf16[1024,512], index: 1, kind: input, shape index: {}]   ;;  %s3849_s2 = inlined_call_operand.hbm [shape: f32[1,512], index: 2, kind: input, shape index: {}]   ;;  %s3850_s3 = inlined_call_operand.hbm [shape: f32[1,512], index: 3, kind: input, shape index: {}]   ;;  %s3851_s4 = inlined_call_operand.hbm [shape: f32[1,512], index: 4, kind: input, shape index: {}]   ;;  %s3852_s5 = inlined_call_operand.hbm [shape: f32[8,512], index: 5, kind: output, shape index: {}]  }
   0x1   :  { %11 = vsyncpa [#allocation6], 0 }
   0x2   :  { %12 = vsyncpa [#allocation9], 0  ;;  %s34_s20 = sshll.u32 %s3849_s2, 4  ;;  %s35_s20 = int_to_ptr.hbm [resolvable:$true] %s34_s20 }
   0x3   :  { %13 = vsyncpa [#allocation4], 0  ;;  %s3656_s21 = smov [#allocation5]   ;;  %s20_s25 = sshll.u32 %s3848_s1, 4  ;;  %s21_s25 = int_to_ptr.hbm [resolvable:$true] %s20_s25 }
   0x4   :  { %s36_s22 = sshll.u32 %s3656_s21, 4  ;;  %s3657_s26 = smov [#allocation2]   ;;  %s37_s22 = int_to_ptr.vmem [resolvable:$true] %s36_s22 }
   0x5   :  { %39 = dma.hbm_to_vmem [thread:$0]  %s35_s20, 64, %s37_s22, [#allocation6]  }
   0x6   :  { %s22_s27 = sshll.u32 %s3657_s26, 4  ;;  %s3658_s28 = smov 256   ;;  %s23_s27 = int_to_ptr.vmem [resolvable:$true] %s22_s27 }
   0x7   :  { %s3659_s29 = smov 16   ;;  %s45_s2 = sshll.u32 %s3850_s3, 4  ;;  %s46_s2 = int_to_ptr.hbm [resolvable:$true] %s45_s2 }
   0x8   :  { %28 = dma.hbm_to_vmem [thread:$0]  %s21_s25, 32768, %s23_s27, [#allocation3], %s3658_s28, %s3658_s28, %s3659_s29  }
   0x9   :  { %s3660_s7 = smov [#allocation7]   ;;  %s56_s1 = sshll.u32 %s3851_s4, 4  ;;  %s57_s1 = int_to_ptr.hbm [resolvable:$true] %s56_s1 }
   0xa   :  { %s47_s8 = sshll.u32 %s3660_s7, 4  ;;  %s3661_s11 = smov [#allocation8]   ;;  %s48_s8 = int_to_ptr.vmem [resolvable:$true] %s47_s8 }
   0xb   :  { %50 = dma.hbm_to_vmem [thread:$0]  %s46_s2, 64, %s48_s8, [#allocation6]  }
   0xc   :  { %s58_s12 = sshll.u32 %s3661_s11, 4  ;;  %s59_s12 = int_to_ptr.vmem [resolvable:$true] %s58_s12 }
   0xd   :  { %61 = dma.hbm_to_vmem [thread:$0]  %s57_s1, 64, %s59_s12, [#allocation9]  }
   0xe   :  { %3648 = dma.done.wait [#allocation3], 32768  }
   0xf   :  { %3649 = vsyncadd [#allocation3], 4294934528 }
  0x10   :  { %3650 = dma.done.wait [#allocation6], 128  }
  0x11   :  { %3651 = vsyncadd [#allocation6], 4294967168 }
  0x12   :  { %3652 = dma.done.wait [#allocation9], 64  }
  0x13   :  { %3653 = vsyncadd [#allocation9], 4294967232  ;;  %v2344_v0 = vld [vmem:[#allocation2 + $0xe0] sm:$0xf]  ;;  %v3284_v1 = vld [vmem:[#allocation2 + $0xec] sm:$0xf0] }
  0x14   :  { %v2472_v2 = vld [vmem:[#allocation2 + $0x1e0] sm:$0xf]  ;;  %v2345_v3 = vor.u32 %v3284_v1, %v2344_v0  ;;  %v3316_v4 = vld [vmem:[#allocation2 + $0x1ec] sm:$0xf0]  ;;  %s2218_s30 = sshll.u32 %s3852_s5, 4  ;;  %s2219_s30 = int_to_ptr.hbm [resolvable:$true] %s2218_s30 }
  0x15   :  { %v2600_v5 = vld [vmem:[#allocation2 + $0x2e0] sm:$0xf]  ;;  %v3348_v6 = vld [vmem:[#allocation2 + $0x2ec] sm:$0xf0]  ;;  %v2473_v7 = vor.u32 %v3316_v4, %v2472_v2 }
  0x16   :  { %v2601_v8 = vor.u32 %v3348_v6, %v2600_v5  ;;  %v2728_v9 = vld [vmem:[#allocation2 + $0x3e0] sm:$0xf]  ;;  %v3380_v10 = vld [vmem:[#allocation2 + $0x3ec] sm:$0xf0]  ;;  %1640 = vmatpush.bf16.msra.mxu0 %v2345_v3 }
  0x17   :  { %v2328_v11 = vld [vmem:[#allocation2 + $0xc0] sm:$0xf]  ;;  %v2729_v12 = vor.u32 %v3380_v10, %v2728_v9  ;;  %v3280_v13 = vld [vmem:[#allocation2 + $0xcc] sm:$0xf0]  ;;  %1653 = vmatpush.bf16.msra.mxu1 %v2473_v7 }
  0x18   :  { %v2456_v14 = vld [vmem:[#allocation2 + $0x1c0] sm:$0xf]  ;;  %v3312_v15 = vld [vmem:[#allocation2 + $0x1cc] sm:$0xf0]  ;;  %1666 = vmatpush.bf16.msra.mxu2 %v2601_v8  ;;  %v2329_v16 = vor.u32 %v3280_v13, %v2328_v11 }
  0x19   :  { %v2457_v17 = vor.u32 %v3312_v15, %v2456_v14  ;;  %v2584_v18 = vld [vmem:[#allocation2 + $0x2c0] sm:$0xf]  ;;  %v3344_v19 = vld [vmem:[#allocation2 + $0x2cc] sm:$0xf0]  ;;  %1679 = vmatpush.bf16.msra.mxu3 %v2729_v12 }
  0x1a   :  { %v2712_v20 = vld [vmem:[#allocation2 + $0x3c0] sm:$0xf]  ;;  %v2585_v21 = vor.u32 %v3344_v19, %v2584_v18  ;;  %v3376_v22 = vld [vmem:[#allocation2 + $0x3cc] sm:$0xf0]  ;;  %1641 = vmatpush.bf16.msra.mxu0 %v2329_v16 }
  0x1b   :  { %v2312_v23 = vld [vmem:[#allocation2 + $0xa0] sm:$0xf]  ;;  %v3276_v24 = vld [vmem:[#allocation2 + $0xac] sm:$0xf0]  ;;  %v2713_v25 = vor.u32 %v3376_v22, %v2712_v20  ;;  %1654 = vmatpush.bf16.msra.mxu1 %v2457_v17 }
  0x1c   :  { %v2440_v26 = vld [vmem:[#allocation2 + $0x1a0] sm:$0xf]  ;;  %v3308_v27 = vld [vmem:[#allocation2 + $0x1ac] sm:$0xf0]  ;;  %v2313_v29 = vor.u32 %v3276_v24, %v2312_v23  ;;  %1667 = vmatpush.bf16.msra.mxu2 %v2585_v21 }
  0x1d   :  { %v2568_v28 = vld [vmem:[#allocation2 + $0x2a0] sm:$0xf]  ;;  %v3340_v30 = vld [vmem:[#allocation2 + $0x2ac] sm:$0xf0]  ;;  %v2441_v33 = vor.u32 %v3308_v27, %v2440_v26  ;;  %1680 = vmatpush.bf16.msra.mxu3 %v2713_v25 }
  0x1e   :  { %v2696_v31 = vld [vmem:[#allocation2 + $0x3a0] sm:$0xf]  ;;  %v3372_v32 = vld [vmem:[#allocation2 + $0x3ac] sm:$0xf0]  ;;  %v2569_v34 = vor.u32 %v3340_v30, %v2568_v28  ;;  %1642 = vmatpush.bf16.msra.mxu0 %v2313_v29 }
  0x1f   :  { %v2296_v35 = vld [vmem:[#allocation2 + $0x80] sm:$0xf]  ;;  %v3272_v36 = vld [vmem:[#allocation2 + $0x8c] sm:$0xf0]  ;;  %v2697_v38 = vor.u32 %v3372_v32, %v2696_v31  ;;  %1655 = vmatpush.bf16.msra.mxu1 %v2441_v33 }
  0x20   :  { %v2424_v37 = vld [vmem:[#allocation2 + $0x180] sm:$0xf]  ;;  %v3304_v39 = vld [vmem:[#allocation2 + $0x18c] sm:$0xf0]  ;;  %v2297_v44 = vor.u32 %v3272_v36, %v2296_v35  ;;  %1668 = vmatpush.bf16.msra.mxu2 %v2569_v34 }
  0x21   :  { %v2552_v40 = vld [vmem:[#allocation2 + $0x280] sm:$0xf]  ;;  %v3336_v41 = vld [vmem:[#allocation2 + $0x28c] sm:$0xf0]  ;;  %v2425_v45 = vor.u32 %v3304_v39, %v2424_v37  ;;  %1681 = vmatpush.bf16.msra.mxu3 %v2697_v38 }
  0x22   :  { %v2680_v42 = vld [vmem:[#allocation2 + $0x380] sm:$0xf]  ;;  %v3368_v43 = vld [vmem:[#allocation2 + $0x38c] sm:$0xf0]  ;;  %v2553_v46 = vor.u32 %v3336_v41, %v2552_v40  ;;  %1643 = vmatpush.bf16.msra.mxu0 %v2297_v44 }
  0x23   :  { %v2280_v47 = vld [vmem:[#allocation2 + $0x60] sm:$0xf]  ;;  %v3268_v48 = vld [vmem:[#allocation2 + $0x6c] sm:$0xf0]  ;;  %v2681_v50 = vor.u32 %v3368_v43, %v2680_v42  ;;  %1656 = vmatpush.bf16.msra.mxu1 %v2425_v45 }
  0x24   :  { %v2408_v49 = vld [vmem:[#allocation2 + $0x160] sm:$0xf]  ;;  %v3300_v51 = vld [vmem:[#allocation2 + $0x16c] sm:$0xf0]  ;;  %v2281_v56 = vor.u32 %v3268_v48, %v2280_v47  ;;  %1669 = vmatpush.bf16.msra.mxu2 %v2553_v46 }
  0x25   :  { %v2536_v52 = vld [vmem:[#allocation2 + $0x260] sm:$0xf]  ;;  %v3332_v53 = vld [vmem:[#allocation2 + $0x26c] sm:$0xf0]  ;;  %v2409_v57 = vor.u32 %v3300_v51, %v2408_v49  ;;  %1682 = vmatpush.bf16.msra.mxu3 %v2681_v50 }
  0x26   :  { %v2664_v54 = vld [vmem:[#allocation2 + $0x360] sm:$0xf]  ;;  %v3364_v55 = vld [vmem:[#allocation2 + $0x36c] sm:$0xf0]  ;;  %v2537_v58 = vor.u32 %v3332_v53, %v2536_v52  ;;  %1644 = vmatpush.bf16.msra.mxu0 %v2281_v56 }
  0x27   :  { %v2264_v59 = vld [vmem:[#allocation2 + $0x40] sm:$0xf]  ;;  %v3264_v60 = vld [vmem:[#allocation2 + $0x4c] sm:$0xf0]  ;;  %v2665_v62 = vor.u32 %v3364_v55, %v2664_v54  ;;  %1657 = vmatpush.bf16.msra.mxu1 %v2409_v57 }
  0x28   :  { %v2392_v61 = vld [vmem:[#allocation2 + $0x140] sm:$0xf]  ;;  %v3296_v63 = vld [vmem:[#allocation2 + $0x14c] sm:$0xf0]  ;;  %v2265_v4 = vor.u32 %v3264_v60, %v2264_v59  ;;  %1670 = vmatpush.bf16.msra.mxu2 %v2537_v58 }
  0x29   :  { %v2520_v0 = vld [vmem:[#allocation2 + $0x240] sm:$0xf]  ;;  %v3328_v1 = vld [vmem:[#allocation2 + $0x24c] sm:$0xf0]  ;;  %v2393_v5 = vor.u32 %v3296_v63, %v2392_v61  ;;  %1683 = vmatpush.bf16.msra.mxu3 %v2665_v62 }
  0x2a   :  { %v2648_v2 = vld [vmem:[#allocation2 + $0x340] sm:$0xf]  ;;  %v3360_v3 = vld [vmem:[#allocation2 + $0x34c] sm:$0xf0]  ;;  %v2521_v6 = vor.u32 %v3328_v1, %v2520_v0  ;;  %1645 = vmatpush.bf16.msra.mxu0 %v2265_v4  ;;  %v81_v1 = vld [vmem:[%s3847_s0 + $0x18] sm:$0xff] }
  0x2b   :  { %v2248_v7 = vld [vmem:[#allocation2 + $0x20] sm:$0xf]  ;;  %v3260_v8 = vld [vmem:[#allocation2 + $0x2c] sm:$0xf0]  ;;  %v2649_v10 = vor.u32 %v3360_v3, %v2648_v2  ;;  %1658 = vmatpush.bf16.msra.mxu1 %v2393_v5  ;;  %v79_v2 = vld [vmem:[%s3847_s0 + $0x8] sm:$0xff] }
  0x2c   :  { %v2376_v9 = vld [vmem:[#allocation2 + $0x120] sm:$0xf]  ;;  %v3292_v11 = vld [vmem:[#allocation2 + $0x12c] sm:$0xf0]  ;;  %v2249_v16 = vor.u32 %v3260_v8, %v2248_v7  ;;  %1671 = vmatpush.bf16.msra.mxu2 %v2521_v6  ;;  %v3723_v6 = vpack.c.bf16 %v81_v1, %v81_v1  ;;  %v3725_v7 = vpack.c.bf16 %v79_v2, %v79_v2 }
  0x2d   :  { %v2504_v12 = vld [vmem:[#allocation2 + $0x220] sm:$0xf]  ;;  %v3324_v13 = vld [vmem:[#allocation2 + $0x22c] sm:$0xf0]  ;;  %v2377_v19 = vor.u32 %v3292_v11, %v2376_v9  ;;  %1684 = vmatpush.bf16.msra.mxu3 %v2649_v10 }
  0x2e   :  { %v2632_v14 = vld [vmem:[#allocation2 + $0x320] sm:$0xf]  ;;  %v3356_v15 = vld [vmem:[#allocation2 + $0x32c] sm:$0xf0]  ;;  %v2505_v20 = vor.u32 %v3324_v13, %v2504_v12  ;;  %1646 = vmatpush.bf16.msra.mxu0 %v2249_v16 }
  0x2f   :  { %v2232_v17 = vld [vmem:[#allocation2] sm:$0xf]  ;;  %v3256_v18 = vld [vmem:[#allocation2 + $0xc] sm:$0xf0]  ;;  %v2633_v24 = vor.u32 %v3356_v15, %v2632_v14  ;;  %1659 = vmatpush.bf16.msra.mxu1 %v2377_v19 }
  0x30   :  { %v2360_v21 = vld [vmem:[#allocation2 + $0x100] sm:$0xf]  ;;  %v3288_v22 = vld [vmem:[#allocation2 + $0x10c] sm:$0xf0]  ;;  %v2233_v31 = vor.u32 %v3256_v18, %v2232_v17  ;;  %1672 = vmatpush.bf16.msra.mxu2 %v2505_v20 }
  0x31   :  { %v2488_v23 = vld [vmem:[#allocation2 + $0x200] sm:$0xf]  ;;  %v3320_v25 = vld [vmem:[#allocation2 + $0x20c] sm:$0xf0]  ;;  %v2361_v35 = vor.u32 %v3288_v22, %v2360_v21  ;;  %1685 = vmatpush.bf16.msra.mxu3 %v2633_v24 }
  0x32   :  { %v2616_v26 = vld [vmem:[#allocation2 + $0x300] sm:$0xf]  ;;  %v3352_v27 = vld [vmem:[#allocation2 + $0x30c] sm:$0xf0]  ;;  %v2489_v36 = vor.u32 %v3320_v25, %v2488_v23  ;;  %1647 = vmatpush.bf16.msra.mxu0 %v2233_v31 }
  0x33   :  { %v2856_v28 = vld [vmem:[#allocation2 + $0x4e0] sm:$0xf]  ;;  %v3412_v29 = vld [vmem:[#allocation2 + $0x4ec] sm:$0xf0]  ;;  %v2617_v39 = vor.u32 %v3352_v27, %v2616_v26  ;;  %1660 = vmatpush.bf16.msra.mxu1 %v2361_v35 }
  0x34   :  { %v2984_v30 = vld [vmem:[#allocation2 + $0x5e0] sm:$0xf]  ;;  %v3444_v32 = vld [vmem:[#allocation2 + $0x5ec] sm:$0xf0]  ;;  %v2857_v40 = vor.u32 %v3412_v29, %v2856_v28  ;;  %1673 = vmatpush.bf16.msra.mxu2 %v2489_v36 }
  0x35   :  { %v3112_v33 = vld [vmem:[#allocation2 + $0x6e0] sm:$0xf]  ;;  %v3476_v34 = vld [vmem:[#allocation2 + $0x6ec] sm:$0xf0]  ;;  %v2985_v41 = vor.u32 %v3444_v32, %v2984_v30  ;;  %1686 = vmatpush.bf16.msra.mxu3 %v2617_v39 }
  0x36   :  { %v3240_v37 = vld [vmem:[#allocation2 + $0x7e0] sm:$0xf]  ;;  %v3508_v38 = vld [vmem:[#allocation2 + $0x7ec] sm:$0xf0]  ;;  %v3113_v42 = vor.u32 %v3476_v34, %v3112_v33  ;;  %1692 = vmatpush.bf16.msrb.mxu0 %v2857_v40  ;;  %1661 = vmatmul.bf16.vlgmr.msra.gmra.mxu1 %v3725_v7 }
  0x37   :  { %v2840_v43 = vld [vmem:[#allocation2 + $0x4c0] sm:$0xf]  ;;  %v3408_v44 = vld [vmem:[#allocation2 + $0x4cc] sm:$0xf0]  ;;  %v3241_v46 = vor.u32 %v3508_v38, %v3240_v37  ;;  %1705 = vmatpush.bf16.msrb.mxu1 %v2985_v41 }
  0x38   :  { %v2968_v45 = vld [vmem:[#allocation2 + $0x5c0] sm:$0xf]  ;;  %v3440_v47 = vld [vmem:[#allocation2 + $0x5cc] sm:$0xf0]  ;;  %v2841_v53 = vor.u32 %v3408_v44, %v2840_v43  ;;  %1718 = vmatpush.bf16.msrb.mxu2 %v3113_v42  ;;  %1687 = vmatmul.bf16.vlgmr.msra.gmra.mxu3 %v3723_v6 }
  0x39   :  { %v3096_v48 = vld [vmem:[#allocation2 + $0x6c0] sm:$0xf]  ;;  %v3472_v49 = vld [vmem:[#allocation2 + $0x6cc] sm:$0xf0]  ;;  %v2969_v58 = vor.u32 %v3440_v47, %v2968_v45  ;;  %1731 = vmatpush.bf16.msrb.mxu3 %v3241_v46 }
  0x3a   :  { %v3224_v50 = vld [vmem:[#allocation2 + $0x7c0] sm:$0xf]  ;;  %v3504_v51 = vld [vmem:[#allocation2 + $0x7cc] sm:$0xf0]  ;;  %v3097_v59 = vor.u32 %v3472_v49, %v3096_v48  ;;  %1693 = vmatpush.bf16.msrb.mxu0 %v2841_v53 }
  0x3b   :  { %v80_v52 = vld [vmem:[%s3847_s0 + $0x10] sm:$0xff]  ;;  %v2824_v54 = vld [vmem:[#allocation2 + $0x4a0] sm:$0xf]  ;;  %v3225_v63 = vor.u32 %v3504_v51, %v3224_v50  ;;  %1706 = vmatpush.bf16.msrb.mxu1 %v2969_v58 }
  0x3c   :  { %v3404_v55 = vld [vmem:[#allocation2 + $0x4ac] sm:$0xf0]  ;;  %v2952_v56 = vld [vmem:[#allocation2 + $0x5a0] sm:$0xf]  ;;  %v3709_v57 = vpack.c.bf16 %v80_v52, %v80_v52  ;;  %1719 = vmatpush.bf16.msrb.mxu2 %v3097_v59 }
  0x3d   :  { %v3436_v60 = vld [vmem:[#allocation2 + $0x5ac] sm:$0xf0]  ;;  %v3080_v61 = vld [vmem:[#allocation2 + $0x6a0] sm:$0xf]  ;;  %v2825_v8 = vor.u32 %v3404_v55, %v2824_v54  ;;  %1732 = vmatpush.bf16.msrb.mxu3 %v3225_v63 }
  0x3e   :  { %v3468_v62 = vld [vmem:[#allocation2 + $0x6ac] sm:$0xf0]  ;;  %1674 = vmatmul.bf16.vlgmr.msra.gmra.mxu2 %v3709_v57  ;;  %v78_v0 = vld [vmem:[%s3847_s0] sm:$0xff]  ;;  %v2953_v9 = vor.u32 %v3436_v60, %v2952_v56 }
  0x3f   :  { %v3208_v3 = vld [vmem:[#allocation2 + $0x7a0] sm:$0xf]  ;;  %v3500_v4 = vld [vmem:[#allocation2 + $0x7ac] sm:$0xf0]  ;;  %v3721_v5 = vpack.c.bf16 %v78_v0, %v78_v0  ;;  %v3081_v10 = vor.u32 %v3468_v62, %v3080_v61  ;;  %1694 = vmatpush.bf16.msrb.mxu0 %v2825_v8  ;;  %v3282_v8 = vld [vmem:[#allocation2 + $0xe4] sm:$0xf] }
  0x40   :  { %v2808_v11 = vld [vmem:[#allocation2 + $0x480] sm:$0xf]  ;;  %v3400_v12 = vld [vmem:[#allocation2 + $0x48c] sm:$0xf0]  ;;  %v3209_v14 = vor.u32 %v3500_v4, %v3208_v3  ;;  %1707 = vmatpush.bf16.msrb.mxu1 %v2953_v9  ;;  %v2346_v9 = vld [vmem:[#allocation2 + $0xf0] sm:$0xf0] }
  0x41   :  { %v2936_v13 = vld [vmem:[#allocation2 + $0x580] sm:$0xf]  ;;  %v3432_v15 = vld [vmem:[#allocation2 + $0x58c] sm:$0xf0]  ;;  %1648 = vmatmul.bf16.vlgmr.msra.gmra.mxu0 %v3721_v5  ;;  %v2809_v20 = vor.u32 %v3400_v12, %v2808_v11  ;;  %1720 = vmatpush.bf16.msrb.mxu2 %v3081_v10  ;;  %v3314_v10 = vld [vmem:[#allocation2 + $0x1e4] sm:$0xf] }
  0x42   :  { %v3064_v16 = vld [vmem:[#allocation2 + $0x680] sm:$0xf]  ;;  %v3464_v17 = vld [vmem:[#allocation2 + $0x68c] sm:$0xf0]  ;;  %v2937_v21 = vor.u32 %v3432_v15, %v2936_v13  ;;  %1733 = vmatpush.bf16.msrb.mxu3 %v3209_v14  ;;  %v2474_v12 = vld [vmem:[#allocation2 + $0x1f0] sm:$0xf0] }
  0x43   :  { %v3192_v18 = vld [vmem:[#allocation2 + $0x780] sm:$0xf]  ;;  %v3496_v19 = vld [vmem:[#allocation2 + $0x78c] sm:$0xf0]  ;;  %v3065_v22 = vor.u32 %v3464_v17, %v3064_v16  ;;  %1695 = vmatpush.bf16.msrb.mxu0 %v2809_v20  ;;  %v3346_v13 = vld [vmem:[#allocation2 + $0x2e4] sm:$0xf] }
  0x44   :  { %v2792_v23 = vld [vmem:[#allocation2 + $0x460] sm:$0xf]  ;;  %v3396_v24 = vld [vmem:[#allocation2 + $0x46c] sm:$0xf0]  ;;  %v3193_v26 = vor.u32 %v3496_v19, %v3192_v18  ;;  %1708 = vmatpush.bf16.msrb.mxu1 %v2937_v21  ;;  %v2602_v14 = vld [vmem:[#allocation2 + $0x2f0] sm:$0xf0]  ;;  %v2349_v21 = vor.u32 %v3282_v8, %v2346_v9 }
  0x45   :  { %v2920_v25 = vld [vmem:[#allocation2 + $0x560] sm:$0xf]  ;;  %v3428_v27 = vld [vmem:[#allocation2 + $0x56c] sm:$0xf0]  ;;  %v2793_v32 = vor.u32 %v3396_v24, %v2792_v23  ;;  %1721 = vmatpush.bf16.msrb.mxu2 %v3065_v22  ;;  %v3378_v17 = vld [vmem:[#allocation2 + $0x3e4] sm:$0xf] }
  0x46   :  { %v3048_v28 = vld [vmem:[#allocation2 + $0x660] sm:$0xf]  ;;  %v3460_v29 = vld [vmem:[#allocation2 + $0x66c] sm:$0xf0]  ;;  %v2921_v33 = vor.u32 %v3428_v27, %v2920_v25  ;;  %1734 = vmatpush.bf16.msrb.mxu3 %v3193_v26  ;;  %v2730_v18 = vld [vmem:[#allocation2 + $0x3f0] sm:$0xf0]  ;;  %v2477_v25 = vor.u32 %v3314_v10, %v2474_v12  ;;  %v2605_v26 = vor.u32 %v3346_v13, %v2602_v14 }
  0x47   :  { %v3176_v30 = vld [vmem:[#allocation2 + $0x760] sm:$0xf]  ;;  %v3492_v31 = vld [vmem:[#allocation2 + $0x76c] sm:$0xf0]  ;;  %v3049_v34 = vor.u32 %v3460_v29, %v3048_v28  ;;  %1696 = vmatpush.bf16.msrb.mxu0 %v2793_v32  ;;  %v85_v23 = vld [vmem:[%s3847_s0 + $0x38] sm:$0xff] }
  0x48   :  { %v2776_v35 = vld [vmem:[#allocation2 + $0x440] sm:$0xf]  ;;  %v3392_v36 = vld [vmem:[#allocation2 + $0x44c] sm:$0xf0]  ;;  %v3177_v38 = vor.u32 %v3492_v31, %v3176_v30  ;;  %1709 = vmatpush.bf16.msrb.mxu1 %v2921_v33  ;;  %v3278_v24 = vld [vmem:[#allocation2 + $0xc4] sm:$0xf]  ;;  %v2733_v30 = vor.u32 %v3378_v17, %v2730_v18 }
  0x49   :  { %v2904_v37 = vld [vmem:[#allocation2 + $0x540] sm:$0xf]  ;;  %v3424_v39 = vld [vmem:[#allocation2 + $0x54c] sm:$0xf0]  ;;  %v2777_v44 = vor.u32 %v3392_v36, %v2776_v35  ;;  %1722 = vmatpush.bf16.msrb.mxu2 %v3049_v34  ;;  %v2330_v27 = vld [vmem:[#allocation2 + $0xd0] sm:$0xf0]  ;;  %v3746_v36 = vpack.c.bf16 %v85_v23, %v85_v23 }
  0x4a   :  { %v3032_v40 = vld [vmem:[#allocation2 + $0x640] sm:$0xf]  ;;  %v3456_v41 = vld [vmem:[#allocation2 + $0x64c] sm:$0xf0]  ;;  %v2905_v45 = vor.u32 %v3424_v39, %v2904_v37  ;;  %1735 = vmatpush.bf16.msrb.mxu3 %v3177_v38  ;;  %v3310_v28 = vld [vmem:[#allocation2 + $0x1c4] sm:$0xf]  ;;  %v2333_v39 = vor.u32 %v3278_v24, %v2330_v27 }
  0x4b   :  { %v3160_v42 = vld [vmem:[#allocation2 + $0x740] sm:$0xf]  ;;  %v3488_v43 = vld [vmem:[#allocation2 + $0x74c] sm:$0xf0]  ;;  %v3033_v46 = vor.u32 %v3456_v41, %v3032_v40  ;;  %1697 = vmatpush.bf16.msrb.mxu0 %v2777_v44  ;;  %v83_v29 = vld [vmem:[%s3847_s0 + $0x28] sm:$0xff] }
  0x4c   :  { %v2760_v47 = vld [vmem:[#allocation2 + $0x420] sm:$0xf]  ;;  %v3388_v48 = vld [vmem:[#allocation2 + $0x42c] sm:$0xf0]  ;;  %v3161_v50 = vor.u32 %v3488_v43, %v3160_v42  ;;  %1710 = vmatpush.bf16.msrb.mxu1 %v2905_v45  ;;  %v2458_v32 = vld [vmem:[#allocation2 + $0x1d0] sm:$0xf0]  ;;  %v3748_v40 = vpack.c.bf16 %v83_v29, %v83_v29 }
  0x4d   :  { %v2888_v49 = vld [vmem:[#allocation2 + $0x520] sm:$0xf]  ;;  %v3420_v51 = vld [vmem:[#allocation2 + $0x52c] sm:$0xf0]  ;;  %v2761_v56 = vor.u32 %v3388_v48, %v2760_v47  ;;  %1723 = vmatpush.bf16.msrb.mxu2 %v3033_v46  ;;  %v3342_v33 = vld [vmem:[#allocation2 + $0x2c4] sm:$0xf]  ;;  %v2461_v41 = vor.u32 %v3310_v28, %v2458_v32 }
  0x4e   :  { %v3016_v52 = vld [vmem:[#allocation2 + $0x620] sm:$0xf]  ;;  %v3452_v53 = vld [vmem:[#allocation2 + $0x62c] sm:$0xf0]  ;;  %v2889_v60 = vor.u32 %v3420_v51, %v2888_v49  ;;  %1736 = vmatpush.bf16.msrb.mxu3 %v3161_v50  ;;  %v2586_v34 = vld [vmem:[#allocation2 + $0x2d0] sm:$0xf0] }
  0x4f   :  { %v3144_v54 = vld [vmem:[#allocation2 + $0x720] sm:$0xf]  ;;  %v3484_v55 = vld [vmem:[#allocation2 + $0x72c] sm:$0xf0]  ;;  %v3017_v61 = vor.u32 %v3452_v53, %v3016_v52  ;;  %1698 = vmatpush.bf16.msrb.mxu0 %v2761_v56  ;;  %v3374_v37 = vld [vmem:[#allocation2 + $0x3c4] sm:$0xf]  ;;  %v2589_v42 = vor.u32 %v3342_v33, %v2586_v34 }
  0x50   :  { %v2744_v58 = vld [vmem:[#allocation2 + $0x400] sm:$0xf]  ;;  %v3384_v59 = vld [vmem:[#allocation2 + $0x40c] sm:$0xf0]  ;;  %v3145_v1 = vor.u32 %v3484_v55, %v3144_v54  ;;  %1711 = vmatpush.bf16.msrb.mxu1 %v2889_v60  ;;  %v2714_v38 = vld [vmem:[#allocation2 + $0x3d0] sm:$0xf0] }
  0x51   :  { %v2872_v62 = vld [vmem:[#allocation2 + $0x500] sm:$0xf]  ;;  %v3416_v63 = vld [vmem:[#allocation2 + $0x50c] sm:$0xf0]  ;;  %v2745_v11 = vor.u32 %v3384_v59, %v2744_v58  ;;  %1724 = vmatpush.bf16.msrb.mxu2 %v3017_v61  ;;  %v3274_v43 = vld [vmem:[#allocation2 + $0xa4] sm:$0xf]  ;;  %v2717_v46 = vor.u32 %v3374_v37, %v2714_v38 }
  0x52   :  { %v3000_v0 = vld [vmem:[#allocation2 + $0x600] sm:$0xf]  ;;  %v3448_v2 = vld [vmem:[#allocation2 + $0x60c] sm:$0xf0]  ;;  %v2873_v15 = vor.u32 %v3416_v63, %v2872_v62  ;;  %1737 = vmatpush.bf16.msrb.mxu3 %v3145_v1  ;;  %v2314_v44 = vld [vmem:[#allocation2 + $0xb0] sm:$0xf0] }
  0x53   :  { %v3128_v3 = vld [vmem:[#allocation2 + $0x700] sm:$0xf]  ;;  %v3480_v4 = vld [vmem:[#allocation2 + $0x70c] sm:$0xf0]  ;;  %v3001_v16 = vor.u32 %v3448_v2, %v3000_v0  ;;  %1699 = vmatpush.bf16.msrb.mxu0 %v2745_v11  ;;  %v3306_v45 = vld [vmem:[#allocation2 + $0x1a4] sm:$0xf]  ;;  %v2317_v52 = vor.u32 %v3274_v43, %v2314_v44 }
  0x54   :  { %v84_v19 = vld [vmem:[%s3847_s0 + $0x30] sm:$0xff]  ;;  %v3129_v20 = vor.u32 %v3480_v4, %v3128_v3  ;;  %v82_v22 = vld [vmem:[%s3847_s0 + $0x20] sm:$0xff]  ;;  %1712 = vmatpush.bf16.msrb.mxu1 %v2873_v15  ;;  %s3663_s0 = smov [#allocation10]  }
  0x55   :  { %v3742_v31 = vpack.c.bf16 %v84_v19, %v84_v19  ;;  %1725 = vmatpush.bf16.msrb.mxu2 %v3001_v16  ;;  %v3744_v35 = vpack.c.bf16 %v82_v22, %v82_v22  ;;  %v2442_v47 = vld [vmem:[#allocation2 + $0x1b0] sm:$0xf0]  ;;  %v3338_v48 = vld [vmem:[#allocation2 + $0x2a4] sm:$0xf]  ;;  %s2216_s27 = sshll.u32 %s3663_s0, 4  ;;  %s2217_s27 = int_to_ptr.vmem [resolvable:$true] %s2216_s27 }
  0x56   :  { %1738 = vmatpush.bf16.msrb.mxu3 %v3129_v20  ;;  %v2570_v49 = vld [vmem:[#allocation2 + $0x2b0] sm:$0xf0]  ;;  %v3370_v50 = vld [vmem:[#allocation2 + $0x3a4] sm:$0xf]  ;;  %v2445_v53 = vor.u32 %v3306_v45, %v2442_v47 }
  0x57   :  { %1744 = vmatpush.bf16.msra.mxu0 %v2349_v21  ;;  %v2698_v51 = vld [vmem:[#allocation2 + $0x3b0] sm:$0xf0]  ;;  %1713 = vmatmul.bf16.vlgmr.msrb.gmra.mxu1 %v3748_v40  ;;  %v2573_v54 = vor.u32 %v3338_v48, %v2570_v49  ;;  %v3270_v55 = vld [vmem:[#allocation2 + $0x84] sm:$0xf] }
  0x58   :  { %1757 = vmatpush.bf16.msra.mxu1 %v2477_v25  ;;  %1726 = vmatmul.bf16.vlgmr.msrb.gmra.mxu2 %v3742_v31  ;;  %v2298_v56 = vld [vmem:[#allocation2 + $0x90] sm:$0xf0]  ;;  %v3302_v58 = vld [vmem:[#allocation2 + $0x184] sm:$0xf]  ;;  %v2701_v59 = vor.u32 %v3370_v50, %v2698_v51 }
  0x59   :  { %1770 = vmatpush.bf16.msra.mxu2 %v2605_v26  ;;  %1700 = vmatmul.bf16.vlgmr.msrb.gmra.mxu0 %v3744_v35  ;;  %v2426_v60 = vld [vmem:[#allocation2 + $0x190] sm:$0xf0]  ;;  %v3334_v61 = vld [vmem:[#allocation2 + $0x284] sm:$0xf]  ;;  %v2301_v1 = vor.u32 %v3270_v55, %v2298_v56 }
  0x5a   :  { %1783 = vmatpush.bf16.msra.mxu3 %v2733_v30  ;;  %v2554_v62 = vld [vmem:[#allocation2 + $0x290] sm:$0xf0]  ;;  %v3366_v63 = vld [vmem:[#allocation2 + $0x384] sm:$0xf]  ;;  %v2429_v2 = vor.u32 %v3302_v58, %v2426_v60 }
  0x5b   :  { %1739 = vmatmul.bf16.vlgmr.msrb.gmra.mxu3 %v3746_v36  ;;  %1745 = vmatpush.bf16.msra.mxu0 %v2333_v39  ;;  %v2682_v0 = vld [vmem:[#allocation2 + $0x390] sm:$0xf0]  ;;  %v2557_v3 = vor.u32 %v3334_v61, %v2554_v62  ;;  %v3266_v4 = vld [vmem:[#allocation2 + $0x64] sm:$0xf] }
  0x5c   :  { %1758 = vmatpush.bf16.msra.mxu1 %v2461_v41  ;;  %v2282_v8 = vld [vmem:[#allocation2 + $0x70] sm:$0xf0]  ;;  %v3298_v9 = vld [vmem:[#allocation2 + $0x164] sm:$0xf]  ;;  %v2685_v10 = vor.u32 %v3366_v63, %v2682_v0 }
  0x5d   :  { %1771 = vmatpush.bf16.msra.mxu2 %v2589_v42  ;;  %v2410_v11 = vld [vmem:[#allocation2 + $0x170] sm:$0xf0]  ;;  %v3330_v12 = vld [vmem:[#allocation2 + $0x264] sm:$0xf]  ;;  %v2285_v16 = vor.u32 %v3266_v4, %v2282_v8 }
  0x5e   :  { %1784 = vmatpush.bf16.msra.mxu3 %v2717_v46  ;;  %v2538_v13 = vld [vmem:[#allocation2 + $0x270] sm:$0xf0]  ;;  %v3362_v14 = vld [vmem:[#allocation2 + $0x364] sm:$0xf]  ;;  %v2413_v17 = vor.u32 %v3298_v9, %v2410_v11 }
  0x5f   :  { %1746 = vmatpush.bf16.msra.mxu0 %v2317_v52  ;;  %v2666_v15 = vld [vmem:[#allocation2 + $0x370] sm:$0xf0]  ;;  %v2541_v18 = vor.u32 %v3330_v12, %v2538_v13  ;;  %v3262_v19 = vld [vmem:[#allocation2 + $0x44] sm:$0xf] }
  0x60   :  { %1759 = vmatpush.bf16.msra.mxu1 %v2445_v53  ;;  %v2266_v20 = vld [vmem:[#allocation2 + $0x50] sm:$0xf0]  ;;  %v3294_v21 = vld [vmem:[#allocation2 + $0x144] sm:$0xf]  ;;  %v2669_v22 = vor.u32 %v3362_v14, %v2666_v15 }
  0x61   :  { %1772 = vmatpush.bf16.msra.mxu2 %v2573_v54  ;;  %v2394_v23 = vld [vmem:[#allocation2 + $0x150] sm:$0xf0]  ;;  %v3326_v24 = vld [vmem:[#allocation2 + $0x244] sm:$0xf]  ;;  %v2269_v28 = vor.u32 %v3262_v19, %v2266_v20 }
  0x62   :  { %1785 = vmatpush.bf16.msra.mxu3 %v2701_v59  ;;  %v2522_v25 = vld [vmem:[#allocation2 + $0x250] sm:$0xf0]  ;;  %v3358_v26 = vld [vmem:[#allocation2 + $0x344] sm:$0xf]  ;;  %v2397_v29 = vor.u32 %v3294_v21, %v2394_v23 }
  0x63   :  { %1747 = vmatpush.bf16.msra.mxu0 %v2301_v1  ;;  %v2650_v27 = vld [vmem:[#allocation2 + $0x350] sm:$0xf0]  ;;  %v2525_v30 = vor.u32 %v3326_v24, %v2522_v25  ;;  %v3258_v32 = vld [vmem:[#allocation2 + $0x24] sm:$0xf] }
  0x64   :  { %1760 = vmatpush.bf16.msra.mxu1 %v2429_v2  ;;  %v2250_v33 = vld [vmem:[#allocation2 + $0x30] sm:$0xf0]  ;;  %v3290_v34 = vld [vmem:[#allocation2 + $0x124] sm:$0xf]  ;;  %v2653_v37 = vor.u32 %v3358_v26, %v2650_v27 }
  0x65   :  { %1773 = vmatpush.bf16.msra.mxu2 %v2557_v3  ;;  %v2378_v38 = vld [vmem:[#allocation2 + $0x130] sm:$0xf0]  ;;  %v3322_v39 = vld [vmem:[#allocation2 + $0x224] sm:$0xf]  ;;  %v2253_v44 = vor.u32 %v3258_v32, %v2250_v33 }
  0x66   :  { %1786 = vmatpush.bf16.msra.mxu3 %v2685_v10  ;;  %v2506_v41 = vld [vmem:[#allocation2 + $0x230] sm:$0xf0]  ;;  %v3354_v42 = vld [vmem:[#allocation2 + $0x324] sm:$0xf]  ;;  %v2381_v47 = vor.u32 %v3290_v34, %v2378_v38 }
  0x67   :  { %1748 = vmatpush.bf16.msra.mxu0 %v2285_v16  ;;  %v2634_v43 = vld [vmem:[#allocation2 + $0x330] sm:$0xf0]  ;;  %v3254_v45 = vld [vmem:[#allocation2 + $0x4] sm:$0xf]  ;;  %v2509_v48 = vor.u32 %v3322_v39, %v2506_v41 }
  0x68   :  { %1761 = vmatpush.bf16.msra.mxu1 %v2413_v17  ;;  %v2234_v46 = vld [vmem:[#allocation2 + $0x10] sm:$0xf0]  ;;  %v3286_v49 = vld [vmem:[#allocation2 + $0x104] sm:$0xf]  ;;  %v2637_v52 = vor.u32 %v3354_v42, %v2634_v43 }
  0x69   :  { %1774 = vmatpush.bf16.msra.mxu2 %v2541_v18  ;;  %v2362_v50 = vld [vmem:[#allocation2 + $0x110] sm:$0xf0]  ;;  %v3318_v51 = vld [vmem:[#allocation2 + $0x204] sm:$0xf]  ;;  %v2237_v60 = vor.u32 %v3254_v45, %v2234_v46 }
  0x6a   :  { %1787 = vmatpush.bf16.msra.mxu3 %v2669_v22  ;;  %v2490_v53 = vld [vmem:[#allocation2 + $0x210] sm:$0xf0]  ;;  %v3350_v54 = vld [vmem:[#allocation2 + $0x304] sm:$0xf]  ;;  %v2365_v0 = vor.u32 %v3286_v49, %v2362_v50 }
  0x6b   :  { %1749 = vmatpush.bf16.msra.mxu0 %v2269_v28  ;;  %v2618_v55 = vld [vmem:[#allocation2 + $0x310] sm:$0xf0]  ;;  %v3410_v56 = vld [vmem:[#allocation2 + $0x4e4] sm:$0xf]  ;;  %v2493_v1 = vor.u32 %v3318_v51, %v2490_v53 }
  0x6c   :  { %1762 = vmatpush.bf16.msra.mxu1 %v2397_v29  ;;  %v2858_v58 = vld [vmem:[#allocation2 + $0x4f0] sm:$0xf0]  ;;  %v3442_v59 = vld [vmem:[#allocation2 + $0x5e4] sm:$0xf]  ;;  %v2621_v4 = vor.u32 %v3350_v54, %v2618_v55 }
  0x6d   :  { %1775 = vmatpush.bf16.msra.mxu2 %v2525_v30  ;;  %v2986_v61 = vld [vmem:[#allocation2 + $0x5f0] sm:$0xf0]  ;;  %v3474_v62 = vld [vmem:[#allocation2 + $0x6e4] sm:$0xf]  ;;  %v2861_v8 = vor.u32 %v3410_v56, %v2858_v58 }
  0x6e   :  { %1788 = vmatpush.bf16.msra.mxu3 %v2653_v37  ;;  %v3114_v63 = vld [vmem:[#allocation2 + $0x6f0] sm:$0xf0]  ;;  %v3506_v2 = vld [vmem:[#allocation2 + $0x7e4] sm:$0xf]  ;;  %v2989_v9 = vor.u32 %v3442_v59, %v2986_v61 }
  0x6f   :  { %1750 = vmatpush.bf16.msra.mxu0 %v2253_v44  ;;  %v3242_v3 = vld [vmem:[#allocation2 + $0x7f0] sm:$0xf0]  ;;  %v3117_v10 = vor.u32 %v3474_v62, %v3114_v63  ;;  %v3406_v11 = vld [vmem:[#allocation2 + $0x4c4] sm:$0xf] }
  0x70   :  { %1763 = vmatpush.bf16.msra.mxu1 %v2381_v47  ;;  %v2842_v12 = vld [vmem:[#allocation2 + $0x4d0] sm:$0xf0]  ;;  %v3438_v13 = vld [vmem:[#allocation2 + $0x5c4] sm:$0xf]  ;;  %v3245_v14 = vor.u32 %v3506_v2, %v3242_v3 }
  0x71   :  { %1776 = vmatpush.bf16.msra.mxu2 %v2509_v48  ;;  %v2970_v15 = vld [vmem:[#allocation2 + $0x5d0] sm:$0xf0]  ;;  %v3470_v16 = vld [vmem:[#allocation2 + $0x6c4] sm:$0xf]  ;;  %v2845_v20 = vor.u32 %v3406_v11, %v2842_v12 }
  0x72   :  { %1789 = vmatpush.bf16.msra.mxu3 %v2637_v52  ;;  %v3098_v17 = vld [vmem:[#allocation2 + $0x6d0] sm:$0xf0]  ;;  %v3502_v18 = vld [vmem:[#allocation2 + $0x7c4] sm:$0xf]  ;;  %v2973_v21 = vor.u32 %v3438_v13, %v2970_v15 }
  0x73   :  { %1751 = vmatpush.bf16.msra.mxu0 %v2237_v60  ;;  %v3226_v19 = vld [vmem:[#allocation2 + $0x7d0] sm:$0xf0]  ;;  %v3101_v22 = vor.u32 %v3470_v16, %v3098_v17  ;;  %v3402_v23 = vld [vmem:[#allocation2 + $0x4a4] sm:$0xf] }
  0x74   :  { %1764 = vmatpush.bf16.msra.mxu1 %v2365_v0  ;;  %v2826_v24 = vld [vmem:[#allocation2 + $0x4b0] sm:$0xf0]  ;;  %v3434_v25 = vld [vmem:[#allocation2 + $0x5a4] sm:$0xf]  ;;  %v3229_v26 = vor.u32 %v3502_v18, %v3226_v19 }
  0x75   :  { %1777 = vmatpush.bf16.msra.mxu2 %v2493_v1  ;;  %v2954_v27 = vld [vmem:[#allocation2 + $0x5b0] sm:$0xf0]  ;;  %v3466_v28 = vld [vmem:[#allocation2 + $0x6a4] sm:$0xf]  ;;  %v2829_v33 = vor.u32 %v3402_v23, %v2826_v24 }
  0x76   :  { %1790 = vmatpush.bf16.msra.mxu3 %v2621_v4  ;;  %v3082_v29 = vld [vmem:[#allocation2 + $0x6b0] sm:$0xf0]  ;;  %v3498_v30 = vld [vmem:[#allocation2 + $0x7a4] sm:$0xf]  ;;  %1752 = vmatmul.bf16.vlgmr.msra.gmra.mxu0 %v3721_v5  ;;  %v2957_v34 = vor.u32 %v3434_v25, %v2954_v27 }
  0x77   :  { %1796 = vmatpush.bf16.msrb.mxu0 %v2861_v8  ;;  %v3210_v32 = vld [vmem:[#allocation2 + $0x7b0] sm:$0xf0]  ;;  %1765 = vmatmul.bf16.vlgmr.msra.gmra.mxu1 %v3725_v7  ;;  %v3085_v37 = vor.u32 %v3466_v28, %v3082_v29  ;;  %v3398_v38 = vld [vmem:[#allocation2 + $0x484] sm:$0xf] }
  0x78   :  { %1809 = vmatpush.bf16.msrb.mxu1 %v2989_v9  ;;  %1778 = vmatmul.bf16.vlgmr.msra.gmra.mxu2 %v3709_v57  ;;  %v2810_v39 = vld [vmem:[#allocation2 + $0x490] sm:$0xf0]  ;;  %v3430_v41 = vld [vmem:[#allocation2 + $0x584] sm:$0xf]  ;;  %v3213_v42 = vor.u32 %v3498_v30, %v3210_v32 }
  0x79   :  { %1822 = vmatpush.bf16.msrb.mxu2 %v3117_v10  ;;  %1791 = vmatmul.bf16.vlgmr.msra.gmra.mxu3 %v3723_v6  ;;  %v2938_v43 = vld [vmem:[#allocation2 + $0x590] sm:$0xf0]  ;;  %v3462_v44 = vld [vmem:[#allocation2 + $0x684] sm:$0xf]  ;;  %v2813_v48 = vor.u32 %v3398_v38, %v2810_v39  ;;  %v2352_v39 = vld [vmem:[#allocation2 + $0xe8] sm:$0xf] }
  0x7a   :  { %1835 = vmatpush.bf16.msrb.mxu3 %v3245_v14  ;;  %v3066_v45 = vld [vmem:[#allocation2 + $0x690] sm:$0xf0]  ;;  %v3494_v46 = vld [vmem:[#allocation2 + $0x784] sm:$0xf]  ;;  %v2941_v49 = vor.u32 %v3430_v41, %v2938_v43  ;;  %v3285_v41 = vld [vmem:[#allocation2 + $0xf4] sm:$0xf0] }
  0x7b   :  { %1797 = vmatpush.bf16.msrb.mxu0 %v2845_v20  ;;  %v3194_v47 = vld [vmem:[#allocation2 + $0x790] sm:$0xf0]  ;;  %v3069_v50 = vor.u32 %v3462_v44, %v3066_v45  ;;  %v3394_v51 = vld [vmem:[#allocation2 + $0x464] sm:$0xf]  ;;  %v3317_v44 = vld [vmem:[#allocation2 + $0x1f4] sm:$0xf0] }
  0x7c   :  { %1810 = vmatpush.bf16.msrb.mxu1 %v2973_v21  ;;  %v2794_v52 = vld [vmem:[#allocation2 + $0x470] sm:$0xf0]  ;;  %v3426_v53 = vld [vmem:[#allocation2 + $0x564] sm:$0xf]  ;;  %v3197_v54 = vor.u32 %v3494_v46, %v3194_v47  ;;  %v2608_v45 = vld [vmem:[#allocation2 + $0x2e8] sm:$0xf] }
  0x7d   :  { %1823 = vmatpush.bf16.msrb.mxu2 %v3101_v22  ;;  %v2922_v55 = vld [vmem:[#allocation2 + $0x570] sm:$0xf0]  ;;  %v3458_v56 = vld [vmem:[#allocation2 + $0x664] sm:$0xf]  ;;  %v2797_v61 = vor.u32 %v3394_v51, %v2794_v52  ;;  %v3349_v46 = vld [vmem:[#allocation2 + $0x2f4] sm:$0xf0]  ;;  %v2353_v52 = vor.u32 %v3285_v41, %v2352_v39 }
  0x7e   :  { %1836 = vmatpush.bf16.msrb.mxu3 %v3229_v26  ;;  %v3050_v58 = vld [vmem:[#allocation2 + $0x670] sm:$0xf0]  ;;  %v3490_v59 = vld [vmem:[#allocation2 + $0x764] sm:$0xf]  ;;  %v2925_v62 = vor.u32 %v3426_v53, %v2922_v55  ;;  %v2336_v55 = vld [vmem:[#allocation2 + $0xc8] sm:$0xf] }
  0x7f   :  { %1798 = vmatpush.bf16.msrb.mxu0 %v2829_v33  ;;  %v3178_v60 = vld [vmem:[#allocation2 + $0x770] sm:$0xf0]  ;;  %v3053_v63 = vor.u32 %v3458_v56, %v3050_v58  ;;  %v3390_v0 = vld [vmem:[#allocation2 + $0x444] sm:$0xf]  ;;  %v3281_v56 = vld [vmem:[#allocation2 + $0xd4] sm:$0xf0] }
  0x80   :  { %1811 = vmatpush.bf16.msrb.mxu1 %v2957_v34  ;;  %v2778_v1 = vld [vmem:[#allocation2 + $0x450] sm:$0xf0]  ;;  %v3422_v2 = vld [vmem:[#allocation2 + $0x544] sm:$0xf]  ;;  %v3181_v3 = vor.u32 %v3490_v59, %v3178_v60  ;;  %v2464_v58 = vld [vmem:[#allocation2 + $0x1c8] sm:$0xf] }
  0x81   :  { %1824 = vmatpush.bf16.msrb.mxu2 %v3085_v37  ;;  %v2906_v4 = vld [vmem:[#allocation2 + $0x550] sm:$0xf0]  ;;  %v3454_v8 = vld [vmem:[#allocation2 + $0x644] sm:$0xf]  ;;  %v2781_v12 = vor.u32 %v3390_v0, %v2778_v1  ;;  %v3313_v60 = vld [vmem:[#allocation2 + $0x1d4] sm:$0xf0]  ;;  %v2337_v1 = vor.u32 %v3281_v56, %v2336_v55 }
  0x82   :  { %1837 = vmatpush.bf16.msrb.mxu3 %v3213_v42  ;;  %v3034_v9 = vld [vmem:[#allocation2 + $0x650] sm:$0xf0]  ;;  %v3486_v10 = vld [vmem:[#allocation2 + $0x744] sm:$0xf]  ;;  %v2909_v13 = vor.u32 %v3422_v2, %v2906_v4  ;;  %v2480_v42 = vld [vmem:[#allocation2 + $0x1e8] sm:$0xf]  ;;  %v2465_v2 = vor.u32 %v3313_v60, %v2464_v58 }
  0x83   :  { %1799 = vmatpush.bf16.msrb.mxu0 %v2813_v48  ;;  %v3162_v11 = vld [vmem:[#allocation2 + $0x750] sm:$0xf0]  ;;  %v3037_v14 = vor.u32 %v3454_v8, %v3034_v9  ;;  %v3386_v15 = vld [vmem:[#allocation2 + $0x424] sm:$0xf]  ;;  %v2481_v53 = vor.u32 %v3317_v44, %v2480_v42  ;;  %v3377_v0 = vld [vmem:[#allocation2 + $0x3d4] sm:$0xf0] }
  0x84   :  { %1812 = vmatpush.bf16.msrb.mxu1 %v2941_v49  ;;  %v2762_v16 = vld [vmem:[#allocation2 + $0x430] sm:$0xf0]  ;;  %v3418_v17 = vld [vmem:[#allocation2 + $0x524] sm:$0xf]  ;;  %v3165_v18 = vor.u32 %v3486_v10, %v3162_v11  ;;  %v2736_v49 = vld [vmem:[#allocation2 + $0x3e8] sm:$0xf] }
  0x85   :  { %1825 = vmatpush.bf16.msrb.mxu2 %v3069_v50  ;;  %v2890_v19 = vld [vmem:[#allocation2 + $0x530] sm:$0xf0]  ;;  %v3450_v20 = vld [vmem:[#allocation2 + $0x624] sm:$0xf]  ;;  %v2765_v24 = vor.u32 %v3386_v15, %v2762_v16  ;;  %v3381_v50 = vld [vmem:[#allocation2 + $0x3f4] sm:$0xf0] }
  0x86   :  { %1838 = vmatpush.bf16.msrb.mxu3 %v3197_v54  ;;  %v3018_v21 = vld [vmem:[#allocation2 + $0x630] sm:$0xf0]  ;;  %v3482_v22 = vld [vmem:[#allocation2 + $0x724] sm:$0xf]  ;;  %v2893_v27 = vor.u32 %v3418_v17, %v2890_v19  ;;  %v2609_v54 = vor.u32 %v3349_v46, %v2608_v45  ;;  %v2737_v59 = vor.u32 %v3381_v50, %v2736_v49  ;;  %v2320_v4 = vld [vmem:[#allocation2 + $0xa8] sm:$0xf] }
  0x87   :  { %1800 = vmatpush.bf16.msrb.mxu0 %v2797_v61  ;;  %v3146_v23 = vld [vmem:[#allocation2 + $0x730] sm:$0xf0]  ;;  %v3382_v25 = vld [vmem:[#allocation2 + $0x404] sm:$0xf]  ;;  %v3021_v28 = vor.u32 %v3450_v20, %v3018_v21  ;;  %v2592_v61 = vld [vmem:[#allocation2 + $0x2c8] sm:$0xf] }
  0x88   :  { %1813 = vmatpush.bf16.msrb.mxu1 %v2925_v62  ;;  %v2746_v26 = vld [vmem:[#allocation2 + $0x410] sm:$0xf0]  ;;  %v3414_v29 = vld [vmem:[#allocation2 + $0x504] sm:$0xf]  ;;  %v3149_v33 = vor.u32 %v3482_v22, %v3146_v23  ;;  %v3345_v62 = vld [vmem:[#allocation2 + $0x2d4] sm:$0xf0] }
  0x89   :  { %1826 = vmatpush.bf16.msrb.mxu2 %v3053_v63  ;;  %v2874_v30 = vld [vmem:[#allocation2 + $0x510] sm:$0xf0]  ;;  %v3446_v32 = vld [vmem:[#allocation2 + $0x604] sm:$0xf]  ;;  %v2749_v43 = vor.u32 %v3382_v25, %v2746_v26  ;;  %v2720_v63 = vld [vmem:[#allocation2 + $0x3c8] sm:$0xf] }
  0x8a   :  { %1839 = vmatpush.bf16.msrb.mxu3 %v3181_v3  ;;  %v3002_v34 = vld [vmem:[#allocation2 + $0x610] sm:$0xf0]  ;;  %v3478_v37 = vld [vmem:[#allocation2 + $0x704] sm:$0xf]  ;;  %v2877_v47 = vor.u32 %v3414_v29, %v2874_v30  ;;  %v2593_v3 = vor.u32 %v3345_v62, %v2592_v61  ;;  %v3277_v8 = vld [vmem:[#allocation2 + $0xb4] sm:$0xf0]  ;;  %v2721_v10 = vor.u32 %v3377_v0, %v2720_v63 }
  0x8b   :  { %1801 = vmatpush.bf16.msrb.mxu0 %v2781_v12  ;;  %v3130_v38 = vld [vmem:[#allocation2 + $0x710] sm:$0xf0]  ;;  %v3005_v48 = vor.u32 %v3446_v32, %v3002_v34  ;;  %v2448_v9 = vld [vmem:[#allocation2 + $0x1a8] sm:$0xf]  ;;  %v3309_v11 = vld [vmem:[#allocation2 + $0x1b4] sm:$0xf0]  ;;  %v2321_v16 = vor.u32 %v3277_v8, %v2320_v4 }
  0x8c   :  { %1814 = vmatpush.bf16.msrb.mxu1 %v2909_v13  ;;  %v3133_v51 = vor.u32 %v3478_v37, %v3130_v38  ;;  %v2576_v12 = vld [vmem:[#allocation2 + $0x2a8] sm:$0xf]  ;;  %v3341_v13 = vld [vmem:[#allocation2 + $0x2b4] sm:$0xf0]  ;;  %v2449_v17 = vor.u32 %v3309_v11, %v2448_v9 }
  0x8d   :  { %1827 = vmatpush.bf16.msrb.mxu2 %v3037_v14  ;;  %v2704_v14 = vld [vmem:[#allocation2 + $0x3a8] sm:$0xf]  ;;  %v3373_v15 = vld [vmem:[#allocation2 + $0x3b4] sm:$0xf0] }
  0x8e   :  { %1840 = vmatpush.bf16.msrb.mxu3 %v3165_v18  ;;  %v2577_v18 = vor.u32 %v3341_v13, %v2576_v12  ;;  %v2304_v19 = vld [vmem:[#allocation2 + $0x88] sm:$0xf]  ;;  %v3273_v20 = vld [vmem:[#allocation2 + $0x94] sm:$0xf0]  ;;  %v2705_v22 = vor.u32 %v3373_v15, %v2704_v14 }
  0x8f   :  { %1802 = vmatpush.bf16.msrb.mxu0 %v2765_v24  ;;  %v2432_v21 = vld [vmem:[#allocation2 + $0x188] sm:$0xf]  ;;  %v3305_v23 = vld [vmem:[#allocation2 + $0x194] sm:$0xf0] }
  0x90   :  { %1815 = vmatpush.bf16.msrb.mxu1 %v2893_v27  ;;  %v2560_v24 = vld [vmem:[#allocation2 + $0x288] sm:$0xf]  ;;  %v3337_v25 = vld [vmem:[#allocation2 + $0x294] sm:$0xf0]  ;;  %v2433_v29 = vor.u32 %v3305_v23, %v2432_v21 }
  0x91   :  { %1828 = vmatpush.bf16.msrb.mxu2 %v3021_v28  ;;  %v2688_v26 = vld [vmem:[#allocation2 + $0x388] sm:$0xf]  ;;  %v3369_v27 = vld [vmem:[#allocation2 + $0x394] sm:$0xf0]  ;;  %v2305_v28 = vor.u32 %v3273_v20, %v2304_v19  ;;  %v2561_v30 = vor.u32 %v3337_v25, %v2560_v24 }
  0x92   :  { %1841 = vmatpush.bf16.msrb.mxu3 %v3149_v33  ;;  %v2288_v32 = vld [vmem:[#allocation2 + $0x68] sm:$0xf]  ;;  %v3269_v33 = vld [vmem:[#allocation2 + $0x74] sm:$0xf0]  ;;  %v2689_v37 = vor.u32 %v3369_v27, %v2688_v26 }
  0x93   :  { %1803 = vmatpush.bf16.msrb.mxu0 %v2749_v43  ;;  %v2416_v34 = vld [vmem:[#allocation2 + $0x168] sm:$0xf]  ;;  %v3301_v38 = vld [vmem:[#allocation2 + $0x174] sm:$0xf0]  ;;  %v2289_v44 = vor.u32 %v3269_v33, %v2288_v32 }
  0x94   :  { %1816 = vmatpush.bf16.msrb.mxu1 %v2877_v47  ;;  %v2544_v39 = vld [vmem:[#allocation2 + $0x268] sm:$0xf]  ;;  %v3333_v41 = vld [vmem:[#allocation2 + $0x274] sm:$0xf0]  ;;  %v2417_v45 = vor.u32 %v3301_v38, %v2416_v34 }
  0x95   :  { %1829 = vmatpush.bf16.msrb.mxu2 %v3005_v48  ;;  %v2672_v42 = vld [vmem:[#allocation2 + $0x368] sm:$0xf]  ;;  %v3365_v43 = vld [vmem:[#allocation2 + $0x374] sm:$0xf0]  ;;  %v2545_v46 = vor.u32 %v3333_v41, %v2544_v39 }
  0x96   :  { %1842 = vmatpush.bf16.msrb.mxu3 %v3133_v51  ;;  %1804 = vmatmul.bf16.vlgmr.msrb.gmra.mxu0 %v3744_v35  ;;  %v2272_v47 = vld [vmem:[#allocation2 + $0x48] sm:$0xf]  ;;  %v3265_v48 = vld [vmem:[#allocation2 + $0x54] sm:$0xf0]  ;;  %v2673_v50 = vor.u32 %v3365_v43, %v2672_v42 }
  0x97   :  { %1848 = vmatpush.bf16.msra.mxu0 %v2353_v52  ;;  %1817 = vmatmul.bf16.vlgmr.msrb.gmra.mxu1 %v3748_v40  ;;  %v2400_v49 = vld [vmem:[#allocation2 + $0x148] sm:$0xf]  ;;  %v3297_v51 = vld [vmem:[#allocation2 + $0x154] sm:$0xf0]  ;;  %v2273_v56 = vor.u32 %v3265_v48, %v2272_v47 }
  0x98   :  { %1861 = vmatpush.bf16.msra.mxu1 %v2481_v53  ;;  %1830 = vmatmul.bf16.vlgmr.msrb.gmra.mxu2 %v3742_v31  ;;  %v2528_v52 = vld [vmem:[#allocation2 + $0x248] sm:$0xf]  ;;  %v3329_v53 = vld [vmem:[#allocation2 + $0x254] sm:$0xf0]  ;;  %v2401_v58 = vor.u32 %v3297_v51, %v2400_v49 }
  0x99   :  { %1874 = vmatpush.bf16.msra.mxu2 %v2609_v54  ;;  %1843 = vmatmul.bf16.vlgmr.msrb.gmra.mxu3 %v3746_v36  ;;  %v2656_v54 = vld [vmem:[#allocation2 + $0x348] sm:$0xf]  ;;  %v3361_v55 = vld [vmem:[#allocation2 + $0x354] sm:$0xf0] }
  0x9a   :  { %1887 = vmatpush.bf16.msra.mxu3 %v2737_v59  ;;  %v2529_v59 = vor.u32 %v3329_v53, %v2528_v52  ;;  %v2256_v60 = vld [vmem:[#allocation2 + $0x28] sm:$0xf]  ;;  %v3261_v61 = vld [vmem:[#allocation2 + $0x34] sm:$0xf0]  ;;  %v2657_v63 = vor.u32 %v3361_v55, %v2656_v54 }
  0x9b   :  { %1849 = vmatpush.bf16.msra.mxu0 %v2337_v1  ;;  %v2384_v62 = vld [vmem:[#allocation2 + $0x128] sm:$0xf]  ;;  %v3293_v0 = vld [vmem:[#allocation2 + $0x134] sm:$0xf0]  ;;  %v2257_v8 = vor.u32 %v3261_v61, %v2256_v60 }
  0x9c   :  { %1862 = vmatpush.bf16.msra.mxu1 %v2465_v2  ;;  %v2512_v1 = vld [vmem:[#allocation2 + $0x228] sm:$0xf]  ;;  %v3325_v2 = vld [vmem:[#allocation2 + $0x234] sm:$0xf0]  ;;  %v2385_v11 = vor.u32 %v3293_v0, %v2384_v62 }
  0x9d   :  { %1875 = vmatpush.bf16.msra.mxu2 %v2593_v3  ;;  %v2640_v3 = vld [vmem:[#allocation2 + $0x328] sm:$0xf]  ;;  %v3357_v4 = vld [vmem:[#allocation2 + $0x334] sm:$0xf0]  ;;  %v2513_v12 = vor.u32 %v3325_v2, %v2512_v1 }
  0x9e   :  { %1888 = vmatpush.bf16.msra.mxu3 %v2721_v10  ;;  %v2240_v9 = vld [vmem:[#allocation2 + $0x8] sm:$0xf]  ;;  %v3257_v10 = vld [vmem:[#allocation2 + $0x14] sm:$0xf0] }
  0x9f   :  { %1850 = vmatpush.bf16.msra.mxu0 %v2321_v16  ;;  %v2368_v13 = vld [vmem:[#allocation2 + $0x108] sm:$0xf]  ;;  %v3289_v14 = vld [vmem:[#allocation2 + $0x114] sm:$0xf0]  ;;  %v2641_v16 = vor.u32 %v3357_v4, %v2640_v3  ;;  %v2241_v23 = vor.u32 %v3257_v10, %v2240_v9 }
  0xa0   :  { %1863 = vmatpush.bf16.msra.mxu1 %v2449_v17  ;;  %v2496_v15 = vld [vmem:[#allocation2 + $0x208] sm:$0xf]  ;;  %v3321_v17 = vld [vmem:[#allocation2 + $0x214] sm:$0xf0]  ;;  %v2369_v27 = vor.u32 %v3289_v14, %v2368_v13 }
  0xa1   :  { %1876 = vmatpush.bf16.msra.mxu2 %v2577_v18  ;;  %v2624_v18 = vld [vmem:[#allocation2 + $0x308] sm:$0xf]  ;;  %v3353_v19 = vld [vmem:[#allocation2 + $0x314] sm:$0xf0] }
  0xa2   :  { %1889 = vmatpush.bf16.msra.mxu3 %v2705_v22  ;;  %v2864_v20 = vld [vmem:[#allocation2 + $0x4e8] sm:$0xf]  ;;  %v3413_v21 = vld [vmem:[#allocation2 + $0x4f4] sm:$0xf0]  ;;  %v2625_v32 = vor.u32 %v3353_v19, %v2624_v18 }
  0xa3   :  { %1851 = vmatpush.bf16.msra.mxu0 %v2305_v28  ;;  %v2992_v22 = vld [vmem:[#allocation2 + $0x5e8] sm:$0xf]  ;;  %v3445_v24 = vld [vmem:[#allocation2 + $0x5f4] sm:$0xf0]  ;;  %v2497_v28 = vor.u32 %v3321_v17, %v2496_v15  ;;  %v2865_v33 = vor.u32 %v3413_v21, %v2864_v20 }
  0xa4   :  { %1864 = vmatpush.bf16.msra.mxu1 %v2433_v29  ;;  %v3120_v25 = vld [vmem:[#allocation2 + $0x6e8] sm:$0xf]  ;;  %v3477_v26 = vld [vmem:[#allocation2 + $0x6f4] sm:$0xf0]  ;;  %v2993_v34 = vor.u32 %v3445_v24, %v2992_v22 }
  0xa5   :  { %1877 = vmatpush.bf16.msra.mxu2 %v2561_v30  ;;  %v3248_v29 = vld [vmem:[#allocation2 + $0x7e8] sm:$0xf]  ;;  %v3509_v30 = vld [vmem:[#allocation2 + $0x7f4] sm:$0xf0] }
  0xa6   :  { %1890 = vmatpush.bf16.msra.mxu3 %v2689_v37  ;;  %v3121_v37 = vor.u32 %v3477_v26, %v3120_v25  ;;  %v2848_v38 = vld [vmem:[#allocation2 + $0x4c8] sm:$0xf]  ;;  %v3409_v39 = vld [vmem:[#allocation2 + $0x4d4] sm:$0xf0]  ;;  %v3249_v42 = vor.u32 %v3509_v30, %v3248_v29 }
  0xa7   :  { %1852 = vmatpush.bf16.msra.mxu0 %v2289_v44  ;;  %v2976_v41 = vld [vmem:[#allocation2 + $0x5c8] sm:$0xf]  ;;  %v3441_v43 = vld [vmem:[#allocation2 + $0x5d4] sm:$0xf0]  ;;  %v2849_v48 = vor.u32 %v3409_v39, %v2848_v38 }
  0xa8   :  { %1865 = vmatpush.bf16.msra.mxu1 %v2417_v45  ;;  %v3104_v44 = vld [vmem:[#allocation2 + $0x6c8] sm:$0xf]  ;;  %v3473_v45 = vld [vmem:[#allocation2 + $0x6d4] sm:$0xf0]  ;;  %v2977_v49 = vor.u32 %v3441_v43, %v2976_v41 }
  0xa9   :  { %1878 = vmatpush.bf16.msra.mxu2 %v2545_v46  ;;  %v3232_v46 = vld [vmem:[#allocation2 + $0x7c8] sm:$0xf]  ;;  %v3505_v47 = vld [vmem:[#allocation2 + $0x7d4] sm:$0xf0] }
  0xaa   :  { %1891 = vmatpush.bf16.msra.mxu3 %v2673_v50  ;;  %v3105_v50 = vor.u32 %v3473_v45, %v3104_v44  ;;  %v2832_v51 = vld [vmem:[#allocation2 + $0x4a8] sm:$0xf]  ;;  %v3405_v52 = vld [vmem:[#allocation2 + $0x4b4] sm:$0xf0]  ;;  %v3233_v54 = vor.u32 %v3505_v47, %v3232_v46  ;;  %v3770_v44 = vld [vmem:[#allocation5] sm:$0xf] }
  0xab   :  { %1853 = vmatpush.bf16.msra.mxu0 %v2273_v56  ;;  %v2960_v53 = vld [vmem:[#allocation2 + $0x5a8] sm:$0xf]  ;;  %v3437_v55 = vld [vmem:[#allocation2 + $0x5b4] sm:$0xf0]  ;;  %v2833_v61 = vor.u32 %v3405_v52, %v2832_v51 }
  0xac   :  { %1866 = vmatpush.bf16.msra.mxu1 %v2401_v58  ;;  %v3088_v56 = vld [vmem:[#allocation2 + $0x6a8] sm:$0xf]  ;;  %v3469_v58 = vld [vmem:[#allocation2 + $0x6b4] sm:$0xf0]  ;;  %v2961_v62 = vor.u32 %v3437_v55, %v2960_v53 }
  0xad   :  { %1879 = vmatpush.bf16.msra.mxu2 %v2529_v59  ;;  %v3216_v59 = vld [vmem:[#allocation2 + $0x7a8] sm:$0xf]  ;;  %v3501_v60 = vld [vmem:[#allocation2 + $0x7b4] sm:$0xf0] }
  0xae   :  { %1892 = vmatpush.bf16.msra.mxu3 %v2657_v63  ;;  %v3089_v63 = vor.u32 %v3469_v58, %v3088_v56  ;;  %v2816_v0 = vld [vmem:[#allocation2 + $0x488] sm:$0xf]  ;;  %v3401_v1 = vld [vmem:[#allocation2 + $0x494] sm:$0xf0]  ;;  %v3217_v3 = vor.u32 %v3501_v60, %v3216_v59  ;;  %v352_v58 = vperm.slane %v3770_v44, 0 }
  0xaf   :  { %1854 = vmatpush.bf16.msra.mxu0 %v2257_v8  ;;  %v2944_v2 = vld [vmem:[#allocation2 + $0x588] sm:$0xf]  ;;  %v3433_v4 = vld [vmem:[#allocation2 + $0x594] sm:$0xf0] }
  0xb0   :  { %1867 = vmatpush.bf16.msra.mxu1 %v2385_v11  ;;  %v3072_v8 = vld [vmem:[#allocation2 + $0x688] sm:$0xf]  ;;  %v3465_v9 = vld [vmem:[#allocation2 + $0x694] sm:$0xf0]  ;;  %v2945_v13 = vor.u32 %v3433_v4, %v2944_v2 }
  0xb1   :  { %1880 = vmatpush.bf16.msra.mxu2 %v2513_v12  ;;  %v3200_v10 = vld [vmem:[#allocation2 + $0x788] sm:$0xf]  ;;  %v3497_v11 = vld [vmem:[#allocation2 + $0x794] sm:$0xf0]  ;;  %v2817_v12 = vor.u32 %v3401_v1, %v2816_v0  ;;  %v3073_v14 = vor.u32 %v3465_v9, %v3072_v8 }
  0xb2   :  { %1893 = vmatpush.bf16.msra.mxu3 %v2641_v16  ;;  %v2800_v15 = vld [vmem:[#allocation2 + $0x468] sm:$0xf]  ;;  %v3397_v16 = vld [vmem:[#allocation2 + $0x474] sm:$0xf0]  ;;  %v3201_v18 = vor.u32 %v3497_v11, %v3200_v10 }
  0xb3   :  { %1855 = vmatpush.bf16.msra.mxu0 %v2241_v23  ;;  %v2928_v17 = vld [vmem:[#allocation2 + $0x568] sm:$0xf]  ;;  %v3429_v19 = vld [vmem:[#allocation2 + $0x574] sm:$0xf0]  ;;  %v2801_v25 = vor.u32 %v3397_v16, %v2800_v15  ;;  %v3766_v26 = vpop.f32.mrf.mxu1  ;;  %v2354_v15 = vld [vmem:[#allocation2 + $0xf8] sm:$0xf0] }
  0xb4   :  { %1868 = vmatpush.bf16.msra.mxu1 %v2369_v27  ;;  %v3056_v20 = vld [vmem:[#allocation2 + $0x668] sm:$0xf]  ;;  %v3461_v21 = vld [vmem:[#allocation2 + $0x674] sm:$0xf0]  ;;  %v2929_v27 = vor.u32 %v3429_v19, %v2928_v17  ;;  %v3315_v16 = vld [vmem:[#allocation2 + $0x1ec] sm:$0xf] }
  0xb5   :  { %1881 = vmatpush.bf16.msra.mxu2 %v2497_v28  ;;  %v3184_v22 = vld [vmem:[#allocation2 + $0x768] sm:$0xf]  ;;  %v3493_v23 = vld [vmem:[#allocation2 + $0x774] sm:$0xf0]  ;;  %v3057_v28 = vor.u32 %v3461_v21, %v3056_v20  ;;  %v3347_v19 = vld [vmem:[#allocation2 + $0x2ec] sm:$0xf] }
  0xb6   :  { %1894 = vmatpush.bf16.msra.mxu3 %v2625_v32  ;;  %1856 = vmatmul.bf16.vlgmr.msra.gmra.mxu0 %v3721_v5  ;;  %v2784_v29 = vld [vmem:[#allocation2 + $0x448] sm:$0xf]  ;;  %v3393_v30 = vld [vmem:[#allocation2 + $0x454] sm:$0xf0]  ;;  %v2610_v20 = vld [vmem:[#allocation2 + $0x2f8] sm:$0xf0] }
  0xb7   :  { %1900 = vmatpush.bf16.msrb.mxu0 %v2865_v33  ;;  %1869 = vmatmul.bf16.vlgmr.msra.gmra.mxu1 %v3725_v7  ;;  %v2912_v32 = vld [vmem:[#allocation2 + $0x548] sm:$0xf]  ;;  %v3457_v39 = vld [vmem:[#allocation2 + $0x654] sm:$0xf0]  ;;  %v2785_v43 = vor.u32 %v3393_v30, %v2784_v29 }
  0xb8   :  { %1913 = vmatpush.bf16.msrb.mxu1 %v2993_v34  ;;  %1882 = vmatmul.bf16.vlgmr.msra.gmra.mxu2 %v3709_v57  ;;  %v3185_v34 = vor.u32 %v3493_v23, %v3184_v22  ;;  %v3040_v38 = vld [vmem:[#allocation2 + $0x648] sm:$0xf]  ;;  %v3421_v51 = vld [vmem:[#allocation2 + $0x534] sm:$0xf0]  ;;  %v3379_v23 = vld [vmem:[#allocation2 + $0x3ec] sm:$0xf] }
  0xb9   :  { %1926 = vmatpush.bf16.msrb.mxu2 %v3121_v37  ;;  %1895 = vmatmul.bf16.vlgmr.msra.gmra.mxu3 %v3723_v6  ;;  %v3425_v37 = vld [vmem:[#allocation2 + $0x554] sm:$0xf0]  ;;  %v3168_v41 = vld [vmem:[#allocation2 + $0x748] sm:$0xf]  ;;  %v3041_v46 = vor.u32 %v3457_v39, %v3040_v38  ;;  %v3311_v38 = vld [vmem:[#allocation2 + $0x1cc] sm:$0xf] }
  0xba   :  { %1939 = vmatpush.bf16.msrb.mxu3 %v3249_v42  ;;  %v3489_v42 = vld [vmem:[#allocation2 + $0x754] sm:$0xf0]  ;;  %v2913_v45 = vor.u32 %v3425_v37, %v2912_v32  ;;  %v2768_v47 = vld [vmem:[#allocation2 + $0x428] sm:$0xf]  ;;  %v2613_v32 = vor.u32 %v3347_v19, %v2610_v20  ;;  %v2338_v37 = vld [vmem:[#allocation2 + $0xd8] sm:$0xf0] }
  0xbb   :  { %1901 = vmatpush.bf16.msrb.mxu0 %v2849_v48  ;;  %v3389_v48 = vld [vmem:[#allocation2 + $0x434] sm:$0xf0]  ;;  %v3024_v52 = vld [vmem:[#allocation2 + $0x628] sm:$0xf]  ;;  %v2290_v19 = vld [vmem:[#allocation2 + $0x78] sm:$0xf0] }
  0xbc   :  { %1914 = vmatpush.bf16.msrb.mxu1 %v2977_v49  ;;  %v2896_v49 = vld [vmem:[#allocation2 + $0x528] sm:$0xf]  ;;  %v3453_v53 = vld [vmem:[#allocation2 + $0x634] sm:$0xf0]  ;;  %v2769_v60 = vor.u32 %v3389_v48, %v2768_v47  ;;  %v3275_v48 = vld [vmem:[#allocation2 + $0xac] sm:$0xf] }
  0xbd   :  { %1927 = vmatpush.bf16.msrb.mxu2 %v3105_v50  ;;  %v3169_v50 = vor.u32 %v3489_v42, %v3168_v41  ;;  %v3152_v55 = vld [vmem:[#allocation2 + $0x728] sm:$0xf]  ;;  %v3485_v56 = vld [vmem:[#allocation2 + $0x734] sm:$0xf0]  ;;  %v2897_v0 = vor.u32 %v3421_v51, %v2896_v49  ;;  %v3025_v1 = vor.u32 %v3453_v53, %v3024_v52  ;;  %v2466_v41 = vld [vmem:[#allocation2 + $0x1d8] sm:$0xf0] }
  0xbe   :  { %1940 = vmatpush.bf16.msrb.mxu3 %v3233_v54  ;;  %v1649_v24 = vpop.f32.mrf.mxu0  ;;  %v3772_v54 = vpop.f32.mrf.mxu3  ;;  %v2880_v2 = vld [vmem:[#allocation2 + $0x508] sm:$0xf]  ;;  %v3153_v9 = vor.u32 %v3485_v56, %v3152_v55  ;;  %v3449_v10 = vld [vmem:[#allocation2 + $0x614] sm:$0xf0]  ;;  %v3343_v42 = vld [vmem:[#allocation2 + $0x2cc] sm:$0xf]  ;;  %v2469_v49 = vor.u32 %v3311_v38, %v2466_v41 }
  0xbf   :  { %1902 = vmatpush.bf16.msrb.mxu0 %v2833_v61  ;;  %v2752_v61 = vld [vmem:[#allocation2 + $0x408] sm:$0xf]  ;;  %v2322_v51 = vld [vmem:[#allocation2 + $0xb8] sm:$0xf0]  ;;  %v3307_v52 = vld [vmem:[#allocation2 + $0x1ac] sm:$0xf] }
  0xc0   :  { %1915 = vmatpush.bf16.msrb.mxu1 %v2961_v62  ;;  %v3385_v62 = vld [vmem:[#allocation2 + $0x414] sm:$0xf0]  ;;  %v3008_v4 = vld [vmem:[#allocation2 + $0x608] sm:$0xf]  ;;  %v2450_v55 = vld [vmem:[#allocation2 + $0x1b8] sm:$0xf0] }
  0xc1   :  { %1928 = vmatpush.bf16.msrb.mxu2 %v3089_v63  ;;  %v3768_v33 = vpop.f32.mrf.mxu2  ;;  %v1664_v63 = vpop.f32.mrf.mxu1  ;;  %v3136_v11 = vld [vmem:[#allocation2 + $0x708] sm:$0xf]  ;;  %v2753_v17 = vor.u32 %v3385_v62, %v2752_v61  ;;  %v3009_v22 = vor.u32 %v3449_v10, %v3008_v4  ;;  %v3339_v56 = vld [vmem:[#allocation2 + $0x2ac] sm:$0xf]  ;;  %v3662_v61 = vmov 8.0  }
  0xc2   :  { %1941 = vmatpush.bf16.msrb.mxu3 %v3217_v3  ;;  %v3417_v3 = vld [vmem:[#allocation2 + $0x514] sm:$0xf0]  ;;  %3518 = vrcp.f32 %v3662_v61  ;;  %v2453_v63 = vor.u32 %v3307_v52, %v2450_v55  ;;  %v2562_v10 = vld [vmem:[#allocation2 + $0x298] sm:$0xf0]  ;;  %v3299_v20 = vld [vmem:[#allocation2 + $0x16c] sm:$0xf] }
  0xc3   :  { %1903 = vmatpush.bf16.msrb.mxu0 %v2817_v12  ;;  %v3481_v12 = vld [vmem:[#allocation2 + $0x714] sm:$0xf0]  ;;  %v2881_v21 = vor.u32 %v3417_v3, %v2880_v2  ;;  %v2306_v2 = vld [vmem:[#allocation2 + $0x98] sm:$0xf0]  ;;  %v3303_v3 = vld [vmem:[#allocation2 + $0x18c] sm:$0xf] }
  0xc4   :  { %1916 = vmatpush.bf16.msrb.mxu1 %v2945_v13  ;;  %v1650_v13 = vadd.f32 %v1649_v24, %v352_v58  ;;  %v2578_v58 = vld [vmem:[#allocation2 + $0x2b8] sm:$0xf0] }
  0xc5   :  { %1929 = vmatpush.bf16.msrb.mxu2 %v3073_v14  ;;  %v3283_v14 = vld [vmem:[#allocation2 + $0xec] sm:$0xf]  ;;  %v2274_v41 = vld [vmem:[#allocation2 + $0x58] sm:$0xf0] }
  0xc6   :  { %1942 = vmatpush.bf16.msrb.mxu3 %v3201_v18  ;;  %v1651_v59 = vpop.f32.mrf.mxu0  ;;  %v2482_v18 = vld [vmem:[#allocation2 + $0x1f8] sm:$0xf0]  ;;  %v1690_v29 = vpop.f32.mrf.mxu3  ;;  %v1663_v24 = vadd.f32 %v3766_v26, %v1650_v13 }
  0xc7   :  { %1904 = vmatpush.bf16.msrb.mxu0 %v2801_v25  ;;  %v2738_v25 = vld [vmem:[#allocation2 + $0x3f8] sm:$0xf0]  ;;  %v2485_v30 = vor.u32 %v3315_v16, %v2482_v18  ;;  %v3371_v59 = vld [vmem:[#allocation2 + $0x3ac] sm:$0xf] }
  0xc8   :  { %1917 = vmatpush.bf16.msrb.mxu1 %v2929_v27  ;;  %v3137_v27 = vor.u32 %v3481_v12, %v3136_v11  ;;  %v2741_v39 = vor.u32 %v3379_v23, %v2738_v25  ;;  %v1676_v26 = vadd.f32 %v3768_v33, %v1663_v24  ;;  %v2325_v33 = vor.u32 %v3275_v48, %v2322_v51  ;;  %v3367_v11 = vld [vmem:[#allocation2 + $0x38c] sm:$0xf]  ;;  %v2690_v12 = vld [vmem:[#allocation2 + $0x398] sm:$0xf0] }
  0xc9   :  { %1930 = vmatpush.bf16.msrb.mxu2 %v3057_v28  ;;  %v1677_v8 = vpop.f32.mrf.mxu2  ;;  %v2357_v28 = vor.u32 %v3283_v14, %v2354_v15  ;;  %v3267_v18 = vld [vmem:[#allocation2 + $0x6c] sm:$0xf]  ;;  %v2418_v23 = vld [vmem:[#allocation2 + $0x178] sm:$0xf0] }
  0xca   :  { %1943 = vmatpush.bf16.msrb.mxu3 %v3185_v34  ;;  %v3279_v34 = vld [vmem:[#allocation2 + $0xcc] sm:$0xf]  ;;  %v1689_v62 = vadd.f32 %v3772_v54, %v1676_v26  ;;  %v2434_v8 = vld [vmem:[#allocation2 + $0x198] sm:$0xf0] }
  0xcb   :  { %1905 = vmatpush.bf16.msrb.mxu0 %v2785_v43  ;;  %v2594_v43 = vld [vmem:[#allocation2 + $0x2d8] sm:$0xf0]  ;;  %v2341_v47 = vor.u32 %v3279_v34, %v2338_v37  ;;  %v2437_v54 = vor.u32 %v3303_v3, %v2434_v8  ;;  %v3331_v25 = vld [vmem:[#allocation2 + $0x26c] sm:$0xf]  ;;  %v2421_v34 = vor.u32 %v3299_v20, %v2418_v23 }
  0xcc   :  { %1918 = vmatpush.bf16.msrb.mxu1 %v2913_v45  ;;  %v3375_v45 = vld [vmem:[#allocation2 + $0x3cc] sm:$0xf]  ;;  %v2674_v24 = vld [vmem:[#allocation2 + $0x378] sm:$0xf0] }
  0xcd   :  { %1931 = vmatpush.bf16.msrb.mxu2 %v3041_v46  ;;  %v2722_v46 = vld [vmem:[#allocation2 + $0x3d8] sm:$0xf0]  ;;  %v3363_v29 = vld [vmem:[#allocation2 + $0x36c] sm:$0xf] }
  0xce   :  { %1944 = vmatpush.bf16.msrb.mxu3 %v3169_v50  ;;  %v2597_v50 = vor.u32 %v3343_v42, %v2594_v43  ;;  %v2725_v53 = vor.u32 %v3375_v45, %v2722_v46  ;;  %v3295_v42 = vld [vmem:[#allocation2 + $0x14c] sm:$0xf]  ;;  %v2677_v43 = vor.u32 %v3363_v29, %v2674_v24  ;;  %v2530_v26 = vld [vmem:[#allocation2 + $0x258] sm:$0xf0] }
  0xcf   :  { %1906 = vmatpush.bf16.msrb.mxu0 %v2769_v60  ;;  %v2706_v60 = vld [vmem:[#allocation2 + $0x3b8] sm:$0xf0]  ;;  %v3327_v48 = vld [vmem:[#allocation2 + $0x24c] sm:$0xf] }
  0xd0   :  { %1919 = vmatpush.bf16.msrb.mxu1 %v2897_v0  ;;  %v2581_v0 = vor.u32 %v3339_v56, %v2578_v58  ;;  %v2709_v4 = vor.u32 %v3371_v59, %v2706_v60  ;;  %v2258_v55 = vld [vmem:[#allocation2 + $0x38] sm:$0xf0]  ;;  %v2533_v60 = vor.u32 %v3327_v48, %v2530_v26  ;;  %v3355_v3 = vld [vmem:[#allocation2 + $0x32c] sm:$0xf] }
  0xd1   :  { %1932 = vmatpush.bf16.msrb.mxu2 %v3025_v1  ;;  %v3271_v1 = vld [vmem:[#allocation2 + $0x8c] sm:$0xf]  ;;  %v2386_v61 = vld [vmem:[#allocation2 + $0x138] sm:$0xf0] }
  0xd2   :  { %1945 = vmatpush.bf16.msrb.mxu3 %v3153_v9  ;;  %v3335_v9 = vld [vmem:[#allocation2 + $0x28c] sm:$0xf]  ;;  %v2309_v13 = vor.u32 %v3271_v1, %v2306_v2  ;;  %v2514_v2 = vld [vmem:[#allocation2 + $0x238] sm:$0xf0] }
  0xd3   :  { %1907 = vmatpush.bf16.msrb.mxu0 %v2753_v17  ;;  %v2565_v15 = vor.u32 %v3335_v9, %v2562_v10  ;;  %v3323_v1 = vld [vmem:[#allocation2 + $0x22c] sm:$0xf]  ;;  %v2626_v23 = vld [vmem:[#allocation2 + $0x318] sm:$0xf0] }
  0xd4   :  { %1920 = vmatpush.bf16.msrb.mxu1 %v2881_v21  ;;  %v1714_v17 = vpop.f32.mrf.mxu1  ;;  %v3782_v21 = vpop.eup %3518  ;;  %v3255_v8 = vld [vmem:[#allocation2 + $0xc] sm:$0xf]  ;;  %v2994_v24 = vld [vmem:[#allocation2 + $0x5f8] sm:$0xf0] }
  0xd5   :  { %1933 = vmatpush.bf16.msrb.mxu2 %v3009_v22  ;;  %v2693_v22 = vor.u32 %v3367_v11, %v2690_v12  ;;  %v2242_v11 = vld [vmem:[#allocation2 + $0x18] sm:$0xf0]  ;;  %v3287_v12 = vld [vmem:[#allocation2 + $0x10c] sm:$0xf]  ;;  %vm2089_vm0 = vweird.f32 %v3782_v21 }
  0xd6   :  { %1946 = vmatpush.bf16.msrb.mxu3 %v3137_v27  ;;  %1908 = vmatmul.bf16.vlgmr.msrb.gmra.mxu0 %v3744_v35  ;;  %v1701_v14 = vpop.f32.mrf.mxu0  ;;  %v2546_v27 = vld [vmem:[#allocation2 + $0x278] sm:$0xf0]  ;;  %v3443_v29 = vld [vmem:[#allocation2 + $0x5ec] sm:$0xf] }
  0xd7   :  { %1952 = vmatpush.bf16.msra.mxu0 %v2357_v28  ;;  %1921 = vmatmul.bf16.vlgmr.msrb.gmra.mxu1 %v3748_v40  ;;  %v1702_v16 = vadd.f32 %v1701_v14, %v1689_v62  ;;  %v2549_v37 = vor.u32 %v3331_v25, %v2546_v27  ;;  %v3411_v25 = vld [vmem:[#allocation2 + $0x4ec] sm:$0xf]  ;;  %v2997_v26 = vor.u32 %v3443_v29, %v2994_v24 }
  0xd8   :  { %1965 = vmatpush.bf16.msra.mxu1 %v2485_v30  ;;  %1934 = vmatmul.bf16.vlgmr.msrb.gmra.mxu2 %v3742_v31  ;;  %v2293_v30 = vor.u32 %v3267_v18, %v2290_v19  ;;  %v3407_v48 = vld [vmem:[#allocation2 + $0x4cc] sm:$0xf] }
  0xd9   :  { %1978 = vmatpush.bf16.msra.mxu2 %v2613_v32  ;;  %1947 = vmatmul.bf16.vlgmr.msrb.gmra.mxu3 %v3746_v36  ;;  %v1715_v28 = vadd.f32 %v1714_v17, %v1702_v16  ;;  %v3263_v32 = vld [vmem:[#allocation2 + $0x4c] sm:$0xf]  ;;  %v2498_v17 = vld [vmem:[#allocation2 + $0x218] sm:$0xf0] }
  0xda   :  { %1991 = vmatpush.bf16.msra.mxu3 %v2741_v39  ;;  %v2085_v39 = vmul.f32 8.0, %v3782_v21  ;;  %v2277_v52 = vor.u32 %v3263_v32, %v2274_v41  ;;  %v3319_v16 = vld [vmem:[#allocation2 + $0x20c] sm:$0xf]  ;;  %v2245_v32 = vor.u32 %v3255_v8, %v2242_v11  ;;  %v3090_v11 = vld [vmem:[#allocation2 + $0x6b8] sm:$0xf0] }
  0xdb   :  { %1953 = vmatpush.bf16.msra.mxu0 %v2341_v47  ;;  %v1727_v38 = vpop.f32.mrf.mxu2  ;;  %v2402_v47 = vld [vmem:[#allocation2 + $0x158] sm:$0xf0]  ;;  %v2501_v41 = vor.u32 %v3319_v16, %v2498_v17  ;;  %v3399_v16 = vld [vmem:[#allocation2 + $0x48c] sm:$0xf] }
  0xdc   :  { %1966 = vmatpush.bf16.msra.mxu1 %v2469_v49  ;;  %v1728_v45 = vadd.f32 %v1727_v38, %v1715_v28  ;;  %v3359_v49 = vld [vmem:[#allocation2 + $0x34c] sm:$0xf]  ;;  %v2086_v58 = vsub.f32 1.0, %v2085_v39  ;;  %v2405_v59 = vor.u32 %v3295_v42, %v2402_v47  ;;  %v1716_v62 = vpop.f32.mrf.mxu1  ;;  %v2866_v28 = vld [vmem:[#allocation2 + $0x4f8] sm:$0xf0] }
  0xdd   :  { %1979 = vmatpush.bf16.msra.mxu2 %v2597_v50  ;;  %v2658_v50 = vld [vmem:[#allocation2 + $0x358] sm:$0xf0]  ;;  %v3507_v42 = vld [vmem:[#allocation2 + $0x7ec] sm:$0xf]  ;;  %v2869_v47 = vor.u32 %v3411_v25, %v2866_v28 }
  0xde   :  { %1992 = vmatpush.bf16.msra.mxu3 %v2725_v53  ;;  %v1740_v46 = vpop.f32.mrf.mxu3  ;;  %v3259_v53 = vld [vmem:[#allocation2 + $0x2c] sm:$0xf]  ;;  %v1703_v56 = vpop.f32.mrf.mxu0  ;;  %v2818_v17 = vld [vmem:[#allocation2 + $0x498] sm:$0xf0] }
  0xdf   :  { %1954 = vmatpush.bf16.msra.mxu0 %v2325_v33  ;;  %v1741_v51 = vadd.f32 %v1740_v46, %v1728_v45  ;;  %v3291_v33 = vld [vmem:[#allocation2 + $0x12c] sm:$0xf]  ;;  %v2261_v10 = vor.u32 %v3259_v53, %v2258_v55 }
  0xe0   :  { %1967 = vmatpush.bf16.msra.mxu1 %v2453_v63  ;;  %v2389_v14 = vor.u32 %v3291_v33, %v2386_v61  ;;  %v3471_v56 = vld [vmem:[#allocation2 + $0x6cc] sm:$0xf]  ;;  %v3234_v33 = vld [vmem:[#allocation2 + $0x7d8] sm:$0xf0] }
  0xe1   :  { %1980 = vmatpush.bf16.msra.mxu2 %v2581_v0  ;;  %v3785_v63 = vmax.f32 %v1741_v51, 0.0  ;;  %v2661_v0 = vor.u32 %v3359_v49, %v2658_v50  ;;  %v2850_v50 = vld [vmem:[#allocation2 + $0x4d8] sm:$0xf0]  ;;  %v3439_v51 = vld [vmem:[#allocation2 + $0x5cc] sm:$0xf] }
  0xe2   :  { %1993 = vmatpush.bf16.msra.mxu3 %v2709_v4  ;;  %v2642_v4 = vld [vmem:[#allocation2 + $0x338] sm:$0xf0]  ;;  %v2853_v62 = vor.u32 %v3407_v48, %v2850_v50  ;;  %v3395_v24 = vld [vmem:[#allocation2 + $0x46c] sm:$0xf] }
  0xe3   :  { %1955 = vmatpush.bf16.msra.mxu0 %v2309_v13  ;;  %v2060_v9 = vrot.slane %v3785_v63, 4  ;;  %v2087_v13 = vmul.f32 %v3782_v21, %v2086_v58  ;;  %v1729_v18 = vpop.f32.mrf.mxu2  ;;  %v2645_v20 = vor.u32 %v3355_v3, %v2642_v4  ;;  %v3106_v58 = vld [vmem:[#allocation2 + $0x6d8] sm:$0xf0]  ;;  %v3435_v4 = vld [vmem:[#allocation2 + $0x5ac] sm:$0xf] }
  0xe4   :  { %1968 = vmatpush.bf16.msra.mxu1 %v2437_v54  ;;  %v2517_v54 = vor.u32 %v3323_v1, %v2514_v2  ;;  %v3109_v1 = vor.u32 %v3471_v56, %v3106_v58  ;;  %v3403_v2 = vld [vmem:[#allocation2 + $0x4ac] sm:$0xf]  ;;  %v2834_v3 = vld [vmem:[#allocation2 + $0x4b8] sm:$0xf0] }
  0xe5   :  { %1981 = vmatpush.bf16.msra.mxu2 %v2565_v15  ;;  %v2370_v15 = vld [vmem:[#allocation2 + $0x118] sm:$0xf0]  ;;  %v2061_v19 = vadd.f32 %v2060_v9, %v3785_v63  ;;  %v2088_v38 = vadd.f32 %v3782_v21, %v2087_v13  ;;  %v3431_v18 = vld [vmem:[#allocation2 + $0x58c] sm:$0xf] }
  0xe6   :  { %1994 = vmatpush.bf16.msra.mxu3 %v2693_v22  ;;  %v3351_v22 = vld [vmem:[#allocation2 + $0x30c] sm:$0xf]  ;;  %v1742_v27 = vpop.f32.mrf.mxu3  ;;  %v2373_v39 = vor.u32 %v3287_v12, %v2370_v15  ;;  %v2962_v9 = vld [vmem:[#allocation2 + $0x5b8] sm:$0xf0] }
  0xe7   :  { %1956 = vmatpush.bf16.msra.mxu0 %v2293_v30  ;;  %v2062_v30 = vrot.slane %v2061_v19, 2  ;;  %v2629_v46 = vor.u32 %v3351_v22, %v2626_v23  ;;  %v3499_v12 = vld [vmem:[#allocation2 + $0x7ac] sm:$0xf]  ;;  %v3218_v13 = vld [vmem:[#allocation2 + $0x7b8] sm:$0xf0]  ;;  %v2965_v15 = vor.u32 %v3435_v4, %v2962_v9 }
  0xe8   :  { %1969 = vmatpush.bf16.msra.mxu1 %v2421_v34  ;;  %v3475_v34 = vld [vmem:[#allocation2 + $0x6ec] sm:$0xf]  ;;  %v3202_v23 = vld [vmem:[#allocation2 + $0x798] sm:$0xf0] }
  0xe9   :  { %1982 = vmatpush.bf16.msra.mxu2 %v2549_v37  ;;  %v3122_v37 = vld [vmem:[#allocation2 + $0x6f8] sm:$0xf0]  ;;  %v2063_v45 = vadd.f32 %v2062_v30, %v2061_v19  ;;  %v3495_v22 = vld [vmem:[#allocation2 + $0x78c] sm:$0xf] }
  0xea   :  { %1995 = vmatpush.bf16.msra.mxu3 %v2677_v43  ;;  %v3250_v43 = vld [vmem:[#allocation2 + $0x7f8] sm:$0xf0]  ;;  %v3125_v49 = vor.u32 %v3475_v34, %v3122_v37  ;;  %v3455_v58 = vld [vmem:[#allocation2 + $0x64c] sm:$0xf] }
  0xeb   :  { %1957 = vmatpush.bf16.msra.mxu0 %v2277_v52  ;;  %v2978_v52 = vld [vmem:[#allocation2 + $0x5d8] sm:$0xf0]  ;;  %v2064_v53 = vrot.slane %v2063_v45, 1  ;;  %v3253_v55 = vor.u32 %v3507_v42, %v3250_v43  ;;  %v3491_v43 = vld [vmem:[#allocation2 + $0x76c] sm:$0xf] }
  0xec   :  { %1970 = vmatpush.bf16.msra.mxu1 %v2405_v59  ;;  %v3793_v59 = vsel %vm2089_vm0, %v3782_v21, %v2088_v38  ;;  %v2802_v30 = vld [vmem:[#allocation2 + $0x478] sm:$0xf0]  ;;  %v3205_v38 = vor.u32 %v3495_v22, %v3202_v23  ;;  %v3419_v9 = vld [vmem:[#allocation2 + $0x52c] sm:$0xf] }
  0xed   :  { %1983 = vmatpush.bf16.msra.mxu2 %v2533_v60  ;;  %v3503_v60 = vld [vmem:[#allocation2 + $0x7cc] sm:$0xf]  ;;  %v2065_v61 = vadd.f32 %v2064_v53, %v2063_v45  ;;  %v3058_v42 = vld [vmem:[#allocation2 + $0x678] sm:$0xf0] }
  0xee   :  { %1996 = vmatpush.bf16.msra.mxu3 %v2661_v0  ;;  %v2981_v0 = vor.u32 %v3439_v51, %v2978_v52  ;;  %v3237_v21 = vor.u32 %v3503_v60, %v3234_v33  ;;  %v3186_v45 = vld [vmem:[#allocation2 + $0x778] sm:$0xf0]  ;;  %v3423_v51 = vld [vmem:[#allocation2 + $0x54c] sm:$0xf] }
  0xef   :  { %1958 = vmatpush.bf16.msra.mxu0 %v2261_v10  ;;  %v2091_v8 = vmul.f32 %v3793_v59, %v2065_v61  ;;  %v3467_v10 = vld [vmem:[#allocation2 + $0x6ac] sm:$0xf]  ;;  %v2786_v50 = vld [vmem:[#allocation2 + $0x458] sm:$0xf0] }
  0xf0   :  { %1971 = vmatpush.bf16.msra.mxu1 %v2389_v14  ;;  %v2914_v56 = vld [vmem:[#allocation2 + $0x558] sm:$0xf0]  ;;  %v3487_v61 = vld [vmem:[#allocation2 + $0x74c] sm:$0xf] }
  0xf1   :  { %1984 = vmatpush.bf16.msra.mxu2 %v2517_v54  ;;  %v3800_v14 = vsub.f32 %v3785_v63, %v2091_v8  ;;  %v2837_v54 = vor.u32 %v3403_v2, %v2834_v3  ;;  %v3074_v63 = vld [vmem:[#allocation2 + $0x698] sm:$0xf0]  ;;  %v2917_v3 = vor.u32 %v3423_v51, %v2914_v56  ;;  %v3387_v8 = vld [vmem:[#allocation2 + $0x42c] sm:$0xf] }
  0xf2   :  { %1997 = vmatpush.bf16.msra.mxu3 %v2645_v20  ;;  %v3463_v20 = vld [vmem:[#allocation2 + $0x68c] sm:$0xf]  ;;  %v3042_v60 = vld [vmem:[#allocation2 + $0x658] sm:$0xf0] }
  0xf3   :  { %1959 = vmatpush.bf16.msra.mxu0 %v2245_v32  ;;  %v2099_v19 = vmul.f32 %v3800_v14, %v3800_v14  ;;  %v3805_v27 = vpop.f32.mrf.mxu0  ;;  %v3077_v29 = vor.u32 %v3463_v20, %v3074_v63  ;;  %v3427_v32 = vld [vmem:[#allocation2 + $0x56c] sm:$0xf]  ;;  %v3045_v4 = vor.u32 %v3455_v58, %v3042_v60  ;;  %v2754_v63 = vld [vmem:[#allocation2 + $0x418] sm:$0xf0] }
  0xf4   :  { %1972 = vmatpush.bf16.msra.mxu1 %v2373_v39  ;;  %v3807_v34 = vpop.f32.mrf.mxu1  ;;  %v2930_v39 = vld [vmem:[#allocation2 + $0x578] sm:$0xf0]  ;;  %v3415_v22 = vld [vmem:[#allocation2 + $0x50c] sm:$0xf] }
  0xf5   :  { %1985 = vmatpush.bf16.msra.mxu2 %v2501_v41  ;;  %v2103_v25 = vrot.slane %v2099_v19, 4  ;;  %v3459_v41 = vld [vmem:[#allocation2 + $0x66c] sm:$0xf]  ;;  %v2933_v48 = vor.u32 %v3427_v32, %v2930_v39  ;;  %v2882_v23 = vld [vmem:[#allocation2 + $0x518] sm:$0xf0] }
  0xf6   :  { %1998 = vmatpush.bf16.msra.mxu3 %v2629_v46  ;;  %1960 = vmatmul.bf16.vlgmr.msra.gmra.mxu0 %v3721_v5  ;;  %v3221_v5 = vor.u32 %v3499_v12, %v3218_v13  ;;  %v2898_v13 = vld [vmem:[#allocation2 + $0x538] sm:$0xf0] }
  0xf7   :  { %2004 = vmatpush.bf16.msrb.mxu0 %v2869_v47  ;;  %1973 = vmatmul.bf16.vlgmr.msra.gmra.mxu1 %v3725_v7  ;;  %v2821_v7 = vor.u32 %v3399_v16, %v2818_v17  ;;  %v2104_v37 = vadd.f32 %v2103_v25, %v2099_v19  ;;  %v2805_v47 = vor.u32 %v3395_v24, %v2802_v30  ;;  %v3154_v16 = vld [vmem:[#allocation2 + $0x738] sm:$0xf0]  ;;  %v353_v17 = vperm.slane %v3770_v44, 1 }
  0xf8   :  { %2017 = vmatpush.bf16.msrb.mxu1 %v2997_v26  ;;  %1986 = vmatmul.bf16.vlgmr.msra.gmra.mxu2 %v3709_v57  ;;  %v3093_v57 = vor.u32 %v3467_v10, %v3090_v11  ;;  %v3061_v26 = vor.u32 %v3459_v41, %v3058_v42  ;;  %v3010_v24 = vld [vmem:[#allocation2 + $0x618] sm:$0xf0]  ;;  %v2885_v41 = vor.u32 %v3415_v22, %v2882_v23 }
  0xf9   :  { %2030 = vmatpush.bf16.msrb.mxu2 %v3125_v49  ;;  %1999 = vmatmul.bf16.vlgmr.msra.gmra.mxu3 %v3723_v6  ;;  %v2946_v6 = vld [vmem:[#allocation2 + $0x598] sm:$0xf0]  ;;  %v2105_v46 = vrot.slane %v2104_v37, 2  ;;  %v3391_v49 = vld [vmem:[#allocation2 + $0x44c] sm:$0xf]  ;;  %v1754_v32 = vadd.f32 %v3805_v27, %v353_v17 }
  0xfa   :  { %2043 = vmatpush.bf16.msrb.mxu3 %v3253_v55  ;;  %v2949_v28 = vor.u32 %v3431_v18, %v2946_v6  ;;  %v3189_v55 = vor.u32 %v3491_v43, %v3186_v45  ;;  %v2901_v6 = vor.u32 %v3419_v9, %v2898_v13 }
  0xfb   :  { %2005 = vmatpush.bf16.msrb.mxu0 %v2853_v62  ;;  %v3809_v52 = vpop.f32.mrf.mxu2  ;;  %v2106_v53 = vadd.f32 %v2105_v46, %v2104_v37  ;;  %v3170_v62 = vld [vmem:[#allocation2 + $0x758] sm:$0xf0]  ;;  %v1755_v2 = vpop.f32.mrf.mxu0  ;;  %v3479_v37 = vld [vmem:[#allocation2 + $0x70c] sm:$0xf]  ;;  %v1767_v45 = vadd.f32 %v3807_v34, %v1754_v32 }
  0xfc   :  { %2018 = vmatpush.bf16.msrb.mxu1 %v2981_v0  ;;  %v3811_v33 = vpop.f32.mrf.mxu3  ;;  %v1768_v10 = vpop.f32.mrf.mxu1  ;;  %v3173_v12 = vor.u32 %v3487_v61, %v3170_v62 }
  0xfd   :  { %2031 = vmatpush.bf16.msrb.mxu2 %v3109_v1  ;;  %v2107_v0 = vrot.slane %v2106_v53, 1  ;;  %v2789_v1 = vor.u32 %v3391_v49, %v2786_v50  ;;  %v1780_v27 = vadd.f32 %v3809_v52, %v1767_v45  ;;  %v3823_v50 = vld [vmem:[#allocation7] sm:$0xf]  ;;  %v3825_v52 = vld [vmem:[#allocation8] sm:$0xf] }
  0xfe   :  { %2044 = vmatpush.bf16.msrb.mxu3 %v3237_v21  ;;  %v2770_v21 = vld [vmem:[#allocation2 + $0x438] sm:$0xf0]  ;;  %v2195_v58 = vperm.slane %v3825_v52, 0 }
  0xff   :  { %2006 = vmatpush.bf16.msrb.mxu0 %v2837_v54  ;;  %v2108_v11 = vadd.f32 %v2107_v0, %v2106_v53  ;;  %v3451_v54 = vld [vmem:[#allocation2 + $0x62c] sm:$0xf]  ;;  %v2773_v19 = vor.u32 %v3387_v8, %v2770_v21  ;;  %v1793_v34 = vadd.f32 %v3811_v33, %v1780_v27 }
 0x100   :  { %2019 = vmatpush.bf16.msrb.mxu1 %v2965_v15  ;;  %v3026_v15 = vld [vmem:[#allocation2 + $0x638] sm:$0xf0] }
 0x101   :  { %2032 = vmatpush.bf16.msrb.mxu2 %v3093_v57  ;;  %v3483_v57 = vld [vmem:[#allocation2 + $0x72c] sm:$0xf]  ;;  %v2127_v18 = vmul.f32 %v2108_v11, %v3793_v59  ;;  %v3029_v20 = vor.u32 %v3451_v54, %v3026_v15 }
 0x102   :  { %2045 = vmatpush.bf16.msrb.mxu3 %v3221_v5  ;;  %v3383_v5 = vld [vmem:[#allocation2 + $0x40c] sm:$0xf] }
 0x103   :  { %2007 = vmatpush.bf16.msrb.mxu0 %v2821_v7  ;;  %v1781_v25 = vpop.f32.mrf.mxu2  ;;  %v2131_v7 = vadd.f32 1e-05, %v2127_v18  ;;  %v2757_v39 = vor.u32 %v3383_v5, %v2754_v63 }
 0x104   :  { %2020 = vmatpush.bf16.msrb.mxu1 %v2949_v28  ;;  %v3157_v28 = vor.u32 %v3483_v57, %v3154_v16  ;;  %v1794_v30 = vpop.f32.mrf.mxu3 }
 0x105   :  { %2033 = vmatpush.bf16.msrb.mxu2 %v3077_v29  ;;  %v3447_v29 = vld [vmem:[#allocation2 + $0x60c] sm:$0xf]  ;;  %3520 = vrsqrt.f32 %v2131_v7  ;;  %vm2141_vm2 = vweird.f32 %v2131_v7 }
 0x106   :  { %2046 = vmatpush.bf16.msrb.mxu3 %v3205_v38  ;;  %v3138_v38 = vld [vmem:[#allocation2 + $0x718] sm:$0xf0]  ;;  %v3013_v42 = vor.u32 %v3447_v29, %v3010_v24 }
 0x107   :  { %2008 = vmatpush.bf16.msrb.mxu0 %v2805_v47  ;;  %v3141_v43 = vor.u32 %v3479_v37, %v3138_v38 }
 0x108   :  { %2021 = vmatpush.bf16.msrb.mxu1 %v2933_v48 }
 0x109   :  { %2034 = vmatpush.bf16.msrb.mxu2 %v3061_v26 }
 0x10a   :  { %2047 = vmatpush.bf16.msrb.mxu3 %v3189_v55 }
 0x10b   :  { %2009 = vmatpush.bf16.msrb.mxu0 %v2789_v1  ;;  %v3521_v46 = vpop.eup %3520 }
 0x10c   :  { %2022 = vmatpush.bf16.msrb.mxu1 %v2917_v3  ;;  %v2136_v47 = vmul.f32 %v3521_v46, %v2131_v7  ;;  %vm2142_vm1 = vweird.f32 %v3521_v46 }
 0x10d   :  { %2035 = vmatpush.bf16.msrb.mxu2 %v3045_v4  ;;  %vm2143_vm3 = vmor %vm2141_vm2, %vm2142_vm1 }
 0x10e   :  { %2048 = vmatpush.bf16.msrb.mxu3 %v3173_v12  ;;  %v2137_v48 = vmul.f32 %v3521_v46, %v2136_v47 }
 0x10f   :  { %2010 = vmatpush.bf16.msrb.mxu0 %v2773_v19 }
 0x110   :  { %2023 = vmatpush.bf16.msrb.mxu1 %v2901_v6  ;;  %v2138_v26 = vmul.f32 0.5, %v2137_v48 }
 0x111   :  { %2036 = vmatpush.bf16.msrb.mxu2 %v3029_v20 }
 0x112   :  { %2049 = vmatpush.bf16.msrb.mxu3 %v3157_v28  ;;  %v2139_v49 = vsub.f32 1.5, %v2138_v26  ;;  %v354_v28 = vperm.slane %v3770_v44, 2 }
 0x113   :  { %2011 = vmatpush.bf16.msrb.mxu0 %v2757_v39  ;;  %v1805_v51 = vpop.f32.mrf.mxu0 }
 0x114   :  { %2024 = vmatpush.bf16.msrb.mxu1 %v2885_v41  ;;  %v2140_v53 = vmul.f32 %v3521_v46, %v2139_v49  ;;  %v1818_v55 = vpop.f32.mrf.mxu1  ;;  %v2182_v49 = vperm.slane %v3823_v50, 1 }
 0x115   :  { %2037 = vmatpush.bf16.msrb.mxu2 %v3013_v42 }
 0x116   :  { %2050 = vmatpush.bf16.msrb.mxu3 %v3141_v43  ;;  %2012 = vmatmul.bf16.vlgmr.msrb.gmra.mxu0 %v3744_v35  ;;  %v1806_v35 = vadd.f32 %v1805_v51, %v1793_v34 }
 0x117   :  { %2025 = vmatmul.bf16.vlgmr.msrb.gmra.mxu1 %v3748_v40  ;;  %v2144_v40 = vsel %vm2143_vm3, %v3521_v46, %v2140_v53 }
 0x118   :  { %2038 = vmatmul.bf16.vlgmr.msrb.gmra.mxu2 %v3742_v31  ;;  %v2181_v31 = vperm.slane %v3823_v50, 0  ;;  %v1819_v56 = vadd.f32 %v1818_v55, %v1806_v35  ;;  %v2196_v55 = vperm.slane %v3825_v52, 1 }
 0x119   :  { %2051 = vmatmul.bf16.vlgmr.msrb.gmra.mxu3 %v3746_v36  ;;  %v2175_v36 = vmul.f32 %v2144_v40, %v3800_v14 }
 0x11b   :  { %v1831_v60 = vpop.f32.mrf.mxu2  ;;  %v2189_v33 = vmul.f32 %v2181_v31, %v2175_v36  ;;  %v1807_v2 = vpop.f32.mrf.mxu0 }
 0x11c   :  { %v1832_v61 = vadd.f32 %v1831_v60, %v1819_v56  ;;  %v1844_v62 = vpop.f32.mrf.mxu3  ;;  %v1820_v3 = vpop.f32.mrf.mxu1 }
 0x11d   :  { %v2203_v0 = vadd.f32 %v2195_v58, %v2189_v33 }
 0x11e   :  { %v1845_v1 = vadd.f32 %v1844_v62, %v1832_v61 }
 0x11f   :  { %2207 = vst [vmem:[#allocation10] sm:$0xff] %v2203_v0 }
 0x120   :  { %v2057_v4 = vmax.f32 %v1845_v1, 0.0 }
 0x122   :  { %v2066_v8 = vrot.slane %v2057_v4, 4 }
 0x123   :  { %v1833_v21 = vpop.f32.mrf.mxu2 }
 0x124   :  { %v2067_v9 = vadd.f32 %v2066_v8, %v2057_v4  ;;  %v1846_v10 = vpop.f32.mrf.mxu3 }
 0x126   :  { %v2068_v11 = vrot.slane %v2067_v9, 2 }
 0x128   :  { %v2069_v12 = vadd.f32 %v2068_v11, %v2067_v9 }
 0x12a   :  { %v2070_v13 = vrot.slane %v2069_v12, 1 }
 0x12c   :  { %v2071_v14 = vadd.f32 %v2070_v13, %v2069_v12 }
 0x12e   :  { %v2092_v54 = vmul.f32 %v3793_v59, %v2071_v14 }
 0x130   :  { %v2096_v15 = vsub.f32 %v2057_v4, %v2092_v54 }
 0x132   :  { %v2100_v57 = vmul.f32 %v2096_v15, %v2096_v15 }
 0x133   :  { %v1857_v17 = vpop.f32.mrf.mxu0 }
 0x134   :  { %v2109_v16 = vrot.slane %v2100_v57, 4  ;;  %v1870_v18 = vpop.f32.mrf.mxu1  ;;  %v1858_v37 = vadd.f32 %v1857_v17, %v354_v28 }
 0x136   :  { %v2110_v19 = vadd.f32 %v2109_v16, %v2100_v57  ;;  %v1871_v38 = vadd.f32 %v1870_v18, %v1858_v37 }
 0x138   :  { %v2111_v5 = vrot.slane %v2110_v19, 2 }
 0x13a   :  { %v2112_v20 = vadd.f32 %v2111_v5, %v2110_v19 }
 0x13b   :  { %v1883_v6 = vpop.f32.mrf.mxu2  ;;  %v1859_v23 = vpop.f32.mrf.mxu0 }
 0x13c   :  { %v1896_v63 = vpop.f32.mrf.mxu3  ;;  %v2113_v22 = vrot.slane %v2112_v20, 1  ;;  %v1872_v25 = vpop.f32.mrf.mxu1  ;;  %v1884_v42 = vadd.f32 %v1883_v6, %v1871_v38 }
 0x13e   :  { %v2114_v7 = vadd.f32 %v2113_v22, %v2112_v20  ;;  %v1897_v46 = vadd.f32 %v1896_v63, %v1884_v42  ;;  %v355_v22 = vperm.slane %v3770_v44, 3  ;;  %v2183_v44 = vperm.slane %v3823_v50, 2 }
 0x140   :  { %v2128_v29 = vmul.f32 %v2114_v7, %v3793_v59 }
 0x142   :  { %v2132_v30 = vadd.f32 1e-05, %v2128_v29 }
 0x143   :  { %v1885_v24 = vpop.f32.mrf.mxu2 }
 0x144   :  { %v1898_v32 = vpop.f32.mrf.mxu3  ;;  %3522 = vrsqrt.f32 %v2132_v30  ;;  %vm2151_vm5 = vweird.f32 %v2132_v30 }
 0x14a   :  { %v3523_v39 = vpop.eup %3522 }
 0x14b   :  { %v2146_v41 = vmul.f32 %v3523_v39, %v2132_v30  ;;  %vm2152_vm4 = vweird.f32 %v3523_v39 }
 0x14c   :  { %vm2153_vm6 = vmor %vm2151_vm5, %vm2152_vm4 }
 0x14d   :  { %v2147_v43 = vmul.f32 %v3523_v39, %v2146_v41 }
 0x14f   :  { %v2148_v45 = vmul.f32 0.5, %v2147_v43 }
 0x151   :  { %v2149_v47 = vsub.f32 1.5, %v2148_v45 }
 0x153   :  { %v1909_v27 = vpop.f32.mrf.mxu0  ;;  %v2150_v48 = vmul.f32 %v3523_v39, %v2149_v47 }
 0x154   :  { %v1910_v26 = vadd.f32 %v1909_v27, %v1897_v46  ;;  %v1922_v34 = vpop.f32.mrf.mxu1 }
 0x155   :  { %v2154_v51 = vsel %vm2153_vm6, %v3523_v39, %v2150_v48  ;;  %v2197_v48 = vperm.slane %v3825_v52, 2 }
 0x156   :  { %v1923_v53 = vadd.f32 %v1922_v34, %v1910_v26  ;;  %v2176_v35 = vmul.f32 %v2154_v51, %v2096_v15 }
 0x158   :  { %v2190_v40 = vmul.f32 %v2182_v49, %v2176_v35 }
 0x15a   :  { %v2204_v58 = vadd.f32 %v2196_v55, %v2190_v40 }
 0x15b   :  { %v1935_v31 = vpop.f32.mrf.mxu2  ;;  %v1911_v33 = vpop.f32.mrf.mxu0 }
 0x15c   :  { %v1936_v56 = vadd.f32 %v1935_v31, %v1923_v53  ;;  %v1948_v36 = vpop.f32.mrf.mxu3  ;;  %v1924_v61 = vpop.f32.mrf.mxu1  ;;  %2208 = vst [vmem:[#allocation10 + $0x8] sm:$0xff] %v2204_v58 }
 0x15e   :  { %v1949_v60 = vadd.f32 %v1948_v36, %v1936_v56 }
 0x160   :  { %v2058_v62 = vmax.f32 %v1949_v60, 0.0 }
 0x162   :  { %v2072_v0 = vrot.slane %v2058_v62, 4 }
 0x163   :  { %v1937_v1 = vpop.f32.mrf.mxu2 }
 0x164   :  { %v2073_v2 = vadd.f32 %v2072_v0, %v2058_v62  ;;  %v1950_v3 = vpop.f32.mrf.mxu3 }
 0x166   :  { %v2074_v4 = vrot.slane %v2073_v2, 2 }
 0x168   :  { %v2075_v8 = vadd.f32 %v2074_v4, %v2073_v2 }
 0x16a   :  { %v2076_v21 = vrot.slane %v2075_v8, 1 }
 0x16c   :  { %v2077_v9 = vadd.f32 %v2076_v21, %v2075_v8 }
 0x16e   :  { %v2093_v10 = vmul.f32 %v3793_v59, %v2077_v9 }
 0x170   :  { %v2097_v11 = vsub.f32 %v2058_v62, %v2093_v10 }
 0x172   :  { %v2101_v12 = vmul.f32 %v2097_v11, %v2097_v11 }
 0x173   :  { %v1961_v14 = vpop.f32.mrf.mxu0 }
 0x174   :  { %v2115_v13 = vrot.slane %v2101_v12, 4  ;;  %v1974_v54 = vpop.f32.mrf.mxu1  ;;  %v1962_v28 = vadd.f32 %v1961_v14, %v355_v22 }
 0x176   :  { %v2116_v15 = vadd.f32 %v2115_v13, %v2101_v12  ;;  %v1975_v29 = vadd.f32 %v1974_v54, %v1962_v28 }
 0x178   :  { %v2117_v57 = vrot.slane %v2116_v15, 2 }
 0x17a   :  { %v2118_v17 = vadd.f32 %v2117_v57, %v2116_v15 }
 0x17b   :  { %v1987_v16 = vpop.f32.mrf.mxu2  ;;  %v1963_v5 = vpop.f32.mrf.mxu0 }
 0x17c   :  { %v2000_v18 = vpop.f32.mrf.mxu3  ;;  %v2119_v19 = vrot.slane %v2118_v17, 1  ;;  %v1976_v6 = vpop.f32.mrf.mxu1  ;;  %v1988_v32 = vadd.f32 %v1987_v16, %v1975_v29 }
 0x17e   :  { %v2120_v20 = vadd.f32 %v2119_v19, %v2118_v17  ;;  %v2001_v39 = vadd.f32 %v2000_v18, %v1988_v32  ;;  %v2184_v19 = vperm.slane %v3823_v50, 3 }
 0x180   :  { %v2129_v63 = vmul.f32 %v2120_v20, %v3793_v59  ;;  %v2198_v20 = vperm.slane %v3825_v52, 3 }
 0x182   :  { %v2133_v25 = vadd.f32 1e-05, %v2129_v63 }
 0x183   :  { %v1989_v23 = vpop.f32.mrf.mxu2 }
 0x184   :  { %v2002_v7 = vpop.f32.mrf.mxu3  ;;  %3524 = vrsqrt.f32 %v2133_v25  ;;  %vm2161_vm8 = vweird.f32 %v2133_v25 }
 0x18a   :  { %v3525_v24 = vpop.eup %3524 }
 0x18b   :  { %v2156_v30 = vmul.f32 %v3525_v24, %v2133_v25  ;;  %vm2162_vm7 = vweird.f32 %v3525_v24 }
 0x18c   :  { %vm2163_vm9 = vmor %vm2161_vm8, %vm2162_vm7 }
 0x18d   :  { %v2157_v37 = vmul.f32 %v3525_v24, %v2156_v30 }
 0x18f   :  { %v2158_v38 = vmul.f32 0.5, %v2157_v37 }
 0x191   :  { %v2159_v42 = vsub.f32 1.5, %v2158_v38 }
 0x193   :  { %v2013_v41 = vpop.f32.mrf.mxu0  ;;  %v2160_v46 = vmul.f32 %v3525_v24, %v2159_v42 }
 0x194   :  { %v2026_v43 = vpop.f32.mrf.mxu1  ;;  %v2014_v45 = vadd.f32 %v2013_v41, %v2001_v39 }
 0x195   :  { %v2164_v47 = vsel %vm2163_vm9, %v3525_v24, %v2160_v46 }
 0x196   :  { %v2177_v27 = vmul.f32 %v2164_v47, %v2097_v11  ;;  %v2027_v26 = vadd.f32 %v2026_v43, %v2014_v45 }
 0x198   :  { %v2191_v49 = vmul.f32 %v2183_v44, %v2177_v27 }
 0x19a   :  { %v2205_v31 = vadd.f32 %v2197_v48, %v2191_v49 }
 0x19b   :  { %v2039_v34 = vpop.f32.mrf.mxu2  ;;  %v2015_v35 = vpop.f32.mrf.mxu0 }
 0x19c   :  { %v2040_v51 = vadd.f32 %v2039_v34, %v2027_v26  ;;  %v2052_v53 = vpop.f32.mrf.mxu3  ;;  %v2028_v55 = vpop.f32.mrf.mxu1  ;;  %2209 = vst [vmem:[#allocation10 + $0x10] sm:$0xff] %v2205_v31 }
 0x19e   :  { %v2053_v40 = vadd.f32 %v2052_v53, %v2040_v51 }
 0x1a0   :  { %v2059_v56 = vmax.f32 %v2053_v40, 0.0 }
 0x1a2   :  { %v2078_v36 = vrot.slane %v2059_v56, 4 }
 0x1a3   :  { %v2041_v58 = vpop.f32.mrf.mxu2 }
 0x1a4   :  { %v2079_v60 = vadd.f32 %v2078_v36, %v2059_v56  ;;  %v2054_v33 = vpop.f32.mrf.mxu3 }
 0x1a6   :  { %v2080_v61 = vrot.slane %v2079_v60, 2 }
 0x1a8   :  { %v2081_v62 = vadd.f32 %v2080_v61, %v2079_v60 }
 0x1aa   :  { %v2082_v0 = vrot.slane %v2081_v62, 1 }
 0x1ac   :  { %v2083_v1 = vadd.f32 %v2082_v0, %v2081_v62 }
 0x1ae   :  { %v2094_v2 = vmul.f32 %v3793_v59, %v2083_v1 }
 0x1b0   :  { %v2098_v3 = vsub.f32 %v2059_v56, %v2094_v2 }
 0x1b2   :  { %v2102_v4 = vmul.f32 %v2098_v3, %v2098_v3 }
 0x1b4   :  { %v2121_v8 = vrot.slane %v2102_v4, 4 }
 0x1b6   :  { %v2122_v21 = vadd.f32 %v2121_v8, %v2102_v4 }
 0x1b8   :  { %v2123_v9 = vrot.slane %v2122_v21, 2 }
 0x1ba   :  { %v2124_v10 = vadd.f32 %v2123_v9, %v2122_v21 }
 0x1bc   :  { %v2125_v11 = vrot.slane %v2124_v10, 1 }
 0x1be   :  { %v2126_v12 = vadd.f32 %v2125_v11, %v2124_v10 }
 0x1c0   :  { %v2130_v13 = vmul.f32 %v2126_v12, %v3793_v59 }
 0x1c2   :  { %v2134_v14 = vadd.f32 1e-05, %v2130_v13 }
 0x1c4   :  { %3526 = vrsqrt.f32 %v2134_v14  ;;  %vm2171_vm11 = vweird.f32 %v2134_v14 }
 0x1ca   :  { %v3527_v54 = vpop.eup %3526 }
 0x1cb   :  { %v2166_v15 = vmul.f32 %v3527_v54, %v2134_v14  ;;  %vm2172_vm10 = vweird.f32 %v3527_v54 }
 0x1cc   :  { %vm2173_vm12 = vmor %vm2171_vm11, %vm2172_vm10 }
 0x1cd   :  { %v2167_v57 = vmul.f32 %v3527_v54, %v2166_v15 }
 0x1cf   :  { %v2168_v16 = vmul.f32 0.5, %v2167_v57 }
 0x1d1   :  { %v2169_v17 = vsub.f32 1.5, %v2168_v16 }
 0x1d3   :  { %v2170_v18 = vmul.f32 %v3527_v54, %v2169_v17 }
 0x1d5   :  { %v2174_v5 = vsel %vm2173_vm12, %v3527_v54, %v2170_v18 }
 0x1d6   :  { %v2178_v6 = vmul.f32 %v2174_v5, %v2098_v3 }
 0x1d8   :  { %v2192_v59 = vmul.f32 %v2184_v19, %v2178_v6 }
 0x1da   :  { %v2206_v63 = vadd.f32 %v2198_v20, %v2192_v59 }
 0x1dc   :  { %2210 = vst [vmem:[#allocation10 + $0x18] sm:$0xff] %v2206_v63 }
 0x1dd   :  { %2221 = dma.vmem_to_hbm [thread:$0]  %s2217_s27, 512, %s2219_s30, [#allocation4]  }
 0x1de   :  { %3654 = dma.done.wait [#allocation4], 512  }
 0x1df   :  { %3655 = vsyncadd [#allocation4], 4294966784 }
 0x1e0   :  { %2226 = vsyncpa [#allocation3], 1 }
 0x1e1   :  { %2227 = vsyncpa [#allocation6], 1 }
 0x1e2   :  { %2228 = vsyncpa [#allocation9], 1 }
 0x1e3   :  { %2229 = vsyncpa [#allocation4], 1 }

// kernel: modified_classifier.2
= control target key start
LH: loop header
LB: loop body
LE: loop exit
PB: predicated region body
PF: predicated region fallthrough
CT: control target
= control target key end

     0   :  { %s16797_s0 = inlined_call_operand.vmem [shape: bf16[8,8192], index: 0, kind: input, shape index: {}]   ;;  %s16798_s1 = inlined_call_operand.hbm [shape: bf16[8192,1024], index: 1, kind: input, shape index: {}]   ;;  %s16799_s2 = inlined_call_operand.hbm [shape: f32[1,1024], index: 2, kind: input, shape index: {}]   ;;  %s16800_s3 = inlined_call_operand.hbm [shape: f32[1,1024], index: 3, kind: input, shape index: {}]   ;;  %s16801_s4 = inlined_call_operand.hbm [shape: f32[1,1024], index: 4, kind: input, shape index: {}]   ;;  %s16802_s5 = inlined_call_operand.vmem [shape: f32[8,1024], index: 5, kind: output, shape index: {}]  }
   0x1   :  { %16832 = sst [smem:[#allocation42_spill]] %s16798_s1 }
   0x2   :  { %16833 = sst [smem:[#allocation43_spill]] %s16799_s2 }
   0x3   :  { %10 = vsyncpa [#allocation3], 0 }
   0x4   :  { %12 = vsyncpa [#allocation3 + $0x1], 0 }
   0x5   :  { %13 = vsyncpa [#allocation5], 0 }
   0x6   :  { %15 = vsyncpa [#allocation5 + $0x1], 0 }
   0x7   :  { %16 = vsyncpa [#allocation8], 0 }
   0x8   :  { %18 = vsyncpa [#allocation8 + $0x1], 0  ;;  %s14060_s18 = smov 0   ;;  %s14062_s19 = smov 0  }
   0x9   :  { %s14064_s20 = smov 0   ;;  %s14066_s21 = smov 0  }
   0xa LB: > { %s14079_s22 = sadd.s32 4294967295, %s14024_s21   ;;  %s14082_s23 = sadd.s32 1, %s14024_s21   ;;  %s14024_s21 = sphi %s14066_s21, %s16903_s21   ;;  %s14020_s20 = sphi %s14064_s20, %s16902_s20   ;;  %s14016_s19 = sphi %s14062_s19, %s16901_s19   ;;  %s14012_s18 = sphi %s14060_s18, %s16900_s18  }
   0xb   : > { %s49_s24 = ssub.s32 %s14024_s21, %s14082_s23  ;;  %s52_s25 = sadd.s32 1, %s14020_s20 }
   0xc   : > { %p50_p0 = scmp.eq.s32.totalorder %s49_s24, 0  ;;  %p59_p1 = scmp.ne.s32.totalorder %s14020_s20, %s14016_s19 }
   0xd   : > { %p60_p2 = scmp.eq.s32.totalorder %s14024_s21, 0  ;;  %p65_p3 = scmp.ne.s32.totalorder %s14016_s19, %s14012_s18 }
   0xe   : > { %s14092_s26 = scalar_select %p50_p0, %s14020_s20, %s52_s25  }
   0xf   : > { %p61_p4 = por %p60_p2, %p59_p1  ;;  %p66_p5 = scmp.eq.s32.totalorder %s14079_s22, 0 }
  0x10   : > { %16834 = sst [smem:[#allocation12_spill]] %s14092_s26  ;;  %p13816_p6 = scmp.lt.s32.totalorder %s14024_s21, 4 }
  0x11   : > { %p14096_p7 = por %p66_p5, %p65_p3  ;;  %s14101_s28 = sand.u32 1, %s14020_s20  }
  0x12   : > { %p14103_p8 = pnand %p13816_p6, %p61_p4  ;;  %s218_s30 = sand.u32 1, %s14024_s21  }
  0x13   : > { %s14109_s6 = sshll.u32 %s14101_s28, 1  ;;  %s14112_s7 = sshll.u32 %s14024_s21, 1 }
  0x14   : > { %s222_s8 = scalar_lea.vmem [#allocation4], %s14109_s6  ;;  %s16837_s2 = sld [smem:[#allocation43_spill]] }
  0x15   : > { %s230_s9 = sshll.u32 %s222_s8, 4  ;;  %p8665_p9 = scmp.ge.s32.totalorder %s14024_s21, 1  ;;  %s231_s9 = int_to_ptr.vmem [resolvable:$true] %s230_s9 }
  0x16   : > { %p273_p10 = scmp.lt.s32.totalorder %s14024_s21, 5  ;;  %s14121_s14 = scalar_lea.sflag [#allocation5], %s218_s30 }
  0x17   : > { %p13866_p12 = pneg %p14103_p8 }
  0x1a   : > { %s226_s12 = scalar_lea.hbm %s16837_s2, %s14112_s7  ;;  %s13869_s24 = scalar_lea.hbm %s16837_s2, 8 }
  0x1b   : > { %s228_s13 = sshll.u32 %s226_s12, 4  ;;  %s229_s13 = int_to_ptr.hbm [resolvable:$true] %s228_s13 }
  0x1c   : > { %s13862_s15 = sshra.s32 %s229_s13, 4  ;;  %s13863_s15 = int_to_ptr.hbm [resolvable:$true] %s13862_s15 }
  0x1d   : > { %s13864_s16 = scalar_lea.hbm %s13863_s15, 2  ;;  %p13870_p1 = scmp.lt.s32.totalorder %s13863_s15, %s16837_s2 }
  0x1e   : > { %p13865_p11 = scmp.ne.s32.totalorder %s13863_s15, %s13864_s16  ;;  %p13871_p2 = scmp.lt.s32.totalorder %s13869_s24, %s13864_s16 }
  0x20   : > { %p13867_p13 = pnand %p13866_p12, %p13865_p11  ;;  %p13872_p3 = por %p13871_p2, %p13870_p1 }
  0x22   : > { %p13868_p0 = pneg %p13867_p13 }
  0x24   : > { %p13873_p4 = pnand %p13872_p3, %p13868_p0 }
  0x26   : > { %13876 = shalt.err (!%p13873_p4)
}
  0x27   : > { %13809 = dma.hbm_to_vmem [thread:$0]  (!%p14103_p8), %s229_s13, 32, %s231_s9, %s14121_s14  }
  0x28   : > { %p14141_p5 = pnand %p8665_p9, %p273_p10  ;;  %s8656_s10 = sshll.u32 %s14101_s28, 13 }
  0x29   : > { %s12770_s11 = sshll.u32 %s14024_s21, 3  ;;  %s16839_s1 = sld [smem:[#allocation42_spill]] }
  0x2a   : > { %s200_s18 = scalar_lea.vmem [#allocation2], %s8656_s10  ;;  %s197_s25 = scalar_lea.sflag [#allocation3], %s14101_s28 }
  0x2b   : > { %s208_s24 = sshll.u32 %s200_s18, 4  ;;  %s209_s24 = int_to_ptr.vmem [resolvable:$true] %s208_s24 }
  0x2f   : > { %s205_s16 = scalar_lea.hbm %s16839_s1, %s12770_s11  ;;  %s13899_s2 = scalar_lea.hbm %s16839_s1, 32768 }
  0x30   : > { %s206_s17 = sshll.u32 %s205_s16, 4  ;;  %s207_s17 = int_to_ptr.hbm [resolvable:$true] %s206_s17 }
  0x31   : > { %s13892_s8 = sshra.s32 %s207_s17, 4  ;;  %s13893_s8 = int_to_ptr.hbm [resolvable:$true] %s13892_s8 }
  0x32   : > { %s13894_s9 = scalar_lea.hbm %s13893_s8, 8192  ;;  %p13900_p11 = scmp.lt.s32.totalorder %s13893_s8, %s16839_s1 }
  0x33   : > { %p13895_p6 = scmp.ne.s32.totalorder %s13893_s8, %s13894_s9  ;;  %p13901_p13 = scmp.lt.s32.totalorder %s13899_s2, %s13894_s9 }
  0x35   : > { %p13897_p9 = pnand %p13895_p6, %p13866_p12  ;;  %p13902_p0 = por %p13901_p13, %p13900_p11 }
  0x37   : > { %p13898_p10 = pneg %p13897_p9 }
  0x39   : > { %p13903_p1 = pnand %p13902_p0, %p13898_p10 }
  0x3b   : > { %13906 = shalt.err (!%p13903_p1)
}
  0x3c   : > { %s14026_s10 = smov 512   ;;  %s14027_s15 = smov 128  }
  0x3d   : > { %s14028_s16 = smov 8   ;;  %s245_s21 = scalar_lea.hbm %s16800_s3, %s14112_s7 }
  0x3e   : > { %13806 = dma.hbm_to_vmem [thread:$0]  (!%p14103_p8), %s207_s17, 131072, %s209_s24, %s197_s25, %s14026_s10, %s14027_s15, %s14028_s16  }
  0x3f   : > { %s241_s26 = scalar_lea.vmem [#allocation6], %s14109_s6  ;;  %s247_s8 = sshll.u32 %s245_s21, 4  ;;  %s248_s8 = int_to_ptr.hbm [resolvable:$true] %s247_s8 }
  0x40   : > { %s249_s12 = sshll.u32 %s241_s26, 4  ;;  %s13922_s2 = sshra.s32 %s248_s8, 4  ;;  %s250_s12 = int_to_ptr.vmem [resolvable:$true] %s249_s12  ;;  %s13923_s2 = int_to_ptr.hbm [resolvable:$true] %s13922_s2 }
  0x41   : > { %s13924_s9 = scalar_lea.hbm %s13923_s2, 2  ;;  %s13929_s17 = scalar_lea.hbm %s16800_s3, 8 }
  0x42   : > { %p13925_p2 = scmp.ne.s32.totalorder %s13923_s2, %s13924_s9  ;;  %p13930_p6 = scmp.lt.s32.totalorder %s13923_s2, %s16800_s3 }
  0x43   : > { %p13931_p9 = scmp.lt.s32.totalorder %s13929_s17, %s13924_s9 }
  0x44   : > { %p13927_p3 = pnand %p13925_p2, %p13866_p12 }
  0x45   : > { %p13932_p10 = por %p13931_p9, %p13930_p6 }
  0x46   : > { %p13928_p4 = pneg %p13927_p3 }
  0x48   : > { %p13933_p11 = pnand %p13932_p10, %p13928_p4 }
  0x4a   : > { %13936 = shalt.err (!%p13933_p11)
}
  0x4b   : > { %13812 = dma.hbm_to_vmem [thread:$0]  (!%p14103_p8), %s248_s8, 32, %s250_s12, %s14121_s14  }
  0x4c   : > { %s264_s1 = scalar_lea.hbm %s16801_s4, %s14112_s7  ;;  %s260_s16 = scalar_lea.vmem [#allocation7], %s14109_s6 }
  0x4d   : > { %s266_s15 = sshll.u32 %s264_s1, 4  ;;  %s268_s18 = sshll.u32 %s260_s16, 4  ;;  %s267_s15 = int_to_ptr.hbm [resolvable:$true] %s266_s15  ;;  %s269_s18 = int_to_ptr.vmem [resolvable:$true] %s268_s18 }
  0x4e   : > { %s257_s13 = scalar_lea.sflag [#allocation8], %s14101_s28  ;;  %s13952_s21 = sshra.s32 %s267_s15, 4  ;;  %s13953_s21 = int_to_ptr.hbm [resolvable:$true] %s13952_s21 }
  0x4f   : > { %s13954_s2 = scalar_lea.hbm %s13953_s21, 2  ;;  %s13959_s12 = scalar_lea.hbm %s16801_s4, 8 }
  0x50   : > { %p13955_p13 = scmp.ne.s32.totalorder %s13953_s21, %s13954_s2  ;;  %p13960_p2 = scmp.lt.s32.totalorder %s13953_s21, %s16801_s4 }
  0x51   : > { %p13961_p3 = scmp.lt.s32.totalorder %s13959_s12, %s13954_s2 }
  0x52   : > { %p13957_p0 = pnand %p13955_p13, %p13866_p12 }
  0x53   : > { %p13962_p4 = por %p13961_p3, %p13960_p2 }
  0x54   : > { %p13958_p1 = pneg %p13957_p0 }
  0x56   : > { %p13963_p6 = pnand %p13962_p4, %p13958_p1 }
  0x58   : > { %13966 = shalt.err (!%p13963_p6)
}
  0x59   : > { %13815 = dma.hbm_to_vmem [thread:$0]  (!%p14103_p8), %s267_s15, 32, %s269_s18, %s257_s13  }
  0x5a   : > { %277 = sbr.rel (%p14141_p5) target bundleno = 1330 (0x532), region = 40 }
  0x5f   : > { %s279_s28 = sand.u32 1, %s14016_s19  }
  0x60   : > { %s8666_s6 = sshll.u32 %s279_s28, 13  ;;  %s280_s11 = scalar_lea.sflag [#allocation3], %s279_s28 }
  0x61   : > { %s14199_s17 = scalar_lea.vmem [#allocation2], %s8666_s6 }
  0x62   : > { %13999 = dma.done.wait (%p14096_p7), %s280_s11, 131072  }
  0x63   : > { %14001 = vsyncadd (%p14096_p7), %s280_s11, 4294836224  ;;  %s289_s24 = sand.u32 1, %s14079_s22   ;;  %s14206_s29 = sshll.u32 %s279_s28, 1 }
  0x64   : > { %s290_s30 = scalar_lea.sflag [#allocation5], %s289_s24  ;;  %s293_s25 = scalar_lea.vmem [#allocation4], %s14206_s29 }
  0x65   : > { %14003 = dma.done.wait (%p14096_p7), %s290_s30, 64  }
  0x66   : > { %14005 = vsyncadd (%p14096_p7), %s290_s30, 4294967232  ;;  %s303_s26 = scalar_lea.vmem [#allocation6], %s14206_s29  ;;  %s310_s10 = scalar_lea.sflag [#allocation8], %s279_s28 }
  0x67   : > { %s313_s1 = scalar_lea.vmem [#allocation7], %s14206_s29 }
  0x68   : > { %14007 = dma.done.wait (%p14096_p7), %s310_s10, 32  }
  0x69   : > { %14009 = vsyncadd (%p14096_p7), %s310_s10, 4294967264  ;;  %v8730_v0 = vld [vmem:[%s14199_s17 + $0x70] sm:$0xf]  ;;  %v12786_v1 = vld [vmem:[%s14199_s17 + $0x74] sm:$0xf0] }
  0x6a   : > { %v8794_v2 = vld [vmem:[%s14199_s17 + $0xf0] sm:$0xf]  ;;  %v8731_v3 = vor.u32 %v12786_v1, %v8730_v0  ;;  %v12802_v4 = vld [vmem:[%s14199_s17 + $0xf4] sm:$0xf0]  ;;  %v8722_v11 = vld [vmem:[%s14199_s17 + $0x60] sm:$0xf] }
  0x6b   : > { %v8858_v5 = vld [vmem:[%s14199_s17 + $0x170] sm:$0xf]  ;;  %v12818_v6 = vld [vmem:[%s14199_s17 + $0x174] sm:$0xf0]  ;;  %v8795_v7 = vor.u32 %v12802_v4, %v8794_v2  ;;  %v12784_v13 = vld [vmem:[%s14199_s17 + $0x64] sm:$0xf0] }
  0x6c   : > { %v8859_v8 = vor.u32 %v12818_v6, %v8858_v5  ;;  %v8922_v9 = vld [vmem:[%s14199_s17 + $0x1f0] sm:$0xf]  ;;  %v12834_v10 = vld [vmem:[%s14199_s17 + $0x1f4] sm:$0xf0]  ;;  %6772 = vmatpush.bf16.msra.mxu0 %v8731_v3  ;;  %v8786_v14 = vld [vmem:[%s14199_s17 + $0xe0] sm:$0xf]  ;;  %v8723_v16 = vor.u32 %v12784_v13, %v8722_v11 }
  0x6d   : > { %v8923_v12 = vor.u32 %v12834_v10, %v8922_v9  ;;  %v12800_v15 = vld [vmem:[%s14199_s17 + $0xe4] sm:$0xf0]  ;;  %6785 = vmatpush.bf16.msra.mxu1 %v8795_v7  ;;  %v8850_v18 = vld [vmem:[%s14199_s17 + $0x160] sm:$0xf]  ;;  %v8714_v23 = vld [vmem:[%s14199_s17 + $0x50] sm:$0xf] }
  0x6e   : > { %6798 = vmatpush.bf16.msra.mxu2 %v8859_v8  ;;  %v8787_v17 = vor.u32 %v12800_v15, %v8786_v14  ;;  %v12816_v19 = vld [vmem:[%s14199_s17 + $0x164] sm:$0xf0]  ;;  %v8914_v20 = vld [vmem:[%s14199_s17 + $0x1e0] sm:$0xf]  ;;  %v12782_v24 = vld [vmem:[%s14199_s17 + $0x54] sm:$0xf0] }
  0x6f   : > { %6811 = vmatpush.bf16.msra.mxu3 %v8923_v12  ;;  %v8851_v21 = vor.u32 %v12816_v19, %v8850_v18  ;;  %v12832_v22 = vld [vmem:[%s14199_s17 + $0x1e4] sm:$0xf0]  ;;  %v8778_v26 = vld [vmem:[%s14199_s17 + $0xd0] sm:$0xf]  ;;  %v12798_v27 = vld [vmem:[%s14199_s17 + $0xd4] sm:$0xf0]  ;;  %v8715_v29 = vor.u32 %v12782_v24, %v8714_v23 }
  0x70   : > { %v8915_v25 = vor.u32 %v12832_v22, %v8914_v20  ;;  %v8842_v28 = vld [vmem:[%s14199_s17 + $0x150] sm:$0xf]  ;;  %6773 = vmatpush.bf16.msra.mxu0 %v8723_v16  ;;  %v12814_v30 = vld [vmem:[%s14199_s17 + $0x154] sm:$0xf0]  ;;  %v8779_v33 = vor.u32 %v12798_v27, %v8778_v26  ;;  %v8706_v35 = vld [vmem:[%s14199_s17 + $0x40] sm:$0xf] }
  0x71   : > { %v8906_v31 = vld [vmem:[%s14199_s17 + $0x1d0] sm:$0xf]  ;;  %v12830_v32 = vld [vmem:[%s14199_s17 + $0x1d4] sm:$0xf0]  ;;  %6786 = vmatpush.bf16.msra.mxu1 %v8787_v17  ;;  %v8843_v34 = vor.u32 %v12814_v30, %v8842_v28  ;;  %v12780_v36 = vld [vmem:[%s14199_s17 + $0x44] sm:$0xf0] }
  0x72   : > { %6799 = vmatpush.bf16.msra.mxu2 %v8851_v21  ;;  %v8770_v37 = vld [vmem:[%s14199_s17 + $0xc0] sm:$0xf]  ;;  %v8907_v38 = vor.u32 %v12830_v32, %v8906_v31  ;;  %v12796_v39 = vld [vmem:[%s14199_s17 + $0xc4] sm:$0xf0]  ;;  %v8707_v44 = vor.u32 %v12780_v36, %v8706_v35  ;;  %v8698_v47 = vld [vmem:[%s14199_s17 + $0x30] sm:$0xf] }
  0x73   : > { %6812 = vmatpush.bf16.msra.mxu3 %v8915_v25  ;;  %v8834_v40 = vld [vmem:[%s14199_s17 + $0x140] sm:$0xf]  ;;  %v12812_v41 = vld [vmem:[%s14199_s17 + $0x144] sm:$0xf0]  ;;  %v8771_v45 = vor.u32 %v12796_v39, %v8770_v37  ;;  %v12778_v48 = vld [vmem:[%s14199_s17 + $0x34] sm:$0xf0] }
  0x74   : > { %v8898_v42 = vld [vmem:[%s14199_s17 + $0x1c0] sm:$0xf]  ;;  %v12828_v43 = vld [vmem:[%s14199_s17 + $0x1c4] sm:$0xf0]  ;;  %6774 = vmatpush.bf16.msra.mxu0 %v8715_v29  ;;  %v8835_v46 = vor.u32 %v12812_v41, %v8834_v40  ;;  %v8762_v49 = vld [vmem:[%s14199_s17 + $0xb0] sm:$0xf]  ;;  %v8699_v56 = vor.u32 %v12778_v48, %v8698_v47 }
  0x75   : > { %6787 = vmatpush.bf16.msra.mxu1 %v8779_v33  ;;  %v8899_v50 = vor.u32 %v12828_v43, %v8898_v42  ;;  %v12794_v51 = vld [vmem:[%s14199_s17 + $0xb4] sm:$0xf0]  ;;  %v8826_v52 = vld [vmem:[%s14199_s17 + $0x130] sm:$0xf]  ;;  %v8690_v59 = vld [vmem:[%s14199_s17 + $0x20] sm:$0xf] }
  0x76   : > { %6800 = vmatpush.bf16.msra.mxu2 %v8843_v34  ;;  %v12810_v53 = vld [vmem:[%s14199_s17 + $0x134] sm:$0xf0]  ;;  %v8890_v54 = vld [vmem:[%s14199_s17 + $0x1b0] sm:$0xf]  ;;  %v8763_v57 = vor.u32 %v12794_v51, %v8762_v49  ;;  %v12776_v60 = vld [vmem:[%s14199_s17 + $0x24] sm:$0xf0] }
  0x77   : > { %6813 = vmatpush.bf16.msra.mxu3 %v8907_v38  ;;  %v12826_v55 = vld [vmem:[%s14199_s17 + $0x1b4] sm:$0xf0]  ;;  %v8827_v58 = vor.u32 %v12810_v53, %v8826_v52  ;;  %v8754_v61 = vld [vmem:[%s14199_s17 + $0xa0] sm:$0xf]  ;;  %v12792_v63 = vld [vmem:[%s14199_s17 + $0xa4] sm:$0xf0]  ;;  %v8691_v4 = vor.u32 %v12776_v60, %v8690_v59 }
  0x78   : > { %6775 = vmatpush.bf16.msra.mxu0 %v8707_v44  ;;  %v8891_v62 = vor.u32 %v12826_v55, %v8890_v54  ;;  %v8818_v0 = vld [vmem:[%s14199_s17 + $0x120] sm:$0xf]  ;;  %v12808_v1 = vld [vmem:[%s14199_s17 + $0x124] sm:$0xf0]  ;;  %v8755_v5 = vor.u32 %v12792_v63, %v8754_v61  ;;  %v8682_v7 = vld [vmem:[%s14199_s17 + $0x10] sm:$0xf] }
  0x79   : > { %6788 = vmatpush.bf16.msra.mxu1 %v8771_v45  ;;  %v8882_v2 = vld [vmem:[%s14199_s17 + $0x1a0] sm:$0xf]  ;;  %v12824_v3 = vld [vmem:[%s14199_s17 + $0x1a4] sm:$0xf0]  ;;  %v8819_v6 = vor.u32 %v12808_v1, %v8818_v0  ;;  %v12774_v8 = vld [vmem:[%s14199_s17 + $0x14] sm:$0xf0] }
  0x7a   : > { %6801 = vmatpush.bf16.msra.mxu2 %v8835_v46  ;;  %v8746_v9 = vld [vmem:[%s14199_s17 + $0x90] sm:$0xf]  ;;  %v8883_v10 = vor.u32 %v12824_v3, %v8882_v2  ;;  %v12790_v11 = vld [vmem:[%s14199_s17 + $0x94] sm:$0xf0]  ;;  %v8683_v16 = vor.u32 %v12774_v8, %v8682_v7  ;;  %v8674_v17 = vld [vmem:[%s14199_s17] sm:$0xf] }
  0x7b   : > { %6814 = vmatpush.bf16.msra.mxu3 %v8899_v50  ;;  %v8810_v12 = vld [vmem:[%s14199_s17 + $0x110] sm:$0xf]  ;;  %v12806_v13 = vld [vmem:[%s14199_s17 + $0x114] sm:$0xf0]  ;;  %v12772_v18 = vld [vmem:[%s14199_s17 + $0x4] sm:$0xf0]  ;;  %v8747_v19 = vor.u32 %v12790_v11, %v8746_v9 }
  0x7c   : > { %6776 = vmatpush.bf16.msra.mxu0 %v8699_v56  ;;  %v8874_v14 = vld [vmem:[%s14199_s17 + $0x190] sm:$0xf]  ;;  %v12822_v15 = vld [vmem:[%s14199_s17 + $0x194] sm:$0xf0]  ;;  %v8811_v20 = vor.u32 %v12806_v13, %v8810_v12  ;;  %v8738_v21 = vld [vmem:[%s14199_s17 + $0x80] sm:$0xf]  ;;  %v8675_v31 = vor.u32 %v12772_v18, %v8674_v17 }
  0x7d   : > { %6789 = vmatpush.bf16.msra.mxu1 %v8763_v57  ;;  %v12788_v22 = vld [vmem:[%s14199_s17 + $0x84] sm:$0xf0]  ;;  %v8802_v23 = vld [vmem:[%s14199_s17 + $0x100] sm:$0xf]  ;;  %v8875_v24 = vor.u32 %v12822_v15, %v8874_v14  ;;  %v8986_v28 = vld [vmem:[%s14199_s17 + $0x270] sm:$0xf] }
  0x7e   : > { %6802 = vmatpush.bf16.msra.mxu2 %v8827_v58  ;;  %v12804_v25 = vld [vmem:[%s14199_s17 + $0x104] sm:$0xf0]  ;;  %v8866_v26 = vld [vmem:[%s14199_s17 + $0x180] sm:$0xf]  ;;  %v12850_v29 = vld [vmem:[%s14199_s17 + $0x274] sm:$0xf0]  ;;  %v8739_v35 = vor.u32 %v12788_v22, %v8738_v21 }
  0x7f   : > { %6815 = vmatpush.bf16.msra.mxu3 %v8891_v62  ;;  %v12820_v27 = vld [vmem:[%s14199_s17 + $0x184] sm:$0xf0]  ;;  %v9050_v30 = vld [vmem:[%s14199_s17 + $0x2f0] sm:$0xf]  ;;  %v12866_v32 = vld [vmem:[%s14199_s17 + $0x2f4] sm:$0xf0]  ;;  %v8803_v36 = vor.u32 %v12804_v25, %v8802_v23  ;;  %v8987_v40 = vor.u32 %v12850_v29, %v8986_v28 }
  0x80   : > { %6777 = vmatpush.bf16.msra.mxu0 %v8691_v4  ;;  %v9114_v33 = vld [vmem:[%s14199_s17 + $0x370] sm:$0xf]  ;;  %v12882_v34 = vld [vmem:[%s14199_s17 + $0x374] sm:$0xf0]  ;;  %v8867_v39 = vor.u32 %v12820_v27, %v8866_v26  ;;  %v9051_v41 = vor.u32 %v12866_v32, %v9050_v30  ;;  %v8978_v43 = vld [vmem:[%s14199_s17 + $0x260] sm:$0xf] }
  0x81   : > { %6790 = vmatpush.bf16.msra.mxu1 %v8755_v5  ;;  %v9178_v37 = vld [vmem:[%s14199_s17 + $0x3f0] sm:$0xf]  ;;  %v12898_v38 = vld [vmem:[%s14199_s17 + $0x3f4] sm:$0xf0]  ;;  %v9115_v42 = vor.u32 %v12882_v34, %v9114_v33  ;;  %v12848_v44 = vld [vmem:[%s14199_s17 + $0x264] sm:$0xf0] }
  0x82   : > { %6803 = vmatpush.bf16.msra.mxu2 %v8819_v6  ;;  %v9042_v45 = vld [vmem:[%s14199_s17 + $0x2e0] sm:$0xf]  ;;  %v9179_v46 = vor.u32 %v12898_v38, %v9178_v37  ;;  %v12864_v47 = vld [vmem:[%s14199_s17 + $0x2e4] sm:$0xf0]  ;;  %v8979_v52 = vor.u32 %v12848_v44, %v8978_v43  ;;  %v8970_v53 = vld [vmem:[%s14199_s17 + $0x250] sm:$0xf] }
  0x83   : > { %6816 = vmatpush.bf16.msra.mxu3 %v8883_v10  ;;  %v9106_v48 = vld [vmem:[%s14199_s17 + $0x360] sm:$0xf]  ;;  %v12880_v49 = vld [vmem:[%s14199_s17 + $0x364] sm:$0xf0]  ;;  %v9043_v54 = vor.u32 %v12864_v47, %v9042_v45  ;;  %v12846_v56 = vld [vmem:[%s14199_s17 + $0x254] sm:$0xf0] }
  0x84   : > { %6778 = vmatpush.bf16.msra.mxu0 %v8683_v16  ;;  %v9170_v50 = vld [vmem:[%s14199_s17 + $0x3e0] sm:$0xf]  ;;  %v12896_v51 = vld [vmem:[%s14199_s17 + $0x3e4] sm:$0xf0]  ;;  %v9107_v55 = vor.u32 %v12880_v49, %v9106_v48  ;;  %v9034_v57 = vld [vmem:[%s14199_s17 + $0x2d0] sm:$0xf]  ;;  %v8971_v0 = vor.u32 %v12846_v56, %v8970_v53 }
  0x85   : > { %6791 = vmatpush.bf16.msra.mxu1 %v8747_v19  ;;  %v12862_v58 = vld [vmem:[%s14199_s17 + $0x2d4] sm:$0xf0]  ;;  %v9171_v59 = vor.u32 %v12896_v51, %v9170_v50  ;;  %v9098_v60 = vld [vmem:[%s14199_s17 + $0x350] sm:$0xf]  ;;  %v367_v2 = vld [vmem:[%s16797_s0 + $0x8] sm:$0xff] }
  0x86   : > { %6804 = vmatpush.bf16.msra.mxu2 %v8811_v20  ;;  %v12878_v61 = vld [vmem:[%s14199_s17 + $0x354] sm:$0xf0]  ;;  %v9162_v62 = vld [vmem:[%s14199_s17 + $0x3d0] sm:$0xf]  ;;  %v9035_v1 = vor.u32 %v12862_v58, %v9034_v57  ;;  %v366_v3 = vld [vmem:[%s16797_s0] sm:$0xff]  ;;  %v1462_v8 = vunpack.c.l.b16 %v367_v2  ;;  %v1463_v10 = vunpack.c.h.b16 %v367_v2 }
  0x87   : > { %6817 = vmatpush.bf16.msra.mxu3 %v8875_v24  ;;  %v12894_v63 = vld [vmem:[%s14199_s17 + $0x3d4] sm:$0xf0]  ;;  %v9099_v4 = vor.u32 %v12878_v61, %v9098_v60  ;;  %v8962_v5 = vld [vmem:[%s14199_s17 + $0x240] sm:$0xf]  ;;  %v12844_v6 = vld [vmem:[%s14199_s17 + $0x244] sm:$0xf0]  ;;  %v1460_v9 = vunpack.c.l.b16 %v366_v3  ;;  %v1461_v15 = vunpack.c.h.b16 %v366_v3 }
  0x88   : > { %6779 = vmatpush.bf16.msra.mxu0 %v8675_v31  ;;  %v9026_v7 = vld [vmem:[%s14199_s17 + $0x2c0] sm:$0xf]  ;;  %v9163_v11 = vor.u32 %v12894_v63, %v9162_v62  ;;  %v12860_v12 = vld [vmem:[%s14199_s17 + $0x2c4] sm:$0xf0]  ;;  %v14321_v18 = vpack.c.b16 %v1462_v8, %v1462_v8  ;;  %v14325_v20 = vpack.c.b16 %v1463_v10, %v1463_v10  ;;  %v8963_v21 = vor.u32 %v12844_v6, %v8962_v5  ;;  %v8954_v25 = vld [vmem:[%s14199_s17 + $0x230] sm:$0xf] }
  0x89   : > { %6792 = vmatpush.bf16.msra.mxu1 %v8739_v35  ;;  %v9090_v13 = vld [vmem:[%s14199_s17 + $0x340] sm:$0xf]  ;;  %v12876_v14 = vld [vmem:[%s14199_s17 + $0x344] sm:$0xf0]  ;;  %v14323_v19 = vpack.c.b16 %v1460_v9, %v1460_v9  ;;  %v14327_v22 = vpack.c.b16 %v1461_v15, %v1461_v15  ;;  %v9027_v23 = vor.u32 %v12860_v12, %v9026_v7  ;;  %v12842_v26 = vld [vmem:[%s14199_s17 + $0x234] sm:$0xf0] }
  0x8a   : > { %6805 = vmatpush.bf16.msra.mxu2 %v8803_v36  ;;  %v9154_v16 = vld [vmem:[%s14199_s17 + $0x3c0] sm:$0xf]  ;;  %v12892_v17 = vld [vmem:[%s14199_s17 + $0x3c4] sm:$0xf0]  ;;  %v9091_v24 = vor.u32 %v12876_v14, %v9090_v13  ;;  %v9018_v27 = vld [vmem:[%s14199_s17 + $0x2b0] sm:$0xf]  ;;  %v8955_v34 = vor.u32 %v12842_v26, %v8954_v25 }
  0x8b   : > { %6818 = vmatpush.bf16.msra.mxu3 %v8867_v39  ;;  %v9155_v28 = vor.u32 %v12892_v17, %v9154_v16  ;;  %v12858_v29 = vld [vmem:[%s14199_s17 + $0x2b4] sm:$0xf0]  ;;  %v9082_v30 = vld [vmem:[%s14199_s17 + $0x330] sm:$0xf]  ;;  %6780 = vmatmul.bf16.vlgmr.msra.gmra.mxu0 %v14323_v19  ;;  %v8946_v37 = vld [vmem:[%s14199_s17 + $0x220] sm:$0xf] }
  0x8c   : > { %6824 = vmatpush.bf16.msrb.mxu0 %v8987_v40  ;;  %v12874_v31 = vld [vmem:[%s14199_s17 + $0x334] sm:$0xf0]  ;;  %v9146_v32 = vld [vmem:[%s14199_s17 + $0x3b0] sm:$0xf]  ;;  %6793 = vmatmul.bf16.vlgmr.msra.gmra.mxu1 %v14327_v22  ;;  %v9019_v35 = vor.u32 %v12858_v29, %v9018_v27  ;;  %v12840_v38 = vld [vmem:[%s14199_s17 + $0x224] sm:$0xf0] }
  0x8d   : > { %6837 = vmatpush.bf16.msrb.mxu1 %v9051_v41  ;;  %6806 = vmatmul.bf16.vlgmr.msra.gmra.mxu2 %v14321_v18  ;;  %v12890_v33 = vld [vmem:[%s14199_s17 + $0x3b4] sm:$0xf0]  ;;  %v9083_v36 = vor.u32 %v12874_v31, %v9082_v30  ;;  %v9010_v39 = vld [vmem:[%s14199_s17 + $0x2a0] sm:$0xf]  ;;  %v12856_v41 = vld [vmem:[%s14199_s17 + $0x2a4] sm:$0xf0] }
  0x8e   : > { %6850 = vmatpush.bf16.msrb.mxu2 %v9115_v42  ;;  %6819 = vmatmul.bf16.vlgmr.msra.gmra.mxu3 %v14325_v20  ;;  %v9147_v40 = vor.u32 %v12890_v33, %v9146_v32  ;;  %v9074_v42 = vld [vmem:[%s14199_s17 + $0x320] sm:$0xf]  ;;  %v12872_v43 = vld [vmem:[%s14199_s17 + $0x324] sm:$0xf0]  ;;  %v9011_v47 = vor.u32 %v12856_v41, %v9010_v39  ;;  %v8938_v49 = vld [vmem:[%s14199_s17 + $0x210] sm:$0xf] }
  0x8f   : > { %6863 = vmatpush.bf16.msrb.mxu3 %v9179_v46  ;;  %v9138_v44 = vld [vmem:[%s14199_s17 + $0x3a0] sm:$0xf]  ;;  %v12888_v45 = vld [vmem:[%s14199_s17 + $0x3a4] sm:$0xf0]  ;;  %v8947_v46 = vor.u32 %v12840_v38, %v8946_v37  ;;  %v9075_v48 = vor.u32 %v12872_v43, %v9074_v42  ;;  %v12838_v50 = vld [vmem:[%s14199_s17 + $0x214] sm:$0xf0] }
  0x90   : > { %6825 = vmatpush.bf16.msrb.mxu0 %v8979_v52  ;;  %v9002_v51 = vld [vmem:[%s14199_s17 + $0x290] sm:$0xf]  ;;  %v9139_v52 = vor.u32 %v12888_v45, %v9138_v44  ;;  %v12854_v53 = vld [vmem:[%s14199_s17 + $0x294] sm:$0xf0]  ;;  %v8930_v58 = vld [vmem:[%s14199_s17 + $0x200] sm:$0xf] }
  0x91   : > { %6838 = vmatpush.bf16.msrb.mxu1 %v9043_v54  ;;  %v9066_v54 = vld [vmem:[%s14199_s17 + $0x310] sm:$0xf]  ;;  %v12886_v57 = vld [vmem:[%s14199_s17 + $0x394] sm:$0xf0]  ;;  %v12836_v60 = vld [vmem:[%s14199_s17 + $0x204] sm:$0xf0]  ;;  %v9003_v63 = vor.u32 %v12854_v53, %v9002_v51 }
  0x92   : > { %6851 = vmatpush.bf16.msrb.mxu2 %v9107_v55  ;;  %v12870_v55 = vld [vmem:[%s14199_s17 + $0x314] sm:$0xf0]  ;;  %v9130_v56 = vld [vmem:[%s14199_s17 + $0x390] sm:$0xf]  ;;  %v8994_v61 = vld [vmem:[%s14199_s17 + $0x280] sm:$0xf] }
  0x93   : > { %6864 = vmatpush.bf16.msrb.mxu3 %v9171_v59  ;;  %v8939_v59 = vor.u32 %v12838_v50, %v8938_v49  ;;  %v12852_v62 = vld [vmem:[%s14199_s17 + $0x284] sm:$0xf0]  ;;  %v369_v3 = vld [vmem:[%s16797_s0 + $0x18] sm:$0xff]  ;;  %v9122_v5 = vld [vmem:[%s14199_s17 + $0x380] sm:$0xf] }
  0x94   : > { %6826 = vmatpush.bf16.msrb.mxu0 %v8971_v0  ;;  %v9067_v0 = vor.u32 %v12870_v55, %v9066_v54  ;;  %v12868_v2 = vld [vmem:[%s14199_s17 + $0x304] sm:$0xf0]  ;;  %v368_v7 = vld [vmem:[%s16797_s0 + $0x10] sm:$0xff]  ;;  %v12914_v9 = vld [vmem:[%s14199_s17 + $0x474] sm:$0xf0]  ;;  %v1466_v15 = vunpack.c.l.b16 %v369_v3  ;;  %v8995_v16 = vor.u32 %v12852_v62, %v8994_v61  ;;  %v1467_v25 = vunpack.c.h.b16 %v369_v3 }
  0x95   : > { %6839 = vmatpush.bf16.msrb.mxu1 %v9035_v1  ;;  %v9058_v1 = vld [vmem:[%s14199_s17 + $0x300] sm:$0xf]  ;;  %v12884_v6 = vld [vmem:[%s14199_s17 + $0x384] sm:$0xf0]  ;;  %v9242_v8 = vld [vmem:[%s14199_s17 + $0x470] sm:$0xf] }
  0x96   : > { %6852 = vmatpush.bf16.msrb.mxu2 %v9099_v4  ;;  %v9131_v4 = vor.u32 %v12886_v57, %v9130_v56  ;;  %v9306_v10 = vld [vmem:[%s14199_s17 + $0x4f0] sm:$0xf]  ;;  %v12930_v12 = vld [vmem:[%s14199_s17 + $0x4f4] sm:$0xf0]  ;;  %v9059_v17 = vor.u32 %v12868_v2, %v9058_v1  ;;  %v9123_v26 = vor.u32 %v12884_v6, %v9122_v5  ;;  %v9243_v27 = vor.u32 %v12914_v9, %v9242_v8  ;;  %v9234_v31 = vld [vmem:[%s14199_s17 + $0x460] sm:$0xf] }
  0x97   : > { %6865 = vmatpush.bf16.msrb.mxu3 %v9163_v11  ;;  %v8931_v11 = vor.u32 %v12836_v60, %v8930_v58  ;;  %v9370_v13 = vld [vmem:[%s14199_s17 + $0x570] sm:$0xf]  ;;  %v12946_v14 = vld [vmem:[%s14199_s17 + $0x574] sm:$0xf0]  ;;  %v9307_v29 = vor.u32 %v12930_v12, %v9306_v10  ;;  %v12912_v32 = vld [vmem:[%s14199_s17 + $0x464] sm:$0xf0]  ;;  %v14385_v38 = vpack.c.b16 %v1466_v15, %v1466_v15  ;;  %v14391_v42 = vpack.c.b16 %v1467_v25, %v1467_v25 }
  0x98   : > { %6827 = vmatpush.bf16.msrb.mxu0 %v8963_v21  ;;  %v9434_v21 = vld [vmem:[%s14199_s17 + $0x5f0] sm:$0xf]  ;;  %v9371_v30 = vor.u32 %v12946_v14, %v9370_v13  ;;  %v9298_v33 = vld [vmem:[%s14199_s17 + $0x4e0] sm:$0xf]  ;;  %v12944_v37 = vld [vmem:[%s14199_s17 + $0x564] sm:$0xf0]  ;;  %v9235_v43 = vor.u32 %v12912_v32, %v9234_v31 }
  0x99   : > { %6840 = vmatpush.bf16.msrb.mxu1 %v9027_v23  ;;  %v12962_v23 = vld [vmem:[%s14199_s17 + $0x5f4] sm:$0xf0]  ;;  %v9426_v39 = vld [vmem:[%s14199_s17 + $0x5e0] sm:$0xf]  ;;  %v9290_v49 = vld [vmem:[%s14199_s17 + $0x4d0] sm:$0xf] }
  0x9a   : > { %6853 = vmatpush.bf16.msrb.mxu2 %v9091_v24  ;;  %v1464_v24 = vunpack.c.l.b16 %v368_v7  ;;  %v12926_v51 = vld [vmem:[%s14199_s17 + $0x4d4] sm:$0xf0]  ;;  %v9418_v54 = vld [vmem:[%s14199_s17 + $0x5d0] sm:$0xf]  ;;  %v12908_v60 = vld [vmem:[%s14199_s17 + $0x444] sm:$0xf0] }
  0x9b   : > { %6866 = vmatpush.bf16.msrb.mxu3 %v9155_v28  ;;  %v1465_v28 = vunpack.c.h.b16 %v368_v7  ;;  %v12942_v53 = vld [vmem:[%s14199_s17 + $0x554] sm:$0xf0]  ;;  %v9291_v57 = vor.u32 %v12926_v51, %v9290_v49  ;;  %v9282_v61 = vld [vmem:[%s14199_s17 + $0x4c0] sm:$0xf]  ;;  %v12940_v1 = vld [vmem:[%s14199_s17 + $0x544] sm:$0xf0] }
  0x9c   : > { %6828 = vmatpush.bf16.msrb.mxu0 %v8955_v34  ;;  %v9435_v34 = vor.u32 %v12962_v23, %v9434_v21  ;;  %v14389_v41 = vpack.c.b16 %v1464_v24, %v1464_v24  ;;  %v12958_v55 = vld [vmem:[%s14199_s17 + $0x5d4] sm:$0xf0]  ;;  %v9410_v2 = vld [vmem:[%s14199_s17 + $0x5c0] sm:$0xf]  ;;  %v12956_v3 = vld [vmem:[%s14199_s17 + $0x5c4] sm:$0xf0] }
  0x9d   : > { %6841 = vmatpush.bf16.msrb.mxu1 %v9019_v35  ;;  %v12928_v35 = vld [vmem:[%s14199_s17 + $0x4e4] sm:$0xf0]  ;;  %v14393_v44 = vpack.c.b16 %v1465_v28, %v1465_v28  ;;  %v9419_v62 = vor.u32 %v12958_v55, %v9418_v54  ;;  %v9210_v7 = vld [vmem:[%s14199_s17 + $0x430] sm:$0xf]  ;;  %v12906_v8 = vld [vmem:[%s14199_s17 + $0x434] sm:$0xf0]  ;;  %v9411_v10 = vor.u32 %v12956_v3, %v9410_v2 }
  0x9e   : > { %6854 = vmatpush.bf16.msrb.mxu2 %v9083_v36  ;;  %v9362_v36 = vld [vmem:[%s14199_s17 + $0x560] sm:$0xf]  ;;  %v9299_v45 = vor.u32 %v12928_v35, %v9298_v33  ;;  %v9274_v9 = vld [vmem:[%s14199_s17 + $0x4b0] sm:$0xf]  ;;  %v12938_v13 = vld [vmem:[%s14199_s17 + $0x534] sm:$0xf0] }
  0x9f   : > { %6867 = vmatpush.bf16.msrb.mxu3 %v9147_v40  ;;  %v12960_v40 = vld [vmem:[%s14199_s17 + $0x5e4] sm:$0xf0]  ;;  %v9338_v12 = vld [vmem:[%s14199_s17 + $0x530] sm:$0xf]  ;;  %v12954_v15 = vld [vmem:[%s14199_s17 + $0x5b4] sm:$0xf0] }
  0xa0   : > { %6829 = vmatpush.bf16.msrb.mxu0 %v8947_v46  ;;  %v9363_v46 = vor.u32 %v12944_v37, %v9362_v36  ;;  %v9427_v50 = vor.u32 %v12960_v40, %v9426_v39  ;;  %v9402_v14 = vld [vmem:[%s14199_s17 + $0x5b0] sm:$0xf]  ;;  %v9339_v21 = vor.u32 %v12938_v13, %v9338_v12  ;;  %v9202_v23 = vld [vmem:[%s14199_s17 + $0x420] sm:$0xf]  ;;  %v12904_v24 = vld [vmem:[%s14199_s17 + $0x424] sm:$0xf0] }
  0xa1   : > { %6842 = vmatpush.bf16.msrb.mxu1 %v9011_v47  ;;  %v9226_v47 = vld [vmem:[%s14199_s17 + $0x450] sm:$0xf]  ;;  %v9266_v25 = vld [vmem:[%s14199_s17 + $0x4a0] sm:$0xf]  ;;  %v12952_v31 = vld [vmem:[%s14199_s17 + $0x5a4] sm:$0xf0]  ;;  %v9203_v32 = vor.u32 %v12904_v24, %v9202_v23 }
  0xa2   : > { %6855 = vmatpush.bf16.msrb.mxu2 %v9075_v48  ;;  %v12910_v48 = vld [vmem:[%s14199_s17 + $0x454] sm:$0xf0]  ;;  %v9330_v28 = vld [vmem:[%s14199_s17 + $0x520] sm:$0xf]  ;;  %v9194_v35 = vld [vmem:[%s14199_s17 + $0x410] sm:$0xf] }
  0xa3   : > { %6868 = vmatpush.bf16.msrb.mxu3 %v9139_v52  ;;  %v9354_v52 = vld [vmem:[%s14199_s17 + $0x550] sm:$0xf]  ;;  %v9227_v56 = vor.u32 %v12910_v48, %v9226_v47  ;;  %v12902_v36 = vld [vmem:[%s14199_s17 + $0x414] sm:$0xf0]  ;;  %v9186_v48 = vld [vmem:[%s14199_s17 + $0x400] sm:$0xf] }
  0xa4   : > { %6830 = vmatpush.bf16.msrb.mxu0 %v8939_v59  ;;  %v9355_v58 = vor.u32 %v12942_v53, %v9354_v52  ;;  %v9218_v59 = vld [vmem:[%s14199_s17 + $0x440] sm:$0xf]  ;;  %v9258_v37 = vld [vmem:[%s14199_s17 + $0x490] sm:$0xf]  ;;  %v12918_v40 = vld [vmem:[%s14199_s17 + $0x494] sm:$0xf0]  ;;  %v9195_v49 = vor.u32 %v12902_v36, %v9194_v35 }
  0xa5   : > { %6843 = vmatpush.bf16.msrb.mxu1 %v9003_v63  ;;  %v12924_v63 = vld [vmem:[%s14199_s17 + $0x4c4] sm:$0xf0]  ;;  %v12950_v47 = vld [vmem:[%s14199_s17 + $0x594] sm:$0xf0]  ;;  %v9250_v51 = vld [vmem:[%s14199_s17 + $0x480] sm:$0xf]  ;;  %v9259_v53 = vor.u32 %v12918_v40, %v9258_v37 }
  0xa6   : > { %6856 = vmatpush.bf16.msrb.mxu2 %v9067_v0  ;;  %v9346_v0 = vld [vmem:[%s14199_s17 + $0x540] sm:$0xf]  ;;  %v9283_v5 = vor.u32 %v12924_v63, %v9282_v61  ;;  %v12916_v52 = vld [vmem:[%s14199_s17 + $0x484] sm:$0xf0]  ;;  %v12978_v63 = vld [vmem:[%s14199_s17 + $0x674] sm:$0xf0] }
  0xa7   : > { %6869 = vmatpush.bf16.msrb.mxu3 %v9131_v4  ;;  %v9219_v4 = vor.u32 %v12908_v60, %v9218_v59  ;;  %v9347_v6 = vor.u32 %v12940_v1, %v9346_v0  ;;  %v9314_v55 = vld [vmem:[%s14199_s17 + $0x500] sm:$0xf]  ;;  %v12948_v60 = vld [vmem:[%s14199_s17 + $0x584] sm:$0xf0]  ;;  %v9562_v0 = vld [vmem:[%s14199_s17 + $0x6f0] sm:$0xf] }
  0xa8   : > { %6831 = vmatpush.bf16.msrb.mxu0 %v8931_v11  ;;  %v12922_v11 = vld [vmem:[%s14199_s17 + $0x4b4] sm:$0xf0]  ;;  %v9378_v59 = vld [vmem:[%s14199_s17 + $0x580] sm:$0xf]  ;;  %v371_v61 = vld [vmem:[%s16797_s0 + $0x28] sm:$0xff] }
  0xa9   : > { %6844 = vmatpush.bf16.msrb.mxu1 %v8995_v16  ;;  %v9211_v16 = vor.u32 %v12906_v8, %v9210_v7  ;;  %v12994_v2 = vld [vmem:[%s14199_s17 + $0x6f4] sm:$0xf0]  ;;  %v9626_v3 = vld [vmem:[%s14199_s17 + $0x770] sm:$0xf]  ;;  %v9379_v12 = vor.u32 %v12948_v60, %v9378_v59  ;;  %v9554_v23 = vld [vmem:[%s14199_s17 + $0x6e0] sm:$0xf] }
  0xaa   : > { %6857 = vmatpush.bf16.msrb.mxu2 %v9059_v17  ;;  %v9275_v17 = vor.u32 %v12922_v11, %v9274_v9  ;;  %v9690_v8 = vld [vmem:[%s14199_s17 + $0x7f0] sm:$0xf]  ;;  %v13026_v9 = vld [vmem:[%s14199_s17 + $0x7f4] sm:$0xf0]  ;;  %v13004_v59 = vld [vmem:[%s14199_s17 + $0x744] sm:$0xf0] }
  0xab   : > { %6870 = vmatpush.bf16.msrb.mxu3 %v9123_v26  ;;  %6832 = vmatmul.bf16.vlgmr.msrb.gmra.mxu0 %v14389_v41  ;;  %v9403_v26 = vor.u32 %v12954_v15, %v9402_v14  ;;  %v1471_v14 = vunpack.c.h.b16 %v371_v61  ;;  %v9563_v15 = vor.u32 %v12994_v2, %v9562_v0  ;;  %v9691_v24 = vor.u32 %v13026_v9, %v9690_v8  ;;  %v9482_v37 = vld [vmem:[%s14199_s17 + $0x650] sm:$0xf]  ;;  %v9666_v60 = vld [vmem:[%s14199_s17 + $0x7c0] sm:$0xf]  ;;  %v12970_v2 = vld [vmem:[%s14199_s17 + $0x634] sm:$0xf0] }
  0xac   : > { %6876 = vmatpush.bf16.msra.mxu0 %v9243_v27  ;;  %6845 = vmatmul.bf16.vlgmr.msrb.gmra.mxu1 %v14393_v44  ;;  %v12920_v27 = vld [vmem:[%s14199_s17 + $0x4a4] sm:$0xf0]  ;;  %v9546_v40 = vld [vmem:[%s14199_s17 + $0x6d0] sm:$0xf]  ;;  %v13018_v9 = vld [vmem:[%s14199_s17 + $0x7b4] sm:$0xf0] }
  0xad   : > { %6889 = vmatpush.bf16.msra.mxu1 %v9307_v29  ;;  %6858 = vmatmul.bf16.vlgmr.msrb.gmra.mxu2 %v14385_v38  ;;  %v12936_v29 = vld [vmem:[%s14199_s17 + $0x524] sm:$0xf0]  ;;  %v9267_v33 = vor.u32 %v12920_v27, %v9266_v25  ;;  %v9618_v27 = vld [vmem:[%s14199_s17 + $0x760] sm:$0xf]  ;;  %v9658_v8 = vld [vmem:[%s14199_s17 + $0x7b0] sm:$0xf] }
  0xae   : > { %6902 = vmatpush.bf16.msra.mxu2 %v9371_v30  ;;  %6871 = vmatmul.bf16.vlgmr.msrb.gmra.mxu3 %v14391_v42  ;;  %v9394_v30 = vld [vmem:[%s14199_s17 + $0x5a0] sm:$0xf] }
  0xaf   : > { %6915 = vmatpush.bf16.msra.mxu3 %v9435_v34  ;;  %v9331_v34 = vor.u32 %v12936_v29, %v9330_v28  ;;  %v9395_v39 = vor.u32 %v12952_v31, %v9394_v30  ;;  %v13008_v28 = vld [vmem:[%s14199_s17 + $0x764] sm:$0xf0]  ;;  %v9682_v31 = vld [vmem:[%s14199_s17 + $0x7e0] sm:$0xf] }
  0xb0   : > { %6877 = vmatpush.bf16.msra.mxu0 %v9235_v43  ;;  %v9322_v43 = vld [vmem:[%s14199_s17 + $0x510] sm:$0xf]  ;;  %v9619_v36 = vor.u32 %v13008_v28, %v9618_v27 }
  0xb1   : > { %6890 = vmatpush.bf16.msra.mxu1 %v9299_v45  ;;  %v12934_v45 = vld [vmem:[%s14199_s17 + $0x514] sm:$0xf0] }
  0xb2   : > { %6903 = vmatpush.bf16.msra.mxu2 %v9363_v46  ;;  %v9386_v46 = vld [vmem:[%s14199_s17 + $0x590] sm:$0xf]  ;;  %v9323_v54 = vor.u32 %v12934_v45, %v9322_v43  ;;  %v12990_v45 = vld [vmem:[%s14199_s17 + $0x6d4] sm:$0xf0] }
  0xb3   : > { %6916 = vmatpush.bf16.msra.mxu3 %v9427_v50  ;;  %v12900_v50 = vld [vmem:[%s14199_s17 + $0x404] sm:$0xf0] }
  0xb4   : > { %6878 = vmatpush.bf16.msra.mxu0 %v9227_v56  ;;  %v12932_v56 = vld [vmem:[%s14199_s17 + $0x504] sm:$0xf0]  ;;  %v9187_v1 = vor.u32 %v12900_v50, %v9186_v48  ;;  %v9674_v48 = vld [vmem:[%s14199_s17 + $0x7d0] sm:$0xf] }
  0xb5   : > { %6891 = vmatpush.bf16.msra.mxu1 %v9291_v57  ;;  %v370_v57 = vld [vmem:[%s16797_s0 + $0x20] sm:$0xff]  ;;  %v9315_v7 = vor.u32 %v12932_v56, %v9314_v55 }
  0xb6   : > { %6904 = vmatpush.bf16.msra.mxu2 %v9355_v58  ;;  %v9387_v58 = vor.u32 %v12950_v47, %v9386_v46  ;;  %v1469_v11 = vunpack.c.h.b16 %v370_v57  ;;  %v9610_v46 = vld [vmem:[%s14199_s17 + $0x750] sm:$0xf]  ;;  %v13006_v47 = vld [vmem:[%s14199_s17 + $0x754] sm:$0xf0]  ;;  %v9538_v55 = vld [vmem:[%s14199_s17 + $0x6c0] sm:$0xf] }
  0xb7   : > { %6917 = vmatpush.bf16.msra.mxu3 %v9419_v62  ;;  %v9498_v62 = vld [vmem:[%s14199_s17 + $0x670] sm:$0xf] }
  0xb8   : > { %6879 = vmatpush.bf16.msra.mxu0 %v9219_v4  ;;  %v13010_v4 = vld [vmem:[%s14199_s17 + $0x774] sm:$0xf0]  ;;  %v9499_v13 = vor.u32 %v12978_v63, %v9498_v62  ;;  %v14471_v30 = vpack.c.b16 %v1469_v11, %v1469_v11 }
  0xb9   : > { %6892 = vmatpush.bf16.msra.mxu1 %v9283_v5  ;;  %v1468_v5 = vunpack.c.l.b16 %v370_v57  ;;  %v12988_v57 = vld [vmem:[%s14199_s17 + $0x6c4] sm:$0xf0] }
  0xba   : > { %6905 = vmatpush.bf16.msra.mxu2 %v9347_v6  ;;  %v9251_v6 = vor.u32 %v12916_v52, %v9250_v51  ;;  %v9547_v51 = vor.u32 %v12990_v45, %v9546_v40  ;;  %v9611_v52 = vor.u32 %v13006_v47, %v9610_v46  ;;  %v9539_v63 = vor.u32 %v12988_v57, %v9538_v55  ;;  %v12998_v40 = vld [vmem:[%s14199_s17 + $0x714] sm:$0xf0]  ;;  %v9442_v46 = vld [vmem:[%s14199_s17 + $0x600] sm:$0xf]  ;;  %v372_v55 = vld [vmem:[%s16797_s0 + $0x30] sm:$0xff] }
  0xbb   : > { %6918 = vmatpush.bf16.msra.mxu3 %v9411_v10  ;;  %v1470_v10 = vunpack.c.l.b16 %v371_v61  ;;  %v14464_v25 = vpack.c.b16 %v1468_v5, %v1468_v5  ;;  %v13020_v61 = vld [vmem:[%s14199_s17 + $0x7c4] sm:$0xf0]  ;;  %v12986_v5 = vld [vmem:[%s14199_s17 + $0x6b4] sm:$0xf0]  ;;  %v9634_v57 = vld [vmem:[%s14199_s17 + $0x780] sm:$0xf] }
  0xbc   : > { %6880 = vmatpush.bf16.msra.mxu0 %v9211_v16  ;;  %v9627_v16 = vor.u32 %v13010_v4, %v9626_v3  ;;  %v9530_v3 = vld [vmem:[%s14199_s17 + $0x6b0] sm:$0xf]  ;;  %v9667_v4 = vor.u32 %v13020_v61, %v9666_v60  ;;  %v13014_v45 = vld [vmem:[%s14199_s17 + $0x794] sm:$0xf0] }
  0xbd   : > { %6893 = vmatpush.bf16.msra.mxu1 %v9275_v17  ;;  %v9490_v17 = vld [vmem:[%s14199_s17 + $0x660] sm:$0xf]  ;;  %v14469_v29 = vpack.c.b16 %v1470_v10, %v1470_v10  ;;  %v9531_v11 = vor.u32 %v12986_v5, %v9530_v3  ;;  %v9754_v60 = vld [vmem:[%s14199_s17 + $0x870] sm:$0xf]  ;;  %v13042_v61 = vld [vmem:[%s14199_s17 + $0x874] sm:$0xf0]  ;;  %v1472_v3 = vunpack.c.l.b16 %v372_v55 }
  0xbe   : > { %6906 = vmatpush.bf16.msra.mxu2 %v9339_v21  ;;  %v12976_v21 = vld [vmem:[%s14199_s17 + $0x664] sm:$0xf0] }
  0xbf   : > { %6919 = vmatpush.bf16.msra.mxu3 %v9403_v26  ;;  %v12992_v26 = vld [vmem:[%s14199_s17 + $0x6e4] sm:$0xf0] }
  0xc0   : > { %6881 = vmatpush.bf16.msra.mxu0 %v9203_v32  ;;  %v13024_v32 = vld [vmem:[%s14199_s17 + $0x7e4] sm:$0xf0]  ;;  %v9555_v35 = vor.u32 %v12992_v26, %v9554_v23 }
  0xc1   : > { %6894 = vmatpush.bf16.msra.mxu1 %v9267_v33  ;;  %v14475_v33 = vpack.c.b16 %v1471_v14, %v1471_v14  ;;  %v9683_v43 = vor.u32 %v13024_v32, %v9682_v31  ;;  %v12968_v14 = vld [vmem:[%s14199_s17 + $0x624] sm:$0xf0]  ;;  %v9450_v32 = vld [vmem:[%s14199_s17 + $0x610] sm:$0xf] }
  0xc2   : > { %6907 = vmatpush.bf16.msra.mxu2 %v9331_v34  ;;  %v9491_v34 = vor.u32 %v12976_v21, %v9490_v17  ;;  %v12984_v17 = vld [vmem:[%s14199_s17 + $0x6a4] sm:$0xf0]  ;;  %v9586_v21 = vld [vmem:[%s14199_s17 + $0x720] sm:$0xf] }
  0xc3   : > { %6920 = vmatpush.bf16.msra.mxu3 %v9395_v39  ;;  %v12974_v39 = vld [vmem:[%s14199_s17 + $0x654] sm:$0xf0]  ;;  %v13000_v23 = vld [vmem:[%s14199_s17 + $0x724] sm:$0xf0] }
  0xc4   : > { %6882 = vmatpush.bf16.msra.mxu0 %v9195_v49  ;;  %v13022_v49 = vld [vmem:[%s14199_s17 + $0x7d4] sm:$0xf0]  ;;  %v9483_v50 = vor.u32 %v12974_v39, %v9482_v37  ;;  %v13016_v26 = vld [vmem:[%s14199_s17 + $0x7a4] sm:$0xf0]  ;;  %v9587_v31 = vor.u32 %v13000_v23, %v9586_v21  ;;  %v9578_v39 = vld [vmem:[%s14199_s17 + $0x710] sm:$0xf]  ;;  %v14546_v23 = vpack.c.b16 %v1472_v3, %v1472_v3 }
  0xc5   : > { %6895 = vmatpush.bf16.msra.mxu1 %v9259_v53  ;;  %v9474_v53 = vld [vmem:[%s14199_s17 + $0x640] sm:$0xf]  ;;  %v9675_v56 = vor.u32 %v13022_v49, %v9674_v48  ;;  %v12982_v37 = vld [vmem:[%s14199_s17 + $0x694] sm:$0xf0]  ;;  %v12964_v48 = vld [vmem:[%s14199_s17 + $0x604] sm:$0xf0] }
  0xc6   : > { %6908 = vmatpush.bf16.msra.mxu2 %v9323_v54  ;;  %v12972_v54 = vld [vmem:[%s14199_s17 + $0x644] sm:$0xf0]  ;;  %v9506_v49 = vld [vmem:[%s14199_s17 + $0x680] sm:$0xf]  ;;  %v9722_v3 = vld [vmem:[%s14199_s17 + $0x830] sm:$0xf] }
  0xc7   : > { %6921 = vmatpush.bf16.msra.mxu3 %v9387_v58  ;;  %v9602_v58 = vld [vmem:[%s14199_s17 + $0x740] sm:$0xf]  ;;  %v9475_v62 = vor.u32 %v12972_v54, %v9474_v53  ;;  %v12996_v54 = vld [vmem:[%s14199_s17 + $0x704] sm:$0xf0] }
  0xc8   : > { %6883 = vmatpush.bf16.msra.mxu0 %v9187_v1  ;;  %v9603_v0 = vor.u32 %v13004_v59, %v9602_v58  ;;  %v9466_v1 = vld [vmem:[%s14199_s17 + $0x630] sm:$0xf]  ;;  %v9570_v53 = vld [vmem:[%s14199_s17 + $0x700] sm:$0xf]  ;;  %v13012_v58 = vld [vmem:[%s14199_s17 + $0x784] sm:$0xf0] }
  0xc9   : > { %6896 = vmatpush.bf16.msra.mxu1 %v9251_v6  ;;  %v9594_v6 = vld [vmem:[%s14199_s17 + $0x730] sm:$0xf]  ;;  %v9467_v10 = vor.u32 %v12970_v2, %v9466_v1  ;;  %v373_v59 = vld [vmem:[%s16797_s0 + $0x38] sm:$0xff]  ;;  %v9571_v5 = vor.u32 %v12996_v54, %v9570_v53 }
  0xca   : > { %6909 = vmatpush.bf16.msra.mxu2 %v9315_v7  ;;  %v13002_v7 = vld [vmem:[%s14199_s17 + $0x734] sm:$0xf0]  ;;  %v9882_v1 = vld [vmem:[%s14199_s17 + $0x970] sm:$0xf] }
  0xcb   : > { %6922 = vmatpush.bf16.msra.mxu3 %v9379_v12  ;;  %6884 = vmatmul.bf16.vlgmr.msra.gmra.mxu0 %v14464_v25  ;;  %v9595_v12 = vor.u32 %v13002_v7, %v9594_v6  ;;  %v13074_v2 = vld [vmem:[%s14199_s17 + $0x974] sm:$0xf0]  ;;  %v9946_v6 = vld [vmem:[%s14199_s17 + $0x9f0] sm:$0xf] }
  0xcc   : > { %6928 = vmatpush.bf16.msrb.mxu0 %v9499_v13  ;;  %6897 = vmatmul.bf16.vlgmr.msra.gmra.mxu1 %v14471_v30  ;;  %v9458_v13 = vld [vmem:[%s14199_s17 + $0x620] sm:$0xf]  ;;  %v13090_v7 = vld [vmem:[%s14199_s17 + $0x9f4] sm:$0xf0] }
  0xcd   : > { %6941 = vmatpush.bf16.msrb.mxu1 %v9563_v15  ;;  %6910 = vmatmul.bf16.vlgmr.msra.gmra.mxu2 %v14469_v29  ;;  %v9522_v15 = vld [vmem:[%s14199_s17 + $0x6a0] sm:$0xf]  ;;  %v9459_v27 = vor.u32 %v12968_v14, %v9458_v13  ;;  %v9883_v14 = vor.u32 %v13074_v2, %v9882_v1  ;;  %v9947_v21 = vor.u32 %v13090_v7, %v9946_v6  ;;  %v13050_v7 = vld [vmem:[%s14199_s17 + $0x8b4] sm:$0xf0] }
  0xce   : > { %6954 = vmatpush.bf16.msrb.mxu2 %v9627_v16  ;;  %6923 = vmatmul.bf16.vlgmr.msra.gmra.mxu3 %v14475_v33  ;;  %v9659_v16 = vor.u32 %v13018_v9, %v9658_v8  ;;  %v9523_v28 = vor.u32 %v12984_v17, %v9522_v15  ;;  %v1474_v8 = vunpack.c.l.b16 %v373_v59  ;;  %v1473_v9 = vunpack.c.h.b16 %v372_v55  ;;  %v9746_v15 = vld [vmem:[%s14199_s17 + $0x860] sm:$0xf] }
  0xcf   : > { %6967 = vmatpush.bf16.msrb.mxu3 %v9691_v24  ;;  %v9650_v24 = vld [vmem:[%s14199_s17 + $0x7a0] sm:$0xf] }
  0xd0   : > { %6929 = vmatpush.bf16.msrb.mxu0 %v9491_v34  ;;  %v12966_v34 = vld [vmem:[%s14199_s17 + $0x614] sm:$0xf0]  ;;  %v9810_v17 = vld [vmem:[%s14199_s17 + $0x8e0] sm:$0xf] }
  0xd1   : > { %6942 = vmatpush.bf16.msrb.mxu1 %v9555_v35  ;;  %v9514_v35 = vld [vmem:[%s14199_s17 + $0x690] sm:$0xf]  ;;  %v9451_v47 = vor.u32 %v12966_v34, %v9450_v32  ;;  %v9938_v32 = vld [vmem:[%s14199_s17 + $0x9e0] sm:$0xf]  ;;  %v13088_v34 = vld [vmem:[%s14199_s17 + $0x9e4] sm:$0xf0] }
  0xd2   : > { %6955 = vmatpush.bf16.msrb.mxu2 %v9619_v36  ;;  %v9651_v36 = vor.u32 %v13016_v26, %v9650_v24  ;;  %v13056_v24 = vld [vmem:[%s14199_s17 + $0x8e4] sm:$0xf0]  ;;  %v9874_v26 = vld [vmem:[%s14199_s17 + $0x960] sm:$0xf] }
  0xd3   : > { %6968 = vmatpush.bf16.msrb.mxu3 %v9683_v43  ;;  %v9642_v43 = vld [vmem:[%s14199_s17 + $0x790] sm:$0xf]  ;;  %v9730_v55 = vld [vmem:[%s14199_s17 + $0x840] sm:$0xf] }
  0xd4   : > { %6930 = vmatpush.bf16.msrb.mxu0 %v9483_v50  ;;  %v12980_v50 = vld [vmem:[%s14199_s17 + $0x684] sm:$0xf0] }
  0xd5   : > { %6943 = vmatpush.bf16.msrb.mxu1 %v9547_v51  ;;  %v9515_v51 = vor.u32 %v12982_v37, %v9514_v35  ;;  %v9811_v37 = vor.u32 %v13056_v24, %v9810_v17  ;;  %v9778_v17 = vld [vmem:[%s14199_s17 + $0x8a0] sm:$0xf]  ;;  %v13048_v24 = vld [vmem:[%s14199_s17 + $0x8a4] sm:$0xf0] }
  0xd6   : > { %6956 = vmatpush.bf16.msrb.mxu2 %v9611_v52  ;;  %v9579_v52 = vor.u32 %v12998_v40, %v9578_v39  ;;  %v9738_v40 = vld [vmem:[%s14199_s17 + $0x850] sm:$0xf] }
  0xd7   : > { %6969 = vmatpush.bf16.msrb.mxu3 %v9675_v56  ;;  %v9643_v56 = vor.u32 %v13014_v45, %v9642_v43  ;;  %v13038_v43 = vld [vmem:[%s14199_s17 + $0x854] sm:$0xf0]  ;;  %v9802_v45 = vld [vmem:[%s14199_s17 + $0x8d0] sm:$0xf] }
  0xd8   : > { %6931 = vmatpush.bf16.msrb.mxu0 %v9475_v62  ;;  %v9818_v62 = vld [vmem:[%s14199_s17 + $0x8f0] sm:$0xf] }
  0xd9   : > { %6944 = vmatpush.bf16.msrb.mxu1 %v9539_v63  ;;  %v9443_v63 = vor.u32 %v12964_v48, %v9442_v46  ;;  %v9939_v46 = vor.u32 %v13088_v34, %v9938_v32  ;;  %v9866_v48 = vld [vmem:[%s14199_s17 + $0x950] sm:$0xf]  ;;  %v9906_v32 = vld [vmem:[%s14199_s17 + $0x9a0] sm:$0xf]  ;;  %v13080_v34 = vld [vmem:[%s14199_s17 + $0x9a4] sm:$0xf0] }
  0xda   : > { %6957 = vmatpush.bf16.msrb.mxu2 %v9603_v0  ;;  %v13058_v0 = vld [vmem:[%s14199_s17 + $0x8f4] sm:$0xf0] }
  0xdb   : > { %6970 = vmatpush.bf16.msrb.mxu3 %v9667_v4  ;;  %v9507_v4 = vor.u32 %v12980_v50, %v9506_v49  ;;  %v9819_v13 = vor.u32 %v13058_v0, %v9818_v62  ;;  %v13070_v49 = vld [vmem:[%s14199_s17 + $0x954] sm:$0xf0]  ;;  %v9930_v50 = vld [vmem:[%s14199_s17 + $0x9d0] sm:$0xf]  ;;  %v9922_v62 = vld [vmem:[%s14199_s17 + $0x9c0] sm:$0xf] }
  0xdc   : > { %6932 = vmatpush.bf16.msrb.mxu0 %v9467_v10  ;;  %v9635_v10 = vor.u32 %v13012_v58, %v9634_v57  ;;  %v9867_v54 = vor.u32 %v13070_v49, %v9866_v48  ;;  %v9794_v57 = vld [vmem:[%s14199_s17 + $0x8c0] sm:$0xf]  ;;  %v9834_v48 = vld [vmem:[%s14199_s17 + $0x910] sm:$0xf]  ;;  %v13062_v49 = vld [vmem:[%s14199_s17 + $0x914] sm:$0xf0] }
  0xdd   : > { %6945 = vmatpush.bf16.msrb.mxu1 %v9531_v11  ;;  %v9755_v11 = vor.u32 %v13042_v61, %v9754_v60  ;;  %v9858_v60 = vld [vmem:[%s14199_s17 + $0x940] sm:$0xf]  ;;  %v13068_v61 = vld [vmem:[%s14199_s17 + $0x944] sm:$0xf0] }
  0xde   : > { %6958 = vmatpush.bf16.msrb.mxu2 %v9595_v12  ;;  %v1475_v12 = vunpack.c.h.b16 %v373_v59  ;;  %v13052_v59 = vld [vmem:[%s14199_s17 + $0x8c4] sm:$0xf0]  ;;  %v9859_v2 = vor.u32 %v13068_v61, %v9858_v60  ;;  %v374_v61 = vld [vmem:[%s16797_s0 + $0x40] sm:$0xff] }
  0xdf   : > { %6971 = vmatpush.bf16.msrb.mxu3 %v9659_v16  ;;  %v13040_v16 = vld [vmem:[%s14199_s17 + $0x864] sm:$0xf0]  ;;  %v9795_v1 = vor.u32 %v13052_v59, %v9794_v57  ;;  %v9826_v59 = vld [vmem:[%s14199_s17 + $0x900] sm:$0xf] }
  0xe0   : > { %6933 = vmatpush.bf16.msrb.mxu0 %v9459_v27  ;;  %v13072_v27 = vld [vmem:[%s14199_s17 + $0x964] sm:$0xf0]  ;;  %v14557_v35 = vpack.c.b16 %v1475_v12, %v1475_v12 }
  0xe1   : > { %6946 = vmatpush.bf16.msrb.mxu1 %v9523_v28  ;;  %v14551_v28 = vpack.c.b16 %v1474_v8, %v1474_v8  ;;  %v9875_v39 = vor.u32 %v13072_v27, %v9874_v26  ;;  %v9850_v8 = vld [vmem:[%s14199_s17 + $0x930] sm:$0xf]  ;;  %v9842_v26 = vld [vmem:[%s14199_s17 + $0x920] sm:$0xf]  ;;  %v13064_v27 = vld [vmem:[%s14199_s17 + $0x924] sm:$0xf0] }
  0xe2   : > { %6959 = vmatpush.bf16.msrb.mxu2 %v9587_v31  ;;  %v14553_v31 = vpack.c.b16 %v1473_v9, %v1473_v9  ;;  %v13066_v9 = vld [vmem:[%s14199_s17 + $0x934] sm:$0xf0]  ;;  %v13060_v60 = vld [vmem:[%s14199_s17 + $0x904] sm:$0xf0] }
  0xe3   : > { %6972 = vmatpush.bf16.msrb.mxu3 %v9651_v36  ;;  %v9747_v36 = vor.u32 %v13040_v16, %v9746_v15  ;;  %v9714_v15 = vld [vmem:[%s14199_s17 + $0x820] sm:$0xf]  ;;  %v13032_v16 = vld [vmem:[%s14199_s17 + $0x824] sm:$0xf0] }
  0xe4   : > { %6934 = vmatpush.bf16.msrb.mxu0 %v9451_v47  ;;  %v13054_v47 = vld [vmem:[%s14199_s17 + $0x8d4] sm:$0xf0] }
  0xe5   : > { %6947 = vmatpush.bf16.msrb.mxu1 %v9515_v51  ;;  %v13086_v51 = vld [vmem:[%s14199_s17 + $0x9d4] sm:$0xf0]  ;;  %v9803_v53 = vor.u32 %v13054_v47, %v9802_v45  ;;  %v9770_v45 = vld [vmem:[%s14199_s17 + $0x890] sm:$0xf] }
  0xe6   : > { %6960 = vmatpush.bf16.msrb.mxu2 %v9579_v52  ;;  %v9739_v52 = vor.u32 %v13038_v43, %v9738_v40  ;;  %v9931_v58 = vor.u32 %v13086_v51, %v9930_v50  ;;  %v9706_v40 = vld [vmem:[%s14199_s17 + $0x810] sm:$0xf]  ;;  %v13030_v43 = vld [vmem:[%s14199_s17 + $0x814] sm:$0xf0] }
  0xe7   : > { %6973 = vmatpush.bf16.msrb.mxu3 %v9643_v56  ;;  %v13036_v56 = vld [vmem:[%s14199_s17 + $0x844] sm:$0xf0]  ;;  %v13046_v47 = vld [vmem:[%s14199_s17 + $0x894] sm:$0xf0]  ;;  %v9898_v50 = vld [vmem:[%s14199_s17 + $0x990] sm:$0xf] }
  0xe8   : > { %6935 = vmatpush.bf16.msrb.mxu0 %v9443_v63  ;;  %v13084_v63 = vld [vmem:[%s14199_s17 + $0x9c4] sm:$0xf0]  ;;  %v9731_v0 = vor.u32 %v13036_v56, %v9730_v55  ;;  %v13078_v51 = vld [vmem:[%s14199_s17 + $0x994] sm:$0xf0]  ;;  %v9762_v55 = vld [vmem:[%s14199_s17 + $0x880] sm:$0xf]  ;;  %v9771_v57 = vor.u32 %v13046_v47, %v9770_v45 }
  0xe9   : > { %6948 = vmatpush.bf16.msrb.mxu1 %v9507_v4  ;;  %v13034_v4 = vld [vmem:[%s14199_s17 + $0x834] sm:$0xf0]  ;;  %v9923_v6 = vor.u32 %v13084_v63, %v9922_v62  ;;  %v13044_v56 = vld [vmem:[%s14199_s17 + $0x884] sm:$0xf0]  ;;  %v9899_v62 = vor.u32 %v13078_v51, %v9898_v50  ;;  %v9890_v63 = vld [vmem:[%s14199_s17 + $0x980] sm:$0xf] }
  0xea   : > { %6961 = vmatpush.bf16.msrb.mxu2 %v9571_v5  ;;  %v9786_v5 = vld [vmem:[%s14199_s17 + $0x8b0] sm:$0xf]  ;;  %v9723_v12 = vor.u32 %v13034_v4, %v9722_v3  ;;  %v13106_v3 = vld [vmem:[%s14199_s17 + $0xa74] sm:$0xf0]  ;;  %v10194_v47 = vld [vmem:[%s14199_s17 + $0xbe0] sm:$0xf] }
  0xeb   : > { %6974 = vmatpush.bf16.msrb.mxu3 %v9635_v10  ;;  %6936 = vmatmul.bf16.vlgmr.msrb.gmra.mxu0 %v14546_v23  ;;  %v9914_v10 = vld [vmem:[%s14199_s17 + $0x9b0] sm:$0xf] }
  0xec   : > { %6980 = vmatpush.bf16.msra.mxu0 %v9755_v11  ;;  %6949 = vmatmul.bf16.vlgmr.msrb.gmra.mxu1 %v14553_v31  ;;  %v13082_v11 = vld [vmem:[%s14199_s17 + $0x9b4] sm:$0xf0]  ;;  %v10074_v4 = vld [vmem:[%s14199_s17 + $0xaf0] sm:$0xf] }
  0xed   : > { %6993 = vmatpush.bf16.msra.mxu1 %v9819_v13  ;;  %6962 = vmatmul.bf16.vlgmr.msrb.gmra.mxu2 %v14551_v28  ;;  %v9787_v13 = vor.u32 %v13050_v7, %v9786_v5  ;;  %v10138_v7 = vld [vmem:[%s14199_s17 + $0xb70] sm:$0xf] }
  0xee   : > { %7006 = vmatpush.bf16.msra.mxu2 %v9883_v14  ;;  %6975 = vmatmul.bf16.vlgmr.msrb.gmra.mxu3 %v14557_v35  ;;  %v9851_v14 = vor.u32 %v13066_v9, %v9850_v8  ;;  %v13138_v8 = vld [vmem:[%s14199_s17 + $0xb74] sm:$0xf0]  ;;  %v1476_v9 = vunpack.c.l.b16 %v374_v61 }
  0xef   : > { %7019 = vmatpush.bf16.msra.mxu3 %v9947_v21  ;;  %v9915_v21 = vor.u32 %v13082_v11, %v9914_v10  ;;  %v9763_v10 = vor.u32 %v13044_v56, %v9762_v55  ;;  %v9827_v11 = vor.u32 %v13060_v60, %v9826_v59  ;;  %v10058_v55 = vld [vmem:[%s14199_s17 + $0xad0] sm:$0xf]  ;;  %v13134_v59 = vld [vmem:[%s14199_s17 + $0xb54] sm:$0xf0] }
  0xf0   : > { %6981 = vmatpush.bf16.msra.mxu0 %v9747_v36  ;;  %v9715_v36 = vor.u32 %v13032_v16, %v9714_v15  ;;  %v1477_v15 = vunpack.c.h.b16 %v374_v61  ;;  %v10186_v60 = vld [vmem:[%s14199_s17 + $0xbd0] sm:$0xf]  ;;  %v13150_v61 = vld [vmem:[%s14199_s17 + $0xbd4] sm:$0xf0] }
  0xf1   : > { %6994 = vmatpush.bf16.msra.mxu1 %v9811_v37  ;;  %v9779_v37 = vor.u32 %v13048_v24, %v9778_v17 }
  0xf2   : > { %7007 = vmatpush.bf16.msra.mxu2 %v9875_v39  ;;  %v9843_v39 = vor.u32 %v13064_v27, %v9842_v26  ;;  %v10139_v26 = vor.u32 %v13138_v8, %v10138_v7  ;;  %v10002_v27 = vld [vmem:[%s14199_s17 + $0xa60] sm:$0xf]  ;;  %v13132_v7 = vld [vmem:[%s14199_s17 + $0xb44] sm:$0xf0] }
  0xf3   : > { %7020 = vmatpush.bf16.msra.mxu3 %v9939_v46  ;;  %v9907_v46 = vor.u32 %v13080_v34, %v9906_v32  ;;  %v13104_v32 = vld [vmem:[%s14199_s17 + $0xa64] sm:$0xf0]  ;;  %v10066_v34 = vld [vmem:[%s14199_s17 + $0xae0] sm:$0xf] }
  0xf4   : > { %6982 = vmatpush.bf16.msra.mxu0 %v9739_v52  ;;  %v9698_v52 = vld [vmem:[%s14199_s17 + $0x800] sm:$0xf]  ;;  %v10003_v50 = vor.u32 %v13104_v32, %v10002_v27  ;;  %v10170_v27 = vld [vmem:[%s14199_s17 + $0xbb0] sm:$0xf]  ;;  %v13146_v32 = vld [vmem:[%s14199_s17 + $0xbb4] sm:$0xf0] }
  0xf5   : > { %6995 = vmatpush.bf16.msra.mxu1 %v9803_v53  ;;  %v9707_v53 = vor.u32 %v13030_v43, %v9706_v40  ;;  %v10130_v40 = vld [vmem:[%s14199_s17 + $0xb60] sm:$0xf]  ;;  %v13136_v43 = vld [vmem:[%s14199_s17 + $0xb64] sm:$0xf0] }
  0xf6   : > { %7008 = vmatpush.bf16.msra.mxu2 %v9867_v54  ;;  %v13028_v54 = vld [vmem:[%s14199_s17 + $0x804] sm:$0xf0]  ;;  %v10178_v8 = vld [vmem:[%s14199_s17 + $0xbc0] sm:$0xf] }
  0xf7   : > { %7021 = vmatpush.bf16.msra.mxu3 %v9931_v58  ;;  %v9835_v58 = vor.u32 %v13062_v49, %v9834_v48  ;;  %v9699_v5 = vor.u32 %v13028_v54, %v9698_v52  ;;  %v13152_v48 = vld [vmem:[%s14199_s17 + $0xbe4] sm:$0xf0]  ;;  %v10131_v52 = vor.u32 %v13136_v43, %v10130_v40  ;;  %v13102_v54 = vld [vmem:[%s14199_s17 + $0xa54] sm:$0xf0] }
  0xf8   : > { %6983 = vmatpush.bf16.msra.mxu0 %v9731_v0  ;;  %v13076_v0 = vld [vmem:[%s14199_s17 + $0x984] sm:$0xf0]  ;;  %v10195_v56 = vor.u32 %v13152_v48, %v10194_v47  ;;  %v10034_v47 = vld [vmem:[%s14199_s17 + $0xaa0] sm:$0xf] }
  0xf9   : > { %6996 = vmatpush.bf16.msra.mxu1 %v9795_v1  ;;  %v375_v1 = vld [vmem:[%s16797_s0 + $0x48] sm:$0xff]  ;;  %v9891_v16 = vor.u32 %v13076_v0, %v9890_v63 }
  0xfa   : > { %7009 = vmatpush.bf16.msra.mxu2 %v9859_v2  ;;  %v10010_v2 = vld [vmem:[%s14199_s17 + $0xa70] sm:$0xf]  ;;  %v13096_v43 = vld [vmem:[%s14199_s17 + $0xa24] sm:$0xf0] }
  0xfb   : > { %7022 = vmatpush.bf16.msra.mxu3 %v9923_v6  ;;  %v13122_v6 = vld [vmem:[%s14199_s17 + $0xaf4] sm:$0xf0]  ;;  %v10011_v17 = vor.u32 %v13106_v3, %v10010_v2  ;;  %v13100_v2 = vld [vmem:[%s14199_s17 + $0xa44] sm:$0xf0]  ;;  %v10050_v3 = vld [vmem:[%s14199_s17 + $0xac0] sm:$0xf] }
  0xfc   : > { %6984 = vmatpush.bf16.msra.mxu0 %v9723_v12  ;;  %v10202_v12 = vld [vmem:[%s14199_s17 + $0xbf0] sm:$0xf]  ;;  %v10075_v24 = vor.u32 %v13122_v6, %v10074_v4  ;;  %v10187_v4 = vor.u32 %v13150_v61, %v10186_v60  ;;  %v10114_v6 = vld [vmem:[%s14199_s17 + $0xb40] sm:$0xf]  ;;  %v13094_v61 = vld [vmem:[%s14199_s17 + $0xa14] sm:$0xf0] }
  0xfd   : > { %6997 = vmatpush.bf16.msra.mxu1 %v9787_v13  ;;  %v13154_v13 = vld [vmem:[%s14199_s17 + $0xbf4] sm:$0xf0]  ;;  %v9962_v60 = vld [vmem:[%s14199_s17 + $0xa10] sm:$0xf] }
  0xfe   : > { %7010 = vmatpush.bf16.msra.mxu2 %v9851_v14  ;;  %v1478_v14 = vunpack.c.l.b16 %v375_v1 }
  0xff   : > { %7023 = vmatpush.bf16.msra.mxu3 %v9915_v21  ;;  %v1479_v21 = vunpack.c.h.b16 %v375_v1  ;;  %v9986_v1 = vld [vmem:[%s14199_s17 + $0xa40] sm:$0xf] }
 0x100   : > { %6985 = vmatpush.bf16.msra.mxu0 %v9715_v36  ;;  %v10203_v36 = vor.u32 %v13154_v13, %v10202_v12  ;;  %v14633_v45 = vpack.c.b16 %v1478_v14, %v1478_v14  ;;  %v10115_v13 = vor.u32 %v13132_v7, %v10114_v6  ;;  %v13098_v14 = vld [vmem:[%s14199_s17 + $0xa34] sm:$0xf0]  ;;  %v9954_v7 = vld [vmem:[%s14199_s17 + $0xa00] sm:$0xf] }
 0x101   : > { %6998 = vmatpush.bf16.msra.mxu1 %v9779_v37  ;;  %v14628_v37 = vpack.c.b16 %v1476_v9, %v1476_v9  ;;  %v14639_v49 = vpack.c.b16 %v1479_v21, %v1479_v21  ;;  %v13148_v9 = vld [vmem:[%s14199_s17 + $0xbc4] sm:$0xf0]  ;;  %v10106_v21 = vld [vmem:[%s14199_s17 + $0xb30] sm:$0xf]  ;;  %v13142_v6 = vld [vmem:[%s14199_s17 + $0xb94] sm:$0xf0] }
 0x102   : > { %7011 = vmatpush.bf16.msra.mxu2 %v9843_v39  ;;  %v13120_v39 = vld [vmem:[%s14199_s17 + $0xae4] sm:$0xf0] }
 0x103   : > { %7024 = vmatpush.bf16.msra.mxu3 %v9907_v46  ;;  %v14635_v46 = vpack.c.b16 %v1477_v15, %v1477_v15  ;;  %v10067_v51 = vor.u32 %v13120_v39, %v10066_v34  ;;  %v10042_v15 = vld [vmem:[%s14199_s17 + $0xab0] sm:$0xf] }
 0x104   : > { %6986 = vmatpush.bf16.msra.mxu0 %v9707_v53  ;;  %v9994_v53 = vld [vmem:[%s14199_s17 + $0xa50] sm:$0xf] }
 0x105   : > { %6999 = vmatpush.bf16.msra.mxu1 %v9771_v57  ;;  %v13118_v57 = vld [vmem:[%s14199_s17 + $0xad4] sm:$0xf0] }
 0x106   : > { %7012 = vmatpush.bf16.msra.mxu2 %v9835_v58  ;;  %v10122_v58 = vld [vmem:[%s14199_s17 + $0xb50] sm:$0xf]  ;;  %v10059_v63 = vor.u32 %v13118_v57, %v10058_v55  ;;  %v13144_v55 = vld [vmem:[%s14199_s17 + $0xba4] sm:$0xf0] }
 0x107   : > { %7025 = vmatpush.bf16.msra.mxu3 %v9899_v62  ;;  %v9995_v62 = vor.u32 %v13102_v54, %v9994_v53  ;;  %v10123_v0 = vor.u32 %v13134_v59, %v10122_v58  ;;  %v13128_v53 = vld [vmem:[%s14199_s17 + $0xb24] sm:$0xf0]  ;;  %v10162_v54 = vld [vmem:[%s14199_s17 + $0xba0] sm:$0xf] }
 0x108   : > { %6987 = vmatpush.bf16.msra.mxu0 %v9699_v5  ;;  %v13116_v5 = vld [vmem:[%s14199_s17 + $0xac4] sm:$0xf0]  ;;  %v6781_v57 = vpop.f32.mrf.mxu0 }
 0x109   : > { %7000 = vmatpush.bf16.msra.mxu1 %v9763_v10  ;;  %v9987_v10 = vor.u32 %v13100_v2, %v9986_v1  ;;  %v10051_v12 = vor.u32 %v13116_v5, %v10050_v3  ;;  %v10163_v1 = vor.u32 %v13144_v55, %v10162_v54  ;;  %v13110_v2 = vld [vmem:[%s14199_s17 + $0xa94] sm:$0xf0]  ;;  %v10090_v3 = vld [vmem:[%s14199_s17 + $0xb10] sm:$0xf] }
 0x10a   : > { %7013 = vmatpush.bf16.msra.mxu2 %v9827_v11  ;;  %v9978_v11 = vld [vmem:[%s14199_s17 + $0xa30] sm:$0xf] }
 0x10b   : > { %7026 = vmatpush.bf16.msra.mxu3 %v9891_v16  ;;  %6988 = vmatmul.bf16.vlgmr.msra.gmra.mxu0 %v14628_v37  ;;  %v13114_v16 = vld [vmem:[%s14199_s17 + $0xab4] sm:$0xf0]  ;;  %v9979_v34 = vor.u32 %v13098_v14, %v9978_v11  ;;  %v10154_v5 = vld [vmem:[%s14199_s17 + $0xb90] sm:$0xf]  ;;  %v10018_v11 = vld [vmem:[%s14199_s17 + $0xa80] sm:$0xf] }
 0x10c   : > { %7032 = vmatpush.bf16.msrb.mxu0 %v10011_v17  ;;  %7001 = vmatmul.bf16.vlgmr.msra.gmra.mxu1 %v14635_v46  ;;  %v10179_v17 = vor.u32 %v13148_v9, %v10178_v8  ;;  %v10043_v39 = vor.u32 %v13114_v16, %v10042_v15  ;;  %v9963_v9 = vor.u32 %v13094_v61, %v9962_v60  ;;  %v10082_v15 = vld [vmem:[%s14199_s17 + $0xb00] sm:$0xf]  ;;  %v13124_v16 = vld [vmem:[%s14199_s17 + $0xb04] sm:$0xf0] }
 0x10d   : > { %7045 = vmatpush.bf16.msrb.mxu1 %v10075_v24  ;;  %7014 = vmatmul.bf16.vlgmr.msra.gmra.mxu2 %v14633_v45  ;;  %v13130_v24 = vld [vmem:[%s14199_s17 + $0xb34] sm:$0xf0] }
 0x10e   : > { %7058 = vmatpush.bf16.msrb.mxu2 %v10139_v26  ;;  %7027 = vmatmul.bf16.vlgmr.msra.gmra.mxu3 %v14639_v49  ;;  %v1422_v26 = vld [vmem:[%s293_s25] sm:$0x3]  ;;  %v10107_v40 = vor.u32 %v13130_v24, %v10106_v21  ;;  %v10155_v24 = vor.u32 %v13142_v6, %v10154_v5 }
 0x10f   : > { %7071 = vmatpush.bf16.msrb.mxu3 %v10203_v36  ;;  %v9970_v36 = vld [vmem:[%s14199_s17 + $0xa20] sm:$0xf]  ;;  %v1424_v48 = vperm.slane %v1422_v26, 0 }
 0x110   : > { %7033 = vmatpush.bf16.msrb.mxu0 %v10003_v50  ;;  %v10171_v50 = vor.u32 %v13146_v32, %v10170_v27  ;;  %v6807_v21 = vpop.f32.mrf.mxu2  ;;  %v10146_v26 = vld [vmem:[%s14199_s17 + $0xb80] sm:$0xf]  ;;  %v13140_v27 = vld [vmem:[%s14199_s17 + $0xb84] sm:$0xf0]  ;;  %v377_v32 = vld [vmem:[%s16797_s0 + $0x58] sm:$0xff]  ;;  %v6783_v54 = vpop.f32.mrf.mxu0 }
 0x111   : > { %7046 = vmatpush.bf16.msrb.mxu1 %v10067_v51  ;;  %v13112_v51 = vld [vmem:[%s14199_s17 + $0xaa4] sm:$0xf0]  ;;  %v10322_v5 = vld [vmem:[%s14199_s17 + $0xce0] sm:$0xf] }
 0x112   : > { %7059 = vmatpush.bf16.msrb.mxu2 %v10131_v52  ;;  %v10098_v52 = vld [vmem:[%s14199_s17 + $0xb20] sm:$0xf]  ;;  %v10035_v58 = vor.u32 %v13112_v51, %v10034_v47  ;;  %v13202_v51 = vld [vmem:[%s14199_s17 + $0xd74] sm:$0xf0] }
 0x113   : > { %7072 = vmatpush.bf16.msrb.mxu3 %v10195_v56  ;;  %v9971_v56 = vor.u32 %v13096_v43, %v9970_v36  ;;  %v10099_v59 = vor.u32 %v13128_v53, %v10098_v52  ;;  %v6820_v36 = vpop.f32.mrf.mxu3  ;;  %v10330_v43 = vld [vmem:[%s14199_s17 + $0xcf0] sm:$0xf]  ;;  %v10242_v54 = vld [vmem:[%s14199_s17 + $0xc40] sm:$0xf] }
 0x114   : > { %7034 = vmatpush.bf16.msrb.mxu0 %v9995_v62  ;;  %v10026_v62 = vld [vmem:[%s14199_s17 + $0xa90] sm:$0xf] }
 0x115   : > { %7047 = vmatpush.bf16.msrb.mxu1 %v10059_v63  ;;  %v6782_v63 = vadd.f32 %v6781_v57, %v1424_v48  ;;  %v13186_v48 = vld [vmem:[%s14199_s17 + $0xcf4] sm:$0xf0]  ;;  %v10458_v57 = vld [vmem:[%s14199_s17 + $0xdf0] sm:$0xf] }
 0x116   : > { %7060 = vmatpush.bf16.msrb.mxu2 %v10123_v0  ;;  %v6794_v0 = vpop.f32.mrf.mxu1 }
 0x117   : > { %7073 = vmatpush.bf16.msrb.mxu3 %v10187_v4  ;;  %v13126_v4 = vld [vmem:[%s14199_s17 + $0xb14] sm:$0xf0]  ;;  %v6795_v8 = vadd.f32 %v6794_v0, %v6782_v63  ;;  %v1483_v0 = vunpack.c.h.b16 %v377_v32 }
 0x118   : > { %7035 = vmatpush.bf16.msrb.mxu0 %v9987_v10  ;;  %v13092_v10 = vld [vmem:[%s14199_s17 + $0xa04] sm:$0xf0]  ;;  %v10091_v14 = vor.u32 %v13126_v4, %v10090_v3  ;;  %v10258_v3 = vld [vmem:[%s14199_s17 + $0xc60] sm:$0xf] }
 0x119   : > { %7048 = vmatpush.bf16.msrb.mxu1 %v10051_v12  ;;  %v13108_v12 = vld [vmem:[%s14199_s17 + $0xa84] sm:$0xf0]  ;;  %v9955_v47 = vor.u32 %v13092_v10, %v9954_v7 }
 0x11a   : > { %7061 = vmatpush.bf16.msrb.mxu2 %v10115_v13  ;;  %v10027_v13 = vor.u32 %v13110_v2, %v10026_v62  ;;  %v10019_v55 = vor.u32 %v13108_v12, %v10018_v11  ;;  %v10147_v62 = vor.u32 %v13140_v27, %v10146_v26  ;;  %v13168_v4 = vld [vmem:[%s14199_s17 + $0xc64] sm:$0xf0]  ;;  %v10250_v27 = vld [vmem:[%s14199_s17 + $0xc50] sm:$0xf] }
 0x11b   : > { %7074 = vmatpush.bf16.msrb.mxu3 %v10179_v17  ;;  %v376_v17 = vld [vmem:[%s16797_s0 + $0x50] sm:$0xff]  ;;  %v13200_v10 = vld [vmem:[%s14199_s17 + $0xd64] sm:$0xf0] }
 0x11c   : > { %7036 = vmatpush.bf16.msrb.mxu0 %v9979_v34  ;;  %v6808_v34 = vadd.f32 %v6807_v21, %v6795_v8  ;;  %v1480_v52 = vunpack.c.l.b16 %v376_v17  ;;  %v1481_v60 = vunpack.c.h.b16 %v376_v17  ;;  %v13184_v8 = vld [vmem:[%s14199_s17 + $0xce4] sm:$0xf0]  ;;  %v10259_v17 = vor.u32 %v13168_v4, %v10258_v3  ;;  %v6822_v21 = vpop.f32.mrf.mxu3  ;;  %v10234_v3 = vld [vmem:[%s14199_s17 + $0xc30] sm:$0xf]  ;;  %v13162_v4 = vld [vmem:[%s14199_s17 + $0xc34] sm:$0xf0] }
 0x11d   : > { %7049 = vmatpush.bf16.msrb.mxu1 %v10043_v39  ;;  %v10266_v39 = vld [vmem:[%s14199_s17 + $0xc70] sm:$0xf] }
 0x11e   : > { %7062 = vmatpush.bf16.msrb.mxu2 %v10107_v40  ;;  %v13170_v40 = vld [vmem:[%s14199_s17 + $0xc74] sm:$0xf0]  ;;  %v14707_v53 = vadd.f32 %v6820_v36, %v6808_v34  ;;  %v6796_v61 = vpop.f32.mrf.mxu1  ;;  %v14714_v7 = vpack.c.b16 %v1480_v52, %v1480_v52  ;;  %v14721_v12 = vpack.c.b16 %v1481_v60, %v1481_v60  ;;  %v10314_v34 = vld [vmem:[%s14199_s17 + $0xcd0] sm:$0xf]  ;;  %v13196_v60 = vld [vmem:[%s14199_s17 + $0xd44] sm:$0xf0] }
 0x11f   : > { %7075 = vmatpush.bf16.msrb.mxu3 %v10171_v50  ;;  %v10394_v50 = vld [vmem:[%s14199_s17 + $0xd70] sm:$0xf]  ;;  %v10267_v63 = vor.u32 %v13170_v40, %v10266_v39  ;;  %v13182_v39 = vld [vmem:[%s14199_s17 + $0xcd4] sm:$0xf0]  ;;  %v10434_v61 = vld [vmem:[%s14199_s17 + $0xdc0] sm:$0xf] }
 0x120   : > { %7037 = vmatpush.bf16.msrb.mxu0 %v9971_v56  ;;  %v10083_v56 = vor.u32 %v13124_v16, %v10082_v15  ;;  %v10395_v2 = vor.u32 %v13202_v51, %v10394_v50  ;;  %v6809_v15 = vpop.f32.mrf.mxu2  ;;  %v14725_v16 = vpack.c.b16 %v1483_v0, %v1483_v0  ;;  %v10378_v40 = vld [vmem:[%s14199_s17 + $0xd50] sm:$0xf]  ;;  %v10315_v51 = vor.u32 %v13182_v39, %v10314_v34  ;;  %v10290_v34 = vld [vmem:[%s14199_s17 + $0xca0] sm:$0xf] }
 0x121   : > { %7050 = vmatpush.bf16.msrb.mxu1 %v10035_v58  ;;  %v13218_v58 = vld [vmem:[%s14199_s17 + $0xdf4] sm:$0xf0]  ;;  %v10426_v15 = vld [vmem:[%s14199_s17 + $0xdb0] sm:$0xf] }
 0x122   : > { %7063 = vmatpush.bf16.msrb.mxu2 %v10099_v59  ;;  %v1482_v59 = vunpack.c.l.b16 %v377_v32  ;;  %v10459_v6 = vor.u32 %v13218_v58, %v10458_v57  ;;  %v13166_v32 = vld [vmem:[%s14199_s17 + $0xc54] sm:$0xf0]  ;;  %v13180_v58 = vld [vmem:[%s14199_s17 + $0xcc4] sm:$0xf0] }
 0x123   : > { %7076 = vmatpush.bf16.msrb.mxu3 %v10163_v1  ;;  %v10331_v1 = vor.u32 %v13186_v48, %v10330_v43  ;;  %v13198_v43 = vld [vmem:[%s14199_s17 + $0xd54] sm:$0xf0]  ;;  %v10251_v50 = vor.u32 %v13166_v32, %v10250_v27  ;;  %v10226_v27 = vld [vmem:[%s14199_s17 + $0xc20] sm:$0xf]  ;;  %v13160_v32 = vld [vmem:[%s14199_s17 + $0xc24] sm:$0xf0] }
 0x124   : > { %7038 = vmatpush.bf16.msrb.mxu0 %v9963_v9  ;;  %v10386_v9 = vld [vmem:[%s14199_s17 + $0xd60] sm:$0xf]  ;;  %v14719_v11 = vpack.c.b16 %v1482_v59, %v1482_v59  ;;  %v13214_v48 = vld [vmem:[%s14199_s17 + $0xdd4] sm:$0xf0]  ;;  %v10379_v52 = vor.u32 %v13198_v43, %v10378_v40  ;;  %v13176_v40 = vld [vmem:[%s14199_s17 + $0xca4] sm:$0xf0] }
 0x125   : > { %7051 = vmatpush.bf16.msrb.mxu1 %v10027_v13  ;;  %v10450_v13 = vld [vmem:[%s14199_s17 + $0xde0] sm:$0xf]  ;;  %v10387_v26 = vor.u32 %v13200_v10, %v10386_v9  ;;  %v13178_v10 = vld [vmem:[%s14199_s17 + $0xcb4] sm:$0xf0] }
 0x126   : > { %7064 = vmatpush.bf16.msrb.mxu2 %v10091_v14  ;;  %v13216_v14 = vld [vmem:[%s14199_s17 + $0xde4] sm:$0xf0]  ;;  %v10370_v59 = vld [vmem:[%s14199_s17 + $0xd40] sm:$0xf] }
 0x127   : > { %7077 = vmatpush.bf16.msrb.mxu3 %v10155_v24  ;;  %v10323_v24 = vor.u32 %v13184_v8, %v10322_v5  ;;  %v10451_v36 = vor.u32 %v13216_v14, %v10450_v13  ;;  %v10298_v5 = vld [vmem:[%s14199_s17 + $0xcb0] sm:$0xf]  ;;  %v13194_v14 = vld [vmem:[%s14199_s17 + $0xd34] sm:$0xf0]  ;;  %v10354_v43 = vld [vmem:[%s14199_s17 + $0xd20] sm:$0xf] }
 0x128   : > { %7039 = vmatpush.bf16.msrb.mxu0 %v9955_v47  ;;  %v10442_v47 = vld [vmem:[%s14199_s17 + $0xdd0] sm:$0xf]  ;;  %v6833_v0 = vpop.f32.mrf.mxu0 }
 0x129   : > { %7052 = vmatpush.bf16.msrb.mxu1 %v10019_v55  ;;  %v13164_v55 = vld [vmem:[%s14199_s17 + $0xc44] sm:$0xf0]  ;;  %v10443_v57 = vor.u32 %v13214_v48, %v10442_v47  ;;  %v6846_v8 = vpop.f32.mrf.mxu1  ;;  %v10362_v13 = vld [vmem:[%s14199_s17 + $0xd30] sm:$0xf] }
 0x12a   : > { %7065 = vmatpush.bf16.msrb.mxu2 %v10083_v56  ;;  %v10306_v56 = vld [vmem:[%s14199_s17 + $0xcc0] sm:$0xf]  ;;  %v13192_v47 = vld [vmem:[%s14199_s17 + $0xd24] sm:$0xf0] }
 0x12b   : > { %7078 = vmatpush.bf16.msrb.mxu3 %v10147_v62  ;;  %7040 = vmatmul.bf16.vlgmr.msrb.gmra.mxu0 %v14714_v7  ;;  %v13212_v62 = vld [vmem:[%s14199_s17 + $0xdc4] sm:$0xf0] }
 0x12c   : > { %7084 = vmatpush.bf16.msra.mxu0 %v10267_v63  ;;  %7053 = vmatmul.bf16.vlgmr.msrb.gmra.mxu1 %v14721_v12  ;;  %v10243_v63 = vor.u32 %v13164_v55, %v10242_v54  ;;  %v10435_v9 = vor.u32 %v13212_v62, %v10434_v61  ;;  %v10227_v54 = vor.u32 %v13160_v32, %v10226_v27  ;;  %v10282_v61 = vld [vmem:[%s14199_s17 + $0xc90] sm:$0xf]  ;;  %v13204_v27 = vld [vmem:[%s14199_s17 + $0xd84] sm:$0xf0] }
 0x12d   : > { %7097 = vmatpush.bf16.msra.mxu1 %v10331_v1  ;;  %7066 = vmatmul.bf16.vlgmr.msrb.gmra.mxu2 %v14719_v11  ;;  %v10307_v1 = vor.u32 %v13180_v58, %v10306_v56  ;;  %v10355_v58 = vor.u32 %v13192_v47, %v10354_v43  ;;  %v379_v32 = vld [vmem:[%s16797_s0 + $0x68] sm:$0xff]  ;;  %v13250_v47 = vld [vmem:[%s14199_s17 + $0xef4] sm:$0xf0] }
 0x12e   : > { %7110 = vmatpush.bf16.msra.mxu2 %v10395_v2  ;;  %7079 = vmatmul.bf16.vlgmr.msrb.gmra.mxu3 %v14725_v16  ;;  %v10371_v2 = vor.u32 %v13196_v60, %v10370_v59  ;;  %v10218_v59 = vld [vmem:[%s14199_s17 + $0xc10] sm:$0xf]  ;;  %v13158_v60 = vld [vmem:[%s14199_s17 + $0xc14] sm:$0xf0] }
 0x12f   : > { %7123 = vmatpush.bf16.msra.mxu3 %v10459_v6  ;;  %v6834_v6 = vadd.f32 %v6833_v0, %v14707_v53  ;;  %v10299_v53 = vor.u32 %v13178_v10, %v10298_v5  ;;  %v13174_v0 = vld [vmem:[%s14199_s17 + $0xc94] sm:$0xf0]  ;;  %v10210_v5 = vld [vmem:[%s14199_s17 + $0xc00] sm:$0xf]  ;;  %v13172_v10 = vld [vmem:[%s14199_s17 + $0xc84] sm:$0xf0] }
 0x130   : > { %7085 = vmatpush.bf16.msra.mxu0 %v10259_v17  ;;  %v13210_v17 = vld [vmem:[%s14199_s17 + $0xdb4] sm:$0xf0]  ;;  %v6835_v56 = vpop.f32.mrf.mxu0 }
 0x131   : > { %7098 = vmatpush.bf16.msra.mxu1 %v10323_v24  ;;  %v6847_v21 = vadd.f32 %v6846_v8, %v6834_v6  ;;  %v10235_v24 = vor.u32 %v13162_v4, %v10234_v3  ;;  %v10427_v39 = vor.u32 %v13210_v17, %v10426_v15  ;;  %v6848_v62 = vpop.f32.mrf.mxu1  ;;  %v10410_v3 = vld [vmem:[%s14199_s17 + $0xd90] sm:$0xf]  ;;  %v13206_v4 = vld [vmem:[%s14199_s17 + $0xd94] sm:$0xf0]  ;;  %v10219_v6 = vor.u32 %v13158_v60, %v10218_v59  ;;  %v13156_v8 = vld [vmem:[%s14199_s17 + $0xc04] sm:$0xf0] }
 0x132   : > { %7111 = vmatpush.bf16.msra.mxu2 %v10387_v26  ;;  %v10363_v26 = vor.u32 %v13194_v14, %v10362_v13  ;;  %v10283_v13 = vor.u32 %v13174_v0, %v10282_v61  ;;  %v10338_v15 = vld [vmem:[%s14199_s17 + $0xd00] sm:$0xf]  ;;  %v13188_v17 = vld [vmem:[%s14199_s17 + $0xd04] sm:$0xf0]  ;;  %v10211_v43 = vor.u32 %v13156_v8, %v10210_v5  ;;  %v10714_v56 = vld [vmem:[%s14199_s17 + $0xff0] sm:$0xf]  ;;  %v1487_v62 = vunpack.c.h.b16 %v379_v32 }
 0x133   : > { %7124 = vmatpush.bf16.msra.mxu3 %v10451_v36  ;;  %v6859_v36 = vpop.f32.mrf.mxu2  ;;  %v10642_v8 = vld [vmem:[%s14199_s17 + $0xf60] sm:$0xf] }
 0x134   : > { %7086 = vmatpush.bf16.msra.mxu0 %v10251_v50  ;;  %v6860_v48 = vadd.f32 %v6859_v36, %v6847_v21  ;;  %v6872_v50 = vpop.f32.mrf.mxu3  ;;  %v378_v21 = vld [vmem:[%s16797_s0 + $0x60] sm:$0xff]  ;;  %v10522_v36 = vld [vmem:[%s14199_s17 + $0xe70] sm:$0xf] }
 0x135   : > { %7099 = vmatpush.bf16.msra.mxu1 %v10315_v51  ;;  %v10418_v51 = vld [vmem:[%s14199_s17 + $0xda0] sm:$0xf]  ;;  %v1485_v59 = vunpack.c.h.b16 %v378_v21 }
 0x136   : > { %7112 = vmatpush.bf16.msra.mxu2 %v10379_v52  ;;  %v13208_v52 = vld [vmem:[%s14199_s17 + $0xda4] sm:$0xf0]  ;;  %v14764_v55 = vadd.f32 %v6872_v50, %v6860_v48  ;;  %v10650_v48 = vld [vmem:[%s14199_s17 + $0xf70] sm:$0xf]  ;;  %v13266_v50 = vld [vmem:[%s14199_s17 + $0xf74] sm:$0xf0] }
 0x137   : > { %7125 = vmatpush.bf16.msra.mxu3 %v10443_v57  ;;  %v10291_v57 = vor.u32 %v13176_v40, %v10290_v34  ;;  %v10586_v40 = vld [vmem:[%s14199_s17 + $0xef0] sm:$0xf]  ;;  %v10651_v0 = vor.u32 %v13266_v50, %v10650_v48 }
 0x138   : > { %7087 = vmatpush.bf16.msra.mxu0 %v10243_v63  ;;  %v10419_v63 = vor.u32 %v13208_v52, %v10418_v51  ;;  %v1484_v51 = vunpack.c.l.b16 %v378_v21 }
 0x139   : > { %7100 = vmatpush.bf16.msra.mxu1 %v10307_v1  ;;  %v10346_v1 = vld [vmem:[%s14199_s17 + $0xd10] sm:$0xf] }
 0x13a   : > { %7113 = vmatpush.bf16.msra.mxu2 %v10371_v2  ;;  %v13190_v2 = vld [vmem:[%s14199_s17 + $0xd14] sm:$0xf0]  ;;  %v14799_v5 = vpack.c.b16 %v1484_v51, %v1484_v51 }
 0x13b   : > { %7126 = vmatpush.bf16.msra.mxu3 %v10435_v9  ;;  %v10274_v9 = vld [vmem:[%s14199_s17 + $0xc80] sm:$0xf]  ;;  %v10347_v14 = vor.u32 %v13190_v2, %v10346_v1  ;;  %v13232_v2 = vld [vmem:[%s14199_s17 + $0xe64] sm:$0xf0] }
 0x13c   : > { %7088 = vmatpush.bf16.msra.mxu0 %v10235_v24  ;;  %v6861_v24 = vpop.f32.mrf.mxu2  ;;  %v6874_v34 = vpop.f32.mrf.mxu3  ;;  %v10275_v52 = vor.u32 %v13172_v10, %v10274_v9  ;;  %v10514_v1 = vld [vmem:[%s14199_s17 + $0xe60] sm:$0xf]  ;;  %v13264_v9 = vld [vmem:[%s14199_s17 + $0xf64] sm:$0xf0] }
 0x13d   : > { %7101 = vmatpush.bf16.msra.mxu1 %v10299_v53  ;;  %v10411_v53 = vor.u32 %v13206_v4, %v10410_v3  ;;  %v10578_v3 = vld [vmem:[%s14199_s17 + $0xee0] sm:$0xf]  ;;  %v10515_v21 = vor.u32 %v13232_v2, %v10514_v1 }
 0x13e   : > { %7114 = vmatpush.bf16.msra.mxu2 %v10363_v26  ;;  %v10402_v26 = vld [vmem:[%s14199_s17 + $0xd80] sm:$0xf] }
 0x13f   : > { %7127 = vmatpush.bf16.msra.mxu3 %v10427_v39  ;;  %v13234_v39 = vld [vmem:[%s14199_s17 + $0xe74] sm:$0xf0]  ;;  %v10403_v60 = vor.u32 %v13204_v27, %v10402_v26  ;;  %v10506_v26 = vld [vmem:[%s14199_s17 + $0xe50] sm:$0xf] }
 0x140   : > { %7089 = vmatpush.bf16.msra.mxu0 %v10227_v54  ;;  %v10339_v54 = vor.u32 %v13188_v17, %v10338_v15  ;;  %v10523_v61 = vor.u32 %v13234_v39, %v10522_v36  ;;  %v13280_v15 = vld [vmem:[%s14199_s17 + $0xfe4] sm:$0xf0]  ;;  %v14810_v17 = vpack.c.b16 %v1487_v62, %v1487_v62  ;;  %v13230_v27 = vld [vmem:[%s14199_s17 + $0xe54] sm:$0xf0]  ;;  %v10634_v39 = vld [vmem:[%s14199_s17 + $0xf50] sm:$0xf] }
 0x141   : > { %7102 = vmatpush.bf16.msra.mxu1 %v10291_v57  ;;  %v13282_v57 = vld [vmem:[%s14199_s17 + $0xff4] sm:$0xf0]  ;;  %v10507_v48 = vor.u32 %v13230_v27, %v10506_v26  ;;  %v10690_v62 = vld [vmem:[%s14199_s17 + $0xfc0] sm:$0xf] }
 0x142   : > { %7115 = vmatpush.bf16.msra.mxu2 %v10355_v58  ;;  %v1486_v58 = vunpack.c.l.b16 %v379_v32  ;;  %v10715_v4 = vor.u32 %v13282_v57, %v10714_v56  ;;  %v10570_v32 = vld [vmem:[%s14199_s17 + $0xed0] sm:$0xf]  ;;  %v13246_v36 = vld [vmem:[%s14199_s17 + $0xed4] sm:$0xf0]  ;;  %v10562_v56 = vld [vmem:[%s14199_s17 + $0xec0] sm:$0xf] }
 0x143   : > { %7128 = vmatpush.bf16.msra.mxu3 %v10419_v63  ;;  %v10587_v63 = vor.u32 %v13250_v47, %v10586_v40  ;;  %v13262_v40 = vld [vmem:[%s14199_s17 + $0xf54] sm:$0xf0]  ;;  %v10571_v50 = vor.u32 %v13246_v36, %v10570_v32  ;;  %v10482_v36 = vld [vmem:[%s14199_s17 + $0xe20] sm:$0xf] }
 0x144   : > { %7090 = vmatpush.bf16.msra.mxu0 %v10219_v6  ;;  %v13248_v6 = vld [vmem:[%s14199_s17 + $0xee4] sm:$0xf0]  ;;  %v14804_v10 = vpack.c.b16 %v1486_v58, %v1486_v58  ;;  %v13278_v47 = vld [vmem:[%s14199_s17 + $0xfd4] sm:$0xf0]  ;;  %v10635_v51 = vor.u32 %v13262_v40, %v10634_v39  ;;  %v10546_v40 = vld [vmem:[%s14199_s17 + $0xea0] sm:$0xf] }
 0x145   : > { %7103 = vmatpush.bf16.msra.mxu1 %v10283_v13  ;;  %v14806_v13 = vpack.c.b16 %v1485_v59, %v1485_v59  ;;  %v10579_v24 = vor.u32 %v13248_v6, %v10578_v3  ;;  %v13244_v58 = vld [vmem:[%s14199_s17 + $0xec4] sm:$0xf0]  ;;  %v10626_v59 = vld [vmem:[%s14199_s17 + $0xf40] sm:$0xf]  ;;  %v10490_v6 = vld [vmem:[%s14199_s17 + $0xe30] sm:$0xf] }
 0x146   : > { %7116 = vmatpush.bf16.msra.mxu2 %v10347_v14  ;;  %v10706_v14 = vld [vmem:[%s14199_s17 + $0xfe0] sm:$0xf]  ;;  %v10563_v3 = vor.u32 %v13244_v58, %v10562_v56  ;;  %v13274_v26 = vld [vmem:[%s14199_s17 + $0xfb4] sm:$0xf0]  ;;  %v13224_v39 = vld [vmem:[%s14199_s17 + $0xe24] sm:$0xf0] }
 0x147   : > { %7129 = vmatpush.bf16.msra.mxu3 %v10411_v53  ;;  %v10643_v53 = vor.u32 %v13264_v9, %v10642_v8  ;;  %v10707_v34 = vor.u32 %v13280_v15, %v10706_v14  ;;  %v13226_v8 = vld [vmem:[%s14199_s17 + $0xe34] sm:$0xf0]  ;;  %v10554_v9 = vld [vmem:[%s14199_s17 + $0xeb0] sm:$0xf]  ;;  %v10674_v56 = vld [vmem:[%s14199_s17 + $0xfa0] sm:$0xf] }
 0x148   : > { %7091 = vmatpush.bf16.msra.mxu0 %v10211_v43  ;;  %v10698_v43 = vld [vmem:[%s14199_s17 + $0xfd0] sm:$0xf]  ;;  %v10491_v27 = vor.u32 %v13226_v8, %v10490_v6  ;;  %v13254_v8 = vld [vmem:[%s14199_s17 + $0xf14] sm:$0xf0] }
 0x149   : > { %7104 = vmatpush.bf16.msra.mxu1 %v10275_v52  ;;  %v10498_v52 = vld [vmem:[%s14199_s17 + $0xe40] sm:$0xf]  ;;  %v10699_v57 = vor.u32 %v13278_v47, %v10698_v43  ;;  %v6898_v2 = vpop.f32.mrf.mxu1  ;;  %v10602_v6 = vld [vmem:[%s14199_s17 + $0xf10] sm:$0xf] }
 0x14a   : > { %7117 = vmatpush.bf16.msra.mxu2 %v10339_v54  ;;  %v13228_v54 = vld [vmem:[%s14199_s17 + $0xe44] sm:$0xf0] }
 0x14b   : > { %7130 = vmatpush.bf16.msra.mxu3 %v10403_v60  ;;  %7092 = vmatmul.bf16.vlgmr.msra.gmra.mxu0 %v14799_v5  ;;  %v13260_v60 = vld [vmem:[%s14199_s17 + $0xf44] sm:$0xf0]  ;;  %v10499_v1 = vor.u32 %v13228_v54, %v10498_v52 }
 0x14c   : > { %7136 = vmatpush.bf16.msrb.mxu0 %v10523_v61  ;;  %7105 = vmatmul.bf16.vlgmr.msra.gmra.mxu1 %v14806_v13  ;;  %v6885_v61 = vpop.f32.mrf.mxu0 }
 0x14d   : > { %7149 = vmatpush.bf16.msrb.mxu1 %v10587_v63  ;;  %7118 = vmatmul.bf16.vlgmr.msra.gmra.mxu2 %v14804_v10  ;;  %v13276_v63 = vld [vmem:[%s14199_s17 + $0xfc4] sm:$0xf0] }
 0x14e   : > { %7162 = vmatpush.bf16.msrb.mxu2 %v10651_v0  ;;  %7131 = vmatmul.bf16.vlgmr.msra.gmra.mxu3 %v14810_v17  ;;  %v6886_v0 = vadd.f32 %v6885_v61, %v14764_v55  ;;  %v10691_v14 = vor.u32 %v13276_v63, %v10690_v62  ;;  %v13258_v55 = vld [vmem:[%s14199_s17 + $0xf34] sm:$0xf0] }
 0x14f   : > { %7175 = vmatpush.bf16.msrb.mxu3 %v10715_v4  ;;  %v10627_v4 = vor.u32 %v13260_v60, %v10626_v59  ;;  %v10483_v59 = vor.u32 %v13224_v39, %v10482_v36  ;;  %v380_v36 = vld [vmem:[%s16797_s0 + $0x70] sm:$0xff] }
 0x150   : > { %7137 = vmatpush.bf16.msrb.mxu0 %v10515_v21  ;;  %v6899_v15 = vadd.f32 %v6898_v2, %v6886_v0  ;;  %v13242_v21 = vld [vmem:[%s14199_s17 + $0xeb4] sm:$0xf0]  ;;  %v6911_v47 = vpop.f32.mrf.mxu2  ;;  %v10474_v0 = vld [vmem:[%s14199_s17 + $0xe10] sm:$0xf] }
 0x151   : > { %7150 = vmatpush.bf16.msrb.mxu1 %v10579_v24  ;;  %v10618_v24 = vld [vmem:[%s14199_s17 + $0xf30] sm:$0xf]  ;;  %v10555_v32 = vor.u32 %v13242_v21, %v10554_v9  ;;  %v6924_v54 = vpop.f32.mrf.mxu3  ;;  %v6900_v60 = vpop.f32.mrf.mxu1 }
 0x152   : > { %7163 = vmatpush.bf16.msrb.mxu2 %v10643_v53  ;;  %v10682_v53 = vld [vmem:[%s14199_s17 + $0xfb0] sm:$0xf]  ;;  %v6912_v52 = vadd.f32 %v6911_v47, %v6899_v15  ;;  %v10466_v15 = vld [vmem:[%s14199_s17 + $0xe00] sm:$0xf]  ;;  %v381_v47 = vld [vmem:[%s16797_s0 + $0x78] sm:$0xff]  ;;  %v1488_v60 = vunpack.c.l.b16 %v380_v36 }
 0x153   : > { %7176 = vmatpush.bf16.msrb.mxu3 %v10707_v34  ;;  %v10619_v34 = vor.u32 %v13258_v55, %v10618_v24  ;;  %v10683_v43 = vor.u32 %v13274_v26, %v10682_v53  ;;  %v10538_v2 = vld [vmem:[%s14199_s17 + $0xe90] sm:$0xf]  ;;  %v13220_v24 = vld [vmem:[%s14199_s17 + $0xe04] sm:$0xf0]  ;;  %v10530_v55 = vld [vmem:[%s14199_s17 + $0xe80] sm:$0xf] }
 0x154   : > { %7138 = vmatpush.bf16.msrb.mxu0 %v10507_v48  ;;  %v13240_v48 = vld [vmem:[%s14199_s17 + $0xea4] sm:$0xf0]  ;;  %v6887_v58 = vpop.f32.mrf.mxu0  ;;  %v14849_v61 = vadd.f32 %v6924_v54, %v6912_v52  ;;  %v10666_v9 = vld [vmem:[%s14199_s17 + $0xf90] sm:$0xf] }
 0x155   : > { %7151 = vmatpush.bf16.msrb.mxu1 %v10571_v50  ;;  %v10610_v50 = vld [vmem:[%s14199_s17 + $0xf20] sm:$0xf]  ;;  %v10547_v62 = vor.u32 %v13240_v48, %v10546_v40  ;;  %v13236_v53 = vld [vmem:[%s14199_s17 + $0xe84] sm:$0xf0]  ;;  %v10842_v52 = vld [vmem:[%s14199_s17 + $0x10f0] sm:$0xf] }
 0x156   : > { %7164 = vmatpush.bf16.msrb.mxu2 %v10635_v51  ;;  %v13256_v51 = vld [vmem:[%s14199_s17 + $0xf24] sm:$0xf0]  ;;  %v10658_v40 = vld [vmem:[%s14199_s17 + $0xf80] sm:$0xf]  ;;  %v10906_v58 = vld [vmem:[%s14199_s17 + $0x1170] sm:$0xf] }
 0x157   : > { %7177 = vmatpush.bf16.msrb.mxu3 %v10699_v57  ;;  %v13272_v57 = vld [vmem:[%s14199_s17 + $0xfa4] sm:$0xf0]  ;;  %v10611_v63 = vor.u32 %v13256_v51, %v10610_v50  ;;  %v10778_v50 = vld [vmem:[%s14199_s17 + $0x1070] sm:$0xf]  ;;  %v13298_v51 = vld [vmem:[%s14199_s17 + $0x1074] sm:$0xf0] }
 0x158   : > { %7139 = vmatpush.bf16.msrb.mxu0 %v10499_v1  ;;  %v13222_v1 = vld [vmem:[%s14199_s17 + $0xe14] sm:$0xf0]  ;;  %v6913_v48 = vpop.f32.mrf.mxu2 }
 0x159   : > { %7152 = vmatpush.bf16.msrb.mxu1 %v10563_v3  ;;  %v10675_v3 = vor.u32 %v13272_v57, %v10674_v56  ;;  %v10475_v21 = vor.u32 %v13222_v1, %v10474_v0  ;;  %v6926_v54 = vpop.f32.mrf.mxu3  ;;  %v10467_v56 = vor.u32 %v13220_v24, %v10466_v15  ;;  %v13314_v57 = vld [vmem:[%s14199_s17 + $0x10f4] sm:$0xf0]  ;;  %v10970_v0 = vld [vmem:[%s14199_s17 + $0x11f0] sm:$0xf]  ;;  %v10770_v15 = vld [vmem:[%s14199_s17 + $0x1060] sm:$0xf] }
 0x15a   : > { %7165 = vmatpush.bf16.msrb.mxu2 %v10627_v4  ;;  %v13238_v4 = vld [vmem:[%s14199_s17 + $0xe94] sm:$0xf0]  ;;  %v10834_v24 = vld [vmem:[%s14199_s17 + $0x10e0] sm:$0xf]  ;;  %v10826_v54 = vld [vmem:[%s14199_s17 + $0x10d0] sm:$0xf] }
 0x15b   : > { %7178 = vmatpush.bf16.msrb.mxu3 %v10691_v14  ;;  %v13270_v14 = vld [vmem:[%s14199_s17 + $0xf94] sm:$0xf0]  ;;  %v10539_v26 = vor.u32 %v13238_v4, %v10538_v2  ;;  %v1490_v2 = vunpack.c.l.b16 %v381_v47 }
 0x15c   : > { %7140 = vmatpush.bf16.msrb.mxu0 %v10491_v27  ;;  %v10603_v27 = vor.u32 %v13254_v8, %v10602_v6  ;;  %v10667_v39 = vor.u32 %v13270_v14, %v10666_v9  ;;  %v13346_v1 = vld [vmem:[%s14199_s17 + $0x11f4] sm:$0xf0]  ;;  %v10779_v6 = vor.u32 %v13298_v51, %v10778_v50  ;;  %v1491_v8 = vunpack.c.h.b16 %v381_v47  ;;  %v10762_v51 = vld [vmem:[%s14199_s17 + $0x1050] sm:$0xf] }
 0x15d   : > { %7153 = vmatpush.bf16.msrb.mxu1 %v10555_v32  ;;  %v10594_v32 = vld [vmem:[%s14199_s17 + $0xf00] sm:$0xf]  ;;  %v10843_v9 = vor.u32 %v13314_v57, %v10842_v52  ;;  %v13294_v52 = vld [vmem:[%s14199_s17 + $0x1054] sm:$0xf0] }
 0x15e   : > { %7166 = vmatpush.bf16.msrb.mxu2 %v10619_v34  ;;  %v13252_v34 = vld [vmem:[%s14199_s17 + $0xf04] sm:$0xf0]  ;;  %v13310_v57 = vld [vmem:[%s14199_s17 + $0x10d4] sm:$0xf0] }
 0x15f   : > { %7179 = vmatpush.bf16.msrb.mxu3 %v10683_v43  ;;  %v13268_v43 = vld [vmem:[%s14199_s17 + $0xf84] sm:$0xf0] }
 0x160   : > { %7141 = vmatpush.bf16.msrb.mxu0 %v10483_v59  ;;  %v13330_v59 = vld [vmem:[%s14199_s17 + $0x1174] sm:$0xf0]  ;;  %v10659_v4 = vor.u32 %v13268_v43, %v10658_v40  ;;  %v13344_v40 = vld [vmem:[%s14199_s17 + $0x11e4] sm:$0xf0]  ;;  %v14895_v43 = vpack.c.b16 %v1491_v8, %v1491_v8 }
 0x161   : > { %7154 = vmatpush.bf16.msrb.mxu1 %v10547_v62  ;;  %v10531_v62 = vor.u32 %v13236_v53, %v10530_v55  ;;  %v10907_v14 = vor.u32 %v13330_v59, %v10906_v58  ;;  %v10971_v55 = vor.u32 %v13346_v1, %v10970_v0  ;;  %v14884_v53 = vpack.c.b16 %v1488_v60, %v1488_v60  ;;  %v10890_v58 = vld [vmem:[%s14199_s17 + $0x1150] sm:$0xf]  ;;  %v13326_v59 = vld [vmem:[%s14199_s17 + $0x1154] sm:$0xf0]  ;;  %v13308_v8 = vld [vmem:[%s14199_s17 + $0x10c4] sm:$0xf0] }
 0x162   : > { %7167 = vmatpush.bf16.msrb.mxu2 %v10611_v63  ;;  %v10595_v63 = vor.u32 %v13252_v34, %v10594_v32  ;;  %v13328_v32 = vld [vmem:[%s14199_s17 + $0x1164] sm:$0xf0]  ;;  %v14889_v34 = vpack.c.b16 %v1490_v2, %v1490_v2  ;;  %16840 = vst [vmem:[#allocation13_spill] sm:$0xff] %v14895_v43  ;;  %v10954_v60 = vld [vmem:[%s14199_s17 + $0x11d0] sm:$0xf]  ;;  %v10827_v0 = vor.u32 %v13310_v57, %v10826_v54 }
 0x163   : > { %7180 = vmatpush.bf16.msrb.mxu3 %v10675_v3  ;;  %v1489_v3 = vunpack.c.h.b16 %v380_v36  ;;  %v10891_v1 = vor.u32 %v13326_v59, %v10890_v58  ;;  %v10754_v2 = vld [vmem:[%s14199_s17 + $0x1040] sm:$0xf]  ;;  %v10874_v54 = vld [vmem:[%s14199_s17 + $0x1130] sm:$0xf]  ;;  %v13338_v57 = vld [vmem:[%s14199_s17 + $0x11b4] sm:$0xf0] }
 0x164   : > { %7142 = vmatpush.bf16.msrb.mxu0 %v10475_v21  ;;  %v13296_v21 = vld [vmem:[%s14199_s17 + $0x1064] sm:$0xf0] }
 0x165   : > { %7155 = vmatpush.bf16.msrb.mxu1 %v10539_v26  ;;  %v13312_v26 = vld [vmem:[%s14199_s17 + $0x10e4] sm:$0xf0]  ;;  %v14891_v36 = vpack.c.b16 %v1489_v3, %v1489_v3  ;;  %v10771_v47 = vor.u32 %v13296_v21, %v10770_v15  ;;  %v10946_v21 = vld [vmem:[%s14199_s17 + $0x11c0] sm:$0xf] }
 0x166   : > { %7168 = vmatpush.bf16.msrb.mxu2 %v10603_v27  ;;  %v10898_v27 = vld [vmem:[%s14199_s17 + $0x1160] sm:$0xf]  ;;  %v10835_v48 = vor.u32 %v13312_v26, %v10834_v24  ;;  %v13292_v3 = vld [vmem:[%s14199_s17 + $0x1044] sm:$0xf0] }
 0x167   : > { %7181 = vmatpush.bf16.msrb.mxu3 %v10667_v39  ;;  %v10962_v39 = vld [vmem:[%s14199_s17 + $0x11e0] sm:$0xf]  ;;  %v10899_v50 = vor.u32 %v13328_v32, %v10898_v27  ;;  %v13340_v24 = vld [vmem:[%s14199_s17 + $0x11c4] sm:$0xf0]  ;;  %v10755_v26 = vor.u32 %v13292_v3, %v10754_v2 }
 0x168   : > { %7143 = vmatpush.bf16.msrb.mxu0 %v10467_v56  ;;  %v10963_v56 = vor.u32 %v13344_v40, %v10962_v39  ;;  %v6937_v15 = vpop.f32.mrf.mxu0  ;;  %v10746_v40 = vld [vmem:[%s14199_s17 + $0x1030] sm:$0xf]  ;;  %v13304_v3 = vld [vmem:[%s14199_s17 + $0x10a4] sm:$0xf0] }
 0x169   : > { %7156 = vmatpush.bf16.msrb.mxu1 %v10531_v62  ;;  %v13342_v62 = vld [vmem:[%s14199_s17 + $0x11d4] sm:$0xf0]  ;;  %v6950_v27 = vpop.f32.mrf.mxu1 }
 0x16a   : > { %7169 = vmatpush.bf16.msrb.mxu2 %v10595_v63  ;;  %v10763_v63 = vor.u32 %v13294_v52, %v10762_v51  ;;  %v13306_v52 = vld [vmem:[%s14199_s17 + $0x10b4] sm:$0xf0] }
 0x16b   : > { %7182 = vmatpush.bf16.msrb.mxu3 %v10659_v4  ;;  %7144 = vmatmul.bf16.vlgmr.msrb.gmra.mxu0 %v14884_v53  ;;  %v10818_v4 = vld [vmem:[%s14199_s17 + $0x10c0] sm:$0xf] }
 0x16c   : > { %7188 = vmatpush.bf16.msra.mxu0 %v10779_v6  ;;  %7157 = vmatmul.bf16.vlgmr.msrb.gmra.mxu1 %v14891_v36  ;;  %v10955_v6 = vor.u32 %v13342_v62, %v10954_v60  ;;  %v10819_v32 = vor.u32 %v13308_v8, %v10818_v4  ;;  %v10738_v62 = vld [vmem:[%s14199_s17 + $0x1020] sm:$0xf] }
 0x16d   : > { %7201 = vmatpush.bf16.msra.mxu1 %v10843_v9  ;;  %7170 = vmatmul.bf16.vlgmr.msrb.gmra.mxu2 %v14889_v34  ;;  %v10882_v9 = vld [vmem:[%s14199_s17 + $0x1140] sm:$0xf] }
 0x16e   : > { %7214 = vmatpush.bf16.msra.mxu2 %v10907_v14  ;;  %7183 = vmatmul.bf16.vlgmr.msrb.gmra.mxu3 %v14895_v43  ;;  %v13324_v14 = vld [vmem:[%s14199_s17 + $0x1144] sm:$0xf0]  ;;  %v10866_v4 = vld [vmem:[%s14199_s17 + $0x1120] sm:$0xf] }
 0x16f   : > { %7227 = vmatpush.bf16.msra.mxu3 %v10971_v55  ;;  %v6938_v55 = vadd.f32 %v6937_v15, %v14849_v61  ;;  %v10883_v39 = vor.u32 %v13324_v14, %v10882_v9  ;;  %v13322_v61 = vld [vmem:[%s14199_s17 + $0x1134] sm:$0xf0]  ;;  %v10930_v14 = vld [vmem:[%s14199_s17 + $0x11a0] sm:$0xf]  ;;  %v13336_v15 = vld [vmem:[%s14199_s17 + $0x11a4] sm:$0xf0] }
 0x170   : > { %7189 = vmatpush.bf16.msra.mxu0 %v10771_v47  ;;  %v13290_v47 = vld [vmem:[%s14199_s17 + $0x1034] sm:$0xf0]  ;;  %v10875_v60 = vor.u32 %v13322_v61, %v10874_v54  ;;  %v6963_v2 = vpop.f32.mrf.mxu2  ;;  %v10922_v54 = vld [vmem:[%s14199_s17 + $0x1190] sm:$0xf]  ;;  %v13392_v43 = vld [vmem:[%s14199_s17 + $0x1364] sm:$0xf0] }
 0x171   : > { %7202 = vmatpush.bf16.msra.mxu1 %v10835_v48  ;;  %v10810_v48 = vld [vmem:[%s14199_s17 + $0x10b0] sm:$0xf]  ;;  %v6951_v51 = vadd.f32 %v6950_v27, %v6938_v55  ;;  %v10747_v58 = vor.u32 %v13290_v47, %v10746_v40  ;;  %v6976_v9 = vpop.f32.mrf.mxu3  ;;  %v6952_v55 = vpop.f32.mrf.mxu1  ;;  %v13286_v40 = vld [vmem:[%s14199_s17 + $0x1014] sm:$0xf0] }
 0x172   : > { %7215 = vmatpush.bf16.msra.mxu2 %v10899_v50  ;;  %v10947_v50 = vor.u32 %v13340_v24, %v10946_v21  ;;  %v10811_v59 = vor.u32 %v13306_v52, %v10810_v48  ;;  %v6939_v21 = vpop.f32.mrf.mxu0  ;;  %v10794_v47 = vld [vmem:[%s14199_s17 + $0x1090] sm:$0xf]  ;;  %v10931_v48 = vor.u32 %v13336_v15, %v10930_v14  ;;  %v13318_v52 = vld [vmem:[%s14199_s17 + $0x1114] sm:$0xf0] }
 0x173   : > { %7228 = vmatpush.bf16.msra.mxu3 %v10963_v56  ;;  %v10938_v56 = vld [vmem:[%s14199_s17 + $0x11b0] sm:$0xf]  ;;  %v6964_v8 = vadd.f32 %v6963_v2, %v6951_v51  ;;  %v13334_v61 = vld [vmem:[%s14199_s17 + $0x1194] sm:$0xf0]  ;;  %v382_v2 = vld [vmem:[%s16797_s0 + $0x80] sm:$0xff] }
 0x174   : > { %7190 = vmatpush.bf16.msra.mxu0 %v10763_v63  ;;  %v13288_v63 = vld [vmem:[%s14199_s17 + $0x1024] sm:$0xf0]  ;;  %v10858_v51 = vld [vmem:[%s14199_s17 + $0x1110] sm:$0xf]  ;;  %v13362_v15 = vld [vmem:[%s14199_s17 + $0x1274] sm:$0xf0] }
 0x175   : > { %7203 = vmatpush.bf16.msra.mxu1 %v10827_v0  ;;  %v10802_v0 = vld [vmem:[%s14199_s17 + $0x10a0] sm:$0xf]  ;;  %v10739_v24 = vor.u32 %v13288_v63, %v10738_v62  ;;  %v10859_v63 = vor.u32 %v13318_v52, %v10858_v51  ;;  %v11034_v14 = vld [vmem:[%s14199_s17 + $0x1270] sm:$0xf]  ;;  %v13410_v51 = vld [vmem:[%s14199_s17 + $0x13f4] sm:$0xf0] }
 0x176   : > { %7216 = vmatpush.bf16.msra.mxu2 %v10891_v1  ;;  %v10939_v1 = vor.u32 %v13338_v57, %v10938_v56  ;;  %v10803_v27 = vor.u32 %v13304_v3, %v10802_v0  ;;  %v10722_v56 = vld [vmem:[%s14199_s17 + $0x1000] sm:$0xf]  ;;  %v10923_v3 = vor.u32 %v13334_v61, %v10922_v54  ;;  %v11098_v21 = vld [vmem:[%s14199_s17 + $0x12f0] sm:$0xf]  ;;  %v1493_v54 = vunpack.c.h.b16 %v382_v2 }
 0x177   : > { %7229 = vmatpush.bf16.msra.mxu3 %v10955_v6  ;;  %v13320_v6 = vld [vmem:[%s14199_s17 + $0x1124] sm:$0xf0]  ;;  %v10850_v0 = vld [vmem:[%s14199_s17 + $0x1100] sm:$0xf] }
 0x178   : > { %7191 = vmatpush.bf16.msra.mxu0 %v10755_v26  ;;  %v14934_v26 = vadd.f32 %v6976_v9, %v6964_v8  ;;  %v383_v8 = vld [vmem:[%s16797_s0 + $0x88] sm:$0xff]  ;;  %v6965_v9 = vpop.f32.mrf.mxu2 }
 0x179   : > { %7204 = vmatpush.bf16.msra.mxu1 %v10819_v32  ;;  %v10867_v32 = vor.u32 %v13320_v6, %v10866_v4  ;;  %v10914_v4 = vld [vmem:[%s14199_s17 + $0x1180] sm:$0xf]  ;;  %v13332_v6 = vld [vmem:[%s14199_s17 + $0x1184] sm:$0xf0]  ;;  %v1494_v52 = vunpack.c.l.b16 %v383_v8 }
 0x17a   : > { %7217 = vmatpush.bf16.msra.mxu2 %v10883_v39  ;;  %v10730_v39 = vld [vmem:[%s14199_s17 + $0x1010] sm:$0xf]  ;;  %v10915_v61 = vor.u32 %v13332_v6, %v10914_v4  ;;  %v11218_v4 = vld [vmem:[%s14199_s17 + $0x13e0] sm:$0xf]  ;;  %v13408_v6 = vld [vmem:[%s14199_s17 + $0x13e4] sm:$0xf0] }
 0x17b   : > { %7230 = vmatpush.bf16.msra.mxu3 %v10947_v50  ;;  %v13302_v50 = vld [vmem:[%s14199_s17 + $0x1094] sm:$0xf0]  ;;  %v10731_v57 = vor.u32 %v13286_v40, %v10730_v39  ;;  %v1492_v40 = vunpack.c.l.b16 %v382_v2  ;;  %v14974_v2 = vpack.c.b16 %v1494_v52, %v1494_v52 }
 0x17c   : > { %7192 = vmatpush.bf16.msra.mxu0 %v10747_v58  ;;  %v13284_v58 = vld [vmem:[%s14199_s17 + $0x1004] sm:$0xf0]  ;;  %v10795_v62 = vor.u32 %v13302_v50, %v10794_v47  ;;  %v13394_v39 = vld [vmem:[%s14199_s17 + $0x1374] sm:$0xf0]  ;;  %v11226_v50 = vld [vmem:[%s14199_s17 + $0x13f0] sm:$0xf] }
 0x17d   : > { %7205 = vmatpush.bf16.msra.mxu1 %v10811_v59  ;;  %v10786_v59 = vld [vmem:[%s14199_s17 + $0x1080] sm:$0xf]  ;;  %v10723_v55 = vor.u32 %v13284_v58, %v10722_v56  ;;  %v11035_v56 = vor.u32 %v13362_v15, %v11034_v14  ;;  %16842 = vst [vmem:[#allocation15_spill] sm:$0xff] %v14974_v2 }
 0x17e   : > { %7218 = vmatpush.bf16.msra.mxu2 %v10875_v60  ;;  %v13300_v60 = vld [vmem:[%s14199_s17 + $0x1084] sm:$0xf0] }
 0x17f   : > { %7231 = vmatpush.bf16.msra.mxu3 %v10939_v1  ;;  %v13316_v1 = vld [vmem:[%s14199_s17 + $0x1104] sm:$0xf0]  ;;  %v10787_v47 = vor.u32 %v13300_v60, %v10786_v59  ;;  %v11227_v59 = vor.u32 %v13410_v51, %v11226_v50  ;;  %v14969_v60 = vpack.c.b16 %v1492_v40, %v1492_v40  ;;  %v13374_v40 = vld [vmem:[%s14199_s17 + $0x12d4] sm:$0xf0] }
 0x180   : > { %7193 = vmatpush.bf16.msra.mxu0 %v10739_v24  ;;  %v6978_v24 = vpop.f32.mrf.mxu3  ;;  %v13406_v50 = vld [vmem:[%s14199_s17 + $0x13d4] sm:$0xf0] }
 0x181   : > { %7206 = vmatpush.bf16.msra.mxu1 %v10803_v27  ;;  %v13378_v27 = vld [vmem:[%s14199_s17 + $0x12f4] sm:$0xf0]  ;;  %v13360_v24 = vld [vmem:[%s14199_s17 + $0x1264] sm:$0xf0]  ;;  %16841 = vst [vmem:[#allocation14_spill] sm:$0xff] %v14969_v60 }
 0x182   : > { %7219 = vmatpush.bf16.msra.mxu2 %v10867_v32  ;;  %v11162_v32 = vld [vmem:[%s14199_s17 + $0x1370] sm:$0xf]  ;;  %v11099_v58 = vor.u32 %v13378_v27, %v11098_v21  ;;  %v13358_v27 = vld [vmem:[%s14199_s17 + $0x1254] sm:$0xf0] }
 0x183   : > { %7232 = vmatpush.bf16.msra.mxu3 %v10931_v48  ;;  %v10851_v48 = vor.u32 %v13316_v1, %v10850_v0  ;;  %v11163_v9 = vor.u32 %v13394_v39, %v11162_v32  ;;  %v13376_v0 = vld [vmem:[%s14199_s17 + $0x12e4] sm:$0xf0]  ;;  %v11154_v1 = vld [vmem:[%s14199_s17 + $0x1360] sm:$0xf]  ;;  %v11082_v32 = vld [vmem:[%s14199_s17 + $0x12d0] sm:$0xf]  ;;  %v11219_v39 = vor.u32 %v13408_v6, %v11218_v4 }
 0x184   : > { %7194 = vmatpush.bf16.msra.mxu0 %v10731_v57  ;;  %v1495_v57 = vunpack.c.h.b16 %v383_v8  ;;  %v11155_v21 = vor.u32 %v13392_v43, %v11154_v1  ;;  %v11210_v43 = vld [vmem:[%s14199_s17 + $0x13d0] sm:$0xf]  ;;  %v11083_v52 = vor.u32 %v13374_v40, %v11082_v32  ;;  %v13370_v40 = vld [vmem:[%s14199_s17 + $0x12b4] sm:$0xf0] }
 0x185   : > { %7207 = vmatpush.bf16.msra.mxu1 %v10795_v62  ;;  %v11026_v62 = vld [vmem:[%s14199_s17 + $0x1260] sm:$0xf] }
 0x186   : > { %7220 = vmatpush.bf16.msra.mxu2 %v10859_v63  ;;  %v11090_v63 = vld [vmem:[%s14199_s17 + $0x12e0] sm:$0xf]  ;;  %v14980_v8 = vpack.c.b16 %v1495_v57, %v1495_v57  ;;  %v11027_v14 = vor.u32 %v13360_v24, %v11026_v62  ;;  %v13388_v24 = vld [vmem:[%s14199_s17 + $0x1344] sm:$0xf0] }
 0x187   : > { %7233 = vmatpush.bf16.msra.mxu3 %v10923_v3  ;;  %v14976_v3 = vpack.c.b16 %v1493_v54, %v1493_v54  ;;  %v11091_v15 = vor.u32 %v13376_v0, %v11090_v63  ;;  %v11074_v57 = vld [vmem:[%s14199_s17 + $0x12c0] sm:$0xf]  ;;  %v13404_v0 = vld [vmem:[%s14199_s17 + $0x13c4] sm:$0xf0] }
 0x188   : > { %7195 = vmatpush.bf16.msra.mxu0 %v10723_v55  ;;  %16844 = vst [vmem:[#allocation17_spill] sm:$0xff] %v14980_v8  ;;  %v11018_v55 = vld [vmem:[%s14199_s17 + $0x1250] sm:$0xf]  ;;  %v11138_v62 = vld [vmem:[%s14199_s17 + $0x1340] sm:$0xf]  ;;  %v6989_v63 = vpop.f32.mrf.mxu0 }
 0x189   : > { %7208 = vmatpush.bf16.msra.mxu1 %v10787_v47  ;;  %16843 = vst [vmem:[#allocation16_spill] sm:$0xff] %v14976_v3  ;;  %v11146_v47 = vld [vmem:[%s14199_s17 + $0x1350] sm:$0xf]  ;;  %v11019_v51 = vor.u32 %v13358_v27, %v11018_v55  ;;  %v6990_v1 = vadd.f32 %v6989_v63, %v14934_v26  ;;  %v7002_v6 = vpop.f32.mrf.mxu1  ;;  %v13354_v55 = vld [vmem:[%s14199_s17 + $0x1234] sm:$0xf0] }
 0x18a   : > { %7221 = vmatpush.bf16.msra.mxu2 %v10851_v48  ;;  %v13390_v48 = vld [vmem:[%s14199_s17 + $0x1354] sm:$0xf0]  ;;  %v11066_v27 = vld [vmem:[%s14199_s17 + $0x12b0] sm:$0xf] }
 0x18b   : > { %7234 = vmatpush.bf16.msra.mxu3 %v10915_v61  ;;  %7196 = vmatmul.bf16.vlgmr.msra.gmra.mxu0 %v14969_v60  ;;  %v11147_v54 = vor.u32 %v13390_v48, %v11146_v47  ;;  %v11010_v61 = vld [vmem:[%s14199_s17 + $0x1240] sm:$0xf]  ;;  %v11130_v47 = vld [vmem:[%s14199_s17 + $0x1330] sm:$0xf]  ;;  %v13386_v26 = vld [vmem:[%s14199_s17 + $0x1334] sm:$0xf0] }
 0x18c   : > { %7240 = vmatpush.bf16.msrb.mxu0 %v11035_v56  ;;  %7209 = vmatmul.bf16.vlgmr.msra.gmra.mxu1 %v14976_v3  ;;  %v13356_v56 = vld [vmem:[%s14199_s17 + $0x1244] sm:$0xf0]  ;;  %v11194_v48 = vld [vmem:[%s14199_s17 + $0x13b0] sm:$0xf] }
 0x18d   : > { %7253 = vmatpush.bf16.msrb.mxu1 %v11099_v58  ;;  %7222 = vmatmul.bf16.vlgmr.msra.gmra.mxu2 %v14974_v2  ;;  %v11211_v58 = vor.u32 %v13406_v50, %v11210_v43  ;;  %v11011_v4 = vor.u32 %v13356_v56, %v11010_v61  ;;  %v13402_v43 = vld [vmem:[%s14199_s17 + $0x13b4] sm:$0xf0]  ;;  %v13352_v61 = vld [vmem:[%s14199_s17 + $0x1224] sm:$0xf0]  ;;  %v11058_v56 = vld [vmem:[%s14199_s17 + $0x12a0] sm:$0xf] }
 0x18e   : > { %7266 = vmatpush.bf16.msrb.mxu2 %v11163_v9  ;;  %7235 = vmatmul.bf16.vlgmr.msra.gmra.mxu3 %v14980_v8  ;;  %v13372_v9 = vld [vmem:[%s14199_s17 + $0x12c4] sm:$0xf0] }
 0x18f   : > { %7279 = vmatpush.bf16.msrb.mxu3 %v11227_v59  ;;  %v11202_v59 = vld [vmem:[%s14199_s17 + $0x13c0] sm:$0xf]  ;;  %v13424_v2 = vld [vmem:[%s14199_s17 + $0x1464] sm:$0xf0] }
 0x190   : > { %7241 = vmatpush.bf16.msrb.mxu0 %v11027_v14  ;;  %v11075_v14 = vor.u32 %v13372_v9, %v11074_v57  ;;  %v11203_v32 = vor.u32 %v13404_v0, %v11202_v59  ;;  %v11195_v57 = vor.u32 %v13402_v43, %v11194_v48  ;;  %v13368_v9 = vld [vmem:[%s14199_s17 + $0x12a4] sm:$0xf0]  ;;  %v11186_v0 = vld [vmem:[%s14199_s17 + $0x13a0] sm:$0xf]  ;;  %v13382_v48 = vld [vmem:[%s14199_s17 + $0x1314] sm:$0xf0] }
 0x191   : > { %7254 = vmatpush.bf16.msrb.mxu1 %v11091_v15  ;;  %v11139_v15 = vor.u32 %v13388_v24, %v11138_v62  ;;  %v11122_v62 = vld [vmem:[%s14199_s17 + $0x1320] sm:$0xf]  ;;  %v13384_v24 = vld [vmem:[%s14199_s17 + $0x1324] sm:$0xf0]  ;;  %v7028_v59 = vpop.f32.mrf.mxu3  ;;  %v11178_v43 = vld [vmem:[%s14199_s17 + $0x1390] sm:$0xf] }
 0x192   : > { %7267 = vmatpush.bf16.msrb.mxu2 %v11155_v21  ;;  %v11002_v21 = vld [vmem:[%s14199_s17 + $0x1230] sm:$0xf]  ;;  %v13456_v60 = vld [vmem:[%s14199_s17 + $0x1564] sm:$0xf0] }
 0x193   : > { %7280 = vmatpush.bf16.msrb.mxu3 %v11219_v39  ;;  %v7003_v39 = vadd.f32 %v7002_v6, %v6990_v1  ;;  %v11003_v50 = vor.u32 %v13354_v55, %v11002_v21  ;;  %v13400_v1 = vld [vmem:[%s14199_s17 + $0x13a4] sm:$0xf0]  ;;  %v11059_v21 = vor.u32 %v13368_v9, %v11058_v56  ;;  %v11123_v55 = vor.u32 %v13384_v24, %v11122_v62  ;;  %v11106_v9 = vld [vmem:[%s14199_s17 + $0x1300] sm:$0xf]  ;;  %v384_v24 = vld [vmem:[%s16797_s0 + $0x90] sm:$0xff] }
 0x194   : > { %7242 = vmatpush.bf16.msrb.mxu0 %v11019_v51  ;;  %v11067_v51 = vor.u32 %v13370_v40, %v11066_v27  ;;  %v10986_v27 = vld [vmem:[%s14199_s17 + $0x1210] sm:$0xf]  ;;  %v11187_v40 = vor.u32 %v13400_v1, %v11186_v0  ;;  %v13364_v56 = vld [vmem:[%s14199_s17 + $0x1284] sm:$0xf0]  ;;  %v385_v1 = vld [vmem:[%s16797_s0 + $0x98] sm:$0xff] }
 0x195   : > { %7255 = vmatpush.bf16.msrb.mxu1 %v11083_v52  ;;  %v11131_v52 = vor.u32 %v13386_v26, %v11130_v47  ;;  %v13366_v47 = vld [vmem:[%s14199_s17 + $0x1294] sm:$0xf0]  ;;  %v11114_v26 = vld [vmem:[%s14199_s17 + $0x1310] sm:$0xf]  ;;  %v13380_v62 = vld [vmem:[%s14199_s17 + $0x1304] sm:$0xf0] }
 0x196   : > { %7268 = vmatpush.bf16.msrb.mxu2 %v11147_v54  ;;  %v10994_v54 = vld [vmem:[%s14199_s17 + $0x1220] sm:$0xf]  ;;  %v13396_v0 = vld [vmem:[%s14199_s17 + $0x1384] sm:$0xf0] }
 0x197   : > { %7281 = vmatpush.bf16.msrb.mxu3 %v11211_v58  ;;  %v7015_v58 = vpop.f32.mrf.mxu2  ;;  %v10995_v6 = vor.u32 %v13352_v61, %v10994_v54  ;;  %v13348_v54 = vld [vmem:[%s14199_s17 + $0x1204] sm:$0xf0]  ;;  %v11042_v61 = vld [vmem:[%s14199_s17 + $0x1280] sm:$0xf] }
 0x198   : > { %7243 = vmatpush.bf16.msrb.mxu0 %v11011_v4  ;;  %v7016_v63 = vadd.f32 %v7015_v58, %v7003_v39  ;;  %v6991_v4 = vpop.f32.mrf.mxu0  ;;  %v11050_v39 = vld [vmem:[%s14199_s17 + $0x1290] sm:$0xf]  ;;  %v11115_v58 = vor.u32 %v13382_v48, %v11114_v26  ;;  %v11043_v26 = vor.u32 %v13364_v56, %v11042_v61  ;;  %v11107_v48 = vor.u32 %v13380_v62, %v11106_v9  ;;  %v13440_v9 = vld [vmem:[%s14199_s17 + $0x14e4] sm:$0xf0]  ;;  %v11410_v62 = vld [vmem:[%s14199_s17 + $0x1560] sm:$0xf] }
 0x199   : > { %7256 = vmatpush.bf16.msrb.mxu1 %v11075_v14  ;;  %v7004_v14 = vpop.f32.mrf.mxu1 }
 0x19a   : > { %7269 = vmatpush.bf16.msrb.mxu2 %v11139_v15  ;;  %v15019_v15 = vadd.f32 %v7028_v59, %v7016_v63  ;;  %v11170_v59 = vld [vmem:[%s14199_s17 + $0x1380] sm:$0xf]  ;;  %v13426_v14 = vld [vmem:[%s14199_s17 + $0x1474] sm:$0xf0] }
 0x19b   : > { %7282 = vmatpush.bf16.msrb.mxu3 %v11203_v32  ;;  %v13350_v32 = vld [vmem:[%s14199_s17 + $0x1214] sm:$0xf0] }
 0x19c   : > { %7244 = vmatpush.bf16.msrb.mxu0 %v11003_v50  ;;  %v13398_v50 = vld [vmem:[%s14199_s17 + $0x1394] sm:$0xf0] }
 0x19d   : > { %7257 = vmatpush.bf16.msrb.mxu1 %v11067_v51  ;;  %v10978_v51 = vld [vmem:[%s14199_s17 + $0x1200] sm:$0xf]  ;;  %v11179_v63 = vor.u32 %v13398_v50, %v11178_v43  ;;  %v11482_v43 = vld [vmem:[%s14199_s17 + $0x15f0] sm:$0xf]  ;;  %v13474_v50 = vld [vmem:[%s14199_s17 + $0x15f4] sm:$0xf0] }
 0x19e   : > { %7270 = vmatpush.bf16.msrb.mxu2 %v11131_v52  ;;  %v10987_v52 = vor.u32 %v13350_v32, %v10986_v27  ;;  %v10979_v27 = vor.u32 %v13348_v54, %v10978_v51  ;;  %v13442_v32 = vld [vmem:[%s14199_s17 + $0x14f4] sm:$0xf0]  ;;  %v11171_v51 = vor.u32 %v13396_v0, %v11170_v59  ;;  %v1499_v54 = vunpack.c.h.b16 %v385_v1  ;;  %v11474_v59 = vld [vmem:[%s14199_s17 + $0x15e0] sm:$0xf]  ;;  %v13472_v0 = vld [vmem:[%s14199_s17 + $0x15e4] sm:$0xf0] }
 0x19f   : > { %7283 = vmatpush.bf16.msrb.mxu3 %v11195_v57  ;;  %v11051_v57 = vor.u32 %v13366_v47, %v11050_v39  ;;  %v7017_v4 = vpop.f32.mrf.mxu2  ;;  %v11418_v39 = vld [vmem:[%s14199_s17 + $0x1570] sm:$0xf]  ;;  %v13458_v47 = vld [vmem:[%s14199_s17 + $0x1574] sm:$0xf0]  ;;  %v11483_v61 = vor.u32 %v13474_v50, %v11482_v43  ;;  %v11266_v50 = vld [vmem:[%s14199_s17 + $0x1440] sm:$0xf] }
 0x1a0   : > { %7245 = vmatpush.bf16.msrb.mxu0 %v10995_v6  ;;  %v11290_v6 = vld [vmem:[%s14199_s17 + $0x1470] sm:$0xf]  ;;  %v1498_v4 = vunpack.c.l.b16 %v385_v1  ;;  %v11419_v3 = vor.u32 %v13458_v47, %v11418_v39  ;;  %v15065_v1 = vpack.c.b16 %v1499_v54, %v1499_v54  ;;  %v11475_v47 = vor.u32 %v13472_v0, %v11474_v59  ;;  %v11394_v54 = vld [vmem:[%s14199_s17 + $0x1540] sm:$0xf] }
 0x1a1   : > { %7258 = vmatpush.bf16.msrb.mxu1 %v11059_v21  ;;  %v11354_v21 = vld [vmem:[%s14199_s17 + $0x14f0] sm:$0xf] }
 0x1a2   : > { %7271 = vmatpush.bf16.msrb.mxu2 %v11123_v55  ;;  %v7030_v55 = vpop.f32.mrf.mxu3  ;;  %v11355_v8 = vor.u32 %v13442_v32, %v11354_v21  ;;  %16848 = vst [vmem:[#allocation21_spill] sm:$0xff] %v15065_v1  ;;  %v11411_v21 = vor.u32 %v13456_v60, %v11410_v62  ;;  %v13422_v32 = vld [vmem:[%s14199_s17 + $0x1454] sm:$0xf0]  ;;  %v11338_v39 = vld [vmem:[%s14199_s17 + $0x14d0] sm:$0xf] }
 0x1a3   : > { %7284 = vmatpush.bf16.msrb.mxu3 %v11187_v40  ;;  %v1496_v40 = vunpack.c.l.b16 %v384_v24  ;;  %v1497_v55 = vunpack.c.h.b16 %v384_v24  ;;  %v15059_v24 = vpack.c.b16 %v1498_v4, %v1498_v4  ;;  %v11466_v60 = vld [vmem:[%s14199_s17 + $0x15d0] sm:$0xf]  ;;  %v13420_v4 = vld [vmem:[%s14199_s17 + $0x1444] sm:$0xf0] }
 0x1a4   : > { %7246 = vmatpush.bf16.msrb.mxu0 %v10987_v52  ;;  %v11291_v52 = vor.u32 %v13426_v14, %v11290_v6  ;;  %v11267_v59 = vor.u32 %v13420_v4, %v11266_v50  ;;  %v13416_v50 = vld [vmem:[%s14199_s17 + $0x1424] sm:$0xf0]  ;;  %v11314_v4 = vld [vmem:[%s14199_s17 + $0x14a0] sm:$0xf] }
 0x1a5   : > { %7259 = vmatpush.bf16.msrb.mxu1 %v11051_v57  ;;  %v11282_v57 = vld [vmem:[%s14199_s17 + $0x1460] sm:$0xf]  ;;  %v15054_v56 = vpack.c.b16 %v1496_v40, %v1496_v40  ;;  %16846 = vst [vmem:[#allocation19_spill] sm:$0xff] %v15059_v24  ;;  %v13438_v40 = vld [vmem:[%s14199_s17 + $0x14d4] sm:$0xf0] }
 0x1a6   : > { %7272 = vmatpush.bf16.msrb.mxu2 %v11115_v58  ;;  %v11346_v58 = vld [vmem:[%s14199_s17 + $0x14e0] sm:$0xf]  ;;  %v11283_v6 = vor.u32 %v13424_v2, %v11282_v57  ;;  %v13470_v2 = vld [vmem:[%s14199_s17 + $0x15d4] sm:$0xf0]  ;;  %v13452_v57 = vld [vmem:[%s14199_s17 + $0x1544] sm:$0xf0] }
 0x1a7   : > { %7285 = vmatpush.bf16.msrb.mxu3 %v11179_v63  ;;  %16845 = vst [vmem:[#allocation18_spill] sm:$0xff] %v15054_v56  ;;  %v15061_v63 = vpack.c.b16 %v1497_v55, %v1497_v55  ;;  %v11347_v14 = vor.u32 %v13440_v9, %v11346_v58  ;;  %v11330_v55 = vld [vmem:[%s14199_s17 + $0x14c0] sm:$0xf]  ;;  %v13468_v9 = vld [vmem:[%s14199_s17 + $0x15c4] sm:$0xf0] }
 0x1a8   : > { %7247 = vmatpush.bf16.msrb.mxu0 %v10979_v27  ;;  %v11274_v27 = vld [vmem:[%s14199_s17 + $0x1450] sm:$0xf]  ;;  %v7041_v58 = vpop.f32.mrf.mxu0 }
 0x1a9   : > { %7260 = vmatpush.bf16.msrb.mxu1 %v11043_v26  ;;  %16847 = vst [vmem:[#allocation20_spill] sm:$0xff] %v15061_v63  ;;  %v11402_v26 = vld [vmem:[%s14199_s17 + $0x1550] sm:$0xf]  ;;  %v7042_v62 = vadd.f32 %v7041_v58, %v15019_v15  ;;  %v7054_v0 = vpop.f32.mrf.mxu1  ;;  %v13450_v15 = vld [vmem:[%s14199_s17 + $0x1534] sm:$0xf0] }
 0x1aa   : > { %7273 = vmatpush.bf16.msrb.mxu2 %v11107_v48  ;;  %v13454_v48 = vld [vmem:[%s14199_s17 + $0x1554] sm:$0xf0] }
 0x1ab   : > { %7286 = vmatpush.bf16.msrb.mxu3 %v11171_v51  ;;  %7248 = vmatmul.bf16.vlgmr.msrb.gmra.mxu0 %v15054_v56  ;;  %v11403_v43 = vor.u32 %v13454_v48, %v11402_v26  ;;  %v11467_v51 = vor.u32 %v13470_v2, %v11466_v60  ;;  %v11386_v26 = vld [vmem:[%s14199_s17 + $0x1530] sm:$0xf]  ;;  %v13466_v60 = vld [vmem:[%s14199_s17 + $0x15b4] sm:$0xf0]  ;;  %v13520_v56 = vld [vmem:[%s14199_s17 + $0x1764] sm:$0xf0] }
 0x1ac   : > { %7292 = vmatpush.bf16.msra.mxu0 %v11291_v52  ;;  %7261 = vmatmul.bf16.vlgmr.msrb.gmra.mxu1 %v15061_v63  ;;  %v13436_v52 = vld [vmem:[%s14199_s17 + $0x14c4] sm:$0xf0]  ;;  %v11450_v48 = vld [vmem:[%s14199_s17 + $0x15b0] sm:$0xf] }
 0x1ad   : > { %7305 = vmatpush.bf16.msra.mxu1 %v11355_v8  ;;  %7274 = vmatmul.bf16.vlgmr.msrb.gmra.mxu2 %v15059_v24  ;;  %v11339_v8 = vor.u32 %v13438_v40, %v11338_v39  ;;  %v13434_v40 = vld [vmem:[%s14199_s17 + $0x14b4] sm:$0xf0]  ;;  %v13488_v24 = vld [vmem:[%s14199_s17 + $0x1664] sm:$0xf0] }
 0x1ae   : > { %7318 = vmatpush.bf16.msra.mxu2 %v11419_v3  ;;  %7287 = vmatmul.bf16.vlgmr.msrb.gmra.mxu3 %v15065_v1  ;;  %v11275_v3 = vor.u32 %v13422_v32, %v11274_v27  ;;  %v13418_v27 = vld [vmem:[%s14199_s17 + $0x1434] sm:$0xf0]  ;;  %v11322_v32 = vld [vmem:[%s14199_s17 + $0x14b0] sm:$0xf] }
 0x1af   : > { %7331 = vmatpush.bf16.msra.mxu3 %v11483_v61  ;;  %v11458_v61 = vld [vmem:[%s14199_s17 + $0x15c0] sm:$0xf] }
 0x1b0   : > { %7293 = vmatpush.bf16.msra.mxu0 %v11283_v6  ;;  %v11331_v6 = vor.u32 %v13436_v52, %v11330_v55  ;;  %v11459_v39 = vor.u32 %v13468_v9, %v11458_v61  ;;  %v11451_v55 = vor.u32 %v13466_v60, %v11450_v48  ;;  %v13432_v52 = vld [vmem:[%s14199_s17 + $0x14a4] sm:$0xf0]  ;;  %v11442_v9 = vld [vmem:[%s14199_s17 + $0x15a0] sm:$0xf]  ;;  %v13446_v48 = vld [vmem:[%s14199_s17 + $0x1514] sm:$0xf0] }
 0x1b1   : > { %7306 = vmatpush.bf16.msra.mxu1 %v11347_v14  ;;  %v11395_v14 = vor.u32 %v13452_v57, %v11394_v54  ;;  %v11378_v54 = vld [vmem:[%s14199_s17 + $0x1520] sm:$0xf]  ;;  %v13448_v57 = vld [vmem:[%s14199_s17 + $0x1524] sm:$0xf0]  ;;  %v7080_v61 = vpop.f32.mrf.mxu3  ;;  %v11434_v60 = vld [vmem:[%s14199_s17 + $0x1590] sm:$0xf] }
 0x1b2   : > { %7319 = vmatpush.bf16.msra.mxu2 %v11411_v21  ;;  %v11258_v21 = vld [vmem:[%s14199_s17 + $0x1430] sm:$0xf] }
 0x1b3   : > { %7332 = vmatpush.bf16.msra.mxu3 %v11475_v47  ;;  %v7055_v47 = vadd.f32 %v7054_v0, %v7042_v62  ;;  %v11259_v2 = vor.u32 %v13418_v27, %v11258_v21  ;;  %v13464_v62 = vld [vmem:[%s14199_s17 + $0x15a4] sm:$0xf0]  ;;  %v11315_v21 = vor.u32 %v13432_v52, %v11314_v4  ;;  %v11379_v27 = vor.u32 %v13448_v57, %v11378_v54  ;;  %v11362_v52 = vld [vmem:[%s14199_s17 + $0x1500] sm:$0xf] }
 0x1b4   : > { %7294 = vmatpush.bf16.msra.mxu0 %v11275_v3  ;;  %v11323_v3 = vor.u32 %v13434_v40, %v11322_v32  ;;  %v11242_v32 = vld [vmem:[%s14199_s17 + $0x1410] sm:$0xf]  ;;  %v11443_v40 = vor.u32 %v13464_v62, %v11442_v9  ;;  %v13428_v4 = vld [vmem:[%s14199_s17 + $0x1484] sm:$0xf0]  ;;  %v386_v57 = vld [vmem:[%s16797_s0 + $0xa0] sm:$0xff] }
 0x1b5   : > { %7307 = vmatpush.bf16.msra.mxu1 %v11339_v8  ;;  %v11387_v8 = vor.u32 %v13450_v15, %v11386_v26  ;;  %v13430_v26 = vld [vmem:[%s14199_s17 + $0x1494] sm:$0xf0]  ;;  %v11370_v15 = vld [vmem:[%s14199_s17 + $0x1510] sm:$0xf]  ;;  %v13444_v54 = vld [vmem:[%s14199_s17 + $0x1504] sm:$0xf0] }
 0x1b6   : > { %7320 = vmatpush.bf16.msra.mxu2 %v11403_v43  ;;  %v11250_v43 = vld [vmem:[%s14199_s17 + $0x1420] sm:$0xf]  ;;  %v13460_v9 = vld [vmem:[%s14199_s17 + $0x1584] sm:$0xf0] }
 0x1b7   : > { %7333 = vmatpush.bf16.msra.mxu3 %v11467_v51  ;;  %v7067_v51 = vpop.f32.mrf.mxu2  ;;  %v11251_v0 = vor.u32 %v13416_v50, %v11250_v43  ;;  %v13412_v43 = vld [vmem:[%s14199_s17 + $0x1404] sm:$0xf0]  ;;  %v11298_v50 = vld [vmem:[%s14199_s17 + $0x1480] sm:$0xf] }
 0x1b8   : > { %7295 = vmatpush.bf16.msra.mxu0 %v11267_v59  ;;  %v7068_v58 = vadd.f32 %v7067_v51, %v7055_v47  ;;  %v7043_v59 = vpop.f32.mrf.mxu0  ;;  %v11306_v47 = vld [vmem:[%s14199_s17 + $0x1490] sm:$0xf]  ;;  %v11371_v51 = vor.u32 %v13446_v48, %v11370_v15  ;;  %v387_v62 = vld [vmem:[%s16797_s0 + $0xa8] sm:$0xff]  ;;  %v11299_v15 = vor.u32 %v13428_v4, %v11298_v50  ;;  %v11363_v48 = vor.u32 %v13444_v54, %v11362_v52  ;;  %v11666_v54 = vld [vmem:[%s14199_s17 + $0x1760] sm:$0xf] }
 0x1b9   : > { %7308 = vmatpush.bf16.msra.mxu1 %v11331_v6  ;;  %v7056_v6 = vpop.f32.mrf.mxu1  ;;  %v13504_v52 = vld [vmem:[%s14199_s17 + $0x16e4] sm:$0xf0] }
 0x1ba   : > { %7321 = vmatpush.bf16.msra.mxu2 %v11395_v14  ;;  %v15104_v14 = vadd.f32 %v7080_v61, %v7068_v58  ;;  %v11426_v61 = vld [vmem:[%s14199_s17 + $0x1580] sm:$0xf]  ;;  %v13490_v6 = vld [vmem:[%s14199_s17 + $0x1674] sm:$0xf0] }
 0x1bb   : > { %7334 = vmatpush.bf16.msra.mxu3 %v11459_v39  ;;  %v13414_v39 = vld [vmem:[%s14199_s17 + $0x1414] sm:$0xf0] }
 0x1bc   : > { %7296 = vmatpush.bf16.msra.mxu0 %v11259_v2  ;;  %v13462_v2 = vld [vmem:[%s14199_s17 + $0x1594] sm:$0xf0] }
 0x1bd   : > { %7309 = vmatpush.bf16.msra.mxu1 %v11323_v3  ;;  %v11234_v3 = vld [vmem:[%s14199_s17 + $0x1400] sm:$0xf]  ;;  %v11435_v58 = vor.u32 %v13462_v2, %v11434_v60  ;;  %v11738_v60 = vld [vmem:[%s14199_s17 + $0x17f0] sm:$0xf]  ;;  %v13538_v2 = vld [vmem:[%s14199_s17 + $0x17f4] sm:$0xf0] }
 0x1be   : > { %7322 = vmatpush.bf16.msra.mxu2 %v11387_v8  ;;  %v11243_v8 = vor.u32 %v13414_v39, %v11242_v32  ;;  %v11235_v32 = vor.u32 %v13412_v43, %v11234_v3  ;;  %v13506_v39 = vld [vmem:[%s14199_s17 + $0x16f4] sm:$0xf0]  ;;  %v11427_v3 = vor.u32 %v13460_v9, %v11426_v61  ;;  %v1503_v43 = vunpack.c.h.b16 %v387_v62  ;;  %v11730_v61 = vld [vmem:[%s14199_s17 + $0x17e0] sm:$0xf]  ;;  %v13536_v9 = vld [vmem:[%s14199_s17 + $0x17e4] sm:$0xf0] }
 0x1bf   : > { %7335 = vmatpush.bf16.msra.mxu3 %v11451_v55  ;;  %v11307_v55 = vor.u32 %v13430_v26, %v11306_v47  ;;  %v7069_v59 = vpop.f32.mrf.mxu2  ;;  %v11674_v47 = vld [vmem:[%s14199_s17 + $0x1770] sm:$0xf]  ;;  %v13522_v26 = vld [vmem:[%s14199_s17 + $0x1774] sm:$0xf0]  ;;  %v11739_v50 = vor.u32 %v13538_v2, %v11738_v60  ;;  %v11522_v2 = vld [vmem:[%s14199_s17 + $0x1640] sm:$0xf] }
 0x1c0   : > { %7297 = vmatpush.bf16.msra.mxu0 %v11251_v0  ;;  %v11546_v0 = vld [vmem:[%s14199_s17 + $0x1670] sm:$0xf]  ;;  %v1502_v59 = vunpack.c.l.b16 %v387_v62  ;;  %v11675_v63 = vor.u32 %v13522_v26, %v11674_v47  ;;  %v15150_v62 = vpack.c.b16 %v1503_v43, %v1503_v43  ;;  %v11731_v26 = vor.u32 %v13536_v9, %v11730_v61  ;;  %v11650_v43 = vld [vmem:[%s14199_s17 + $0x1740] sm:$0xf] }
 0x1c1   : > { %7310 = vmatpush.bf16.msra.mxu1 %v11315_v21  ;;  %v11610_v21 = vld [vmem:[%s14199_s17 + $0x16f0] sm:$0xf] }
 0x1c2   : > { %7323 = vmatpush.bf16.msra.mxu2 %v11379_v27  ;;  %v7082_v27 = vpop.f32.mrf.mxu3  ;;  %v11611_v1 = vor.u32 %v13506_v39, %v11610_v21  ;;  %16852 = vst [vmem:[#allocation25_spill] sm:$0xff] %v15150_v62  ;;  %v11667_v21 = vor.u32 %v13520_v56, %v11666_v54  ;;  %v13486_v39 = vld [vmem:[%s14199_s17 + $0x1654] sm:$0xf0]  ;;  %v11594_v47 = vld [vmem:[%s14199_s17 + $0x16d0] sm:$0xf] }
 0x1c3   : > { %7336 = vmatpush.bf16.msra.mxu3 %v11443_v40  ;;  %v1500_v40 = vunpack.c.l.b16 %v386_v57  ;;  %v1501_v27 = vunpack.c.h.b16 %v386_v57  ;;  %v15144_v57 = vpack.c.b16 %v1502_v59, %v1502_v59  ;;  %v11722_v56 = vld [vmem:[%s14199_s17 + $0x17d0] sm:$0xf]  ;;  %v13484_v59 = vld [vmem:[%s14199_s17 + $0x1644] sm:$0xf0] }
 0x1c4   : > { %7298 = vmatpush.bf16.msra.mxu0 %v11243_v8  ;;  %v11547_v8 = vor.u32 %v13490_v6, %v11546_v0  ;;  %v11523_v61 = vor.u32 %v13484_v59, %v11522_v2  ;;  %v13480_v2 = vld [vmem:[%s14199_s17 + $0x1624] sm:$0xf0]  ;;  %v11570_v59 = vld [vmem:[%s14199_s17 + $0x16a0] sm:$0xf] }
 0x1c5   : > { %7311 = vmatpush.bf16.msra.mxu1 %v11307_v55  ;;  %v11538_v55 = vld [vmem:[%s14199_s17 + $0x1660] sm:$0xf]  ;;  %v15139_v4 = vpack.c.b16 %v1500_v40, %v1500_v40  ;;  %16850 = vst [vmem:[#allocation23_spill] sm:$0xff] %v15144_v57  ;;  %v13502_v40 = vld [vmem:[%s14199_s17 + $0x16d4] sm:$0xf0] }
 0x1c6   : > { %7324 = vmatpush.bf16.msra.mxu2 %v11371_v51  ;;  %v11602_v51 = vld [vmem:[%s14199_s17 + $0x16e0] sm:$0xf]  ;;  %v11539_v0 = vor.u32 %v13488_v24, %v11538_v55  ;;  %v13534_v24 = vld [vmem:[%s14199_s17 + $0x17d4] sm:$0xf0]  ;;  %v13516_v55 = vld [vmem:[%s14199_s17 + $0x1744] sm:$0xf0] }
 0x1c7   : > { %7337 = vmatpush.bf16.msra.mxu3 %v11435_v58  ;;  %16849 = vst [vmem:[#allocation22_spill] sm:$0xff] %v15139_v4  ;;  %v15146_v58 = vpack.c.b16 %v1501_v27, %v1501_v27  ;;  %v11603_v6 = vor.u32 %v13504_v52, %v11602_v51  ;;  %v11586_v27 = vld [vmem:[%s14199_s17 + $0x16c0] sm:$0xf]  ;;  %v13532_v52 = vld [vmem:[%s14199_s17 + $0x17c4] sm:$0xf0] }
 0x1c8   : > { %7299 = vmatpush.bf16.msra.mxu0 %v11235_v32  ;;  %v11530_v32 = vld [vmem:[%s14199_s17 + $0x1650] sm:$0xf]  ;;  %v7093_v51 = vpop.f32.mrf.mxu0 }
 0x1c9   : > { %7312 = vmatpush.bf16.msra.mxu1 %v11299_v15  ;;  %16851 = vst [vmem:[#allocation24_spill] sm:$0xff] %v15146_v58  ;;  %v11658_v15 = vld [vmem:[%s14199_s17 + $0x1750] sm:$0xf]  ;;  %v7094_v54 = vadd.f32 %v7093_v51, %v15104_v14  ;;  %v7106_v9 = vpop.f32.mrf.mxu1  ;;  %v13514_v14 = vld [vmem:[%s14199_s17 + $0x1734] sm:$0xf0] }
 0x1ca   : > { %7325 = vmatpush.bf16.msra.mxu2 %v11363_v48  ;;  %v13518_v48 = vld [vmem:[%s14199_s17 + $0x1754] sm:$0xf0] }
 0x1cb   : > { %7338 = vmatpush.bf16.msra.mxu3 %v11427_v3  ;;  %7300 = vmatmul.bf16.vlgmr.msra.gmra.mxu0 %v15139_v4  ;;  %v11659_v60 = vor.u32 %v13518_v48, %v11658_v15  ;;  %v11723_v3 = vor.u32 %v13534_v24, %v11722_v56  ;;  %v11642_v15 = vld [vmem:[%s14199_s17 + $0x1730] sm:$0xf]  ;;  %v13530_v56 = vld [vmem:[%s14199_s17 + $0x17b4] sm:$0xf0]  ;;  %v13584_v4 = vld [vmem:[%s14199_s17 + $0x1964] sm:$0xf0] }
 0x1cc   : > { %7344 = vmatpush.bf16.msrb.mxu0 %v11547_v8  ;;  %7313 = vmatmul.bf16.vlgmr.msra.gmra.mxu1 %v15146_v58  ;;  %v13500_v8 = vld [vmem:[%s14199_s17 + $0x16c4] sm:$0xf0]  ;;  %v11706_v48 = vld [vmem:[%s14199_s17 + $0x17b0] sm:$0xf] }
 0x1cd   : > { %7357 = vmatpush.bf16.msrb.mxu1 %v11611_v1  ;;  %7326 = vmatmul.bf16.vlgmr.msra.gmra.mxu2 %v15144_v57  ;;  %v11595_v1 = vor.u32 %v13502_v40, %v11594_v47  ;;  %v13498_v40 = vld [vmem:[%s14199_s17 + $0x16b4] sm:$0xf0]  ;;  %v13552_v57 = vld [vmem:[%s14199_s17 + $0x1864] sm:$0xf0] }
 0x1ce   : > { %7370 = vmatpush.bf16.msrb.mxu2 %v11675_v63  ;;  %7339 = vmatmul.bf16.vlgmr.msra.gmra.mxu3 %v15150_v62  ;;  %v11531_v63 = vor.u32 %v13486_v39, %v11530_v32  ;;  %v13482_v32 = vld [vmem:[%s14199_s17 + $0x1634] sm:$0xf0]  ;;  %v11578_v39 = vld [vmem:[%s14199_s17 + $0x16b0] sm:$0xf] }
 0x1cf   : > { %7383 = vmatpush.bf16.msrb.mxu3 %v11739_v50  ;;  %v11714_v50 = vld [vmem:[%s14199_s17 + $0x17c0] sm:$0xf] }
 0x1d0   : > { %7345 = vmatpush.bf16.msrb.mxu0 %v11539_v0  ;;  %v11587_v0 = vor.u32 %v13500_v8, %v11586_v27  ;;  %v11715_v47 = vor.u32 %v13532_v52, %v11714_v50  ;;  %v11707_v27 = vor.u32 %v13530_v56, %v11706_v48  ;;  %v13496_v8 = vld [vmem:[%s14199_s17 + $0x16a4] sm:$0xf0]  ;;  %v11698_v52 = vld [vmem:[%s14199_s17 + $0x17a0] sm:$0xf]  ;;  %v13510_v48 = vld [vmem:[%s14199_s17 + $0x1714] sm:$0xf0] }
 0x1d1   : > { %7358 = vmatpush.bf16.msrb.mxu1 %v11603_v6  ;;  %v11651_v6 = vor.u32 %v13516_v55, %v11650_v43  ;;  %v11634_v43 = vld [vmem:[%s14199_s17 + $0x1720] sm:$0xf]  ;;  %v13512_v55 = vld [vmem:[%s14199_s17 + $0x1724] sm:$0xf0]  ;;  %v7132_v50 = vpop.f32.mrf.mxu3  ;;  %v11690_v56 = vld [vmem:[%s14199_s17 + $0x1790] sm:$0xf] }
 0x1d2   : > { %7371 = vmatpush.bf16.msrb.mxu2 %v11667_v21  ;;  %v11514_v21 = vld [vmem:[%s14199_s17 + $0x1630] sm:$0xf] }
 0x1d3   : > { %7384 = vmatpush.bf16.msrb.mxu3 %v11731_v26  ;;  %v7107_v26 = vadd.f32 %v7106_v9, %v7094_v54  ;;  %v11515_v24 = vor.u32 %v13482_v32, %v11514_v21  ;;  %v13528_v54 = vld [vmem:[%s14199_s17 + $0x17a4] sm:$0xf0]  ;;  %v11571_v21 = vor.u32 %v13496_v8, %v11570_v59  ;;  %v11635_v32 = vor.u32 %v13512_v55, %v11634_v43  ;;  %v11618_v8 = vld [vmem:[%s14199_s17 + $0x1700] sm:$0xf]  ;;  %v388_v55 = vld [vmem:[%s16797_s0 + $0xb0] sm:$0xff] }
 0x1d4   : > { %7346 = vmatpush.bf16.msrb.mxu0 %v11531_v63  ;;  %v11579_v63 = vor.u32 %v13498_v40, %v11578_v39  ;;  %v11498_v39 = vld [vmem:[%s14199_s17 + $0x1610] sm:$0xf]  ;;  %v11699_v40 = vor.u32 %v13528_v54, %v11698_v52  ;;  %v13492_v59 = vld [vmem:[%s14199_s17 + $0x1684] sm:$0xf0]  ;;  %v389_v54 = vld [vmem:[%s16797_s0 + $0xb8] sm:$0xff] }
 0x1d5   : > { %7359 = vmatpush.bf16.msrb.mxu1 %v11595_v1  ;;  %v11643_v1 = vor.u32 %v13514_v14, %v11642_v15  ;;  %v13494_v15 = vld [vmem:[%s14199_s17 + $0x1694] sm:$0xf0]  ;;  %v11626_v14 = vld [vmem:[%s14199_s17 + $0x1710] sm:$0xf]  ;;  %v13508_v43 = vld [vmem:[%s14199_s17 + $0x1704] sm:$0xf0] }
 0x1d6   : > { %7372 = vmatpush.bf16.msrb.mxu2 %v11659_v60  ;;  %v11506_v60 = vld [vmem:[%s14199_s17 + $0x1620] sm:$0xf]  ;;  %v13524_v52 = vld [vmem:[%s14199_s17 + $0x1784] sm:$0xf0] }
 0x1d7   : > { %7385 = vmatpush.bf16.msrb.mxu3 %v11723_v3  ;;  %v7119_v3 = vpop.f32.mrf.mxu2  ;;  %v11507_v9 = vor.u32 %v13480_v2, %v11506_v60  ;;  %v13476_v60 = vld [vmem:[%s14199_s17 + $0x1604] sm:$0xf0]  ;;  %v11554_v2 = vld [vmem:[%s14199_s17 + $0x1680] sm:$0xf] }
 0x1d8   : > { %7347 = vmatpush.bf16.msrb.mxu0 %v11523_v61  ;;  %v7120_v51 = vadd.f32 %v7119_v3, %v7107_v26  ;;  %v7095_v61 = vpop.f32.mrf.mxu0  ;;  %v11562_v26 = vld [vmem:[%s14199_s17 + $0x1690] sm:$0xf]  ;;  %v11627_v3 = vor.u32 %v13510_v48, %v11626_v14  ;;  %v11555_v14 = vor.u32 %v13492_v59, %v11554_v2  ;;  %v11619_v48 = vor.u32 %v13508_v43, %v11618_v8  ;;  %v13568_v8 = vld [vmem:[%s14199_s17 + $0x18e4] sm:$0xf0]  ;;  %v11922_v43 = vld [vmem:[%s14199_s17 + $0x1960] sm:$0xf] }
 0x1d9   : > { %7360 = vmatpush.bf16.msrb.mxu1 %v11587_v0  ;;  %v7108_v0 = vpop.f32.mrf.mxu1 }
 0x1da   : > { %7373 = vmatpush.bf16.msrb.mxu2 %v11651_v6  ;;  %v15189_v6 = vadd.f32 %v7132_v50, %v7120_v51  ;;  %v11682_v50 = vld [vmem:[%s14199_s17 + $0x1780] sm:$0xf]  ;;  %v13554_v0 = vld [vmem:[%s14199_s17 + $0x1874] sm:$0xf0] }
 0x1db   : > { %7386 = vmatpush.bf16.msrb.mxu3 %v11715_v47  ;;  %v13478_v47 = vld [vmem:[%s14199_s17 + $0x1614] sm:$0xf0] }
 0x1dc   : > { %7348 = vmatpush.bf16.msrb.mxu0 %v11515_v24  ;;  %v13526_v24 = vld [vmem:[%s14199_s17 + $0x1794] sm:$0xf0] }
 0x1dd   : > { %7361 = vmatpush.bf16.msrb.mxu1 %v11579_v63  ;;  %v11490_v63 = vld [vmem:[%s14199_s17 + $0x1600] sm:$0xf]  ;;  %v11691_v51 = vor.u32 %v13526_v24, %v11690_v56  ;;  %v11994_v56 = vld [vmem:[%s14199_s17 + $0x19f0] sm:$0xf]  ;;  %v13602_v24 = vld [vmem:[%s14199_s17 + $0x19f4] sm:$0xf0] }
 0x1de   : > { %7374 = vmatpush.bf16.msrb.mxu2 %v11643_v1  ;;  %v11499_v1 = vor.u32 %v13478_v47, %v11498_v39  ;;  %v11491_v39 = vor.u32 %v13476_v60, %v11490_v63  ;;  %v13570_v47 = vld [vmem:[%s14199_s17 + $0x18f4] sm:$0xf0]  ;;  %v11683_v63 = vor.u32 %v13524_v52, %v11682_v50  ;;  %v1507_v60 = vunpack.c.h.b16 %v389_v54  ;;  %v11986_v50 = vld [vmem:[%s14199_s17 + $0x19e0] sm:$0xf]  ;;  %v13600_v52 = vld [vmem:[%s14199_s17 + $0x19e4] sm:$0xf0] }
 0x1df   : > { %7387 = vmatpush.bf16.msrb.mxu3 %v11707_v27  ;;  %v11563_v27 = vor.u32 %v13494_v15, %v11562_v26  ;;  %v7121_v61 = vpop.f32.mrf.mxu2  ;;  %v11930_v26 = vld [vmem:[%s14199_s17 + $0x1970] sm:$0xf]  ;;  %v13586_v15 = vld [vmem:[%s14199_s17 + $0x1974] sm:$0xf0]  ;;  %v11995_v2 = vor.u32 %v13602_v24, %v11994_v56  ;;  %v11778_v24 = vld [vmem:[%s14199_s17 + $0x1840] sm:$0xf] }
 0x1e0   : > { %7349 = vmatpush.bf16.msrb.mxu0 %v11507_v9  ;;  %v11802_v9 = vld [vmem:[%s14199_s17 + $0x1870] sm:$0xf]  ;;  %v1506_v61 = vunpack.c.l.b16 %v389_v54  ;;  %v11931_v58 = vor.u32 %v13586_v15, %v11930_v26  ;;  %v15235_v54 = vpack.c.b16 %v1507_v60, %v1507_v60  ;;  %v11987_v15 = vor.u32 %v13600_v52, %v11986_v50  ;;  %v11906_v60 = vld [vmem:[%s14199_s17 + $0x1940] sm:$0xf] }
 0x1e1   : > { %7362 = vmatpush.bf16.msrb.mxu1 %v11571_v21  ;;  %v11866_v21 = vld [vmem:[%s14199_s17 + $0x18f0] sm:$0xf] }
 0x1e2   : > { %7375 = vmatpush.bf16.msrb.mxu2 %v11635_v32  ;;  %v7134_v32 = vpop.f32.mrf.mxu3  ;;  %v11867_v62 = vor.u32 %v13570_v47, %v11866_v21  ;;  %16856 = vst [vmem:[#allocation29_spill] sm:$0xff] %v15235_v54  ;;  %v11923_v21 = vor.u32 %v13584_v4, %v11922_v43  ;;  %v13550_v47 = vld [vmem:[%s14199_s17 + $0x1854] sm:$0xf0]  ;;  %v11850_v26 = vld [vmem:[%s14199_s17 + $0x18d0] sm:$0xf] }
 0x1e3   : > { %7388 = vmatpush.bf16.msrb.mxu3 %v11699_v40  ;;  %v1504_v40 = vunpack.c.l.b16 %v388_v55  ;;  %v1505_v32 = vunpack.c.h.b16 %v388_v55  ;;  %v15229_v55 = vpack.c.b16 %v1506_v61, %v1506_v61  ;;  %v11978_v4 = vld [vmem:[%s14199_s17 + $0x19d0] sm:$0xf]  ;;  %v13548_v61 = vld [vmem:[%s14199_s17 + $0x1844] sm:$0xf0] }
 0x1e4   : > { %7350 = vmatpush.bf16.msrb.mxu0 %v11499_v1  ;;  %v11803_v1 = vor.u32 %v13554_v0, %v11802_v9  ;;  %v11779_v50 = vor.u32 %v13548_v61, %v11778_v24  ;;  %v13544_v24 = vld [vmem:[%s14199_s17 + $0x1824] sm:$0xf0]  ;;  %v11826_v61 = vld [vmem:[%s14199_s17 + $0x18a0] sm:$0xf] }
 0x1e5   : > { %7363 = vmatpush.bf16.msrb.mxu1 %v11563_v27  ;;  %v11794_v27 = vld [vmem:[%s14199_s17 + $0x1860] sm:$0xf]  ;;  %v15224_v59 = vpack.c.b16 %v1504_v40, %v1504_v40  ;;  %16854 = vst [vmem:[#allocation27_spill] sm:$0xff] %v15229_v55  ;;  %v13566_v40 = vld [vmem:[%s14199_s17 + $0x18d4] sm:$0xf0] }
 0x1e6   : > { %7376 = vmatpush.bf16.msrb.mxu2 %v11627_v3  ;;  %v11858_v3 = vld [vmem:[%s14199_s17 + $0x18e0] sm:$0xf]  ;;  %v11795_v9 = vor.u32 %v13552_v57, %v11794_v27  ;;  %v13598_v57 = vld [vmem:[%s14199_s17 + $0x19d4] sm:$0xf0]  ;;  %v13580_v27 = vld [vmem:[%s14199_s17 + $0x1944] sm:$0xf0] }
 0x1e7   : > { %7389 = vmatpush.bf16.msrb.mxu3 %v11691_v51  ;;  %16853 = vst [vmem:[#allocation26_spill] sm:$0xff] %v15224_v59  ;;  %v15231_v51 = vpack.c.b16 %v1505_v32, %v1505_v32  ;;  %v11859_v0 = vor.u32 %v13568_v8, %v11858_v3  ;;  %v11842_v32 = vld [vmem:[%s14199_s17 + $0x18c0] sm:$0xf]  ;;  %v13596_v8 = vld [vmem:[%s14199_s17 + $0x19c4] sm:$0xf0] }
 0x1e8   : > { %7351 = vmatpush.bf16.msrb.mxu0 %v11491_v39  ;;  %v11786_v39 = vld [vmem:[%s14199_s17 + $0x1850] sm:$0xf]  ;;  %v7145_v3 = vpop.f32.mrf.mxu0 }
 0x1e9   : > { %7364 = vmatpush.bf16.msrb.mxu1 %v11555_v14  ;;  %16855 = vst [vmem:[#allocation28_spill] sm:$0xff] %v15231_v51  ;;  %v11914_v14 = vld [vmem:[%s14199_s17 + $0x1950] sm:$0xf]  ;;  %v7146_v43 = vadd.f32 %v7145_v3, %v15189_v6  ;;  %v7158_v52 = vpop.f32.mrf.mxu1  ;;  %v13578_v6 = vld [vmem:[%s14199_s17 + $0x1934] sm:$0xf0] }
 0x1ea   : > { %7377 = vmatpush.bf16.msrb.mxu2 %v11619_v48  ;;  %v13582_v48 = vld [vmem:[%s14199_s17 + $0x1954] sm:$0xf0] }
 0x1eb   : > { %7390 = vmatpush.bf16.msrb.mxu3 %v11683_v63  ;;  %7352 = vmatmul.bf16.vlgmr.msrb.gmra.mxu0 %v15224_v59  ;;  %v11915_v56 = vor.u32 %v13582_v48, %v11914_v14  ;;  %v11979_v63 = vor.u32 %v13598_v57, %v11978_v4  ;;  %v11898_v14 = vld [vmem:[%s14199_s17 + $0x1930] sm:$0xf]  ;;  %v13594_v4 = vld [vmem:[%s14199_s17 + $0x19b4] sm:$0xf0]  ;;  %v13648_v59 = vld [vmem:[%s14199_s17 + $0x1b64] sm:$0xf0] }
 0x1ec   : > { %7396 = vmatpush.bf16.msra.mxu0 %v11803_v1  ;;  %7365 = vmatmul.bf16.vlgmr.msrb.gmra.mxu1 %v15231_v51  ;;  %v13564_v1 = vld [vmem:[%s14199_s17 + $0x18c4] sm:$0xf0]  ;;  %v11962_v48 = vld [vmem:[%s14199_s17 + $0x19b0] sm:$0xf] }
 0x1ed   : > { %7409 = vmatpush.bf16.msra.mxu1 %v11867_v62  ;;  %7378 = vmatmul.bf16.vlgmr.msrb.gmra.mxu2 %v15229_v55  ;;  %v11851_v62 = vor.u32 %v13566_v40, %v11850_v26  ;;  %v13562_v40 = vld [vmem:[%s14199_s17 + $0x18b4] sm:$0xf0]  ;;  %v13616_v55 = vld [vmem:[%s14199_s17 + $0x1a64] sm:$0xf0] }
 0x1ee   : > { %7422 = vmatpush.bf16.msra.mxu2 %v11931_v58  ;;  %7391 = vmatmul.bf16.vlgmr.msrb.gmra.mxu3 %v15235_v54  ;;  %v11787_v58 = vor.u32 %v13550_v47, %v11786_v39  ;;  %v13546_v39 = vld [vmem:[%s14199_s17 + $0x1834] sm:$0xf0]  ;;  %v11834_v47 = vld [vmem:[%s14199_s17 + $0x18b0] sm:$0xf] }
 0x1ef   : > { %7435 = vmatpush.bf16.msra.mxu3 %v11995_v2  ;;  %v11970_v2 = vld [vmem:[%s14199_s17 + $0x19c0] sm:$0xf] }
 0x1f0   : > { %7397 = vmatpush.bf16.msra.mxu0 %v11795_v9  ;;  %v11843_v9 = vor.u32 %v13564_v1, %v11842_v32  ;;  %v11971_v26 = vor.u32 %v13596_v8, %v11970_v2  ;;  %v11963_v32 = vor.u32 %v13594_v4, %v11962_v48  ;;  %v13560_v1 = vld [vmem:[%s14199_s17 + $0x18a4] sm:$0xf0]  ;;  %v11954_v8 = vld [vmem:[%s14199_s17 + $0x19a0] sm:$0xf]  ;;  %v13574_v48 = vld [vmem:[%s14199_s17 + $0x1914] sm:$0xf0] }
 0x1f1   : > { %7410 = vmatpush.bf16.msra.mxu1 %v11859_v0  ;;  %v11907_v0 = vor.u32 %v13580_v27, %v11906_v60  ;;  %v11890_v60 = vld [vmem:[%s14199_s17 + $0x1920] sm:$0xf]  ;;  %v13576_v27 = vld [vmem:[%s14199_s17 + $0x1924] sm:$0xf0]  ;;  %v7184_v2 = vpop.f32.mrf.mxu3  ;;  %v11946_v4 = vld [vmem:[%s14199_s17 + $0x1990] sm:$0xf] }
 0x1f2   : > { %7423 = vmatpush.bf16.msra.mxu2 %v11923_v21  ;;  %v11770_v21 = vld [vmem:[%s14199_s17 + $0x1830] sm:$0xf] }
 0x1f3   : > { %7436 = vmatpush.bf16.msra.mxu3 %v11987_v15  ;;  %v7159_v15 = vadd.f32 %v7158_v52, %v7146_v43  ;;  %v11771_v57 = vor.u32 %v13546_v39, %v11770_v21  ;;  %v13592_v43 = vld [vmem:[%s14199_s17 + $0x19a4] sm:$0xf0]  ;;  %v11827_v21 = vor.u32 %v13560_v1, %v11826_v61  ;;  %v11891_v39 = vor.u32 %v13576_v27, %v11890_v60  ;;  %v11874_v1 = vld [vmem:[%s14199_s17 + $0x1900] sm:$0xf] }
 0x1f4   : > { %7398 = vmatpush.bf16.msra.mxu0 %v11787_v58  ;;  %v11835_v58 = vor.u32 %v13562_v40, %v11834_v47  ;;  %v11754_v47 = vld [vmem:[%s14199_s17 + $0x1810] sm:$0xf]  ;;  %v11955_v40 = vor.u32 %v13592_v43, %v11954_v8  ;;  %v13556_v61 = vld [vmem:[%s14199_s17 + $0x1884] sm:$0xf0]  ;;  %v390_v27 = vld [vmem:[%s16797_s0 + $0xc0] sm:$0xff] }
 0x1f5   : > { %7411 = vmatpush.bf16.msra.mxu1 %v11851_v62  ;;  %v11899_v62 = vor.u32 %v13578_v6, %v11898_v14  ;;  %v13558_v14 = vld [vmem:[%s14199_s17 + $0x1894] sm:$0xf0]  ;;  %v11882_v6 = vld [vmem:[%s14199_s17 + $0x1910] sm:$0xf]  ;;  %v13572_v60 = vld [vmem:[%s14199_s17 + $0x1904] sm:$0xf0] }
 0x1f6   : > { %7424 = vmatpush.bf16.msra.mxu2 %v11915_v56  ;;  %v11762_v56 = vld [vmem:[%s14199_s17 + $0x1820] sm:$0xf]  ;;  %v13588_v8 = vld [vmem:[%s14199_s17 + $0x1984] sm:$0xf0] }
 0x1f7   : > { %7437 = vmatpush.bf16.msra.mxu3 %v11979_v63  ;;  %v7171_v63 = vpop.f32.mrf.mxu2  ;;  %v11763_v52 = vor.u32 %v13544_v24, %v11762_v56  ;;  %v13540_v56 = vld [vmem:[%s14199_s17 + $0x1804] sm:$0xf0]  ;;  %v11810_v24 = vld [vmem:[%s14199_s17 + $0x1880] sm:$0xf] }
 0x1f8   : > { %7399 = vmatpush.bf16.msra.mxu0 %v11779_v50  ;;  %v7172_v3 = vadd.f32 %v7171_v63, %v7159_v15  ;;  %v7147_v50 = vpop.f32.mrf.mxu0  ;;  %v11818_v15 = vld [vmem:[%s14199_s17 + $0x1890] sm:$0xf]  ;;  %v11883_v63 = vor.u32 %v13574_v48, %v11882_v6  ;;  %v391_v43 = vld [vmem:[%s16797_s0 + $0xc8] sm:$0xff]  ;;  %v11811_v6 = vor.u32 %v13556_v61, %v11810_v24  ;;  %v11875_v48 = vor.u32 %v13572_v60, %v11874_v1  ;;  %v12178_v60 = vld [vmem:[%s14199_s17 + $0x1b60] sm:$0xf] }
 0x1f9   : > { %7412 = vmatpush.bf16.msra.mxu1 %v11843_v9  ;;  %v7160_v9 = vpop.f32.mrf.mxu1  ;;  %v13632_v1 = vld [vmem:[%s14199_s17 + $0x1ae4] sm:$0xf0] }
 0x1fa   : > { %7425 = vmatpush.bf16.msra.mxu2 %v11907_v0  ;;  %v15274_v0 = vadd.f32 %v7184_v2, %v7172_v3  ;;  %v11938_v2 = vld [vmem:[%s14199_s17 + $0x1980] sm:$0xf]  ;;  %v13618_v9 = vld [vmem:[%s14199_s17 + $0x1a74] sm:$0xf0] }
 0x1fb   : > { %7438 = vmatpush.bf16.msra.mxu3 %v11971_v26  ;;  %v13542_v26 = vld [vmem:[%s14199_s17 + $0x1814] sm:$0xf0] }
 0x1fc   : > { %7400 = vmatpush.bf16.msra.mxu0 %v11771_v57  ;;  %v13590_v57 = vld [vmem:[%s14199_s17 + $0x1994] sm:$0xf0] }
 0x1fd   : > { %7413 = vmatpush.bf16.msra.mxu1 %v11835_v58  ;;  %v11746_v58 = vld [vmem:[%s14199_s17 + $0x1800] sm:$0xf]  ;;  %v11947_v3 = vor.u32 %v13590_v57, %v11946_v4  ;;  %v12250_v4 = vld [vmem:[%s14199_s17 + $0x1bf0] sm:$0xf]  ;;  %v13666_v57 = vld [vmem:[%s14199_s17 + $0x1bf4] sm:$0xf0] }
 0x1fe   : > { %7426 = vmatpush.bf16.msra.mxu2 %v11899_v62  ;;  %v11755_v62 = vor.u32 %v13542_v26, %v11754_v47  ;;  %v11747_v47 = vor.u32 %v13540_v56, %v11746_v58  ;;  %v13634_v26 = vld [vmem:[%s14199_s17 + $0x1af4] sm:$0xf0]  ;;  %v11939_v58 = vor.u32 %v13588_v8, %v11938_v2  ;;  %v1511_v56 = vunpack.c.h.b16 %v391_v43  ;;  %v12242_v2 = vld [vmem:[%s14199_s17 + $0x1be0] sm:$0xf]  ;;  %v13664_v8 = vld [vmem:[%s14199_s17 + $0x1be4] sm:$0xf0] }
 0x1ff   : > { %7439 = vmatpush.bf16.msra.mxu3 %v11963_v32  ;;  %v11819_v32 = vor.u32 %v13558_v14, %v11818_v15  ;;  %v7173_v50 = vpop.f32.mrf.mxu2  ;;  %v12186_v15 = vld [vmem:[%s14199_s17 + $0x1b70] sm:$0xf]  ;;  %v13650_v14 = vld [vmem:[%s14199_s17 + $0x1b74] sm:$0xf0]  ;;  %v12251_v24 = vor.u32 %v13666_v57, %v12250_v4  ;;  %v12034_v57 = vld [vmem:[%s14199_s17 + $0x1a40] sm:$0xf] }
 0x200   : > { %7401 = vmatpush.bf16.msra.mxu0 %v11763_v52  ;;  %v12058_v52 = vld [vmem:[%s14199_s17 + $0x1a70] sm:$0xf]  ;;  %v1510_v50 = vunpack.c.l.b16 %v391_v43  ;;  %v12187_v51 = vor.u32 %v13650_v14, %v12186_v15  ;;  %v15320_v43 = vpack.c.b16 %v1511_v56, %v1511_v56  ;;  %v12243_v14 = vor.u32 %v13664_v8, %v12242_v2  ;;  %v12162_v56 = vld [vmem:[%s14199_s17 + $0x1b40] sm:$0xf] }
 0x201   : > { %7414 = vmatpush.bf16.msra.mxu1 %v11827_v21  ;;  %v12122_v21 = vld [vmem:[%s14199_s17 + $0x1af0] sm:$0xf] }
 0x202   : > { %7427 = vmatpush.bf16.msra.mxu2 %v11891_v39  ;;  %v7186_v39 = vpop.f32.mrf.mxu3  ;;  %v12123_v54 = vor.u32 %v13634_v26, %v12122_v21  ;;  %16860 = vst [vmem:[#allocation33_spill] sm:$0xff] %v15320_v43  ;;  %v12179_v21 = vor.u32 %v13648_v59, %v12178_v60  ;;  %v13614_v26 = vld [vmem:[%s14199_s17 + $0x1a54] sm:$0xf0]  ;;  %v12106_v15 = vld [vmem:[%s14199_s17 + $0x1ad0] sm:$0xf] }
 0x203   : > { %7440 = vmatpush.bf16.msra.mxu3 %v11955_v40  ;;  %v1508_v40 = vunpack.c.l.b16 %v390_v27  ;;  %v1509_v39 = vunpack.c.h.b16 %v390_v27  ;;  %v15314_v27 = vpack.c.b16 %v1510_v50, %v1510_v50  ;;  %v12234_v59 = vld [vmem:[%s14199_s17 + $0x1bd0] sm:$0xf]  ;;  %v13612_v50 = vld [vmem:[%s14199_s17 + $0x1a44] sm:$0xf0] }
 0x204   : > { %7402 = vmatpush.bf16.msra.mxu0 %v11755_v62  ;;  %v12059_v62 = vor.u32 %v13618_v9, %v12058_v52  ;;  %v12035_v2 = vor.u32 %v13612_v50, %v12034_v57  ;;  %v13608_v57 = vld [vmem:[%s14199_s17 + $0x1a24] sm:$0xf0]  ;;  %v12082_v50 = vld [vmem:[%s14199_s17 + $0x1aa0] sm:$0xf] }
 0x205   : > { %7415 = vmatpush.bf16.msra.mxu1 %v11819_v32  ;;  %v12050_v32 = vld [vmem:[%s14199_s17 + $0x1a60] sm:$0xf]  ;;  %v15309_v61 = vpack.c.b16 %v1508_v40, %v1508_v40  ;;  %16858 = vst [vmem:[#allocation31_spill] sm:$0xff] %v15314_v27  ;;  %v13630_v40 = vld [vmem:[%s14199_s17 + $0x1ad4] sm:$0xf0] }
 0x206   : > { %7428 = vmatpush.bf16.msra.mxu2 %v11883_v63  ;;  %v12114_v63 = vld [vmem:[%s14199_s17 + $0x1ae0] sm:$0xf]  ;;  %v12051_v52 = vor.u32 %v13616_v55, %v12050_v32  ;;  %v13662_v55 = vld [vmem:[%s14199_s17 + $0x1bd4] sm:$0xf0]  ;;  %v13644_v32 = vld [vmem:[%s14199_s17 + $0x1b44] sm:$0xf0] }
 0x207   : > { %7441 = vmatpush.bf16.msra.mxu3 %v11947_v3  ;;  %16857 = vst [vmem:[#allocation30_spill] sm:$0xff] %v15309_v61  ;;  %v15316_v3 = vpack.c.b16 %v1509_v39, %v1509_v39  ;;  %v12115_v9 = vor.u32 %v13632_v1, %v12114_v63  ;;  %v12098_v39 = vld [vmem:[%s14199_s17 + $0x1ac0] sm:$0xf]  ;;  %v13660_v1 = vld [vmem:[%s14199_s17 + $0x1bc4] sm:$0xf0] }
 0x208   : > { %7403 = vmatpush.bf16.msra.mxu0 %v11747_v47  ;;  %v12042_v47 = vld [vmem:[%s14199_s17 + $0x1a50] sm:$0xf]  ;;  %v7197_v63 = vpop.f32.mrf.mxu0 }
 0x209   : > { %7416 = vmatpush.bf16.msra.mxu1 %v11811_v6  ;;  %16859 = vst [vmem:[#allocation32_spill] sm:$0xff] %v15316_v3  ;;  %v12170_v6 = vld [vmem:[%s14199_s17 + $0x1b50] sm:$0xf]  ;;  %v7198_v60 = vadd.f32 %v7197_v63, %v15274_v0  ;;  %v7210_v8 = vpop.f32.mrf.mxu1  ;;  %v13642_v0 = vld [vmem:[%s14199_s17 + $0x1b34] sm:$0xf0] }
 0x20a   : > { %7429 = vmatpush.bf16.msra.mxu2 %v11875_v48  ;;  %v13646_v48 = vld [vmem:[%s14199_s17 + $0x1b54] sm:$0xf0] }
 0x20b   : > { %7442 = vmatpush.bf16.msra.mxu3 %v11939_v58  ;;  %7404 = vmatmul.bf16.vlgmr.msra.gmra.mxu0 %v15309_v61  ;;  %v12171_v4 = vor.u32 %v13646_v48, %v12170_v6  ;;  %v12235_v58 = vor.u32 %v13662_v55, %v12234_v59  ;;  %v12154_v6 = vld [vmem:[%s14199_s17 + $0x1b30] sm:$0xf]  ;;  %v13658_v59 = vld [vmem:[%s14199_s17 + $0x1bb4] sm:$0xf0]  ;;  %v13712_v61 = vld [vmem:[%s14199_s17 + $0x1d64] sm:$0xf0] }
 0x20c   : > { %7448 = vmatpush.bf16.msrb.mxu0 %v12059_v62  ;;  %7417 = vmatmul.bf16.vlgmr.msra.gmra.mxu1 %v15316_v3  ;;  %v13628_v62 = vld [vmem:[%s14199_s17 + $0x1ac4] sm:$0xf0]  ;;  %v12218_v48 = vld [vmem:[%s14199_s17 + $0x1bb0] sm:$0xf] }
 0x20d   : > { %7461 = vmatpush.bf16.msrb.mxu1 %v12123_v54  ;;  %7430 = vmatmul.bf16.vlgmr.msra.gmra.mxu2 %v15314_v27  ;;  %v12107_v54 = vor.u32 %v13630_v40, %v12106_v15  ;;  %v13626_v40 = vld [vmem:[%s14199_s17 + $0x1ab4] sm:$0xf0]  ;;  %v13680_v27 = vld [vmem:[%s14199_s17 + $0x1c64] sm:$0xf0] }
 0x20e   : > { %7474 = vmatpush.bf16.msrb.mxu2 %v12187_v51  ;;  %7443 = vmatmul.bf16.vlgmr.msra.gmra.mxu3 %v15320_v43  ;;  %v12043_v51 = vor.u32 %v13614_v26, %v12042_v47  ;;  %v13610_v47 = vld [vmem:[%s14199_s17 + $0x1a34] sm:$0xf0]  ;;  %v12090_v26 = vld [vmem:[%s14199_s17 + $0x1ab0] sm:$0xf] }
 0x20f   : > { %7487 = vmatpush.bf16.msrb.mxu3 %v12251_v24  ;;  %v12226_v24 = vld [vmem:[%s14199_s17 + $0x1bc0] sm:$0xf] }
 0x210   : > { %7449 = vmatpush.bf16.msrb.mxu0 %v12051_v52  ;;  %v12099_v52 = vor.u32 %v13628_v62, %v12098_v39  ;;  %v12227_v15 = vor.u32 %v13660_v1, %v12226_v24  ;;  %v12219_v39 = vor.u32 %v13658_v59, %v12218_v48  ;;  %v13624_v62 = vld [vmem:[%s14199_s17 + $0x1aa4] sm:$0xf0]  ;;  %v12210_v1 = vld [vmem:[%s14199_s17 + $0x1ba0] sm:$0xf]  ;;  %v13638_v48 = vld [vmem:[%s14199_s17 + $0x1b14] sm:$0xf0] }
 0x211   : > { %7462 = vmatpush.bf16.msrb.mxu1 %v12115_v9  ;;  %v12163_v9 = vor.u32 %v13644_v32, %v12162_v56  ;;  %v12146_v56 = vld [vmem:[%s14199_s17 + $0x1b20] sm:$0xf]  ;;  %v13640_v32 = vld [vmem:[%s14199_s17 + $0x1b24] sm:$0xf0]  ;;  %v7236_v24 = vpop.f32.mrf.mxu3  ;;  %v12202_v59 = vld [vmem:[%s14199_s17 + $0x1b90] sm:$0xf] }
 0x212   : > { %7475 = vmatpush.bf16.msrb.mxu2 %v12179_v21  ;;  %v12026_v21 = vld [vmem:[%s14199_s17 + $0x1a30] sm:$0xf] }
 0x213   : > { %7488 = vmatpush.bf16.msrb.mxu3 %v12243_v14  ;;  %v7211_v14 = vadd.f32 %v7210_v8, %v7198_v60  ;;  %v12027_v55 = vor.u32 %v13610_v47, %v12026_v21  ;;  %v13656_v60 = vld [vmem:[%s14199_s17 + $0x1ba4] sm:$0xf0]  ;;  %v12083_v21 = vor.u32 %v13624_v62, %v12082_v50  ;;  %v12147_v47 = vor.u32 %v13640_v32, %v12146_v56  ;;  %v12130_v62 = vld [vmem:[%s14199_s17 + $0x1b00] sm:$0xf]  ;;  %v392_v32 = vld [vmem:[%s16797_s0 + $0xd0] sm:$0xff] }
 0x214   : > { %7450 = vmatpush.bf16.msrb.mxu0 %v12043_v51  ;;  %v12091_v51 = vor.u32 %v13626_v40, %v12090_v26  ;;  %v12010_v26 = vld [vmem:[%s14199_s17 + $0x1a10] sm:$0xf]  ;;  %v12211_v40 = vor.u32 %v13656_v60, %v12210_v1  ;;  %v13620_v50 = vld [vmem:[%s14199_s17 + $0x1a84] sm:$0xf0]  ;;  %v393_v60 = vld [vmem:[%s16797_s0 + $0xd8] sm:$0xff] }
 0x215   : > { %7463 = vmatpush.bf16.msrb.mxu1 %v12107_v54  ;;  %v12155_v54 = vor.u32 %v13642_v0, %v12154_v6  ;;  %v13622_v6 = vld [vmem:[%s14199_s17 + $0x1a94] sm:$0xf0]  ;;  %v12138_v0 = vld [vmem:[%s14199_s17 + $0x1b10] sm:$0xf]  ;;  %v13636_v56 = vld [vmem:[%s14199_s17 + $0x1b04] sm:$0xf0] }
 0x216   : > { %7476 = vmatpush.bf16.msrb.mxu2 %v12171_v4  ;;  %v12018_v4 = vld [vmem:[%s14199_s17 + $0x1a20] sm:$0xf]  ;;  %v13652_v1 = vld [vmem:[%s14199_s17 + $0x1b84] sm:$0xf0] }
 0x217   : > { %7489 = vmatpush.bf16.msrb.mxu3 %v12235_v58  ;;  %v7223_v58 = vpop.f32.mrf.mxu2  ;;  %v12019_v8 = vor.u32 %v13608_v57, %v12018_v4  ;;  %v13604_v4 = vld [vmem:[%s14199_s17 + $0x1a04] sm:$0xf0]  ;;  %v12066_v57 = vld [vmem:[%s14199_s17 + $0x1a80] sm:$0xf] }
 0x218   : > { %7451 = vmatpush.bf16.msrb.mxu0 %v12035_v2  ;;  %v7224_v63 = vadd.f32 %v7223_v58, %v7211_v14  ;;  %v7199_v2 = vpop.f32.mrf.mxu0  ;;  %v12074_v14 = vld [vmem:[%s14199_s17 + $0x1a90] sm:$0xf]  ;;  %v12139_v58 = vor.u32 %v13638_v48, %v12138_v0  ;;  %v12067_v0 = vor.u32 %v13620_v50, %v12066_v57  ;;  %v12131_v48 = vor.u32 %v13636_v56, %v12130_v62  ;;  %v13696_v62 = vld [vmem:[%s14199_s17 + $0x1ce4] sm:$0xf0]  ;;  %v12434_v56 = vld [vmem:[%s14199_s17 + $0x1d60] sm:$0xf] }
 0x219   : > { %7464 = vmatpush.bf16.msrb.mxu1 %v12099_v52  ;;  %v7212_v52 = vpop.f32.mrf.mxu1 }
 0x21a   : > { %7477 = vmatpush.bf16.msrb.mxu2 %v12163_v9  ;;  %v15359_v9 = vadd.f32 %v7236_v24, %v7224_v63  ;;  %v12194_v24 = vld [vmem:[%s14199_s17 + $0x1b80] sm:$0xf]  ;;  %v13682_v52 = vld [vmem:[%s14199_s17 + $0x1c74] sm:$0xf0] }
 0x21b   : > { %7490 = vmatpush.bf16.msrb.mxu3 %v12227_v15  ;;  %v13606_v15 = vld [vmem:[%s14199_s17 + $0x1a14] sm:$0xf0] }
 0x21c   : > { %7452 = vmatpush.bf16.msrb.mxu0 %v12027_v55  ;;  %v13654_v55 = vld [vmem:[%s14199_s17 + $0x1b94] sm:$0xf0] }
 0x21d   : > { %7465 = vmatpush.bf16.msrb.mxu1 %v12091_v51  ;;  %v12002_v51 = vld [vmem:[%s14199_s17 + $0x1a00] sm:$0xf]  ;;  %v12203_v63 = vor.u32 %v13654_v55, %v12202_v59  ;;  %v12506_v59 = vld [vmem:[%s14199_s17 + $0x1df0] sm:$0xf]  ;;  %v13730_v55 = vld [vmem:[%s14199_s17 + $0x1df4] sm:$0xf0] }
 0x21e   : > { %7478 = vmatpush.bf16.msrb.mxu2 %v12155_v54  ;;  %v12011_v54 = vor.u32 %v13606_v15, %v12010_v26  ;;  %v12003_v26 = vor.u32 %v13604_v4, %v12002_v51  ;;  %v13698_v15 = vld [vmem:[%s14199_s17 + $0x1cf4] sm:$0xf0]  ;;  %v12195_v51 = vor.u32 %v13652_v1, %v12194_v24  ;;  %v1515_v4 = vunpack.c.h.b16 %v393_v60  ;;  %v12498_v24 = vld [vmem:[%s14199_s17 + $0x1de0] sm:$0xf]  ;;  %v13728_v1 = vld [vmem:[%s14199_s17 + $0x1de4] sm:$0xf0] }
 0x21f   : > { %7491 = vmatpush.bf16.msrb.mxu3 %v12219_v39  ;;  %v12075_v39 = vor.u32 %v13622_v6, %v12074_v14  ;;  %v7225_v2 = vpop.f32.mrf.mxu2  ;;  %v12442_v14 = vld [vmem:[%s14199_s17 + $0x1d70] sm:$0xf]  ;;  %v13714_v6 = vld [vmem:[%s14199_s17 + $0x1d74] sm:$0xf0]  ;;  %v12507_v57 = vor.u32 %v13730_v55, %v12506_v59  ;;  %v12290_v55 = vld [vmem:[%s14199_s17 + $0x1c40] sm:$0xf] }
 0x220   : > { %7453 = vmatpush.bf16.msrb.mxu0 %v12019_v8  ;;  %v12314_v8 = vld [vmem:[%s14199_s17 + $0x1c70] sm:$0xf]  ;;  %v1514_v2 = vunpack.c.l.b16 %v393_v60  ;;  %v12443_v3 = vor.u32 %v13714_v6, %v12442_v14  ;;  %v15405_v60 = vpack.c.b16 %v1515_v4, %v1515_v4  ;;  %v12499_v6 = vor.u32 %v13728_v1, %v12498_v24  ;;  %v12418_v4 = vld [vmem:[%s14199_s17 + $0x1d40] sm:$0xf] }
 0x221   : > { %7466 = vmatpush.bf16.msrb.mxu1 %v12083_v21  ;;  %v12378_v21 = vld [vmem:[%s14199_s17 + $0x1cf0] sm:$0xf] }
 0x222   : > { %7479 = vmatpush.bf16.msrb.mxu2 %v12147_v47  ;;  %v7238_v47 = vpop.f32.mrf.mxu3  ;;  %v12379_v43 = vor.u32 %v13698_v15, %v12378_v21  ;;  %16864 = vst [vmem:[#allocation37_spill] sm:$0xff] %v15405_v60  ;;  %v12435_v21 = vor.u32 %v13712_v61, %v12434_v56  ;;  %v13678_v15 = vld [vmem:[%s14199_s17 + $0x1c54] sm:$0xf0]  ;;  %v12362_v14 = vld [vmem:[%s14199_s17 + $0x1cd0] sm:$0xf] }
 0x223   : > { %7492 = vmatpush.bf16.msrb.mxu3 %v12211_v40  ;;  %v1512_v40 = vunpack.c.l.b16 %v392_v32  ;;  %v1513_v47 = vunpack.c.h.b16 %v392_v32  ;;  %v15399_v32 = vpack.c.b16 %v1514_v2, %v1514_v2  ;;  %v12490_v61 = vld [vmem:[%s14199_s17 + $0x1dd0] sm:$0xf]  ;;  %v13676_v2 = vld [vmem:[%s14199_s17 + $0x1c44] sm:$0xf0] }
 0x224   : > { %7454 = vmatpush.bf16.msrb.mxu0 %v12011_v54  ;;  %v12315_v54 = vor.u32 %v13682_v52, %v12314_v8  ;;  %v12291_v24 = vor.u32 %v13676_v2, %v12290_v55  ;;  %v13672_v55 = vld [vmem:[%s14199_s17 + $0x1c24] sm:$0xf0]  ;;  %v12338_v2 = vld [vmem:[%s14199_s17 + $0x1ca0] sm:$0xf] }
 0x225   : > { %7467 = vmatpush.bf16.msrb.mxu1 %v12075_v39  ;;  %v12306_v39 = vld [vmem:[%s14199_s17 + $0x1c60] sm:$0xf]  ;;  %v15394_v50 = vpack.c.b16 %v1512_v40, %v1512_v40  ;;  %16862 = vst [vmem:[#allocation35_spill] sm:$0xff] %v15399_v32  ;;  %v13694_v40 = vld [vmem:[%s14199_s17 + $0x1cd4] sm:$0xf0] }
 0x226   : > { %7480 = vmatpush.bf16.msrb.mxu2 %v12139_v58  ;;  %v12370_v58 = vld [vmem:[%s14199_s17 + $0x1ce0] sm:$0xf]  ;;  %v12307_v8 = vor.u32 %v13680_v27, %v12306_v39  ;;  %v13726_v27 = vld [vmem:[%s14199_s17 + $0x1dd4] sm:$0xf0]  ;;  %v13708_v39 = vld [vmem:[%s14199_s17 + $0x1d44] sm:$0xf0] }
 0x227   : > { %7493 = vmatpush.bf16.msrb.mxu3 %v12203_v63  ;;  %16861 = vst [vmem:[#allocation34_spill] sm:$0xff] %v15394_v50  ;;  %v15401_v63 = vpack.c.b16 %v1513_v47, %v1513_v47  ;;  %v12371_v52 = vor.u32 %v13696_v62, %v12370_v58  ;;  %v12354_v47 = vld [vmem:[%s14199_s17 + $0x1cc0] sm:$0xf]  ;;  %v13724_v62 = vld [vmem:[%s14199_s17 + $0x1dc4] sm:$0xf0] }
 0x228   : > { %7455 = vmatpush.bf16.msrb.mxu0 %v12003_v26  ;;  %v12298_v26 = vld [vmem:[%s14199_s17 + $0x1c50] sm:$0xf]  ;;  %v7249_v58 = vpop.f32.mrf.mxu0 }
 0x229   : > { %7468 = vmatpush.bf16.msrb.mxu1 %v12067_v0  ;;  %16863 = vst [vmem:[#allocation36_spill] sm:$0xff] %v15401_v63  ;;  %v12426_v0 = vld [vmem:[%s14199_s17 + $0x1d50] sm:$0xf]  ;;  %v7250_v56 = vadd.f32 %v7249_v58, %v15359_v9  ;;  %v7262_v1 = vpop.f32.mrf.mxu1  ;;  %v13706_v9 = vld [vmem:[%s14199_s17 + $0x1d34] sm:$0xf0] }
 0x22a   : > { %7481 = vmatpush.bf16.msrb.mxu2 %v12131_v48  ;;  %v13710_v48 = vld [vmem:[%s14199_s17 + $0x1d54] sm:$0xf0] }
 0x22b   : > { %7494 = vmatpush.bf16.msrb.mxu3 %v12195_v51  ;;  %7456 = vmatmul.bf16.vlgmr.msrb.gmra.mxu0 %v15394_v50  ;;  %v12427_v59 = vor.u32 %v13710_v48, %v12426_v0  ;;  %v12491_v51 = vor.u32 %v13726_v27, %v12490_v61  ;;  %v12410_v0 = vld [vmem:[%s14199_s17 + $0x1d30] sm:$0xf]  ;;  %v13722_v61 = vld [vmem:[%s14199_s17 + $0x1db4] sm:$0xf0]  ;;  %v13776_v50 = vld [vmem:[%s14199_s17 + $0x1f64] sm:$0xf0] }
 0x22c   : > { %7500 = vmatpush.bf16.msra.mxu0 %v12315_v54  ;;  %7469 = vmatmul.bf16.vlgmr.msrb.gmra.mxu1 %v15401_v63  ;;  %v13692_v54 = vld [vmem:[%s14199_s17 + $0x1cc4] sm:$0xf0]  ;;  %v12474_v48 = vld [vmem:[%s14199_s17 + $0x1db0] sm:$0xf] }
 0x22d   : > { %7513 = vmatpush.bf16.msra.mxu1 %v12379_v43  ;;  %7482 = vmatmul.bf16.vlgmr.msrb.gmra.mxu2 %v15399_v32  ;;  %v12363_v43 = vor.u32 %v13694_v40, %v12362_v14  ;;  %v13690_v40 = vld [vmem:[%s14199_s17 + $0x1cb4] sm:$0xf0]  ;;  %v13744_v32 = vld [vmem:[%s14199_s17 + $0x1e64] sm:$0xf0] }
 0x22e   : > { %7526 = vmatpush.bf16.msra.mxu2 %v12443_v3  ;;  %7495 = vmatmul.bf16.vlgmr.msrb.gmra.mxu3 %v15405_v60  ;;  %v12299_v3 = vor.u32 %v13678_v15, %v12298_v26  ;;  %v13674_v26 = vld [vmem:[%s14199_s17 + $0x1c34] sm:$0xf0]  ;;  %v12346_v15 = vld [vmem:[%s14199_s17 + $0x1cb0] sm:$0xf] }
 0x22f   : > { %7539 = vmatpush.bf16.msra.mxu3 %v12507_v57  ;;  %v12482_v57 = vld [vmem:[%s14199_s17 + $0x1dc0] sm:$0xf] }
 0x230   : > { %7501 = vmatpush.bf16.msra.mxu0 %v12307_v8  ;;  %v12355_v8 = vor.u32 %v13692_v54, %v12354_v47  ;;  %v12483_v14 = vor.u32 %v13724_v62, %v12482_v57  ;;  %v12475_v47 = vor.u32 %v13722_v61, %v12474_v48  ;;  %v13688_v54 = vld [vmem:[%s14199_s17 + $0x1ca4] sm:$0xf0]  ;;  %v12466_v62 = vld [vmem:[%s14199_s17 + $0x1da0] sm:$0xf]  ;;  %v13702_v48 = vld [vmem:[%s14199_s17 + $0x1d14] sm:$0xf0] }
 0x231   : > { %7514 = vmatpush.bf16.msra.mxu1 %v12371_v52  ;;  %v12419_v52 = vor.u32 %v13708_v39, %v12418_v4  ;;  %v12402_v4 = vld [vmem:[%s14199_s17 + $0x1d20] sm:$0xf]  ;;  %v13704_v39 = vld [vmem:[%s14199_s17 + $0x1d24] sm:$0xf0]  ;;  %v7288_v57 = vpop.f32.mrf.mxu3  ;;  %v12458_v61 = vld [vmem:[%s14199_s17 + $0x1d90] sm:$0xf] }
 0x232   : > { %7527 = vmatpush.bf16.msra.mxu2 %v12435_v21  ;;  %v12282_v21 = vld [vmem:[%s14199_s17 + $0x1c30] sm:$0xf] }
 0x233   : > { %7540 = vmatpush.bf16.msra.mxu3 %v12499_v6  ;;  %v7263_v6 = vadd.f32 %v7262_v1, %v7250_v56  ;;  %v12283_v27 = vor.u32 %v13674_v26, %v12282_v21  ;;  %v13720_v56 = vld [vmem:[%s14199_s17 + $0x1da4] sm:$0xf0]  ;;  %v12339_v21 = vor.u32 %v13688_v54, %v12338_v2  ;;  %v12403_v26 = vor.u32 %v13704_v39, %v12402_v4  ;;  %v12386_v54 = vld [vmem:[%s14199_s17 + $0x1d00] sm:$0xf] }
 0x234   : > { %7502 = vmatpush.bf16.msra.mxu0 %v12299_v3  ;;  %v12347_v3 = vor.u32 %v13690_v40, %v12346_v15  ;;  %v12266_v15 = vld [vmem:[%s14199_s17 + $0x1c10] sm:$0xf]  ;;  %v12467_v40 = vor.u32 %v13720_v56, %v12466_v62  ;;  %v13684_v2 = vld [vmem:[%s14199_s17 + $0x1c84] sm:$0xf0]  ;;  %v394_v39 = vld [vmem:[%s16797_s0 + $0xe0] sm:$0xff] }
 0x235   : > { %7515 = vmatpush.bf16.msra.mxu1 %v12363_v43  ;;  %v12411_v43 = vor.u32 %v13706_v9, %v12410_v0  ;;  %v13686_v0 = vld [vmem:[%s14199_s17 + $0x1c94] sm:$0xf0]  ;;  %v12394_v9 = vld [vmem:[%s14199_s17 + $0x1d10] sm:$0xf]  ;;  %v13700_v4 = vld [vmem:[%s14199_s17 + $0x1d04] sm:$0xf0] }
 0x236   : > { %7528 = vmatpush.bf16.msra.mxu2 %v12427_v59  ;;  %v12274_v59 = vld [vmem:[%s14199_s17 + $0x1c20] sm:$0xf]  ;;  %v13716_v62 = vld [vmem:[%s14199_s17 + $0x1d84] sm:$0xf0] }
 0x237   : > { %7541 = vmatpush.bf16.msra.mxu3 %v12491_v51  ;;  %v7275_v51 = vpop.f32.mrf.mxu2  ;;  %v12275_v1 = vor.u32 %v13672_v55, %v12274_v59  ;;  %v13668_v59 = vld [vmem:[%s14199_s17 + $0x1c04] sm:$0xf0]  ;;  %v12322_v55 = vld [vmem:[%s14199_s17 + $0x1c80] sm:$0xf] }
 0x238   : > { %7503 = vmatpush.bf16.msra.mxu0 %v12291_v24  ;;  %v7276_v58 = vadd.f32 %v7275_v51, %v7263_v6  ;;  %v7251_v24 = vpop.f32.mrf.mxu0  ;;  %v12330_v6 = vld [vmem:[%s14199_s17 + $0x1c90] sm:$0xf]  ;;  %v12395_v51 = vor.u32 %v13702_v48, %v12394_v9  ;;  %v395_v56 = vld [vmem:[%s16797_s0 + $0xe8] sm:$0xff]  ;;  %v12323_v9 = vor.u32 %v13684_v2, %v12322_v55  ;;  %v12387_v48 = vor.u32 %v13700_v4, %v12386_v54  ;;  %v12690_v4 = vld [vmem:[%s14199_s17 + $0x1f60] sm:$0xf] }
 0x239   : > { %7516 = vmatpush.bf16.msra.mxu1 %v12355_v8  ;;  %v7264_v8 = vpop.f32.mrf.mxu1  ;;  %v13760_v54 = vld [vmem:[%s14199_s17 + $0x1ee4] sm:$0xf0] }
 0x23a   : > { %7529 = vmatpush.bf16.msra.mxu2 %v12419_v52  ;;  %v15444_v52 = vadd.f32 %v7288_v57, %v7276_v58  ;;  %v12450_v57 = vld [vmem:[%s14199_s17 + $0x1d80] sm:$0xf]  ;;  %v13746_v8 = vld [vmem:[%s14199_s17 + $0x1e74] sm:$0xf0] }
 0x23b   : > { %7542 = vmatpush.bf16.msra.mxu3 %v12483_v14  ;;  %v13670_v14 = vld [vmem:[%s14199_s17 + $0x1c14] sm:$0xf0] }
 0x23c   : > { %7504 = vmatpush.bf16.msra.mxu0 %v12283_v27  ;;  %v13718_v27 = vld [vmem:[%s14199_s17 + $0x1d94] sm:$0xf0] }
 0x23d   : > { %7517 = vmatpush.bf16.msra.mxu1 %v12347_v3  ;;  %v12258_v3 = vld [vmem:[%s14199_s17 + $0x1c00] sm:$0xf]  ;;  %v12459_v58 = vor.u32 %v13718_v27, %v12458_v61  ;;  %v12762_v61 = vld [vmem:[%s14199_s17 + $0x1ff0] sm:$0xf]  ;;  %v13794_v27 = vld [vmem:[%s14199_s17 + $0x1ff4] sm:$0xf0] }
 0x23e   : > { %7530 = vmatpush.bf16.msra.mxu2 %v12411_v43  ;;  %v12267_v43 = vor.u32 %v13670_v14, %v12266_v15  ;;  %v12259_v15 = vor.u32 %v13668_v59, %v12258_v3  ;;  %v13762_v14 = vld [vmem:[%s14199_s17 + $0x1ef4] sm:$0xf0]  ;;  %v12451_v3 = vor.u32 %v13716_v62, %v12450_v57  ;;  %v1519_v59 = vunpack.c.h.b16 %v395_v56  ;;  %v12754_v57 = vld [vmem:[%s14199_s17 + $0x1fe0] sm:$0xf]  ;;  %v13792_v62 = vld [vmem:[%s14199_s17 + $0x1fe4] sm:$0xf0] }
 0x23f   : > { %7543 = vmatpush.bf16.msra.mxu3 %v12475_v47  ;;  %v12331_v47 = vor.u32 %v13686_v0, %v12330_v6  ;;  %v7277_v24 = vpop.f32.mrf.mxu2  ;;  %v12698_v6 = vld [vmem:[%s14199_s17 + $0x1f70] sm:$0xf]  ;;  %v13778_v0 = vld [vmem:[%s14199_s17 + $0x1f74] sm:$0xf0]  ;;  %v12763_v55 = vor.u32 %v13794_v27, %v12762_v61  ;;  %v12546_v27 = vld [vmem:[%s14199_s17 + $0x1e40] sm:$0xf] }
 0x240   : > { %7505 = vmatpush.bf16.msra.mxu0 %v12275_v1  ;;  %v12570_v1 = vld [vmem:[%s14199_s17 + $0x1e70] sm:$0xf]  ;;  %v1518_v24 = vunpack.c.l.b16 %v395_v56  ;;  %v12699_v63 = vor.u32 %v13778_v0, %v12698_v6  ;;  %v15490_v56 = vpack.c.b16 %v1519_v59, %v1519_v59  ;;  %v12755_v0 = vor.u32 %v13792_v62, %v12754_v57  ;;  %v12674_v59 = vld [vmem:[%s14199_s17 + $0x1f40] sm:$0xf] }
 0x241   : > { %7518 = vmatpush.bf16.msra.mxu1 %v12339_v21  ;;  %v12634_v21 = vld [vmem:[%s14199_s17 + $0x1ef0] sm:$0xf] }
 0x242   : > { %7531 = vmatpush.bf16.msra.mxu2 %v12403_v26  ;;  %v7290_v26 = vpop.f32.mrf.mxu3  ;;  %v12635_v60 = vor.u32 %v13762_v14, %v12634_v21  ;;  %16868 = vst [vmem:[#allocation41_spill] sm:$0xff] %v15490_v56  ;;  %v12691_v21 = vor.u32 %v13776_v50, %v12690_v4  ;;  %v13742_v14 = vld [vmem:[%s14199_s17 + $0x1e54] sm:$0xf0]  ;;  %v12618_v6 = vld [vmem:[%s14199_s17 + $0x1ed0] sm:$0xf] }
 0x243   : > { %7544 = vmatpush.bf16.msra.mxu3 %v12467_v40  ;;  %v1516_v40 = vunpack.c.l.b16 %v394_v39  ;;  %v1517_v26 = vunpack.c.h.b16 %v394_v39  ;;  %v15484_v39 = vpack.c.b16 %v1518_v24, %v1518_v24  ;;  %v12746_v50 = vld [vmem:[%s14199_s17 + $0x1fd0] sm:$0xf]  ;;  %v13740_v24 = vld [vmem:[%s14199_s17 + $0x1e44] sm:$0xf0] }
 0x244   : > { %7506 = vmatpush.bf16.msra.mxu0 %v12267_v43  ;;  %v12571_v43 = vor.u32 %v13746_v8, %v12570_v1  ;;  %v12547_v57 = vor.u32 %v13740_v24, %v12546_v27  ;;  %v13736_v27 = vld [vmem:[%s14199_s17 + $0x1e24] sm:$0xf0]  ;;  %v12594_v24 = vld [vmem:[%s14199_s17 + $0x1ea0] sm:$0xf] }
 0x245   : > { %7519 = vmatpush.bf16.msra.mxu1 %v12331_v47  ;;  %v12562_v47 = vld [vmem:[%s14199_s17 + $0x1e60] sm:$0xf]  ;;  %v15479_v2 = vpack.c.b16 %v1516_v40, %v1516_v40  ;;  %16866 = vst [vmem:[#allocation39_spill] sm:$0xff] %v15484_v39  ;;  %v13758_v40 = vld [vmem:[%s14199_s17 + $0x1ed4] sm:$0xf0] }
 0x246   : > { %7532 = vmatpush.bf16.msra.mxu2 %v12395_v51  ;;  %v12626_v51 = vld [vmem:[%s14199_s17 + $0x1ee0] sm:$0xf]  ;;  %v12563_v1 = vor.u32 %v13744_v32, %v12562_v47  ;;  %v13790_v32 = vld [vmem:[%s14199_s17 + $0x1fd4] sm:$0xf0]  ;;  %v13772_v47 = vld [vmem:[%s14199_s17 + $0x1f44] sm:$0xf0] }
 0x247   : > { %7545 = vmatpush.bf16.msra.mxu3 %v12459_v58  ;;  %16865 = vst [vmem:[#allocation38_spill] sm:$0xff] %v15479_v2  ;;  %v15486_v58 = vpack.c.b16 %v1517_v26, %v1517_v26  ;;  %v12627_v8 = vor.u32 %v13760_v54, %v12626_v51  ;;  %v12610_v26 = vld [vmem:[%s14199_s17 + $0x1ec0] sm:$0xf]  ;;  %v13788_v54 = vld [vmem:[%s14199_s17 + $0x1fc4] sm:$0xf0] }
 0x248   : > { %7507 = vmatpush.bf16.msra.mxu0 %v12259_v15  ;;  %v12554_v15 = vld [vmem:[%s14199_s17 + $0x1e50] sm:$0xf]  ;;  %v7301_v51 = vpop.f32.mrf.mxu0 }
 0x249   : > { %7520 = vmatpush.bf16.msra.mxu1 %v12323_v9  ;;  %16867 = vst [vmem:[#allocation40_spill] sm:$0xff] %v15486_v58  ;;  %v12682_v9 = vld [vmem:[%s14199_s17 + $0x1f50] sm:$0xf]  ;;  %v7302_v4 = vadd.f32 %v7301_v51, %v15444_v52  ;;  %v7314_v62 = vpop.f32.mrf.mxu1  ;;  %v13770_v52 = vld [vmem:[%s14199_s17 + $0x1f34] sm:$0xf0] }
 0x24a   : > { %7533 = vmatpush.bf16.msra.mxu2 %v12387_v48  ;;  %v13774_v48 = vld [vmem:[%s14199_s17 + $0x1f54] sm:$0xf0] }
 0x24b   : > { %7546 = vmatpush.bf16.msra.mxu3 %v12451_v3  ;;  %7508 = vmatmul.bf16.vlgmr.msra.gmra.mxu0 %v15479_v2  ;;  %v12683_v61 = vor.u32 %v13774_v48, %v12682_v9  ;;  %v12747_v3 = vor.u32 %v13790_v32, %v12746_v50  ;;  %v12666_v9 = vld [vmem:[%s14199_s17 + $0x1f30] sm:$0xf]  ;;  %v13786_v50 = vld [vmem:[%s14199_s17 + $0x1fb4] sm:$0xf0]  ;;  %v8852_v2 = vld [vmem:[%s14199_s17 + $0x168] sm:$0xf0] }
 0x24c   : > { %7552 = vmatpush.bf16.msrb.mxu0 %v12571_v43  ;;  %7521 = vmatmul.bf16.vlgmr.msra.gmra.mxu1 %v15486_v58  ;;  %v13756_v43 = vld [vmem:[%s14199_s17 + $0x1ec4] sm:$0xf0]  ;;  %v12730_v48 = vld [vmem:[%s14199_s17 + $0x1fb0] sm:$0xf] }
 0x24d   : > { %7565 = vmatpush.bf16.msrb.mxu1 %v12635_v60  ;;  %7534 = vmatmul.bf16.vlgmr.msra.gmra.mxu2 %v15484_v39  ;;  %v12619_v60 = vor.u32 %v13758_v40, %v12618_v6  ;;  %v13754_v40 = vld [vmem:[%s14199_s17 + $0x1eb4] sm:$0xf0]  ;;  %v8724_v39 = vld [vmem:[%s14199_s17 + $0x68] sm:$0xf0] }
 0x24e   : > { %7578 = vmatpush.bf16.msrb.mxu2 %v12699_v63  ;;  %7547 = vmatmul.bf16.vlgmr.msra.gmra.mxu3 %v15490_v56  ;;  %v12555_v63 = vor.u32 %v13742_v14, %v12554_v15  ;;  %v13738_v15 = vld [vmem:[%s14199_s17 + $0x1e34] sm:$0xf0]  ;;  %v12602_v14 = vld [vmem:[%s14199_s17 + $0x1eb0] sm:$0xf] }
 0x24f   : > { %7591 = vmatpush.bf16.msrb.mxu3 %v12763_v55  ;;  %v12738_v55 = vld [vmem:[%s14199_s17 + $0x1fc0] sm:$0xf] }
 0x250   : > { %7553 = vmatpush.bf16.msrb.mxu0 %v12563_v1  ;;  %v12611_v1 = vor.u32 %v13756_v43, %v12610_v26  ;;  %v12739_v6 = vor.u32 %v13788_v54, %v12738_v55  ;;  %v12731_v26 = vor.u32 %v13786_v50, %v12730_v48  ;;  %v13752_v43 = vld [vmem:[%s14199_s17 + $0x1ea4] sm:$0xf0]  ;;  %v12722_v54 = vld [vmem:[%s14199_s17 + $0x1fa0] sm:$0xf]  ;;  %v13766_v48 = vld [vmem:[%s14199_s17 + $0x1f14] sm:$0xf0] }
 0x251   : > { %7566 = vmatpush.bf16.msrb.mxu1 %v12627_v8  ;;  %v12675_v8 = vor.u32 %v13772_v47, %v12674_v59  ;;  %v12658_v59 = vld [vmem:[%s14199_s17 + $0x1f20] sm:$0xf]  ;;  %v13768_v47 = vld [vmem:[%s14199_s17 + $0x1f24] sm:$0xf0]  ;;  %v7340_v55 = vpop.f32.mrf.mxu3  ;;  %v12714_v50 = vld [vmem:[%s14199_s17 + $0x1f90] sm:$0xf] }
 0x252   : > { %7579 = vmatpush.bf16.msrb.mxu2 %v12691_v21  ;;  %v12538_v21 = vld [vmem:[%s14199_s17 + $0x1e30] sm:$0xf] }
 0x253   : > { %7592 = vmatpush.bf16.msrb.mxu3 %v12755_v0  ;;  %v7315_v0 = vadd.f32 %v7314_v62, %v7302_v4  ;;  %v12539_v32 = vor.u32 %v13738_v15, %v12538_v21  ;;  %v13784_v4 = vld [vmem:[%s14199_s17 + $0x1fa4] sm:$0xf0]  ;;  %v12595_v21 = vor.u32 %v13752_v43, %v12594_v24  ;;  %v12659_v15 = vor.u32 %v13768_v47, %v12658_v59  ;;  %v12642_v43 = vld [vmem:[%s14199_s17 + $0x1f00] sm:$0xf]  ;;  %v396_v47 = vld [vmem:[%s16797_s0 + $0xf0] sm:$0xff] }
 0x254   : > { %7554 = vmatpush.bf16.msrb.mxu0 %v12555_v63  ;;  %v12603_v63 = vor.u32 %v13754_v40, %v12602_v14  ;;  %v12522_v14 = vld [vmem:[%s14199_s17 + $0x1e10] sm:$0xf]  ;;  %v12723_v40 = vor.u32 %v13784_v4, %v12722_v54  ;;  %v13748_v24 = vld [vmem:[%s14199_s17 + $0x1e84] sm:$0xf0]  ;;  %v397_v4 = vld [vmem:[%s16797_s0 + $0xf8] sm:$0xff] }
 0x255   : > { %7567 = vmatpush.bf16.msrb.mxu1 %v12619_v60  ;;  %v12667_v60 = vor.u32 %v13770_v52, %v12666_v9  ;;  %v13750_v9 = vld [vmem:[%s14199_s17 + $0x1e94] sm:$0xf0]  ;;  %v12650_v52 = vld [vmem:[%s14199_s17 + $0x1f10] sm:$0xf]  ;;  %v13764_v59 = vld [vmem:[%s14199_s17 + $0x1f04] sm:$0xf0] }
 0x256   : > { %7580 = vmatpush.bf16.msrb.mxu2 %v12683_v61  ;;  %v12530_v61 = vld [vmem:[%s14199_s17 + $0x1e20] sm:$0xf]  ;;  %v13780_v54 = vld [vmem:[%s14199_s17 + $0x1f84] sm:$0xf0] }
 0x257   : > { %7593 = vmatpush.bf16.msrb.mxu3 %v12747_v3  ;;  %v7327_v3 = vpop.f32.mrf.mxu2  ;;  %v12531_v62 = vor.u32 %v13736_v27, %v12530_v61  ;;  %v13732_v61 = vld [vmem:[%s14199_s17 + $0x1e04] sm:$0xf0]  ;;  %v12578_v27 = vld [vmem:[%s14199_s17 + $0x1e80] sm:$0xf] }
 0x258   : > { %7555 = vmatpush.bf16.msrb.mxu0 %v12547_v57  ;;  %v7328_v51 = vadd.f32 %v7327_v3, %v7315_v0  ;;  %v7303_v57 = vpop.f32.mrf.mxu0  ;;  %v12586_v0 = vld [vmem:[%s14199_s17 + $0x1e90] sm:$0xf]  ;;  %v12651_v3 = vor.u32 %v13766_v48, %v12650_v52  ;;  %v12579_v52 = vor.u32 %v13748_v24, %v12578_v27  ;;  %v12643_v48 = vor.u32 %v13764_v59, %v12642_v43  ;;  %v8788_v43 = vld [vmem:[%s14199_s17 + $0xe8] sm:$0xf0]  ;;  %v12815_v59 = vld [vmem:[%s14199_s17 + $0x164] sm:$0xf] }
 0x259   : > { %7568 = vmatpush.bf16.msrb.mxu1 %v12611_v1  ;;  %v7316_v1 = vpop.f32.mrf.mxu1 }
 0x25a   : > { %7581 = vmatpush.bf16.msrb.mxu2 %v12675_v8  ;;  %v15529_v8 = vadd.f32 %v7340_v55, %v7328_v51  ;;  %v12706_v55 = vld [vmem:[%s14199_s17 + $0x1f80] sm:$0xf]  ;;  %v8732_v1 = vld [vmem:[%s14199_s17 + $0x78] sm:$0xf0] }
 0x25b   : > { %7594 = vmatpush.bf16.msrb.mxu3 %v12739_v6  ;;  %v13734_v6 = vld [vmem:[%s14199_s17 + $0x1e14] sm:$0xf0] }
 0x25c   : > { %7556 = vmatpush.bf16.msrb.mxu0 %v12539_v32  ;;  %v13782_v32 = vld [vmem:[%s14199_s17 + $0x1f94] sm:$0xf0] }
 0x25d   : > { %7569 = vmatpush.bf16.msrb.mxu1 %v12603_v63  ;;  %v12514_v63 = vld [vmem:[%s14199_s17 + $0x1e00] sm:$0xf]  ;;  %v12715_v51 = vor.u32 %v13782_v32, %v12714_v50  ;;  %v12833_v50 = vld [vmem:[%s14199_s17 + $0x1f4] sm:$0xf]  ;;  %v8924_v32 = vld [vmem:[%s14199_s17 + $0x1f8] sm:$0xf0] }
 0x25e   : > { %7582 = vmatpush.bf16.msrb.mxu2 %v12667_v60  ;;  %v12523_v60 = vor.u32 %v13734_v6, %v12522_v14  ;;  %v12515_v14 = vor.u32 %v13732_v61, %v12514_v63  ;;  %v8796_v6 = vld [vmem:[%s14199_s17 + $0xf8] sm:$0xf0]  ;;  %v12707_v63 = vor.u32 %v13780_v54, %v12706_v55  ;;  %v1523_v61 = vunpack.c.h.b16 %v397_v4  ;;  %v12831_v55 = vld [vmem:[%s14199_s17 + $0x1e4] sm:$0xf]  ;;  %v8916_v54 = vld [vmem:[%s14199_s17 + $0x1e8] sm:$0xf0] }
 0x25f   : > { %7595 = vmatpush.bf16.msrb.mxu3 %v12731_v26  ;;  %v12587_v26 = vor.u32 %v13750_v9, %v12586_v0  ;;  %v7329_v57 = vpop.f32.mrf.mxu2  ;;  %v12817_v0 = vld [vmem:[%s14199_s17 + $0x174] sm:$0xf]  ;;  %v8860_v9 = vld [vmem:[%s14199_s17 + $0x178] sm:$0xf0]  ;;  %v8927_v27 = vor.u32 %v12833_v50, %v8924_v32  ;;  %v12779_v32 = vld [vmem:[%s14199_s17 + $0x44] sm:$0xf] }
 0x260   : > { %7557 = vmatpush.bf16.msrb.mxu0 %v12531_v62  ;;  %v12785_v62 = vld [vmem:[%s14199_s17 + $0x74] sm:$0xf]  ;;  %v1522_v57 = vunpack.c.l.b16 %v397_v4  ;;  %v8863_v58 = vor.u32 %v12817_v0, %v8860_v9  ;;  %v15575_v4 = vpack.c.b16 %v1523_v61, %v1523_v61  ;;  %v8919_v9 = vor.u32 %v12831_v55, %v8916_v54  ;;  %v12811_v61 = vld [vmem:[%s14199_s17 + $0x144] sm:$0xf] }
 0x261   : > { %7570 = vmatpush.bf16.msrb.mxu1 %v12595_v21  ;;  %v12801_v21 = vld [vmem:[%s14199_s17 + $0xf4] sm:$0xf] }
 0x262   : > { %7583 = vmatpush.bf16.msrb.mxu2 %v12659_v15  ;;  %v7342_v15 = vpop.f32.mrf.mxu3  ;;  %v8799_v56 = vor.u32 %v12801_v21, %v8796_v6  ;;  %v8855_v21 = vor.u32 %v12815_v59, %v8852_v2  ;;  %v8716_v6 = vld [vmem:[%s14199_s17 + $0x58] sm:$0xf0]  ;;  %v12797_v0 = vld [vmem:[%s14199_s17 + $0xd4] sm:$0xf] }
 0x263   : > { %7596 = vmatpush.bf16.msrb.mxu3 %v12723_v40  ;;  %v1520_v40 = vunpack.c.l.b16 %v396_v47  ;;  %v1521_v15 = vunpack.c.h.b16 %v396_v47  ;;  %v15569_v47 = vpack.c.b16 %v1522_v57, %v1522_v57  ;;  %v12829_v2 = vld [vmem:[%s14199_s17 + $0x1d4] sm:$0xf]  ;;  %v8708_v57 = vld [vmem:[%s14199_s17 + $0x48] sm:$0xf0] }
 0x264   : > { %7558 = vmatpush.bf16.msrb.mxu0 %v12523_v60  ;;  %v8735_v60 = vor.u32 %v12785_v62, %v8732_v1  ;;  %v8711_v55 = vor.u32 %v12779_v32, %v8708_v57  ;;  %v8692_v32 = vld [vmem:[%s14199_s17 + $0x28] sm:$0xf0]  ;;  %v12791_v57 = vld [vmem:[%s14199_s17 + $0xa4] sm:$0xf] }
 0x265   : > { %7571 = vmatpush.bf16.msrb.mxu1 %v12587_v26  ;;  %v12783_v26 = vld [vmem:[%s14199_s17 + $0x64] sm:$0xf]  ;;  %v15564_v24 = vpack.c.b16 %v1520_v40, %v1520_v40  ;;  %v8780_v40 = vld [vmem:[%s14199_s17 + $0xd8] sm:$0xf0] }
 0x266   : > { %7584 = vmatpush.bf16.msrb.mxu2 %v12651_v3  ;;  %v12799_v3 = vld [vmem:[%s14199_s17 + $0xe4] sm:$0xf]  ;;  %v8727_v62 = vor.u32 %v12783_v26, %v8724_v39  ;;  %v8908_v39 = vld [vmem:[%s14199_s17 + $0x1d8] sm:$0xf0]  ;;  %v8836_v26 = vld [vmem:[%s14199_s17 + $0x148] sm:$0xf0] }
 0x267   : > { %7597 = vmatpush.bf16.msrb.mxu3 %v12715_v51  ;;  %v15571_v51 = vpack.c.b16 %v1521_v15, %v1521_v15  ;;  %v8791_v1 = vor.u32 %v12799_v3, %v8788_v43  ;;  %v12795_v15 = vld [vmem:[%s14199_s17 + $0xc4] sm:$0xf]  ;;  %v8900_v43 = vld [vmem:[%s14199_s17 + $0x1c8] sm:$0xf0] }
 0x268   : > { %7559 = vmatpush.bf16.msrb.mxu0 %v12515_v14  ;;  %v12781_v14 = vld [vmem:[%s14199_s17 + $0x54] sm:$0xf]  ;;  %v7353_v3 = vpop.f32.mrf.mxu0 }
 0x269   : > { %7572 = vmatpush.bf16.msrb.mxu1 %v12579_v52  ;;  %v12813_v52 = vld [vmem:[%s14199_s17 + $0x154] sm:$0xf]  ;;  %v7354_v59 = vadd.f32 %v7353_v3, %v15529_v8  ;;  %v7366_v54 = vpop.f32.mrf.mxu1  ;;  %v8828_v8 = vld [vmem:[%s14199_s17 + $0x138] sm:$0xf0] }
 0x26a   : > { %7585 = vmatpush.bf16.msrb.mxu2 %v12643_v48  ;;  %v8844_v48 = vld [vmem:[%s14199_s17 + $0x158] sm:$0xf0] }
 0x26b   : > { %7598 = vmatpush.bf16.msrb.mxu3 %v12707_v63  ;;  %7560 = vmatmul.bf16.vlgmr.msrb.gmra.mxu0 %v15564_v24  ;;  %v8847_v50 = vor.u32 %v12813_v52, %v8844_v48  ;;  %v8911_v63 = vor.u32 %v12829_v2, %v8908_v39  ;;  %v12809_v52 = vld [vmem:[%s14199_s17 + $0x134] sm:$0xf]  ;;  %v8892_v2 = vld [vmem:[%s14199_s17 + $0x1b8] sm:$0xf0] }
 0x26c   : > { %7604 = vmatpush.bf16.msra.mxu0 %v8735_v60  ;;  %7573 = vmatmul.bf16.vlgmr.msrb.gmra.mxu1 %v15571_v51  ;;  %v8772_v60 = vld [vmem:[%s14199_s17 + $0xc8] sm:$0xf0]  ;;  %v12825_v48 = vld [vmem:[%s14199_s17 + $0x1b4] sm:$0xf] }
 0x26d   : > { %7617 = vmatpush.bf16.msra.mxu1 %v8799_v56  ;;  %7586 = vmatmul.bf16.vlgmr.msrb.gmra.mxu2 %v15569_v47  ;;  %v8783_v56 = vor.u32 %v12797_v0, %v8780_v40  ;;  %v8764_v40 = vld [vmem:[%s14199_s17 + $0xb8] sm:$0xf0] }
 0x26e   : > { %7630 = vmatpush.bf16.msra.mxu2 %v8863_v58  ;;  %7599 = vmatmul.bf16.vlgmr.msrb.gmra.mxu3 %v15575_v4  ;;  %v8719_v58 = vor.u32 %v12781_v14, %v8716_v6  ;;  %v8700_v14 = vld [vmem:[%s14199_s17 + $0x38] sm:$0xf0]  ;;  %v12793_v6 = vld [vmem:[%s14199_s17 + $0xb4] sm:$0xf] }
 0x26f   : > { %7643 = vmatpush.bf16.msra.mxu3 %v8927_v27  ;;  %v12827_v27 = vld [vmem:[%s14199_s17 + $0x1c4] sm:$0xf] }
 0x270   : > { %7605 = vmatpush.bf16.msra.mxu0 %v8727_v62  ;;  %v8775_v62 = vor.u32 %v12795_v15, %v8772_v60  ;;  %v8903_v0 = vor.u32 %v12827_v27, %v8900_v43  ;;  %v8895_v15 = vor.u32 %v12825_v48, %v8892_v2  ;;  %v8756_v60 = vld [vmem:[%s14199_s17 + $0xa8] sm:$0xf0]  ;;  %v12823_v43 = vld [vmem:[%s14199_s17 + $0x1a4] sm:$0xf]  ;;  %v8812_v48 = vld [vmem:[%s14199_s17 + $0x118] sm:$0xf0] }
 0x271   : > { %7618 = vmatpush.bf16.msra.mxu1 %v8791_v1  ;;  %v8839_v1 = vor.u32 %v12811_v61, %v8836_v26  ;;  %v12807_v61 = vld [vmem:[%s14199_s17 + $0x124] sm:$0xf]  ;;  %v8820_v26 = vld [vmem:[%s14199_s17 + $0x128] sm:$0xf0]  ;;  %v7392_v27 = vpop.f32.mrf.mxu3  ;;  %v12821_v2 = vld [vmem:[%s14199_s17 + $0x194] sm:$0xf] }
 0x272   : > { %7631 = vmatpush.bf16.msra.mxu2 %v8855_v21  ;;  %v12777_v21 = vld [vmem:[%s14199_s17 + $0x34] sm:$0xf] }
 0x273   : > { %7644 = vmatpush.bf16.msra.mxu3 %v8919_v9  ;;  %v7367_v9 = vadd.f32 %v7366_v54, %v7354_v59  ;;  %v8703_v39 = vor.u32 %v12777_v21, %v8700_v14  ;;  %v8884_v59 = vld [vmem:[%s14199_s17 + $0x1a8] sm:$0xf0]  ;;  %v8759_v21 = vor.u32 %v12791_v57, %v8756_v60  ;;  %v8823_v14 = vor.u32 %v12807_v61, %v8820_v26  ;;  %v12803_v60 = vld [vmem:[%s14199_s17 + $0x104] sm:$0xf] }
 0x274   : > { %7606 = vmatpush.bf16.msra.mxu0 %v8719_v58  ;;  %v8767_v58 = vor.u32 %v12793_v6, %v8764_v40  ;;  %v12773_v6 = vld [vmem:[%s14199_s17 + $0x14] sm:$0xf]  ;;  %v8887_v40 = vor.u32 %v12823_v43, %v8884_v59  ;;  %v8804_v26 = vld [vmem:[%s14199_s17 + $0x108] sm:$0xf0] }
 0x275   : > { %7619 = vmatpush.bf16.msra.mxu1 %v8783_v56  ;;  %v8831_v56 = vor.u32 %v12809_v52, %v8828_v8  ;;  %v8748_v52 = vld [vmem:[%s14199_s17 + $0x98] sm:$0xf0]  ;;  %v12805_v8 = vld [vmem:[%s14199_s17 + $0x114] sm:$0xf] }
 0x276   : > { %7632 = vmatpush.bf16.msra.mxu2 %v8847_v50  ;;  %v12775_v50 = vld [vmem:[%s14199_s17 + $0x24] sm:$0xf]  ;;  %v8815_v57 = vor.u32 %v12805_v8, %v8812_v48  ;;  %v12849_v59 = vld [vmem:[%s14199_s17 + $0x274] sm:$0xf]  ;;  %v9180_v8 = vld [vmem:[%s14199_s17 + $0x3f8] sm:$0xf0] }
 0x277   : > { %7645 = vmatpush.bf16.msra.mxu3 %v8911_v63  ;;  %v7379_v63 = vpop.f32.mrf.mxu2  ;;  %v8695_v54 = vor.u32 %v12775_v50, %v8692_v32  ;;  %v8676_v50 = vld [vmem:[%s14199_s17 + $0x8] sm:$0xf0] }
 0x278   : > { %7607 = vmatpush.bf16.msra.mxu0 %v8711_v55  ;;  %v7380_v3 = vadd.f32 %v7379_v63, %v7367_v9  ;;  %v7355_v55 = vpop.f32.mrf.mxu0  ;;  %v12789_v9 = vld [vmem:[%s14199_s17 + $0x94] sm:$0xf]  ;;  %v8740_v63 = vld [vmem:[%s14199_s17 + $0x88] sm:$0xf0] }
 0x279   : > { %7620 = vmatpush.bf16.msra.mxu1 %v8775_v62  ;;  %v7368_v62 = vpop.f32.mrf.mxu1  ;;  %v8751_v32 = vor.u32 %v12789_v9, %v8748_v52  ;;  %v8988_v55 = vld [vmem:[%s14199_s17 + $0x278] sm:$0xf0]  ;;  %v12897_v52 = vld [vmem:[%s14199_s17 + $0x3f4] sm:$0xf] }
 0x27a   : > { %7633 = vmatpush.bf16.msra.mxu2 %v8839_v1  ;;  %v15614_v1 = vadd.f32 %v7392_v27, %v7380_v3  ;;  %v12819_v3 = vld [vmem:[%s14199_s17 + $0x184] sm:$0xf]  ;;  %v8868_v27 = vld [vmem:[%s14199_s17 + $0x188] sm:$0xf0]  ;;  %v7394_v62 = vpop.f32.mrf.mxu3 }
 0x27b   : > { %7646 = vmatpush.bf16.msra.mxu3 %v8903_v0  ;;  %v8684_v0 = vld [vmem:[%s14199_s17 + $0x18] sm:$0xf0]  ;;  %v8871_v48 = vor.u32 %v12819_v3, %v8868_v27 }
 0x27c   : > { %7608 = vmatpush.bf16.msra.mxu0 %v8703_v39  ;;  %v8876_v39 = vld [vmem:[%s14199_s17 + $0x198] sm:$0xf0] }
 0x27d   : > { %7621 = vmatpush.bf16.msra.mxu1 %v8767_v58  ;;  %v8687_v58 = vor.u32 %v12773_v6, %v8684_v0  ;;  %v8879_v61 = vor.u32 %v12821_v2, %v8876_v39  ;;  %v12881_v6 = vld [vmem:[%s14199_s17 + $0x374] sm:$0xf]  ;;  %v9116_v0 = vld [vmem:[%s14199_s17 + $0x378] sm:$0xf0]  ;;  %v8991_v2 = vor.u32 %v12849_v59, %v8988_v55 }
 0x27e   : > { %7634 = vmatpush.bf16.msra.mxu2 %v8831_v56  ;;  %v12771_v56 = vld [vmem:[%s14199_s17 + $0x4] sm:$0xf]  ;;  %v12845_v59 = vld [vmem:[%s14199_s17 + $0x254] sm:$0xf]  ;;  %v8972_v55 = vld [vmem:[%s14199_s17 + $0x258] sm:$0xf0] }
 0x27f   : > { %7647 = vmatpush.bf16.msra.mxu3 %v8895_v15  ;;  %v12787_v15 = vld [vmem:[%s14199_s17 + $0x84] sm:$0xf]  ;;  %v7381_v43 = vpop.f32.mrf.mxu2 }
 0x280   : > { %7609 = vmatpush.bf16.msra.mxu0 %v8695_v54  ;;  %v12865_v54 = vld [vmem:[%s14199_s17 + $0x2f4] sm:$0xf]  ;;  %v8743_v9 = vor.u32 %v12787_v15, %v8740_v63  ;;  %v12863_v43 = vld [vmem:[%s14199_s17 + $0x2e4] sm:$0xf]  ;;  %v9108_v63 = vld [vmem:[%s14199_s17 + $0x368] sm:$0xf0] }
 0x281   : > { %7622 = vmatpush.bf16.msra.mxu1 %v8759_v21  ;;  %v8679_v21 = vor.u32 %v12771_v56, %v8676_v50  ;;  %v12847_v56 = vld [vmem:[%s14199_s17 + $0x264] sm:$0xf]  ;;  %v8980_v50 = vld [vmem:[%s14199_s17 + $0x268] sm:$0xf0] }
 0x282   : > { %7635 = vmatpush.bf16.msra.mxu2 %v8823_v14  ;;  %v9052_v14 = vld [vmem:[%s14199_s17 + $0x2f8] sm:$0xf0]  ;;  %v12879_v15 = vld [vmem:[%s14199_s17 + $0x364] sm:$0xf] }
 0x283   : > { %7648 = vmatpush.bf16.msra.mxu3 %v8887_v40  ;;  %v8807_v40 = vor.u32 %v12803_v60, %v8804_v26  ;;  %v9055_v39 = vor.u32 %v12865_v54, %v9052_v14  ;;  %v12895_v60 = vld [vmem:[%s14199_s17 + $0x3e4] sm:$0xf]  ;;  %v8983_v26 = vor.u32 %v12847_v56, %v8980_v50  ;;  %v9111_v27 = vor.u32 %v12879_v15, %v9108_v63  ;;  %v12861_v54 = vld [vmem:[%s14199_s17 + $0x2d4] sm:$0xf] }
 0x284   : > { %7610 = vmatpush.bf16.msra.mxu0 %v8687_v58  ;;  %v9119_v58 = vor.u32 %v12881_v6, %v9116_v0  ;;  %v12877_v14 = vld [vmem:[%s14199_s17 + $0x354] sm:$0xf]  ;;  %v9100_v6 = vld [vmem:[%s14199_s17 + $0x358] sm:$0xf0]  ;;  %v12891_v50 = vld [vmem:[%s14199_s17 + $0x3c4] sm:$0xf] }
 0x285   : > { %7623 = vmatpush.bf16.msra.mxu1 %v8751_v32  ;;  %v9183_v32 = vor.u32 %v12897_v52, %v9180_v8  ;;  %v12893_v0 = vld [vmem:[%s14199_s17 + $0x3d4] sm:$0xf]  ;;  %v9103_v8 = vor.u32 %v12877_v14, %v9100_v6 }
 0x286   : > { %7636 = vmatpush.bf16.msra.mxu2 %v8815_v57  ;;  %v9044_v57 = vld [vmem:[%s14199_s17 + $0x2e8] sm:$0xf0] }
 0x287   : > { %7649 = vmatpush.bf16.msra.mxu3 %v8879_v61  ;;  %v9172_v61 = vld [vmem:[%s14199_s17 + $0x3e8] sm:$0xf0]  ;;  %v9047_v3 = vor.u32 %v12863_v43, %v9044_v57 }
 0x288   : > { %7611 = vmatpush.bf16.msra.mxu0 %v8679_v21  ;;  %v9175_v62 = vor.u32 %v12895_v60, %v9172_v61  ;;  %v9036_v21 = vld [vmem:[%s14199_s17 + $0x2d8] sm:$0xf0]  ;;  %v7405_v56 = vpop.f32.mrf.mxu0  ;;  %v9156_v43 = vld [vmem:[%s14199_s17 + $0x3c8] sm:$0xf0]  ;;  %v12841_v60 = vld [vmem:[%s14199_s17 + $0x234] sm:$0xf] }
 0x289   : > { %7624 = vmatpush.bf16.msra.mxu1 %v8743_v9  ;;  %v9164_v9 = vld [vmem:[%s14199_s17 + $0x3d8] sm:$0xf0]  ;;  %v9039_v52 = vor.u32 %v12861_v54, %v9036_v21  ;;  %v7418_v57 = vpop.f32.mrf.mxu1  ;;  %v12889_v54 = vld [vmem:[%s14199_s17 + $0x3b4] sm:$0xf] }
 0x28a   : > { %7637 = vmatpush.bf16.msra.mxu2 %v8807_v40  ;;  %v8975_v40 = vor.u32 %v12845_v59, %v8972_v55  ;;  %v8956_v61 = vld [vmem:[%s14199_s17 + $0x238] sm:$0xf0]  ;;  %v12873_v55 = vld [vmem:[%s14199_s17 + $0x334] sm:$0xf] }
 0x28b   : > { %7650 = vmatpush.bf16.msra.mxu3 %v8871_v48  ;;  %7612 = vmatmul.bf16.vlgmr.msra.gmra.mxu0 %v14323_v19  ;;  %v8964_v48 = vld [vmem:[%s14199_s17 + $0x248] sm:$0xf0]  ;;  %v9020_v59 = vld [vmem:[%s14199_s17 + $0x2b8] sm:$0xf0]  ;;  %v8959_v21 = vor.u32 %v12841_v60, %v8956_v61  ;;  %v12853_v60 = vld [vmem:[%s14199_s17 + $0x294] sm:$0xf] }
 0x28c   : > { %7656 = vmatpush.bf16.msrb.mxu0 %v8991_v2  ;;  %7625 = vmatmul.bf16.vlgmr.msra.gmra.mxu1 %v14327_v22  ;;  %v12859_v2 = vld [vmem:[%s14199_s17 + $0x2c4] sm:$0xf]  ;;  %v9028_v19 = vld [vmem:[%s14199_s17 + $0x2c8] sm:$0xf0]  ;;  %v7406_v22 = vadd.f32 %v7405_v56, %v15614_v1  ;;  %v9084_v1 = vld [vmem:[%s14199_s17 + $0x338] sm:$0xf0] }
 0x28d   : > { %7669 = vmatpush.bf16.msrb.mxu1 %v9055_v39  ;;  %7638 = vmatmul.bf16.vlgmr.msra.gmra.mxu2 %v14321_v18  ;;  %v12843_v18 = vld [vmem:[%s14199_s17 + $0x244] sm:$0xf]  ;;  %v9167_v39 = vor.u32 %v12893_v0, %v9164_v9  ;;  %v9031_v15 = vor.u32 %v12859_v2, %v9028_v19  ;;  %v9087_v6 = vor.u32 %v12873_v55, %v9084_v1  ;;  %v8948_v9 = vld [vmem:[%s14199_s17 + $0x228] sm:$0xf0]  ;;  %v9132_v55 = vld [vmem:[%s14199_s17 + $0x398] sm:$0xf0] }
 0x28e   : > { %7682 = vmatpush.bf16.msrb.mxu2 %v9119_v58  ;;  %7651 = vmatmul.bf16.vlgmr.msra.gmra.mxu3 %v14325_v20  ;;  %v12875_v20 = vld [vmem:[%s14199_s17 + $0x344] sm:$0xf]  ;;  %v9092_v58 = vld [vmem:[%s14199_s17 + $0x348] sm:$0xf0] }
 0x28f   : > { %7695 = vmatpush.bf16.msrb.mxu3 %v9183_v32  ;;  %v8967_v32 = vor.u32 %v12843_v18, %v8964_v48  ;;  %v9095_v63 = vor.u32 %v12875_v20, %v9092_v58  ;;  %v12839_v0 = vld [vmem:[%s14199_s17 + $0x224] sm:$0xf]  ;;  %v9012_v18 = vld [vmem:[%s14199_s17 + $0x2a8] sm:$0xf0] }
 0x290   : > { %7657 = vmatpush.bf16.msrb.mxu0 %v8983_v26  ;;  %v12857_v26 = vld [vmem:[%s14199_s17 + $0x2b4] sm:$0xf]  ;;  %v12871_v48 = vld [vmem:[%s14199_s17 + $0x324] sm:$0xf]  ;;  %v9076_v2 = vld [vmem:[%s14199_s17 + $0x328] sm:$0xf0]  ;;  %v7407_v56 = vpop.f32.mrf.mxu0 }
 0x291   : > { %7670 = vmatpush.bf16.msrb.mxu1 %v9047_v3  ;;  %v9159_v3 = vor.u32 %v12891_v50, %v9156_v43  ;;  %v9023_v14 = vor.u32 %v12857_v26, %v9020_v59  ;;  %v7444_v19 = vpop.f32.mrf.mxu3  ;;  %v12887_v20 = vld [vmem:[%s14199_s17 + $0x3a4] sm:$0xf]  ;;  %v9140_v58 = vld [vmem:[%s14199_s17 + $0x3a8] sm:$0xf0]  ;;  %v8951_v50 = vor.u32 %v12839_v0, %v8948_v9  ;;  %v7420_v43 = vpop.f32.mrf.mxu1  ;;  %v9004_v26 = vld [vmem:[%s14199_s17 + $0x298] sm:$0xf0] }
 0x292   : > { %7683 = vmatpush.bf16.msrb.mxu2 %v9111_v27  ;;  %v7419_v27 = vadd.f32 %v7418_v57, %v7406_v22  ;;  %v9079_v57 = vor.u32 %v12871_v48, %v9076_v2  ;;  %v9143_v61 = vor.u32 %v12887_v20, %v9140_v58  ;;  %v12885_v59 = vld [vmem:[%s14199_s17 + $0x394] sm:$0xf]  ;;  %v8996_v0 = vld [vmem:[%s14199_s17 + $0x288] sm:$0xf0]  ;;  %v12867_v9 = vld [vmem:[%s14199_s17 + $0x304] sm:$0xf] }
 0x293   : > { %7696 = vmatpush.bf16.msrb.mxu3 %v9175_v62  ;;  %v9148_v62 = vld [vmem:[%s14199_s17 + $0x3b8] sm:$0xf0]  ;;  %v12913_v2 = vld [vmem:[%s14199_s17 + $0x474] sm:$0xf] }
 0x294   : > { %7658 = vmatpush.bf16.msrb.mxu0 %v8975_v40  ;;  %v12855_v40 = vld [vmem:[%s14199_s17 + $0x2a4] sm:$0xf]  ;;  %v9308_v56 = vld [vmem:[%s14199_s17 + $0x4f8] sm:$0xf0] }
 0x295   : > { %7671 = vmatpush.bf16.msrb.mxu1 %v9039_v52  ;;  %v9151_v52 = vor.u32 %v12889_v54, %v9148_v62  ;;  %v12835_v54 = vld [vmem:[%s14199_s17 + $0x204] sm:$0xf]  ;;  %v8932_v62 = vld [vmem:[%s14199_s17 + $0x208] sm:$0xf0]  ;;  %v9372_v43 = vld [vmem:[%s14199_s17 + $0x578] sm:$0xf0] }
 0x296   : > { %7684 = vmatpush.bf16.msrb.mxu2 %v9103_v8  ;;  %v7431_v8 = vpop.f32.mrf.mxu2  ;;  %v8935_v58 = vor.u32 %v12835_v54, %v8932_v62  ;;  %v9300_v54 = vld [vmem:[%s14199_s17 + $0x4e8] sm:$0xf0]  ;;  %v12943_v62 = vld [vmem:[%s14199_s17 + $0x564] sm:$0xf] }
 0x297   : > { %7697 = vmatpush.bf16.msrb.mxu3 %v9167_v39  ;;  %v7432_v39 = vadd.f32 %v7431_v8, %v7419_v27  ;;  %v9068_v27 = vld [vmem:[%s14199_s17 + $0x318] sm:$0xf0]  ;;  %v12883_v8 = vld [vmem:[%s14199_s17 + $0x384] sm:$0xf] }
 0x298   : > { %7659 = vmatpush.bf16.msrb.mxu0 %v8967_v32  ;;  %v9015_v32 = vor.u32 %v12855_v40, %v9012_v18  ;;  %v9135_v40 = vor.u32 %v12885_v59, %v9132_v55  ;;  %v9124_v18 = vld [vmem:[%s14199_s17 + $0x388] sm:$0xf0]  ;;  %v12927_v55 = vld [vmem:[%s14199_s17 + $0x4e4] sm:$0xf] }
 0x299   : > { %7672 = vmatpush.bf16.msrb.mxu1 %v9031_v15  ;;  %v15685_v22 = vadd.f32 %v7444_v19, %v7432_v39  ;;  %v12837_v15 = vld [vmem:[%s14199_s17 + $0x214] sm:$0xf]  ;;  %v9244_v39 = vld [vmem:[%s14199_s17 + $0x478] sm:$0xf0]  ;;  %v7446_v20 = vpop.f32.mrf.mxu3  ;;  %v9236_v59 = vld [vmem:[%s14199_s17 + $0x468] sm:$0xf0] }
 0x29a   : > { %7685 = vmatpush.bf16.msrb.mxu2 %v9095_v63  ;;  %v8940_v63 = vld [vmem:[%s14199_s17 + $0x218] sm:$0xf0]  ;;  %v12929_v19 = vld [vmem:[%s14199_s17 + $0x4f4] sm:$0xf] }
 0x29b   : > { %7698 = vmatpush.bf16.msrb.mxu3 %v9159_v3  ;;  %v12869_v3 = vld [vmem:[%s14199_s17 + $0x314] sm:$0xf]  ;;  %v8943_v1 = vor.u32 %v12837_v15, %v8940_v63  ;;  %v9436_v63 = vld [vmem:[%s14199_s17 + $0x5f8] sm:$0xf0] }
 0x29c   : > { %7660 = vmatpush.bf16.msrb.mxu0 %v8959_v21  ;;  %v9007_v21 = vor.u32 %v12853_v60, %v9004_v26  ;;  %v12961_v15 = vld [vmem:[%s14199_s17 + $0x5f4] sm:$0xf]  ;;  %v9127_v60 = vor.u32 %v12883_v8, %v9124_v18  ;;  %v9311_v26 = vor.u32 %v12929_v19, %v9308_v56  ;;  %v9228_v8 = vld [vmem:[%s14199_s17 + $0x458] sm:$0xf0] }
 0x29d   : > { %7673 = vmatpush.bf16.msrb.mxu1 %v9023_v14  ;;  %v9071_v14 = vor.u32 %v12869_v3, %v9068_v27  ;;  %v12911_v27 = vld [vmem:[%s14199_s17 + $0x464] sm:$0xf]  ;;  %v12925_v18 = vld [vmem:[%s14199_s17 + $0x4d4] sm:$0xf]  ;;  %v9356_v19 = vld [vmem:[%s14199_s17 + $0x558] sm:$0xf0] }
 0x29e   : > { %7686 = vmatpush.bf16.msrb.mxu2 %v9087_v6  ;;  %v12851_v6 = vld [vmem:[%s14199_s17 + $0x284] sm:$0xf]  ;;  %v7433_v48 = vpop.f32.mrf.mxu2  ;;  %v12957_v20 = vld [vmem:[%s14199_s17 + $0x5d4] sm:$0xf] }
 0x29f   : > { %7699 = vmatpush.bf16.msrb.mxu3 %v9151_v52  ;;  %v9060_v52 = vld [vmem:[%s14199_s17 + $0x308] sm:$0xf0] }
 0x2a0   : > { %7661 = vmatpush.bf16.msrb.mxu0 %v8951_v50  ;;  %v12945_v50 = vld [vmem:[%s14199_s17 + $0x574] sm:$0xf] }
 0x2a1   : > { %7674 = vmatpush.bf16.msrb.mxu1 %v9015_v32  ;;  %v8999_v32 = vor.u32 %v12851_v6, %v8996_v0  ;;  %v9375_v3 = vor.u32 %v12945_v50, %v9372_v43  ;;  %v9428_v6 = vld [vmem:[%s14199_s17 + $0x5e8] sm:$0xf0]  ;;  %v9239_v0 = vor.u32 %v12911_v27, %v9236_v59  ;;  %v12907_v43 = vld [vmem:[%s14199_s17 + $0x444] sm:$0xf] }
 0x2a2   : > { %7687 = vmatpush.bf16.msrb.mxu2 %v9079_v57  ;;  %v9063_v57 = vor.u32 %v12867_v9, %v9060_v52  ;;  %v9303_v9 = vor.u32 %v12927_v55, %v9300_v54  ;;  %v12909_v52 = vld [vmem:[%s14199_s17 + $0x454] sm:$0xf] }
 0x2a3   : > { %7700 = vmatpush.bf16.msrb.mxu3 %v9143_v61  ;;  %v9247_v61 = vor.u32 %v12913_v2, %v9244_v39  ;;  %v9292_v2 = vld [vmem:[%s14199_s17 + $0x4d8] sm:$0xf0]  ;;  %v12941_v39 = vld [vmem:[%s14199_s17 + $0x554] sm:$0xf]  ;;  %v9231_v56 = vor.u32 %v12909_v52, %v9228_v8 }
 0x2a4   : > { %7662 = vmatpush.bf16.msrb.mxu0 %v8943_v1  ;;  %v9439_v1 = vor.u32 %v12961_v15, %v9436_v63  ;;  %v9359_v50 = vor.u32 %v12941_v39, %v9356_v19  ;;  %v9284_v15 = vld [vmem:[%s14199_s17 + $0x4c8] sm:$0xf0]  ;;  %v12905_v55 = vld [vmem:[%s14199_s17 + $0x434] sm:$0xf] }
 0x2a5   : > { %7675 = vmatpush.bf16.msrb.mxu1 %v9007_v21  ;;  %v9364_v21 = vld [vmem:[%s14199_s17 + $0x568] sm:$0xf0]  ;;  %v12921_v54 = vld [vmem:[%s14199_s17 + $0x4b4] sm:$0xf] }
 0x2a6   : > { %7688 = vmatpush.bf16.msrb.mxu2 %v9071_v14  ;;  %v12959_v14 = vld [vmem:[%s14199_s17 + $0x5e4] sm:$0xf]  ;;  %v9348_v63 = vld [vmem:[%s14199_s17 + $0x548] sm:$0xf0] }
 0x2a7   : > { %7701 = vmatpush.bf16.msrb.mxu3 %v9135_v40  ;;  %v9367_v40 = vor.u32 %v12943_v62, %v9364_v21  ;;  %v9431_v48 = vor.u32 %v12959_v14, %v9428_v6  ;;  %v9276_v21 = vld [vmem:[%s14199_s17 + $0x4b8] sm:$0xf0]  ;;  %v12937_v14 = vld [vmem:[%s14199_s17 + $0x534] sm:$0xf] }
 0x2a8   : > { %7663 = vmatpush.bf16.msrb.mxu0 %v8935_v58  ;;  %v9420_v58 = vld [vmem:[%s14199_s17 + $0x5d8] sm:$0xf0]  ;;  %v9279_v52 = vor.u32 %v12921_v54, %v9276_v21  ;;  %v12899_v21 = vld [vmem:[%s14199_s17 + $0x404] sm:$0xf] }
 0x2a9   : > { %7676 = vmatpush.bf16.msrb.mxu1 %v8999_v32  ;;  %v9220_v32 = vld [vmem:[%s14199_s17 + $0x448] sm:$0xf0]  ;;  %v9340_v6 = vld [vmem:[%s14199_s17 + $0x538] sm:$0xf0] }
 0x2aa   : > { %7689 = vmatpush.bf16.msrb.mxu2 %v9063_v57  ;;  %v12923_v57 = vld [vmem:[%s14199_s17 + $0x4c4] sm:$0xf]  ;;  %v9343_v8 = vor.u32 %v12937_v14, %v9340_v6  ;;  %v9388_v54 = vld [vmem:[%s14199_s17 + $0x598] sm:$0xf0]  ;;  %v9188_v14 = vld [vmem:[%s14199_s17 + $0x408] sm:$0xf0] }
 0x2ab   : > { %7702 = vmatpush.bf16.msrb.mxu3 %v9127_v60  ;;  %7664 = vmatmul.bf16.vlgmr.msrb.gmra.mxu0 %v14389_v41  ;;  %v9423_v41 = vor.u32 %v12957_v20, %v9420_v58  ;;  %v15737_v60 = vpop.f32.mrf.mxu0  ;;  %v9287_v27 = vor.u32 %v12923_v57, %v9284_v15  ;;  %v9268_v20 = vld [vmem:[%s14199_s17 + $0x4a8] sm:$0xf0]  ;;  %v12935_v58 = vld [vmem:[%s14199_s17 + $0x524] sm:$0xf] }
 0x2ac   : > { %7708 = vmatpush.bf16.msra.mxu0 %v9247_v61  ;;  %7677 = vmatmul.bf16.vlgmr.msrb.gmra.mxu1 %v14393_v44  ;;  %v12955_v44 = vld [vmem:[%s14199_s17 + $0x5c4] sm:$0xf]  ;;  %v9412_v61 = vld [vmem:[%s14199_s17 + $0x5c8] sm:$0xf0] }
 0x2ad   : > { %7721 = vmatpush.bf16.msra.mxu1 %v9311_v26  ;;  %7690 = vmatmul.bf16.vlgmr.msrb.gmra.mxu2 %v14385_v38  ;;  %v9295_v38 = vor.u32 %v12925_v18, %v9292_v2  ;;  %v9223_v26 = vor.u32 %v12907_v43, %v9220_v32  ;;  %v9415_v62 = vor.u32 %v12955_v44, %v9412_v61  ;;  %v12903_v18 = vld [vmem:[%s14199_s17 + $0x424] sm:$0xf]  ;;  %v9396_v43 = vld [vmem:[%s14199_s17 + $0x5a8] sm:$0xf0]  ;;  %v9196_v44 = vld [vmem:[%s14199_s17 + $0x418] sm:$0xf0] }
 0x2ae   : > { %7734 = vmatpush.bf16.msra.mxu2 %v9375_v3  ;;  %7703 = vmatmul.bf16.vlgmr.msrb.gmra.mxu3 %v14391_v42  ;;  %v12939_v42 = vld [vmem:[%s14199_s17 + $0x544] sm:$0xf]  ;;  %v15741_v3 = vpop.f32.mrf.mxu1  ;;  %v12917_v61 = vld [vmem:[%s14199_s17 + $0x494] sm:$0xf] }
 0x2af   : > { %7747 = vmatpush.bf16.msra.mxu3 %v9439_v1  ;;  %v9351_v59 = vor.u32 %v12939_v42, %v9348_v63  ;;  %v9212_v1 = vld [vmem:[%s14199_s17 + $0x438] sm:$0xf0]  ;;  %v12919_v2 = vld [vmem:[%s14199_s17 + $0x4a4] sm:$0xf]  ;;  %v12901_v63 = vld [vmem:[%s14199_s17 + $0x414] sm:$0xf] }
 0x2b0   : > { %7709 = vmatpush.bf16.msra.mxu0 %v9239_v0  ;;  %v12953_v0 = vld [vmem:[%s14199_s17 + $0x5b4] sm:$0xf]  ;;  %v15754_v19 = vpop.f32.mrf.mxu2  ;;  %v9271_v15 = vor.u32 %v12919_v2, %v9268_v20  ;;  %v9380_v2 = vld [vmem:[%s14199_s17 + $0x588] sm:$0xf0] }
 0x2b1   : > { %7722 = vmatpush.bf16.msra.mxu1 %v9303_v9  ;;  %v9404_v9 = vld [vmem:[%s14199_s17 + $0x5b8] sm:$0xf0]  ;;  %v12977_v20 = vld [vmem:[%s14199_s17 + $0x674] sm:$0xf] }
 0x2b2   : > { %7735 = vmatpush.bf16.msra.mxu2 %v9367_v40  ;;  %v9215_v40 = vor.u32 %v12905_v55, %v9212_v1  ;;  %v9407_v39 = vor.u32 %v12953_v0, %v9404_v9  ;;  %v9324_v55 = vld [vmem:[%s14199_s17 + $0x518] sm:$0xf0]  ;;  %v12949_v1 = vld [vmem:[%s14199_s17 + $0x594] sm:$0xf]  ;;  %v12915_v9 = vld [vmem:[%s14199_s17 + $0x484] sm:$0xf] }
 0x2b3   : > { %7748 = vmatpush.bf16.msra.mxu3 %v9431_v48  ;;  %v9204_v48 = vld [vmem:[%s14199_s17 + $0x428] sm:$0xf0]  ;;  %v7459_v32 = vpop.f32.mrf.mxu0 }
 0x2b4   : > { %7710 = vmatpush.bf16.msra.mxu0 %v9231_v56  ;;  %v9332_v56 = vld [vmem:[%s14199_s17 + $0x528] sm:$0xf0]  ;;  %v9207_v57 = vor.u32 %v12903_v18, %v9204_v48  ;;  %v12947_v48 = vld [vmem:[%s14199_s17 + $0x584] sm:$0xf]  ;;  %v9564_v32 = vld [vmem:[%s14199_s17 + $0x6f8] sm:$0xf0] }
 0x2b5   : > { %7723 = vmatpush.bf16.msra.mxu1 %v9295_v38  ;;  %v15759_v38 = vpop.f32.mrf.mxu3  ;;  %v9335_v42 = vor.u32 %v12935_v58, %v9332_v56  ;;  %v9316_v18 = vld [vmem:[%s14199_s17 + $0x508] sm:$0xf0]  ;;  %v9500_v58 = vld [vmem:[%s14199_s17 + $0x678] sm:$0xf0]  ;;  %v12993_v56 = vld [vmem:[%s14199_s17 + $0x6f4] sm:$0xf] }
 0x2b6   : > { %7736 = vmatpush.bf16.msra.mxu2 %v9359_v50  ;;  %v12951_v50 = vld [vmem:[%s14199_s17 + $0x5a4] sm:$0xf] }
 0x2b7   : > { %7749 = vmatpush.bf16.msra.mxu3 %v9423_v41  ;;  %v7472_v41 = vpop.f32.mrf.mxu1 }
 0x2b8   : > { %7711 = vmatpush.bf16.msra.mxu0 %v9223_v26  ;;  %v9399_v26 = vor.u32 %v12951_v50, %v9396_v43  ;;  %v9191_v43 = vor.u32 %v12899_v21, %v9188_v14  ;;  %v9628_v41 = vld [vmem:[%s14199_s17 + $0x778] sm:$0xf0]  ;;  %v9556_v21 = vld [vmem:[%s14199_s17 + $0x6e8] sm:$0xf0]  ;;  %v13007_v14 = vld [vmem:[%s14199_s17 + $0x764] sm:$0xf] }
 0x2b9   : > { %7724 = vmatpush.bf16.msra.mxu1 %v9287_v27  ;;  %v9260_v27 = vld [vmem:[%s14199_s17 + $0x498] sm:$0xf0] }
 0x2ba   : > { %7737 = vmatpush.bf16.msra.mxu2 %v9351_v59  ;;  %v12933_v59 = vld [vmem:[%s14199_s17 + $0x514] sm:$0xf]  ;;  %v9263_v6 = vor.u32 %v12917_v61, %v9260_v27  ;;  %v9383_v61 = vor.u32 %v12947_v48, %v9380_v2  ;;  %v9567_v27 = vor.u32 %v12993_v56, %v9564_v32  ;;  %v9484_v48 = vld [vmem:[%s14199_s17 + $0x658] sm:$0xf0] }
 0x2bb   : > { %7750 = vmatpush.bf16.msra.mxu3 %v9415_v62  ;;  %v9199_v62 = vor.u32 %v12901_v63, %v9196_v44  ;;  %v9327_v0 = vor.u32 %v12933_v59, %v9324_v55  ;;  %v13025_v63 = vld [vmem:[%s14199_s17 + $0x7f4] sm:$0xf]  ;;  %v9692_v44 = vld [vmem:[%s14199_s17 + $0x7f8] sm:$0xf0]  ;;  %v12975_v55 = vld [vmem:[%s14199_s17 + $0x664] sm:$0xf] }
 0x2bc   : > { %7712 = vmatpush.bf16.msra.mxu0 %v9215_v40  ;;  %v9252_v40 = vld [vmem:[%s14199_s17 + $0x488] sm:$0xf0]  ;;  %v12989_v2 = vld [vmem:[%s14199_s17 + $0x6d4] sm:$0xf]  ;;  %v9612_v56 = vld [vmem:[%s14199_s17 + $0x758] sm:$0xf0] }
 0x2bd   : > { %7725 = vmatpush.bf16.msra.mxu1 %v9279_v52  ;;  %v12931_v52 = vld [vmem:[%s14199_s17 + $0x504] sm:$0xf]  ;;  %v7498_v50 = vpop.f32.mrf.mxu3 }
 0x2be   : > { %7738 = vmatpush.bf16.msra.mxu2 %v9343_v8  ;;  %v9391_v8 = vor.u32 %v12949_v1, %v9388_v54  ;;  %v9492_v1 = vld [vmem:[%s14199_s17 + $0x668] sm:$0xf0]  ;;  %v12991_v54 = vld [vmem:[%s14199_s17 + $0x6e4] sm:$0xf]  ;;  %v13021_v50 = vld [vmem:[%s14199_s17 + $0x7d4] sm:$0xf] }
 0x2bf   : > { %7751 = vmatpush.bf16.msra.mxu3 %v9407_v39  ;;  %v7485_v39 = vpop.f32.mrf.mxu2 }
 0x2c0   : > { %7713 = vmatpush.bf16.msra.mxu0 %v9207_v57  ;;  %v13009_v57 = vld [vmem:[%s14199_s17 + $0x774] sm:$0xf] }
 0x2c1   : > { %7726 = vmatpush.bf16.msra.mxu1 %v9271_v15  ;;  %v9255_v15 = vor.u32 %v12915_v9, %v9252_v40  ;;  %v9631_v59 = vor.u32 %v13009_v57, %v9628_v41  ;;  %v9684_v9 = vld [vmem:[%s14199_s17 + $0x7e8] sm:$0xf0]  ;;  %v9495_v40 = vor.u32 %v12975_v55, %v9492_v1  ;;  %v12971_v41 = vld [vmem:[%s14199_s17 + $0x644] sm:$0xf] }
 0x2c2   : > { %7739 = vmatpush.bf16.msra.mxu2 %v9335_v42  ;;  %v9319_v42 = vor.u32 %v12931_v52, %v9316_v18  ;;  %v9559_v52 = vor.u32 %v12991_v54, %v9556_v21  ;;  %v12973_v18 = vld [vmem:[%s14199_s17 + $0x654] sm:$0xf] }
 0x2c3   : > { %7752 = vmatpush.bf16.msra.mxu3 %v9399_v26  ;;  %v9503_v26 = vor.u32 %v12977_v20, %v9500_v58  ;;  %v9548_v20 = vld [vmem:[%s14199_s17 + $0x6d8] sm:$0xf0]  ;;  %v13005_v58 = vld [vmem:[%s14199_s17 + $0x754] sm:$0xf] }
 0x2c4   : > { %7714 = vmatpush.bf16.msra.mxu0 %v9199_v62  ;;  %v9695_v62 = vor.u32 %v13025_v63, %v9692_v44  ;;  %v9551_v32 = vor.u32 %v12989_v2, %v9548_v20  ;;  %v9615_v57 = vor.u32 %v13005_v58, %v9612_v56  ;;  %v13003_v63 = vld [vmem:[%s14199_s17 + $0x744] sm:$0xf]  ;;  %v9604_v44 = vld [vmem:[%s14199_s17 + $0x748] sm:$0xf0]  ;;  %v12969_v54 = vld [vmem:[%s14199_s17 + $0x634] sm:$0xf] }
 0x2c5   : > { %7727 = vmatpush.bf16.msra.mxu1 %v9263_v6  ;;  %v9620_v6 = vld [vmem:[%s14199_s17 + $0x768] sm:$0xf0]  ;;  %v9607_v1 = vor.u32 %v13003_v63, %v9604_v44  ;;  %v12985_v21 = vld [vmem:[%s14199_s17 + $0x6b4] sm:$0xf]  ;;  %v12967_v2 = vld [vmem:[%s14199_s17 + $0x624] sm:$0xf] }
 0x2c6   : > { %7740 = vmatpush.bf16.msra.mxu2 %v9327_v0  ;;  %v13023_v0 = vld [vmem:[%s14199_s17 + $0x7e4] sm:$0xf] }
 0x2c7   : > { %7753 = vmatpush.bf16.msra.mxu3 %v9391_v8  ;;  %v9623_v8 = vor.u32 %v13007_v14, %v9620_v6  ;;  %v9687_v39 = vor.u32 %v13023_v0, %v9684_v9  ;;  %v9532_v6 = vld [vmem:[%s14199_s17 + $0x6b8] sm:$0xf0]  ;;  %v13001_v0 = vld [vmem:[%s14199_s17 + $0x734] sm:$0xf]  ;;  %v12983_v20 = vld [vmem:[%s14199_s17 + $0x6a4] sm:$0xf] }
 0x2c8   : > { %7715 = vmatpush.bf16.msra.mxu0 %v9191_v43  ;;  %v9676_v43 = vld [vmem:[%s14199_s17 + $0x7d8] sm:$0xf0] }
 0x2c9   : > { %7728 = vmatpush.bf16.msra.mxu1 %v9255_v15  ;;  %v9476_v15 = vld [vmem:[%s14199_s17 + $0x648] sm:$0xf0]  ;;  %v9596_v9 = vld [vmem:[%s14199_s17 + $0x738] sm:$0xf0] }
 0x2ca   : > { %7741 = vmatpush.bf16.msra.mxu2 %v9319_v42  ;;  %v9540_v42 = vld [vmem:[%s14199_s17 + $0x6c8] sm:$0xf0] }
 0x2cb   : > { %7754 = vmatpush.bf16.msra.mxu3 %v9383_v61  ;;  %7716 = vmatmul.bf16.vlgmr.msra.gmra.mxu0 %v14464_v25  ;;  %v9487_v25 = vor.u32 %v12973_v18, %v9484_v48  ;;  %v13019_v61 = vld [vmem:[%s14199_s17 + $0x7c4] sm:$0xf]  ;;  %v9535_v18 = vor.u32 %v12985_v21, %v9532_v6  ;;  %v9599_v48 = vor.u32 %v13001_v0, %v9596_v9  ;;  %v9644_v21 = vld [vmem:[%s14199_s17 + $0x798] sm:$0xf0]  ;;  %v9444_v0 = vld [vmem:[%s14199_s17 + $0x608] sm:$0xf0] }
 0x2cc   : > { %7760 = vmatpush.bf16.msrb.mxu0 %v9503_v26  ;;  %7729 = vmatmul.bf16.vlgmr.msra.gmra.mxu1 %v14471_v30  ;;  %v9679_v30 = vor.u32 %v13021_v50, %v9676_v43  ;;  %v9668_v26 = vld [vmem:[%s14199_s17 + $0x7c8] sm:$0xf0]  ;;  %v12999_v43 = vld [vmem:[%s14199_s17 + $0x724] sm:$0xf] }
 0x2cd   : > { %7773 = vmatpush.bf16.msrb.mxu1 %v9567_v27  ;;  %7742 = vmatmul.bf16.vlgmr.msra.gmra.mxu2 %v14469_v29  ;;  %v12987_v29 = vld [vmem:[%s14199_s17 + $0x6c4] sm:$0xf]  ;;  %v9479_v27 = vor.u32 %v12971_v41, %v9476_v15  ;;  %v9671_v14 = vor.u32 %v13019_v61, %v9668_v26  ;;  %v9524_v50 = vld [vmem:[%s14199_s17 + $0x6a8] sm:$0xf0]  ;;  %v12981_v61 = vld [vmem:[%s14199_s17 + $0x694] sm:$0xf] }
 0x2ce   : > { %7786 = vmatpush.bf16.msrb.mxu2 %v9631_v59  ;;  %7755 = vmatmul.bf16.vlgmr.msra.gmra.mxu3 %v14475_v33  ;;  %v15813_v33 = vpop.f32.mrf.mxu0  ;;  %v15817_v59 = vpop.f32.mrf.mxu1  ;;  %v9543_v55 = vor.u32 %v12987_v29, %v9540_v42  ;;  %v13015_v41 = vld [vmem:[%s14199_s17 + $0x7a4] sm:$0xf]  ;;  %v9652_v15 = vld [vmem:[%s14199_s17 + $0x7a8] sm:$0xf0]  ;;  %v9527_v63 = vor.u32 %v12983_v20, %v9524_v50  ;;  %v9756_v50 = vld [vmem:[%s14199_s17 + $0x878] sm:$0xf0] }
 0x2cf   : > { %7799 = vmatpush.bf16.msrb.mxu3 %v9695_v62  ;;  %v9468_v62 = vld [vmem:[%s14199_s17 + $0x638] sm:$0xf0]  ;;  %v9655_v26 = vor.u32 %v13015_v41, %v9652_v15  ;;  %v12963_v6 = vld [vmem:[%s14199_s17 + $0x604] sm:$0xf]  ;;  %v9636_v20 = vld [vmem:[%s14199_s17 + $0x788] sm:$0xf0] }
 0x2d0   : > { %7761 = vmatpush.bf16.msrb.mxu0 %v9495_v40  ;;  %v13017_v40 = vld [vmem:[%s14199_s17 + $0x7b4] sm:$0xf]  ;;  %v15830_v56 = vpop.f32.mrf.mxu2  ;;  %v9820_v41 = vld [vmem:[%s14199_s17 + $0x8f8] sm:$0xf0] }
 0x2d1   : > { %7774 = vmatpush.bf16.msrb.mxu1 %v9559_v52  ;;  %v9660_v52 = vld [vmem:[%s14199_s17 + $0x7b8] sm:$0xf0]  ;;  %v13073_v15 = vld [vmem:[%s14199_s17 + $0x974] sm:$0xf] }
 0x2d2   : > { %7787 = vmatpush.bf16.msrb.mxu2 %v9623_v8  ;;  %v9471_v8 = vor.u32 %v12969_v54, %v9468_v62  ;;  %v9663_v58 = vor.u32 %v13017_v40, %v9660_v52  ;;  %v13013_v62 = vld [vmem:[%s14199_s17 + $0x794] sm:$0xf] }
 0x2d3   : > { %7800 = vmatpush.bf16.msrb.mxu3 %v9687_v39  ;;  %v9460_v39 = vld [vmem:[%s14199_s17 + $0x628] sm:$0xf0] }
 0x2d4   : > { %7762 = vmatpush.bf16.msrb.mxu0 %v9487_v25  ;;  %v9588_v25 = vld [vmem:[%s14199_s17 + $0x728] sm:$0xf0] }
 0x2d5   : > { %7775 = vmatpush.bf16.msrb.mxu1 %v9551_v32  ;;  %v7458_v32 = vadd.f32 %v15737_v60, %v15685_v22  ;;  %v9591_v44 = vor.u32 %v12999_v43, %v9588_v25  ;;  %v12965_v22 = vld [vmem:[%s14199_s17 + $0x614] sm:$0xf]  ;;  %v9452_v60 = vld [vmem:[%s14199_s17 + $0x618] sm:$0xf0] }
 0x2d6   : > { %7788 = vmatpush.bf16.msrb.mxu2 %v9615_v57  ;;  %v15837_v57 = vpop.f32.mrf.mxu3  ;;  %v7511_v29 = vpop.f32.mrf.mxu0  ;;  %v13057_v43 = vld [vmem:[%s14199_s17 + $0x8f4] sm:$0xf] }
 0x2d7   : > { %7801 = vmatpush.bf16.msrb.mxu3 %v9679_v30  ;;  %v9463_v30 = vor.u32 %v12967_v2, %v9460_v39  ;;  %v7524_v42 = vpop.f32.mrf.mxu1  ;;  %v7471_v54 = vadd.f32 %v15741_v3, %v7458_v32  ;;  %v12979_v3 = vld [vmem:[%s14199_s17 + $0x684] sm:$0xf]  ;;  %v9572_v2 = vld [vmem:[%s14199_s17 + $0x708] sm:$0xf0]  ;;  %v9447_v32 = vor.u32 %v12963_v6, %v9444_v0  ;;  %v9884_v29 = vld [vmem:[%s14199_s17 + $0x978] sm:$0xf0] }
 0x2d8   : > { %7763 = vmatpush.bf16.msrb.mxu0 %v9479_v27  ;;  %v9516_v27 = vld [vmem:[%s14199_s17 + $0x698] sm:$0xf0]  ;;  %v13011_v39 = vld [vmem:[%s14199_s17 + $0x784] sm:$0xf]  ;;  %v9876_v6 = vld [vmem:[%s14199_s17 + $0x968] sm:$0xf0] }
 0x2d9   : > { %7776 = vmatpush.bf16.msrb.mxu1 %v9543_v55  ;;  %v12997_v55 = vld [vmem:[%s14199_s17 + $0x714] sm:$0xf]  ;;  %v7484_v9 = vadd.f32 %v15754_v19, %v7471_v54  ;;  %v9519_v40 = vor.u32 %v12981_v61, %v9516_v27  ;;  %v9823_v27 = vor.u32 %v13057_v43, %v9820_v41  ;;  %v13055_v54 = vld [vmem:[%s14199_s17 + $0x8e4] sm:$0xf]  ;;  %v14029_v41 = vmov 8.0  }
 0x2da   : > { %7789 = vmatpush.bf16.msrb.mxu2 %v9607_v1  ;;  %v9580_v1 = vld [vmem:[%s14199_s17 + $0x718] sm:$0xf0]  ;;  %v13041_v19 = vld [vmem:[%s14199_s17 + $0x874] sm:$0xf]  ;;  %v13087_v0 = vld [vmem:[%s14199_s17 + $0x9e4] sm:$0xf]  ;;  %13853 = vrcp.f32 %v14029_v41 }
 0x2db   : > { %7802 = vmatpush.bf16.msrb.mxu3 %v9671_v14  ;;  %v9455_v14 = vor.u32 %v12965_v22, %v9452_v60  ;;  %v9583_v52 = vor.u32 %v12997_v55, %v9580_v1  ;;  %v9948_v22 = vld [vmem:[%s14199_s17 + $0x9f8] sm:$0xf0]  ;;  %v9639_v60 = vor.u32 %v13011_v39, %v9636_v20  ;;  %v9759_v61 = vor.u32 %v13041_v19, %v9756_v50  ;;  %v9748_v1 = vld [vmem:[%s14199_s17 + $0x868] sm:$0xf0]  ;;  %v13069_v20 = vld [vmem:[%s14199_s17 + $0x954] sm:$0xf] }
 0x2dc   : > { %7764 = vmatpush.bf16.msrb.mxu0 %v9471_v8  ;;  %v9508_v8 = vld [vmem:[%s14199_s17 + $0x688] sm:$0xf0]  ;;  %v9887_v55 = vor.u32 %v13073_v15, %v9884_v29  ;;  %v13085_v19 = vld [vmem:[%s14199_s17 + $0x9d4] sm:$0xf]  ;;  %v9932_v50 = vld [vmem:[%s14199_s17 + $0x9d8] sm:$0xf0] }
 0x2dd   : > { %7777 = vmatpush.bf16.msrb.mxu1 %v9535_v18  ;;  %v12995_v18 = vld [vmem:[%s14199_s17 + $0x704] sm:$0xf]  ;;  %v9511_v42 = vor.u32 %v12979_v3, %v9508_v8  ;;  %v9796_v15 = vld [vmem:[%s14199_s17 + $0x8c8] sm:$0xf0] }
 0x2de   : > { %7790 = vmatpush.bf16.msrb.mxu2 %v9599_v48  ;;  %v9647_v48 = vor.u32 %v13013_v62, %v9644_v21  ;;  %v7550_v25 = vpop.f32.mrf.mxu3  ;;  %v9812_v21 = vld [vmem:[%s14199_s17 + $0x8e8] sm:$0xf0] }
 0x2df   : > { %7803 = vmatpush.bf16.msrb.mxu3 %v9663_v58  ;;  %v7537_v58 = vpop.f32.mrf.mxu2  ;;  %v9815_v3 = vor.u32 %v13055_v54, %v9812_v21  ;;  %v9860_v29 = vld [vmem:[%s14199_s17 + $0x948] sm:$0xf0]  ;;  %v9788_v54 = vld [vmem:[%s14199_s17 + $0x8b8] sm:$0xf0] }
 0x2e0   : > { %7765 = vmatpush.bf16.msrb.mxu0 %v9463_v30  ;;  %v7497_v30 = vadd.f32 %v15759_v38, %v7484_v9  ;;  %v13039_v38 = vld [vmem:[%s14199_s17 + $0x864] sm:$0xf]  ;;  %v9940_v9 = vld [vmem:[%s14199_s17 + $0x9e8] sm:$0xf0]  ;;  %v9868_v58 = vld [vmem:[%s14199_s17 + $0x958] sm:$0xf0] }
 0x2e1   : > { %7778 = vmatpush.bf16.msrb.mxu1 %v9527_v63  ;;  %v9575_v63 = vor.u32 %v12995_v18, %v9572_v2  ;;  %v9740_v18 = vld [vmem:[%s14199_s17 + $0x858] sm:$0xf0]  ;;  %v9943_v39 = vor.u32 %v13087_v0, %v9940_v9  ;;  %v9871_v25 = vor.u32 %v13069_v20, %v9868_v58  ;;  %v13063_v58 = vld [vmem:[%s14199_s17 + $0x924] sm:$0xf] }
 0x2e2   : > { %7791 = vmatpush.bf16.msrb.mxu2 %v9591_v44  ;;  %v13089_v44 = vld [vmem:[%s14199_s17 + $0x9f4] sm:$0xf]  ;;  %v9804_v2 = vld [vmem:[%s14199_s17 + $0x8d8] sm:$0xf0] }
 0x2e3   : > { %7804 = vmatpush.bf16.msrb.mxu3 %v9655_v26  ;;  %v7510_v26 = vadd.f32 %v15813_v33, %v7497_v30  ;;  %v9951_v62 = vor.u32 %v13089_v44, %v9948_v22  ;;  %v9751_v33 = vor.u32 %v13039_v38, %v9748_v1  ;;  %v9924_v44 = vld [vmem:[%s14199_s17 + $0x9c8] sm:$0xf0]  ;;  %v9724_v38 = vld [vmem:[%s14199_s17 + $0x838] sm:$0xf0] }
 0x2e4   : > { %7766 = vmatpush.bf16.msrb.mxu0 %v9455_v14  ;;  %v13071_v14 = vld [vmem:[%s14199_s17 + $0x964] sm:$0xf]  ;;  %v9852_v21 = vld [vmem:[%s14199_s17 + $0x938] sm:$0xf0] }
 0x2e5   : > { %7779 = vmatpush.bf16.msrb.mxu1 %v9519_v40  ;;  %v13037_v40 = vld [vmem:[%s14199_s17 + $0x854] sm:$0xf]  ;;  %v9879_v8 = vor.u32 %v13071_v14, %v9876_v6  ;;  %v15906_v14 = vpop.eup %13853  ;;  %v9916_v0 = vld [vmem:[%s14199_s17 + $0x9b8] sm:$0xf0] }
 0x2e6   : > { %7792 = vmatpush.bf16.msrb.mxu2 %v9583_v52  ;;  %v7523_v52 = vadd.f32 %v15817_v59, %v7510_v26  ;;  %v13081_v6 = vld [vmem:[%s14199_s17 + $0x9b4] sm:$0xf]  ;;  %v8451_v20 = vmul.f32 8.0, %v15906_v14  ;;  %vm8455_vm0 = vweird.f32 %v15906_v14 }
 0x2e7   : > { %7805 = vmatpush.bf16.msrb.mxu3 %v9647_v48  ;;  %v13053_v48 = vld [vmem:[%s14199_s17 + $0x8d4] sm:$0xf] }
 0x2e8   : > { %7767 = vmatpush.bf16.msrb.mxu0 %v9447_v32  ;;  %v7536_v59 = vadd.f32 %v15830_v56, %v7523_v52  ;;  %v9807_v43 = vor.u32 %v13053_v48, %v9804_v2  ;;  %v13035_v56 = vld [vmem:[%s14199_s17 + $0x844] sm:$0xf]  ;;  %v9732_v32 = vld [vmem:[%s14199_s17 + $0x848] sm:$0xf0]  ;;  %v9919_v2 = vor.u32 %v13081_v6, %v9916_v0 }
 0x2e9   : > { %7780 = vmatpush.bf16.msrb.mxu1 %v9511_v42  ;;  %v7561_v42 = vpop.f32.mrf.mxu0  ;;  %v9735_v22 = vor.u32 %v13035_v56, %v9732_v32  ;;  %v9780_v48 = vld [vmem:[%s14199_s17 + $0x8a8] sm:$0xf0]  ;;  %v13029_v32 = vld [vmem:[%s14199_s17 + $0x814] sm:$0xf]  ;;  %v13059_v6 = vld [vmem:[%s14199_s17 + $0x904] sm:$0xf] }
 0x2ea   : > { %7793 = vmatpush.bf16.msrb.mxu2 %v9575_v63  ;;  %v7549_v30 = vadd.f32 %v15837_v57, %v7536_v59  ;;  %v13083_v63 = vld [vmem:[%s14199_s17 + $0x9c4] sm:$0xf]  ;;  %v13049_v57 = vld [vmem:[%s14199_s17 + $0x8b4] sm:$0xf]  ;;  %v9844_v59 = vld [vmem:[%s14199_s17 + $0x928] sm:$0xf0] }
 0x2eb   : > { %7806 = vmatpush.bf16.msrb.mxu3 %v9639_v60  ;;  %7768 = vmatmul.bf16.vlgmr.msrb.gmra.mxu0 %v14546_v23  ;;  %v9743_v23 = vor.u32 %v13037_v40, %v9740_v18  ;;  %v7574_v60 = vpop.f32.mrf.mxu1  ;;  %v9927_v1 = vor.u32 %v13083_v63, %v9924_v44  ;;  %v9791_v52 = vor.u32 %v13049_v57, %v9788_v54  ;;  %v13047_v18 = vld [vmem:[%s14199_s17 + $0x8a4] sm:$0xf]  ;;  %v13061_v44 = vld [vmem:[%s14199_s17 + $0x914] sm:$0xf] }
 0x2ec   : > { %7812 = vmatpush.bf16.msra.mxu0 %v9759_v61  ;;  %7781 = vmatmul.bf16.vlgmr.msrb.gmra.mxu1 %v14553_v31  ;;  %v9935_v31 = vor.u32 %v13085_v19, %v9932_v50  ;;  %v7562_v61 = vadd.f32 %v7561_v42, %v7549_v30  ;;  %v9772_v30 = vld [vmem:[%s14199_s17 + $0x898] sm:$0xf0]  ;;  %v8452_v42 = vsub.f32 1.0, %v8451_v20  ;;  %v13043_v57 = vld [vmem:[%s14199_s17 + $0x884] sm:$0xf] }
 0x2ed   : > { %7825 = vmatpush.bf16.msra.mxu1 %v9823_v27  ;;  %7794 = vmatmul.bf16.vlgmr.msrb.gmra.mxu2 %v14551_v28  ;;  %v13051_v28 = vld [vmem:[%s14199_s17 + $0x8c4] sm:$0xf] }
 0x2ee   : > { %7838 = vmatpush.bf16.msra.mxu2 %v9887_v55  ;;  %7807 = vmatmul.bf16.vlgmr.msrb.gmra.mxu3 %v14557_v35  ;;  %v13067_v35 = vld [vmem:[%s14199_s17 + $0x944] sm:$0xf]  ;;  %v9799_v26 = vor.u32 %v13051_v28, %v9796_v15  ;;  %v13033_v55 = vld [vmem:[%s14199_s17 + $0x834] sm:$0xf]  ;;  %v7575_v40 = vadd.f32 %v7574_v60, %v7562_v61  ;;  %v9847_v15 = vor.u32 %v13063_v58, %v9844_v59  ;;  %v10076_v58 = vld [vmem:[%s14199_s17 + $0xaf8] sm:$0xf0] }
 0x2ef   : > { %7851 = vmatpush.bf16.msra.mxu3 %v9951_v62  ;;  %v9863_v27 = vor.u32 %v13067_v35, %v9860_v29  ;;  %v13065_v62 = vld [vmem:[%s14199_s17 + $0x934] sm:$0xf]  ;;  %v9727_v9 = vor.u32 %v13033_v55, %v9724_v38  ;;  %v9708_v35 = vld [vmem:[%s14199_s17 + $0x818] sm:$0xf0]  ;;  %v13027_v55 = vld [vmem:[%s14199_s17 + $0x804] sm:$0xf]  ;;  %v8453_v0 = vmul.f32 %v15906_v14, %v8452_v42 }
 0x2f0   : > { %7813 = vmatpush.bf16.msra.mxu0 %v9751_v33  ;;  %v13031_v33 = vld [vmem:[%s14199_s17 + $0x824] sm:$0xf]  ;;  %v13045_v29 = vld [vmem:[%s14199_s17 + $0x894] sm:$0xf]  ;;  %v9700_v38 = vld [vmem:[%s14199_s17 + $0x808] sm:$0xf0] }
 0x2f1   : > { %7826 = vmatpush.bf16.msra.mxu1 %v9815_v3  ;;  %v9855_v3 = vor.u32 %v13065_v62, %v9852_v21  ;;  %v7600_v50 = vpop.f32.mrf.mxu3  ;;  %v13077_v61 = vld [vmem:[%s14199_s17 + $0x994] sm:$0xf]  ;;  %v9775_v54 = vor.u32 %v13045_v29, %v9772_v30  ;;  %v9764_v21 = vld [vmem:[%s14199_s17 + $0x888] sm:$0xf0]  ;;  %v9703_v20 = vor.u32 %v13027_v55, %v9700_v38  ;;  %v13103_v29 = vld [vmem:[%s14199_s17 + $0xa64] sm:$0xf] }
 0x2f2   : > { %7839 = vmatpush.bf16.msra.mxu2 %v9879_v8  ;;  %v9716_v8 = vld [vmem:[%s14199_s17 + $0x828] sm:$0xf0]  ;;  %v13137_v59 = vld [vmem:[%s14199_s17 + $0xb74] sm:$0xf]  ;;  %v13119_v42 = vld [vmem:[%s14199_s17 + $0xae4] sm:$0xf] }
 0x2f3   : > { %7852 = vmatpush.bf16.msra.mxu3 %v9943_v39  ;;  %v7587_v39 = vpop.f32.mrf.mxu2  ;;  %v9719_v56 = vor.u32 %v13031_v33, %v9716_v8  ;;  %v7576_v28 = vpop.f32.mrf.mxu1  ;;  %v9828_v33 = vld [vmem:[%s14199_s17 + $0x908] sm:$0xf0] }
 0x2f4   : > { %7814 = vmatpush.bf16.msra.mxu0 %v9743_v23  ;;  %v7588_v19 = vadd.f32 %v7587_v39, %v7575_v40  ;;  %v13079_v23 = vld [vmem:[%s14199_s17 + $0x9a4] sm:$0xf]  ;;  %v10004_v30 = vld [vmem:[%s14199_s17 + $0xa68] sm:$0xf0] }
 0x2f5   : > { %7827 = vmatpush.bf16.msra.mxu1 %v9807_v43  ;;  %v9908_v43 = vld [vmem:[%s14199_s17 + $0x9a8] sm:$0xf0]  ;;  %v13075_v40 = vld [vmem:[%s14199_s17 + $0x984] sm:$0xf] }
 0x2f6   : > { %7840 = vmatpush.bf16.msra.mxu2 %v9871_v25  ;;  %v7563_v25 = vpop.f32.mrf.mxu0  ;;  %v7601_v41 = vadd.f32 %v7600_v50, %v7588_v19  ;;  %v9911_v63 = vor.u32 %v13079_v23, %v9908_v43  ;;  %v10140_v19 = vld [vmem:[%s14199_s17 + $0xb78] sm:$0xf0]  ;;  %v9767_v23 = vor.u32 %v13043_v57, %v9764_v21  ;;  %v9831_v43 = vor.u32 %v13059_v6, %v9828_v33  ;;  %v10196_v55 = vld [vmem:[%s14199_s17 + $0xbe8] sm:$0xf0]  ;;  %v13101_v21 = vld [vmem:[%s14199_s17 + $0xa54] sm:$0xf] }
 0x2f7   : > { %7853 = vmatpush.bf16.msra.mxu3 %v9935_v31  ;;  %v9783_v31 = vor.u32 %v13047_v18, %v9780_v48  ;;  %v13105_v18 = vld [vmem:[%s14199_s17 + $0xa74] sm:$0xf]  ;;  %v10012_v48 = vld [vmem:[%s14199_s17 + $0xa78] sm:$0xf0]  ;;  %v10007_v57 = vor.u32 %v13103_v29, %v10004_v30 }
 0x2f8   : > { %7815 = vmatpush.bf16.msra.mxu0 %v9735_v22  ;;  %v9836_v22 = vld [vmem:[%s14199_s17 + $0x918] sm:$0xf0]  ;;  %v15925_v60 = vmax.f32 %v7601_v41, 0.0  ;;  %v13153_v25 = vld [vmem:[%s14199_s17 + $0xbf4] sm:$0xf]  ;;  %v10015_v41 = vor.u32 %v13105_v18, %v10012_v48 }
 0x2f9   : > { %7828 = vmatpush.bf16.msra.mxu1 %v9799_v26  ;;  %v9900_v26 = vld [vmem:[%s14199_s17 + $0x998] sm:$0xf0]  ;;  %v9839_v62 = vor.u32 %v13061_v44, %v9836_v22  ;;  %v7602_v39 = vpop.f32.mrf.mxu3  ;;  %v10068_v44 = vld [vmem:[%s14199_s17 + $0xae8] sm:$0xf0]  ;;  %v13135_v22 = vld [vmem:[%s14199_s17 + $0xb64] sm:$0xf] }
 0x2fa   : > { %7841 = vmatpush.bf16.msra.mxu2 %v9863_v27  ;;  %v9711_v27 = vor.u32 %v13029_v32, %v9708_v35  ;;  %v8454_v32 = vadd.f32 %v15906_v14, %v8453_v0  ;;  %v10143_v35 = vor.u32 %v13137_v59, %v10140_v19  ;;  %v9996_v6 = vld [vmem:[%s14199_s17 + $0xa58] sm:$0xf0]  ;;  %v13117_v0 = vld [vmem:[%s14199_s17 + $0xad4] sm:$0xf]  ;;  %v13099_v48 = vld [vmem:[%s14199_s17 + $0xa44] sm:$0xf] }
 0x2fb   : > { %7854 = vmatpush.bf16.msra.mxu3 %v9927_v1  ;;  %v8438_v1 = vrot.slane %v15925_v60, 4  ;;  %v13133_v33 = vld [vmem:[%s14199_s17 + $0xb54] sm:$0xf]  ;;  %v13115_v39 = vld [vmem:[%s14199_s17 + $0xac4] sm:$0xf] }
 0x2fc   : > { %7816 = vmatpush.bf16.msra.mxu0 %v9727_v9  ;;  %v9903_v9 = vor.u32 %v13077_v61, %v9900_v26  ;;  %v10132_v61 = vld [vmem:[%s14199_s17 + $0xb68] sm:$0xf0]  ;;  %v15961_v38 = vsel %vm8455_vm0, %v15906_v14, %v8454_v32  ;;  %v13147_v19 = vld [vmem:[%s14199_s17 + $0xbc4] sm:$0xf]  ;;  %v13129_v30 = vld [vmem:[%s14199_s17 + $0xb34] sm:$0xf] }
 0x2fd   : > { %7829 = vmatpush.bf16.msra.mxu1 %v9791_v52  ;;  %v9892_v52 = vld [vmem:[%s14199_s17 + $0x988] sm:$0xf0]  ;;  %v8439_v8 = vadd.f32 %v8438_v1, %v15925_v60 }
 0x2fe   : > { %7842 = vmatpush.bf16.msra.mxu2 %v9855_v3  ;;  %v7589_v3 = vpop.f32.mrf.mxu2  ;;  %v9895_v28 = vor.u32 %v13075_v40, %v9892_v52  ;;  %v10124_v40 = vld [vmem:[%s14199_s17 + $0xb58] sm:$0xf0]  ;;  %v10116_v59 = vld [vmem:[%s14199_s17 + $0xb48] sm:$0xf0] }
 0x2ff   : > { %7855 = vmatpush.bf16.msra.mxu3 %v9919_v2  ;;  %v13121_v2 = vld [vmem:[%s14199_s17 + $0xaf4] sm:$0xf]  ;;  %v8440_v50 = vrot.slane %v8439_v8, 2 }
 0x300   : > { %7817 = vmatpush.bf16.msra.mxu0 %v9719_v56  ;;  %v10204_v56 = vld [vmem:[%s14199_s17 + $0xbf8] sm:$0xf0]  ;;  %v13149_v3 = vld [vmem:[%s14199_s17 + $0xbd4] sm:$0xf] }
 0x301   : > { %7830 = vmatpush.bf16.msra.mxu1 %v9783_v31  ;;  %v8441_v31 = vadd.f32 %v8440_v50, %v8439_v8  ;;  %v10188_v8 = vld [vmem:[%s14199_s17 + $0xbd8] sm:$0xf0]  ;;  %v10180_v50 = vld [vmem:[%s14199_s17 + $0xbc8] sm:$0xf0] }
 0x302   : > { %7843 = vmatpush.bf16.msra.mxu2 %v9847_v15  ;;  %v10079_v15 = vor.u32 %v13121_v2, %v10076_v58  ;;  %v9988_v2 = vld [vmem:[%s14199_s17 + $0xa48] sm:$0xf0]  ;;  %v10183_v29 = vor.u32 %v13147_v19, %v10180_v50 }
 0x303   : > { %7856 = vmatpush.bf16.msra.mxu3 %v9911_v63  ;;  %v10207_v63 = vor.u32 %v13153_v25, %v10204_v56  ;;  %v8442_v26 = vrot.slane %v8441_v31, 1  ;;  %v10052_v58 = vld [vmem:[%s14199_s17 + $0xac8] sm:$0xf0]  ;;  %v9980_v25 = vld [vmem:[%s14199_s17 + $0xa38] sm:$0xf0] }
 0x304   : > { %7818 = vmatpush.bf16.msra.mxu0 %v9711_v27  ;;  %v13151_v27 = vld [vmem:[%s14199_s17 + $0xbe4] sm:$0xf] }
 0x305   : > { %7831 = vmatpush.bf16.msra.mxu1 %v9775_v54  ;;  %v8443_v1 = vadd.f32 %v8442_v26, %v8441_v31  ;;  %v10071_v54 = vor.u32 %v13119_v42, %v10068_v44  ;;  %v10199_v14 = vor.u32 %v13151_v27, %v10196_v55  ;;  %v13113_v31 = vld [vmem:[%s14199_s17 + $0xab4] sm:$0xf]  ;;  %v10108_v42 = vld [vmem:[%s14199_s17 + $0xb38] sm:$0xf0]  ;;  %v13095_v55 = vld [vmem:[%s14199_s17 + $0xa24] sm:$0xf] }
 0x306   : > { %7844 = vmatpush.bf16.msra.mxu2 %v9839_v62  ;;  %v10135_v62 = vor.u32 %v13135_v22, %v10132_v61  ;;  %v13145_v61 = vld [vmem:[%s14199_s17 + $0xbb4] sm:$0xf]  ;;  %v10172_v26 = vld [vmem:[%s14199_s17 + $0xbb8] sm:$0xf0] }
 0x307   : > { %7857 = vmatpush.bf16.msra.mxu3 %v9903_v9  ;;  %v10060_v9 = vld [vmem:[%s14199_s17 + $0xad8] sm:$0xf0]  ;;  %v8457_v52 = vmul.f32 %v15961_v38, %v8443_v1 }
 0x308   : > { %7819 = vmatpush.bf16.msra.mxu0 %v9703_v20  ;;  %v10191_v20 = vor.u32 %v13149_v3, %v10188_v8  ;;  %v7613_v56 = vpop.f32.mrf.mxu0 }
 0x309   : > { %7832 = vmatpush.bf16.msra.mxu1 %v9767_v23  ;;  %v15977_v18 = vsub.f32 %v15925_v60, %v8457_v52  ;;  %v9991_v23 = vor.u32 %v13099_v48, %v9988_v2  ;;  %v13093_v48 = vld [vmem:[%s14199_s17 + $0xa14] sm:$0xf] }
 0x30a   : > { %7845 = vmatpush.bf16.msra.mxu2 %v9831_v43  ;;  %v13097_v43 = vld [vmem:[%s14199_s17 + $0xa34] sm:$0xf] }
 0x30b   : > { %7858 = vmatpush.bf16.msra.mxu3 %v9895_v28  ;;  %7820 = vmatmul.bf16.vlgmr.msra.gmra.mxu0 %v14628_v37  ;;  %v9999_v37 = vor.u32 %v13101_v21, %v9996_v6  ;;  %v8461_v60 = vmul.f32 %v15977_v18, %v15977_v18  ;;  %v10055_v28 = vor.u32 %v13115_v39, %v10052_v58  ;;  %v9972_v21 = vld [vmem:[%s14199_s17 + $0xa28] sm:$0xf0]  ;;  %v13111_v6 = vld [vmem:[%s14199_s17 + $0xaa4] sm:$0xf] }
 0x30c   : > { %7864 = vmatpush.bf16.msrb.mxu0 %v10015_v41  ;;  %7833 = vmatmul.bf16.vlgmr.msra.gmra.mxu1 %v14635_v46  ;;  %v10127_v46 = vor.u32 %v13133_v33, %v10124_v40  ;;  %v9983_v27 = vor.u32 %v13097_v43, %v9980_v25  ;;  %v13127_v33 = vld [vmem:[%s14199_s17 + $0xb24] sm:$0xf]  ;;  %v10100_v40 = vld [vmem:[%s14199_s17 + $0xb28] sm:$0xf0]  ;;  %v13125_v43 = vld [vmem:[%s14199_s17 + $0xb14] sm:$0xf] }
 0x30d   : > { %7877 = vmatpush.bf16.msrb.mxu1 %v10079_v15  ;;  %7846 = vmatmul.bf16.vlgmr.msra.gmra.mxu2 %v14633_v45  ;;  %v10063_v45 = vor.u32 %v13117_v0, %v10060_v9  ;;  %v8463_v32 = vrot.slane %v8461_v60, 4  ;;  %v10044_v15 = vld [vmem:[%s14199_s17 + $0xab8] sm:$0xf0]  ;;  %v10036_v9 = vld [vmem:[%s14199_s17 + $0xaa8] sm:$0xf0] }
 0x30e   : > { %7890 = vmatpush.bf16.msrb.mxu2 %v10143_v35  ;;  %7859 = vmatmul.bf16.vlgmr.msra.gmra.mxu3 %v14639_v49  ;;  %v13131_v49 = vld [vmem:[%s14199_s17 + $0xb44] sm:$0xf]  ;;  %v7626_v35 = vpop.f32.mrf.mxu1  ;;  %v10039_v58 = vor.u32 %v13111_v6, %v10036_v9  ;;  %v10092_v25 = vld [vmem:[%s14199_s17 + $0xb18] sm:$0xf0]  ;;  %v13185_v6 = vld [vmem:[%s14199_s17 + $0xcf4] sm:$0xf] }
 0x30f   : > { %7903 = vmatpush.bf16.msrb.mxu3 %v10207_v63  ;;  %v10119_v41 = vor.u32 %v13131_v49, %v10116_v59  ;;  %v13859_v63 = vld [vmem:[%s293_s25] sm:$0x3]  ;;  %v8464_v22 = vadd.f32 %v8463_v32, %v8461_v60  ;;  %v10103_v49 = vor.u32 %v13127_v33, %v10100_v40  ;;  %v9964_v59 = vld [vmem:[%s14199_s17 + $0xa18] sm:$0xf0]  ;;  %v13109_v60 = vld [vmem:[%s14199_s17 + $0xa94] sm:$0xf] }
 0x310   : > { %7865 = vmatpush.bf16.msrb.mxu0 %v10007_v57  ;;  %v1425_v44 = vperm.slane %v13859_v63, 1  ;;  %v7639_v0 = vpop.f32.mrf.mxu2  ;;  %v7615_v39 = vpop.f32.mrf.mxu0  ;;  %v10095_v63 = vor.u32 %v13125_v43, %v10092_v25  ;;  %v13201_v9 = vld [vmem:[%s14199_s17 + $0xd74] sm:$0xf]  ;;  %v10396_v33 = vld [vmem:[%s14199_s17 + $0xd78] sm:$0xf0]  ;;  %s8670_s25 = sshll.u32 %s14079_s22, 1 }
 0x311   : > { %7878 = vmatpush.bf16.msrb.mxu1 %v10071_v54  ;;  %v8465_v1 = vrot.slane %v8464_v22, 2  ;;  %v10047_v54 = vor.u32 %v13113_v31, %v10044_v15  ;;  %v7652_v3 = vpop.f32.mrf.mxu3  ;;  %v9967_v31 = vor.u32 %v13093_v48, %v9964_v59  ;;  %v13091_v15 = vld [vmem:[%s14199_s17 + $0xa04] sm:$0xf]  ;;  %v10399_v48 = vor.u32 %v13201_v9, %v10396_v33  ;;  %v10260_v39 = vld [vmem:[%s14199_s17 + $0xc68] sm:$0xf0]  ;;  %p16063_p7 = scmp.lt.s32.totalorder %s8670_s25, 7 }
 0x312   : > { %7891 = vmatpush.bf16.msrb.mxu2 %v10135_v62  ;;  %v7614_v57 = vadd.f32 %v7613_v56, %v1425_v44  ;;  %v10111_v62 = vor.u32 %v13129_v30, %v10108_v42  ;;  %v10020_v44 = vld [vmem:[%s14199_s17 + $0xa88] sm:$0xf0]  ;;  %v13199_v59 = vld [vmem:[%s14199_s17 + $0xd64] sm:$0xf]  ;;  %v8509_v9 = vld [vmem:[%s313_s1] sm:$0x3] }
 0x313   : > { %7904 = vmatpush.bf16.msrb.mxu3 %v10199_v14  ;;  %v10175_v14 = vor.u32 %v13145_v61, %v10172_v26  ;;  %v8466_v8 = vadd.f32 %v8465_v1, %v8464_v22  ;;  %v13123_v22 = vld [vmem:[%s14199_s17 + $0xb04] sm:$0xf]  ;;  %v10084_v61 = vld [vmem:[%s14199_s17 + $0xb08] sm:$0xf0]  ;;  %v13169_v1 = vld [vmem:[%s14199_s17 + $0xc74] sm:$0xf] }
 0x314   : > { %7866 = vmatpush.bf16.msrb.mxu0 %v9999_v37  ;;  %v7627_v52 = vadd.f32 %v7626_v35, %v7614_v57  ;;  %v13143_v37 = vld [vmem:[%s14199_s17 + $0xba4] sm:$0xf]  ;;  %v9956_v35 = vld [vmem:[%s14199_s17 + $0xa08] sm:$0xf0]  ;;  %s16905_s25 = smov (!%p16063_p7, %s8670_s25), 7 }
 0x315   : > { %7879 = vmatpush.bf16.msrb.mxu1 %v10063_v45  ;;  %v10164_v45 = vld [vmem:[%s14199_s17 + $0xba8] sm:$0xf0]  ;;  %s8671_s22 = sshll.u32 %s16905_s25, 3 }
 0x316   : > { %7892 = vmatpush.bf16.msrb.mxu2 %v10127_v46  ;;  %v9975_v46 = vor.u32 %v13095_v55, %v9972_v21  ;;  %v7640_v2 = vadd.f32 %v7639_v0, %v7627_v52  ;;  %v7628_v19 = vpop.f32.mrf.mxu1  ;;  %v10167_v50 = vor.u32 %v13143_v37, %v10164_v45  ;;  %v13139_v55 = vld [vmem:[%s14199_s17 + $0xb84] sm:$0xf]  ;;  %v10148_v57 = vld [vmem:[%s14199_s17 + $0xb88] sm:$0xf0]  ;;  %v10268_v21 = vld [vmem:[%s14199_s17 + $0xc78] sm:$0xf0]  ;;  %v9959_v0 = vor.u32 %v13091_v15, %v9956_v35  ;;  %s16115_s6 = scalar_lea.vmem %s16802_s5, %s8671_s22 }
 0x317   : > { %7905 = vmatpush.bf16.msrb.mxu3 %v10191_v20  ;;  %v8467_v20 = vrot.slane %v8466_v8, 1  ;;  %v10087_v52 = vor.u32 %v13123_v22, %v10084_v61  ;;  %v10151_v37 = vor.u32 %v13139_v55, %v10148_v57  ;;  %v10271_v45 = vor.u32 %v13169_v1, %v10268_v21  ;;  %v13215_v19 = vld [vmem:[%s14199_s17 + $0xde4] sm:$0xf]  ;;  %v10308_v55 = vld [vmem:[%s14199_s17 + $0xcc8] sm:$0xf0] }
 0x318   : > { %7867 = vmatpush.bf16.msrb.mxu0 %v9991_v23  ;;  %v10028_v23 = vld [vmem:[%s14199_s17 + $0xa98] sm:$0xf0]  ;;  %v16013_v56 = vadd.f32 %v7652_v3, %v7640_v2  ;;  %v7641_v26 = vpop.f32.mrf.mxu2  ;;  %v13217_v3 = vld [vmem:[%s14199_s17 + $0xdf4] sm:$0xf]  ;;  %v13167_v2 = vld [vmem:[%s14199_s17 + $0xc64] sm:$0xf] }
 0x319   : > { %7880 = vmatpush.bf16.msrb.mxu1 %v10055_v28  ;;  %v8468_v32 = vadd.f32 %v8467_v20, %v8466_v8  ;;  %v13141_v28 = vld [vmem:[%s14199_s17 + $0xb94] sm:$0xf]  ;;  %v10031_v42 = vor.u32 %v13109_v60, %v10028_v23  ;;  %v10460_v8 = vld [vmem:[%s14199_s17 + $0xdf8] sm:$0xf0]  ;;  %v13183_v20 = vld [vmem:[%s14199_s17 + $0xce4] sm:$0xf]  ;;  %v10263_v23 = vor.u32 %v13167_v2, %v10260_v39 }
 0x31a   : > { %7893 = vmatpush.bf16.msrb.mxu2 %v10119_v41  ;;  %v10156_v41 = vld [vmem:[%s14199_s17 + $0xb98] sm:$0xf0]  ;;  %v10388_v60 = vld [vmem:[%s14199_s17 + $0xd68] sm:$0xf0]  ;;  %v13211_v21 = vld [vmem:[%s14199_s17 + $0xdc4] sm:$0xf] }
 0x31b   : > { %7906 = vmatpush.bf16.msrb.mxu3 %v10183_v29  ;;  %v13107_v29 = vld [vmem:[%s14199_s17 + $0xa84] sm:$0xf]  ;;  %v8475_v30 = vmul.f32 %v8468_v32, %v15961_v38  ;;  %v10391_v32 = vor.u32 %v13199_v59, %v10388_v60  ;;  %v10244_v26 = vld [vmem:[%s14199_s17 + $0xc48] sm:$0xf0]  ;;  %v13209_v60 = vld [vmem:[%s14199_s17 + $0xdb4] sm:$0xf] }
 0x31c   : > { %7868 = vmatpush.bf16.msrb.mxu0 %v9983_v27  ;;  %v10159_v27 = vor.u32 %v13141_v28, %v10156_v41  ;;  %v10023_v40 = vor.u32 %v13107_v29, %v10020_v44  ;;  %v13165_v28 = vld [vmem:[%s14199_s17 + $0xc54] sm:$0xf]  ;;  %v10252_v41 = vld [vmem:[%s14199_s17 + $0xc58] sm:$0xf0] }
 0x31d   : > { %7881 = vmatpush.bf16.msrb.mxu1 %v10047_v54  ;;  %v7654_v54 = vpop.f32.mrf.mxu3  ;;  %v10316_v29 = vld [vmem:[%s14199_s17 + $0xcd8] sm:$0xf0] }
 0x31e   : > { %7894 = vmatpush.bf16.msrb.mxu2 %v10111_v62  ;;  %v16027_v62 = vadd.f32 1e-05, %v8475_v30  ;;  %v13197_v30 = vld [vmem:[%s14199_s17 + $0xd54] sm:$0xf]  ;;  %v10444_v44 = vld [vmem:[%s14199_s17 + $0xdd8] sm:$0xf0] }
 0x31f   : > { %7907 = vmatpush.bf16.msrb.mxu3 %v10175_v14  ;;  %v10332_v14 = vld [vmem:[%s14199_s17 + $0xcf8] sm:$0xf0]  ;;  %v10372_v54 = vld [vmem:[%s14199_s17 + $0xd48] sm:$0xf0] }
 0x320   : > { %7869 = vmatpush.bf16.msrb.mxu0 %v9975_v46  ;;  %13855 = vrsqrt.f32 %v16027_v62  ;;  %v10335_v46 = vor.u32 %v13185_v6, %v10332_v14  ;;  %v10436_v6 = vld [vmem:[%s14199_s17 + $0xdc8] sm:$0xf0]  ;;  %v8501_v14 = vld [vmem:[%s303_s26] sm:$0x3]  ;;  %vm8485_vm2 = vweird.f32 %v16027_v62 }
 0x321   : > { %7882 = vmatpush.bf16.msrb.mxu1 %v10039_v58  ;;  %v10463_v58 = vor.u32 %v13217_v3, %v10460_v8  ;;  %v13161_v8 = vld [vmem:[%s14199_s17 + $0xc34] sm:$0xf]  ;;  %v10439_v39 = vor.u32 %v13211_v21, %v10436_v6  ;;  %v8503_v59 = vperm.slane %v8501_v14, 0  ;;  %v10284_v6 = vld [vmem:[%s14199_s17 + $0xc98] sm:$0xf0] }
 0x322   : > { %7895 = vmatpush.bf16.msrb.mxu2 %v10103_v49  ;;  %v10324_v49 = vld [vmem:[%s14199_s17 + $0xce8] sm:$0xf0]  ;;  %v10348_v14 = vld [vmem:[%s14199_s17 + $0xd18] sm:$0xf0] }
 0x323   : > { %7908 = vmatpush.bf16.msrb.mxu3 %v10167_v50  ;;  %v10452_v50 = vld [vmem:[%s14199_s17 + $0xde8] sm:$0xf0]  ;;  %v10327_v25 = vor.u32 %v13183_v20, %v10324_v49  ;;  %v10300_v20 = vld [vmem:[%s14199_s17 + $0xcb8] sm:$0xf0] }
 0x324   : > { %7870 = vmatpush.bf16.msrb.mxu0 %v9967_v31  ;;  %v13181_v31 = vld [vmem:[%s14199_s17 + $0xcd4] sm:$0xf]  ;;  %v10455_v35 = vor.u32 %v13215_v19, %v10452_v50  ;;  %v10364_v49 = vld [vmem:[%s14199_s17 + $0xd38] sm:$0xf0] }
 0x325   : > { %7883 = vmatpush.bf16.msrb.mxu1 %v10031_v42  ;;  %v10380_v42 = vld [vmem:[%s14199_s17 + $0xd58] sm:$0xf0]  ;;  %v10319_v22 = vor.u32 %v13181_v31, %v10316_v29  ;;  %v10228_v31 = vld [vmem:[%s14199_s17 + $0xc28] sm:$0xf0] }
 0x326   : > { %7896 = vmatpush.bf16.msrb.mxu2 %v10095_v63  ;;  %v16046_v43 = vpop.eup %13855  ;;  %v13213_v63 = vld [vmem:[%s14199_s17 + $0xdd4] sm:$0xf]  ;;  %v10383_v61 = vor.u32 %v13197_v30, %v10380_v42  ;;  %v10428_v19 = vld [vmem:[%s14199_s17 + $0xdb8] sm:$0xf0]  ;;  %v13191_v30 = vld [vmem:[%s14199_s17 + $0xd24] sm:$0xf] }
 0x327   : > { %7909 = vmatpush.bf16.msrb.mxu3 %v10159_v27  ;;  %v8480_v15 = vmul.f32 %v16046_v43, %v16027_v62  ;;  %v13179_v27 = vld [vmem:[%s14199_s17 + $0xcc4] sm:$0xf]  ;;  %v10447_v1 = vor.u32 %v13213_v63, %v10444_v44  ;;  %vm8486_vm1 = vweird.f32 %v16046_v43  ;;  %v8511_v62 = vperm.slane %v8509_v9, 0  ;;  %v10356_v42 = vld [vmem:[%s14199_s17 + $0xd28] sm:$0xf0] }
 0x328   : > { %7871 = vmatpush.bf16.msrb.mxu0 %v9959_v0  ;;  %vm8487_vm3 = vmor %vm8485_vm2, %vm8486_vm1  ;;  %v10431_v29 = vor.u32 %v13209_v60, %v10428_v19  ;;  %v13205_v9 = vld [vmem:[%s14199_s17 + $0xd94] sm:$0xf]  ;;  %v10524_v19 = vld [vmem:[%s14199_s17 + $0xe78] sm:$0xf0] }
 0x329   : > { %7884 = vmatpush.bf16.msrb.mxu1 %v10023_v40  ;;  %v7665_v40 = vpop.f32.mrf.mxu0  ;;  %v13233_v60 = vld [vmem:[%s14199_s17 + $0xe74] sm:$0xf] }
 0x32a   : > { %7897 = vmatpush.bf16.msrb.mxu2 %v10087_v52  ;;  %v10311_v52 = vor.u32 %v13179_v27, %v10308_v55  ;;  %v10359_v55 = vor.u32 %v13191_v30, %v10356_v42  ;;  %v13231_v30 = vld [vmem:[%s14199_s17 + $0xe64] sm:$0xf]  ;;  %v10516_v42 = vld [vmem:[%s14199_s17 + $0xe68] sm:$0xf0] }
 0x32b   : > { %7910 = vmatpush.bf16.msrb.mxu3 %v10151_v37  ;;  %7872 = vmatmul.bf16.vlgmr.msrb.gmra.mxu0 %v14714_v7  ;;  %v8481_v7 = vmul.f32 %v16046_v43, %v8480_v15  ;;  %v10236_v37 = vld [vmem:[%s14199_s17 + $0xc38] sm:$0xf0]  ;;  %v13175_v15 = vld [vmem:[%s14199_s17 + $0xca4] sm:$0xf] }
 0x32c   : > { %7916 = vmatpush.bf16.msra.mxu0 %v10271_v45  ;;  %7885 = vmatmul.bf16.vlgmr.msrb.gmra.mxu1 %v14721_v12  ;;  %v13163_v12 = vld [vmem:[%s14199_s17 + $0xc44] sm:$0xf]  ;;  %v13177_v45 = vld [vmem:[%s14199_s17 + $0xcb4] sm:$0xf] }
 0x32d   : > { %7929 = vmatpush.bf16.msra.mxu1 %v10335_v46  ;;  %7898 = vmatmul.bf16.vlgmr.msrb.gmra.mxu2 %v14719_v11  ;;  %v10255_v11 = vor.u32 %v13165_v28, %v10252_v41  ;;  %v8482_v57 = vmul.f32 0.5, %v8481_v7  ;;  %v10247_v33 = vor.u32 %v13163_v12, %v10244_v26  ;;  %v7666_v46 = vadd.f32 %v7665_v40, %v16013_v56  ;;  %v13159_v41 = vld [vmem:[%s14199_s17 + $0xc24] sm:$0xf] }
 0x32e   : > { %7942 = vmatpush.bf16.msra.mxu2 %v10399_v48  ;;  %7911 = vmatmul.bf16.vlgmr.msrb.gmra.mxu3 %v14725_v16  ;;  %v13195_v16 = vld [vmem:[%s14199_s17 + $0xd44] sm:$0xf]  ;;  %v7678_v48 = vpop.f32.mrf.mxu1  ;;  %v10231_v12 = vor.u32 %v13159_v41, %v10228_v31  ;;  %v13281_v41 = vld [vmem:[%s14199_s17 + $0xff4] sm:$0xf]  ;;  %v10716_v31 = vld [vmem:[%s14199_s17 + $0xff8] sm:$0xf0] }
 0x32f   : > { %7955 = vmatpush.bf16.msra.mxu3 %v10463_v58  ;;  %v8483_v0 = vsub.f32 1.5, %v8482_v57  ;;  %v10375_v3 = vor.u32 %v13195_v16, %v10372_v54  ;;  %v13193_v58 = vld [vmem:[%s14199_s17 + $0xd34] sm:$0xf]  ;;  %v7679_v56 = vadd.f32 %v7678_v48, %v7666_v46  ;;  %v13207_v7 = vld [vmem:[%s14199_s17 + $0xda4] sm:$0xf] }
 0x330   : > { %7917 = vmatpush.bf16.msra.mxu0 %v10263_v23  ;;  %v10239_v23 = vor.u32 %v13161_v8, %v10236_v37  ;;  %v10367_v28 = vor.u32 %v13193_v58, %v10364_v49  ;;  %v13157_v57 = vld [vmem:[%s14199_s17 + $0xc14] sm:$0xf]  ;;  %v10276_v46 = vld [vmem:[%s14199_s17 + $0xc88] sm:$0xf0]  ;;  %v13187_v48 = vld [vmem:[%s14199_s17 + $0xd04] sm:$0xf] }
 0x331   : > { %7930 = vmatpush.bf16.msra.mxu1 %v10327_v25  ;;  %v8484_v2 = vmul.f32 %v16046_v43, %v8483_v0  ;;  %v7704_v44 = vpop.f32.mrf.mxu3  ;;  %v13173_v16 = vld [vmem:[%s14199_s17 + $0xc94] sm:$0xf]  ;;  %v13203_v58 = vld [vmem:[%s14199_s17 + $0xd84] sm:$0xf]  ;;  %v10404_v49 = vld [vmem:[%s14199_s17 + $0xd88] sm:$0xf0] }
 0x332   : > { %7943 = vmatpush.bf16.msra.mxu2 %v10391_v32  ;;  %v10303_v32 = vor.u32 %v13177_v45, %v10300_v20  ;;  %v13189_v0 = vld [vmem:[%s14199_s17 + $0xd14] sm:$0xf]  ;;  %v10287_v8 = vor.u32 %v13173_v16, %v10284_v6  ;;  %v13171_v45 = vld [vmem:[%s14199_s17 + $0xc84] sm:$0xf]  ;;  %v10340_v20 = vld [vmem:[%s14199_s17 + $0xd08] sm:$0xf0] }
 0x333   : > { %7956 = vmatpush.bf16.msra.mxu3 %v10455_v35  ;;  %v8488_v50 = vsel %vm8487_vm3, %v16046_v43, %v8484_v2  ;;  %v7691_v35 = vpop.f32.mrf.mxu2  ;;  %v10292_v43 = vld [vmem:[%s14199_s17 + $0xca8] sm:$0xf0]  ;;  %v10351_v37 = vor.u32 %v13189_v0, %v10348_v14  ;;  %v13245_v16 = vld [vmem:[%s14199_s17 + $0xed4] sm:$0xf]  ;;  %v10636_v0 = vld [vmem:[%s14199_s17 + $0xf58] sm:$0xf0] }
 0x334   : > { %7918 = vmatpush.bf16.msra.mxu0 %v10255_v11  ;;  %v8499_v25 = vmul.f32 %v8488_v50, %v15977_v18  ;;  %v7692_v63 = vadd.f32 %v7691_v35, %v7679_v56  ;;  %v10420_v11 = vld [vmem:[%s14199_s17 + $0xda8] sm:$0xf0]  ;;  %v10295_v27 = vor.u32 %v13175_v15, %v10292_v43  ;;  %v13249_v56 = vld [vmem:[%s14199_s17 + $0xef4] sm:$0xf]  ;;  %v10407_v15 = vor.u32 %v13203_v58, %v10404_v49 }
 0x335   : > { %7931 = vmatpush.bf16.msra.mxu1 %v10319_v22  ;;  %v10423_v21 = vor.u32 %v13207_v7, %v10420_v11  ;;  %v10527_v35 = vor.u32 %v13233_v60, %v10524_v19  ;;  %v13263_v7 = vld [vmem:[%s14199_s17 + $0xf64] sm:$0xf]  ;;  %v10644_v11 = vld [vmem:[%s14199_s17 + $0xf68] sm:$0xf0]  ;;  %v13261_v6 = vld [vmem:[%s14199_s17 + $0xf54] sm:$0xf] }
 0x336   : > { %7944 = vmatpush.bf16.msra.mxu2 %v10383_v61  ;;  %v8507_v18 = vmul.f32 %v8503_v59, %v8499_v25  ;;  %v16117_v22 = vadd.f32 %v7704_v44, %v7692_v63  ;;  %v7667_v61 = vpop.f32.mrf.mxu0  ;;  %v7680_v54 = vpop.f32.mrf.mxu1  ;;  %v10652_v25 = vld [vmem:[%s14199_s17 + $0xf78] sm:$0xf0]  ;;  %v13247_v63 = vld [vmem:[%s14199_s17 + $0xee4] sm:$0xf]  ;;  %v10719_v44 = vor.u32 %v13281_v41, %v10716_v31  ;;  %v13277_v14 = vld [vmem:[%s14199_s17 + $0xfd4] sm:$0xf] }
 0x337   : > { %7957 = vmatpush.bf16.msra.mxu3 %v10447_v1  ;;  %v10220_v1 = vld [vmem:[%s14199_s17 + $0xc18] sm:$0xf0]  ;;  %v10708_v61 = vld [vmem:[%s14199_s17 + $0xfe8] sm:$0xf0]  ;;  %v13241_v19 = vld [vmem:[%s14199_s17 + $0xeb4] sm:$0xf] }
 0x338   : > { %7919 = vmatpush.bf16.msra.mxu0 %v10247_v33  ;;  %v8515_v26 = vadd.f32 %v8511_v62, %v8507_v18  ;;  %v10412_v33 = vld [vmem:[%s14199_s17 + $0xd98] sm:$0xf0]  ;;  %v10223_v40 = vor.u32 %v13157_v57, %v10220_v1  ;;  %v10580_v18 = vld [vmem:[%s14199_s17 + $0xee8] sm:$0xf0]  ;;  %v13229_v57 = vld [vmem:[%s14199_s17 + $0xe54] sm:$0xf] }
 0x339   : > { %7932 = vmatpush.bf16.msra.mxu1 %v10311_v52  ;;  %v13155_v52 = vld [vmem:[%s14199_s17 + $0xc04] sm:$0xf]  ;;  %v7706_v59 = vpop.f32.mrf.mxu3  ;;  %v10588_v62 = vld [vmem:[%s14199_s17 + $0xef8] sm:$0xf0] }
 0x33a   : > { %7945 = vmatpush.bf16.msra.mxu2 %v10375_v3  ;;  %8517 = vst [vmem:[%s16115_s6] sm:$0xff] %v8515_v26  ;;  %v10212_v3 = vld [vmem:[%s14199_s17 + $0xc08] sm:$0xf0]  ;;  %v10519_v26 = vor.u32 %v13231_v30, %v10516_v42  ;;  %v10508_v1 = vld [vmem:[%s14199_s17 + $0xe58] sm:$0xf0]  ;;  %v13225_v59 = vld [vmem:[%s14199_s17 + $0xe34] sm:$0xf] }
 0x33b   : > { %7958 = vmatpush.bf16.msra.mxu3 %v10439_v39  ;;  %v7693_v2 = vpop.f32.mrf.mxu2  ;;  %v10415_v39 = vor.u32 %v13205_v9, %v10412_v33  ;;  %v10215_v50 = vor.u32 %v13155_v52, %v10212_v3  ;;  %v10700_v9 = vld [vmem:[%s14199_s17 + $0xfd8] sm:$0xf0]  ;;  %v13227_v52 = vld [vmem:[%s14199_s17 + $0xe44] sm:$0xf]  ;;  %v10500_v3 = vld [vmem:[%s14199_s17 + $0xe48] sm:$0xf0] }
 0x33c   : > { %7920 = vmatpush.bf16.msra.mxu0 %v10239_v23  ;;  %v13265_v23 = vld [vmem:[%s14199_s17 + $0xf74] sm:$0xf]  ;;  %v10492_v60 = vld [vmem:[%s14199_s17 + $0xe38] sm:$0xf0]  ;;  %v10548_v42 = vld [vmem:[%s14199_s17 + $0xea8] sm:$0xf0] }
 0x33d   : > { %7933 = vmatpush.bf16.msra.mxu1 %v10303_v32  ;;  %v10279_v32 = vor.u32 %v13171_v45, %v10276_v46  ;;  %v10655_v43 = vor.u32 %v13265_v23, %v10652_v25  ;;  %v10628_v45 = vld [vmem:[%s14199_s17 + $0xf48] sm:$0xf0]  ;;  %v13275_v46 = vld [vmem:[%s14199_s17 + $0xfc4] sm:$0xf]  ;;  %v13257_v23 = vld [vmem:[%s14199_s17 + $0xf34] sm:$0xf] }
 0x33e   : > { %7946 = vmatpush.bf16.msra.mxu2 %v10367_v28  ;;  %v10343_v28 = vor.u32 %v13187_v48, %v10340_v20  ;;  %v10692_v48 = vld [vmem:[%s14199_s17 + $0xfc8] sm:$0xf0]  ;;  %v13273_v25 = vld [vmem:[%s14199_s17 + $0xfb4] sm:$0xf] }
 0x33f   : > { %7959 = vmatpush.bf16.msra.mxu3 %v10431_v29  ;;  %v10591_v29 = vor.u32 %v13249_v56, %v10588_v62  ;;  %v10695_v56 = vor.u32 %v13275_v46, %v10692_v48  ;;  %v10556_v62 = vld [vmem:[%s14199_s17 + $0xeb8] sm:$0xf0]  ;;  %v10596_v46 = vld [vmem:[%s14199_s17 + $0xf08] sm:$0xf0]  ;;  %v13267_v48 = vld [vmem:[%s14199_s17 + $0xf84] sm:$0xf] }
 0x340   : > { %7921 = vmatpush.bf16.msra.mxu0 %v10231_v12  ;;  %v13279_v12 = vld [vmem:[%s14199_s17 + $0xfe4] sm:$0xf]  ;;  %v10559_v41 = vor.u32 %v13241_v19, %v10556_v62  ;;  %v10844_v19 = vld [vmem:[%s14199_s17 + $0x10f8] sm:$0xf0] }
 0x341   : > { %7934 = vmatpush.bf16.msra.mxu1 %v10295_v27  ;;  %v10583_v27 = vor.u32 %v13247_v63, %v10580_v18  ;;  %v10711_v54 = vor.u32 %v13279_v12, %v10708_v61  ;;  %v13255_v63 = vld [vmem:[%s14199_s17 + $0xf24] sm:$0xf]  ;;  %v10676_v12 = vld [vmem:[%s14199_s17 + $0xfa8] sm:$0xf0] }
 0x342   : > { %7947 = vmatpush.bf16.msra.mxu2 %v10359_v55  ;;  %v10647_v55 = vor.u32 %v13263_v7, %v10644_v11  ;;  %v13271_v11 = vld [vmem:[%s14199_s17 + $0xfa4] sm:$0xf] }
 0x343   : > { %7960 = vmatpush.bf16.msra.mxu3 %v10423_v21  ;;  %v10572_v21 = vld [vmem:[%s14199_s17 + $0xed8] sm:$0xf0] }
 0x344   : > { %7922 = vmatpush.bf16.msra.mxu0 %v10223_v40  ;;  %v10575_v33 = vor.u32 %v13245_v16, %v10572_v21  ;;  %v10639_v40 = vor.u32 %v13261_v6, %v10636_v0  ;;  %v13221_v16 = vld [vmem:[%s14199_s17 + $0xe14] sm:$0xf]  ;;  %v10679_v6 = vor.u32 %v13271_v11, %v10676_v12  ;;  %v10540_v0 = vld [vmem:[%s14199_s17 + $0xe98] sm:$0xf0] }
 0x345   : > { %7935 = vmatpush.bf16.msra.mxu1 %v10287_v8  ;;  %v10564_v8 = vld [vmem:[%s14199_s17 + $0xec8] sm:$0xf0]  ;;  %v13237_v21 = vld [vmem:[%s14199_s17 + $0xe94] sm:$0xf] }
 0x346   : > { %7948 = vmatpush.bf16.msra.mxu2 %v10351_v37  ;;  %v13259_v37 = vld [vmem:[%s14199_s17 + $0xf44] sm:$0xf] }
 0x347   : > { %7961 = vmatpush.bf16.msra.mxu3 %v10415_v39  ;;  %v10503_v39 = vor.u32 %v13227_v52, %v10500_v3  ;;  %v10631_v49 = vor.u32 %v13259_v37, %v10628_v45  ;;  %v13219_v52 = vld [vmem:[%s14199_s17 + $0xe04] sm:$0xf]  ;;  %v10468_v3 = vld [vmem:[%s14199_s17 + $0xe08] sm:$0xf0] }
 0x348   : > { %7923 = vmatpush.bf16.msra.mxu0 %v10215_v50  ;;  %v10532_v37 = vld [vmem:[%s14199_s17 + $0xe88] sm:$0xf0]  ;;  %v13251_v45 = vld [vmem:[%s14199_s17 + $0xf04] sm:$0xf] }
 0x349   : > { %7936 = vmatpush.bf16.msra.mxu1 %v10279_v32  ;;  %v7730_v20 = vpop.f32.mrf.mxu1  ;;  %v10684_v32 = vld [vmem:[%s14199_s17 + $0xfb8] sm:$0xf0] }
 0x34a   : > { %7949 = vmatpush.bf16.msra.mxu2 %v10343_v28  ;;  %v10495_v28 = vor.u32 %v13225_v59, %v10492_v60  ;;  %v10471_v60 = vor.u32 %v13219_v52, %v10468_v3  ;;  %v13323_v52 = vld [vmem:[%s14199_s17 + $0x1144] sm:$0xf]  ;;  %v10884_v3 = vld [vmem:[%s14199_s17 + $0x1148] sm:$0xf0] }
 0x34b   : > { %7962 = vmatpush.bf16.msra.mxu3 %v10407_v15  ;;  %7924 = vmatmul.bf16.vlgmr.msra.gmra.mxu0 %v14799_v5  ;;  %v10511_v5 = vor.u32 %v13229_v57, %v10508_v1  ;;  %v13223_v15 = vld [vmem:[%s14199_s17 + $0xe24] sm:$0xf] }
 0x34c   : > { %7968 = vmatpush.bf16.msrb.mxu0 %v10527_v35  ;;  %7937 = vmatmul.bf16.vlgmr.msra.gmra.mxu1 %v14806_v13  ;;  %v10703_v13 = vor.u32 %v13277_v14, %v10700_v9  ;;  %v10484_v35 = vld [vmem:[%s14199_s17 + $0xe28] sm:$0xf0]  ;;  %v13253_v14 = vld [vmem:[%s14199_s17 + $0xf14] sm:$0xf]  ;;  %v10604_v9 = vld [vmem:[%s14199_s17 + $0xf18] sm:$0xf0] }
 0x34d   : > { %7981 = vmatpush.bf16.msrb.mxu1 %v10591_v29  ;;  %7950 = vmatmul.bf16.vlgmr.msra.gmra.mxu2 %v14804_v10  ;;  %v13243_v10 = vld [vmem:[%s14199_s17 + $0xec4] sm:$0xf] }
 0x34e   : > { %7994 = vmatpush.bf16.msrb.mxu2 %v10655_v43  ;;  %7963 = vmatmul.bf16.vlgmr.msra.gmra.mxu3 %v14810_v17  ;;  %v7717_v17 = vpop.f32.mrf.mxu0  ;;  %v10567_v58 = vor.u32 %v13243_v10, %v10564_v8  ;;  %v13239_v29 = vld [vmem:[%s14199_s17 + $0xea4] sm:$0xf]  ;;  %v10687_v43 = vor.u32 %v13273_v25, %v10684_v32  ;;  %v10543_v10 = vor.u32 %v13237_v21, %v10540_v0  ;;  %v10972_v25 = vld [vmem:[%s14199_s17 + $0x11f8] sm:$0xf0]  ;;  %v13341_v21 = vld [vmem:[%s14199_s17 + $0x11d4] sm:$0xf] }
 0x34f   : > { %8007 = vmatpush.bf16.msrb.mxu3 %v10719_v44  ;;  %v7718_v2 = vadd.f32 %v7717_v17, %v16117_v22  ;;  %v10620_v22 = vld [vmem:[%s14199_s17 + $0xf38] sm:$0xf0]  ;;  %v10612_v44 = vld [vmem:[%s14199_s17 + $0xf28] sm:$0xf0]  ;;  %v10551_v57 = vor.u32 %v13239_v29, %v10548_v42  ;;  %v13235_v8 = vld [vmem:[%s14199_s17 + $0xe84] sm:$0xf] }
 0x350   : > { %7969 = vmatpush.bf16.msrb.mxu0 %v10519_v26  ;;  %v10623_v31 = vor.u32 %v13257_v23, %v10620_v22  ;;  %v7743_v30 = vpop.f32.mrf.mxu2  ;;  %v10487_v26 = vor.u32 %v13223_v15, %v10484_v35  ;;  %v10615_v1 = vor.u32 %v13255_v63, %v10612_v44  ;;  %v10535_v62 = vor.u32 %v13235_v8, %v10532_v37  ;;  %v13345_v22 = vld [vmem:[%s14199_s17 + $0x11f4] sm:$0xf]  ;;  %v13295_v15 = vld [vmem:[%s14199_s17 + $0x1064] sm:$0xf]  ;;  %v10772_v35 = vld [vmem:[%s14199_s17 + $0x1068] sm:$0xf0] }
 0x351   : > { %7982 = vmatpush.bf16.msrb.mxu1 %v10583_v27  ;;  %v7731_v50 = vadd.f32 %v7730_v20, %v7718_v2  ;;  %v7756_v7 = vpop.f32.mrf.mxu3  ;;  %v7732_v27 = vpop.f32.mrf.mxu1  ;;  %v10660_v2 = vld [vmem:[%s14199_s17 + $0xf88] sm:$0xf0]  ;;  %v13297_v20 = vld [vmem:[%s14199_s17 + $0x1074] sm:$0xf]  ;;  %v10599_v23 = vor.u32 %v13251_v45, %v10596_v46  ;;  %v13311_v29 = vld [vmem:[%s14199_s17 + $0x10e4] sm:$0xf] }
 0x352   : > { %7995 = vmatpush.bf16.msrb.mxu2 %v10647_v55  ;;  %v10663_v32 = vor.u32 %v13267_v48, %v10660_v2  ;;  %v13327_v42 = vld [vmem:[%s14199_s17 + $0x1164] sm:$0xf]  ;;  %v10900_v63 = vld [vmem:[%s14199_s17 + $0x1168] sm:$0xf0]  ;;  %v13309_v27 = vld [vmem:[%s14199_s17 + $0x10d4] sm:$0xf]  ;;  %v10887_v48 = vor.u32 %v13323_v52, %v10884_v3 }
 0x353   : > { %8008 = vmatpush.bf16.msrb.mxu3 %v10711_v54  ;;  %v7744_v18 = vadd.f32 %v7743_v30, %v7731_v50  ;;  %v10476_v54 = vld [vmem:[%s14199_s17 + $0xe18] sm:$0xf0]  ;;  %v10836_v30 = vld [vmem:[%s14199_s17 + $0x10e8] sm:$0xf0]  ;;  %v13343_v44 = vld [vmem:[%s14199_s17 + $0x11e4] sm:$0xf]  ;;  %v10903_v12 = vor.u32 %v13327_v42, %v10900_v63 }
 0x354   : > { %7970 = vmatpush.bf16.msrb.mxu0 %v10511_v5  ;;  %v13269_v5 = vld [vmem:[%s14199_s17 + $0xf94] sm:$0xf]  ;;  %v10908_v50 = vld [vmem:[%s14199_s17 + $0x1178] sm:$0xf0]  ;;  %v10839_v11 = vor.u32 %v13311_v29, %v10836_v30  ;;  %v16870_v0 = vld [vmem:[#allocation13_spill] sm:$0xff] }
 0x355   : > { %7983 = vmatpush.bf16.msrb.mxu1 %v10575_v33  ;;  %v16189_v55 = vadd.f32 %v7756_v7, %v7744_v18  ;;  %v10668_v33 = vld [vmem:[%s14199_s17 + $0xf98] sm:$0xf0]  ;;  %v10964_v18 = vld [vmem:[%s14199_s17 + $0x11e8] sm:$0xf0]  ;;  %v10775_v7 = vor.u32 %v13295_v15, %v10772_v35  ;;  %v13289_v2 = vld [vmem:[%s14199_s17 + $0x1034] sm:$0xf] }
 0x356   : > { %7996 = vmatpush.bf16.msrb.mxu2 %v10639_v40  ;;  %v7719_v61 = vpop.f32.mrf.mxu0  ;;  %v10479_v40 = vor.u32 %v13221_v16, %v10476_v54  ;;  %v10671_v17 = vor.u32 %v13269_v5, %v10668_v33  ;;  %v13325_v16 = vld [vmem:[%s14199_s17 + $0x1154] sm:$0xf]  ;;  %v10892_v54 = vld [vmem:[%s14199_s17 + $0x1158] sm:$0xf0]  ;;  %v13291_v5 = vld [vmem:[%s14199_s17 + $0x1044] sm:$0xf] }
 0x357   : > { %8009 = vmatpush.bf16.msrb.mxu3 %v10703_v13  ;;  %v10607_v13 = vor.u32 %v13253_v14, %v10604_v9  ;;  %v13293_v61 = vld [vmem:[%s14199_s17 + $0x1054] sm:$0xf]  ;;  %v10895_v9 = vor.u32 %v13325_v16, %v10892_v54  ;;  %v10756_v33 = vld [vmem:[%s14199_s17 + $0x1048] sm:$0xf0]  ;;  %v13319_v15 = vld [vmem:[%s14199_s17 + $0x1124] sm:$0xf] }
 0x358   : > { %7971 = vmatpush.bf16.msrb.mxu0 %v10503_v39  ;;  %v7745_v39 = vpop.f32.mrf.mxu2  ;;  %v10948_v8 = vld [vmem:[%s14199_s17 + $0x11c8] sm:$0xf0]  ;;  %v10759_v45 = vor.u32 %v13291_v5, %v10756_v33  ;;  %v13335_v30 = vld [vmem:[%s14199_s17 + $0x11a4] sm:$0xf]  ;;  %v13317_v16 = vld [vmem:[%s14199_s17 + $0x1114] sm:$0xf] }
 0x359   : > { %7984 = vmatpush.bf16.msrb.mxu1 %v10567_v58  ;;  %v10780_v58 = vld [vmem:[%s14199_s17 + $0x1078] sm:$0xf0]  ;;  %v7758_v59 = vpop.f32.mrf.mxu3  ;;  %v10868_v35 = vld [vmem:[%s14199_s17 + $0x1128] sm:$0xf0]  ;;  %v13299_v33 = vld [vmem:[%s14199_s17 + $0x1084] sm:$0xf] }
 0x35a   : > { %7997 = vmatpush.bf16.msrb.mxu2 %v10631_v49  ;;  %v13313_v49 = vld [vmem:[%s14199_s17 + $0x10f4] sm:$0xf]  ;;  %v10748_v39 = vld [vmem:[%s14199_s17 + $0x1038] sm:$0xf0]  ;;  %v10932_v42 = vld [vmem:[%s14199_s17 + $0x11a8] sm:$0xf0] }
 0x35b   : > { %8010 = vmatpush.bf16.msrb.mxu3 %v10695_v56  ;;  %v13329_v56 = vld [vmem:[%s14199_s17 + $0x1174] sm:$0xf]  ;;  %v10812_v59 = vld [vmem:[%s14199_s17 + $0x10b8] sm:$0xf0]  ;;  %v10852_v52 = vld [vmem:[%s14199_s17 + $0x1108] sm:$0xf0] }
 0x35c   : > { %7972 = vmatpush.bf16.msrb.mxu0 %v10495_v28  ;;  %v10783_v28 = vor.u32 %v13297_v20, %v10780_v58  ;;  %v13305_v20 = vld [vmem:[%s14199_s17 + $0x10b4] sm:$0xf]  ;;  %v10860_v54 = vld [vmem:[%s14199_s17 + $0x1118] sm:$0xf0]  ;;  %v13331_v3 = vld [vmem:[%s14199_s17 + $0x1184] sm:$0xf] }
 0x35d   : > { %7985 = vmatpush.bf16.msrb.mxu1 %v10559_v41  ;;  %v10847_v41 = vor.u32 %v13313_v49, %v10844_v19  ;;  %v13337_v19 = vld [vmem:[%s14199_s17 + $0x11b4] sm:$0xf]  ;;  %v10863_v5 = vor.u32 %v13317_v16, %v10860_v54 }
 0x35e   : > { %7998 = vmatpush.bf16.msrb.mxu2 %v10623_v31  ;;  %v10911_v31 = vor.u32 %v13329_v56, %v10908_v50  ;;  %v10940_v56 = vld [vmem:[%s14199_s17 + $0x11b8] sm:$0xf0]  ;;  %v10751_v50 = vor.u32 %v13289_v2, %v10748_v39  ;;  %v13393_v2 = vld [vmem:[%s14199_s17 + $0x1374] sm:$0xf] }
 0x35f   : > { %8011 = vmatpush.bf16.msrb.mxu3 %v10687_v43  ;;  %v10975_v43 = vor.u32 %v13345_v22, %v10972_v25  ;;  %v13287_v22 = vld [vmem:[%s14199_s17 + $0x1024] sm:$0xf]  ;;  %v10740_v25 = vld [vmem:[%s14199_s17 + $0x1028] sm:$0xf0]  ;;  %v11164_v39 = vld [vmem:[%s14199_s17 + $0x1378] sm:$0xf0] }
 0x360   : > { %7973 = vmatpush.bf16.msrb.mxu0 %v10487_v26  ;;  %v10764_v26 = vld [vmem:[%s14199_s17 + $0x1058] sm:$0xf0] }
 0x361   : > { %7986 = vmatpush.bf16.msrb.mxu1 %v10551_v57  ;;  %v10967_v57 = vor.u32 %v13343_v44, %v10964_v18  ;;  %v10743_v44 = vor.u32 %v13287_v22, %v10740_v25  ;;  %v11092_v25 = vld [vmem:[%s14199_s17 + $0x12e8] sm:$0xf0] }
 0x362   : > { %7999 = vmatpush.bf16.msrb.mxu2 %v10615_v1  ;;  %v10828_v1 = vld [vmem:[%s14199_s17 + $0x10d8] sm:$0xf0] }
 0x363   : > { %8012 = vmatpush.bf16.msrb.mxu3 %v10679_v6  ;;  %v10956_v6 = vld [vmem:[%s14199_s17 + $0x11d8] sm:$0xf0]  ;;  %v10831_v14 = vor.u32 %v13309_v27, %v10828_v1  ;;  %v13301_v27 = vld [vmem:[%s14199_s17 + $0x1094] sm:$0xf] }
 0x364   : > { %7974 = vmatpush.bf16.msrb.mxu0 %v10479_v40  ;;  %v10820_v40 = vld [vmem:[%s14199_s17 + $0x10c8] sm:$0xf0]  ;;  %v10796_v1 = vld [vmem:[%s14199_s17 + $0x1098] sm:$0xf0] }
 0x365   : > { %7987 = vmatpush.bf16.msrb.mxu1 %v10543_v10 }
 0x366   : > { %8000 = vmatpush.bf16.msrb.mxu2 %v10607_v13  ;;  %v13339_v13 = vld [vmem:[%s14199_s17 + $0x11c4] sm:$0xf] }
 0x367   : > { %8013 = vmatpush.bf16.msrb.mxu3 %v10671_v17  ;;  %v10951_v58 = vor.u32 %v13339_v13, %v10948_v8  ;;  %v13361_v8 = vld [vmem:[%s14199_s17 + $0x1274] sm:$0xf] }
 0x368   : > { %7975 = vmatpush.bf16.msrb.mxu0 %v10471_v60  ;;  %v7769_v10 = vpop.f32.mrf.mxu0  ;;  %v13321_v60 = vld [vmem:[%s14199_s17 + $0x1134] sm:$0xf] }
 0x369   : > { %7988 = vmatpush.bf16.msrb.mxu1 %v10535_v62  ;;  %v7770_v37 = vadd.f32 %v7769_v10, %v16189_v55  ;;  %v7782_v17 = vpop.f32.mrf.mxu1  ;;  %v10876_v55 = vld [vmem:[%s14199_s17 + $0x1138] sm:$0xf0]  ;;  %v10815_v62 = vor.u32 %v13305_v20, %v10812_v59  ;;  %v10916_v10 = vld [vmem:[%s14199_s17 + $0x1188] sm:$0xf0] }
 0x36a   : > { %8001 = vmatpush.bf16.msrb.mxu2 %v10599_v23  ;;  %v10879_v23 = vor.u32 %v13321_v60, %v10876_v55  ;;  %v11228_v59 = vld [vmem:[%s14199_s17 + $0x13f8] sm:$0xf0]  ;;  %v10919_v60 = vor.u32 %v13331_v3, %v10916_v10 }
 0x36b   : > { %8014 = vmatpush.bf16.msrb.mxu3 %v10663_v32  ;;  %7976 = vmatmul.bf16.vlgmr.msrb.gmra.mxu0 %v14884_v53  ;;  %v10767_v53 = vor.u32 %v13293_v61, %v10764_v26  ;;  %v7783_v49 = vadd.f32 %v7782_v17, %v7770_v37  ;;  %v13303_v32 = vld [vmem:[%s14199_s17 + $0x10a4] sm:$0xf]  ;;  %v13285_v61 = vld [vmem:[%s14199_s17 + $0x1014] sm:$0xf]  ;;  %v10732_v26 = vld [vmem:[%s14199_s17 + $0x1018] sm:$0xf0] }
 0x36c   : > { %8020 = vmatpush.bf16.msra.mxu0 %v10783_v28  ;;  %7989 = vmatmul.bf16.vlgmr.msrb.gmra.mxu1 %v14891_v36  ;;  %v10959_v36 = vor.u32 %v13341_v21, %v10956_v6  ;;  %v10943_v28 = vor.u32 %v13337_v19, %v10940_v56  ;;  %v13333_v21 = vld [vmem:[%s14199_s17 + $0x1194] sm:$0xf]  ;;  %v10924_v6 = vld [vmem:[%s14199_s17 + $0x1198] sm:$0xf0]  ;;  %v11167_v56 = vor.u32 %v13393_v2, %v11164_v39 }
 0x36d   : > { %8033 = vmatpush.bf16.msra.mxu1 %v10847_v41  ;;  %8002 = vmatmul.bf16.vlgmr.msrb.gmra.mxu2 %v14889_v34  ;;  %v13307_v34 = vld [vmem:[%s14199_s17 + $0x10c4] sm:$0xf]  ;;  %v11036_v37 = vld [vmem:[%s14199_s17 + $0x1278] sm:$0xf0]  ;;  %v13385_v39 = vld [vmem:[%s14199_s17 + $0x1334] sm:$0xf] }
 0x36e   : > { %8046 = vmatpush.bf16.msra.mxu2 %v10911_v31  ;;  %8015 = vmatmul.bf16.vlgmr.msrb.gmra.mxu3 %v16870_v0  ;;  %v10823_v46 = vor.u32 %v13307_v34, %v10820_v40  ;;  %v10804_v31 = vld [vmem:[%s14199_s17 + $0x10a8] sm:$0xf0]  ;;  %v10735_v0 = vor.u32 %v13285_v61, %v10732_v26  ;;  %v10927_v40 = vor.u32 %v13333_v21, %v10924_v6  ;;  %v16872_v61 = vld [vmem:[#allocation15_spill] sm:$0xff]  ;;  %v16873_v26 = vld [vmem:[#allocation16_spill] sm:$0xff] }
 0x36f   : > { %8059 = vmatpush.bf16.msra.mxu3 %v10975_v43  ;;  %v10788_v34 = vld [vmem:[%s14199_s17 + $0x1088] sm:$0xf0]  ;;  %v11039_v55 = vor.u32 %v13361_v8, %v11036_v37  ;;  %v13355_v6 = vld [vmem:[%s14199_s17 + $0x1244] sm:$0xf]  ;;  %v13353_v37 = vld [vmem:[%s14199_s17 + $0x1234] sm:$0xf] }
 0x370   : > { %8021 = vmatpush.bf16.msra.mxu0 %v10775_v7  ;;  %v7795_v41 = vpop.f32.mrf.mxu2  ;;  %v7771_v63 = vpop.f32.mrf.mxu0  ;;  %v10791_v20 = vor.u32 %v13299_v33, %v10788_v34  ;;  %v11140_v33 = vld [vmem:[%s14199_s17 + $0x1348] sm:$0xf0]  ;;  %v11068_v2 = vld [vmem:[%s14199_s17 + $0x12b8] sm:$0xf0] }
 0x371   : > { %8034 = vmatpush.bf16.msra.mxu1 %v10839_v11  ;;  %v7796_v29 = vadd.f32 %v7795_v41, %v7783_v49  ;;  %v7808_v43 = vpop.f32.mrf.mxu3  ;;  %v7784_v18 = vpop.f32.mrf.mxu1  ;;  %v10807_v11 = vor.u32 %v13303_v32, %v10804_v31  ;;  %v13409_v49 = vld [vmem:[%s14199_s17 + $0x13f4] sm:$0xf]  ;;  %v13391_v32 = vld [vmem:[%s14199_s17 + $0x1364] sm:$0xf]  ;;  %v11220_v31 = vld [vmem:[%s14199_s17 + $0x13e8] sm:$0xf0] }
 0x372   : > { %8047 = vmatpush.bf16.msra.mxu2 %v10903_v12  ;;  %v10871_v12 = vor.u32 %v13319_v15, %v10868_v35  ;;  %v11231_v22 = vor.u32 %v13409_v49, %v11228_v59  ;;  %v13407_v41 = vld [vmem:[%s14199_s17 + $0x13e4] sm:$0xf]  ;;  %v16871_v63 = vld [vmem:[#allocation14_spill] sm:$0xff]  ;;  %v11084_v18 = vld [vmem:[%s14199_s17 + $0x12d8] sm:$0xf0] }
 0x373   : > { %8060 = vmatpush.bf16.msra.mxu3 %v10967_v57  ;;  %v16260_v7 = vadd.f32 %v7808_v43, %v7796_v29  ;;  %v10935_v57 = vor.u32 %v13335_v30, %v10932_v42  ;;  %v13357_v43 = vld [vmem:[%s14199_s17 + $0x1254] sm:$0xf]  ;;  %v11020_v30 = vld [vmem:[%s14199_s17 + $0x1258] sm:$0xf0] }
 0x374   : > { %8022 = vmatpush.bf16.msra.mxu0 %v10767_v53  ;;  %v13283_v53 = vld [vmem:[%s14199_s17 + $0x1004] sm:$0xf]  ;;  %v13373_v42 = vld [vmem:[%s14199_s17 + $0x12d4] sm:$0xf]  ;;  %v11023_v16 = vor.u32 %v13357_v43, %v11020_v30 }
 0x375   : > { %8035 = vmatpush.bf16.msra.mxu1 %v10831_v14  ;;  %v10724_v14 = vld [vmem:[%s14199_s17 + $0x1008] sm:$0xf0]  ;;  %v11087_v54 = vor.u32 %v13373_v42, %v11084_v18  ;;  %v13365_v18 = vld [vmem:[%s14199_s17 + $0x1294] sm:$0xf] }
 0x376   : > { %8048 = vmatpush.bf16.msra.mxu2 %v10895_v9  ;;  %v10799_v9 = vor.u32 %v13301_v27, %v10796_v1  ;;  %v13405_v27 = vld [vmem:[%s14199_s17 + $0x13d4] sm:$0xf]  ;;  %v16874_v1 = vld [vmem:[#allocation17_spill] sm:$0xff] }
 0x377   : > { %8061 = vmatpush.bf16.msra.mxu3 %v10959_v36  ;;  %v13315_v36 = vld [vmem:[%s14199_s17 + $0x1104] sm:$0xf] }
 0x378   : > { %8023 = vmatpush.bf16.msra.mxu0 %v10759_v45  ;;  %v7797_v13 = vpop.f32.mrf.mxu2  ;;  %v13377_v45 = vld [vmem:[%s14199_s17 + $0x12f4] sm:$0xf] }
 0x379   : > { %8036 = vmatpush.bf16.msra.mxu1 %v10823_v46  ;;  %v7810_v17 = vpop.f32.mrf.mxu3  ;;  %v10727_v46 = vor.u32 %v13283_v53, %v10724_v14  ;;  %v13371_v53 = vld [vmem:[%s14199_s17 + $0x12c4] sm:$0xf] }
 0x37a   : > { %8049 = vmatpush.bf16.msra.mxu2 %v10887_v48  ;;  %v11100_v48 = vld [vmem:[%s14199_s17 + $0x12f8] sm:$0xf0]  ;;  %v13369_v17 = vld [vmem:[%s14199_s17 + $0x12b4] sm:$0xf] }
 0x37b   : > { %8062 = vmatpush.bf16.msra.mxu3 %v10951_v58  ;;  %v10855_v58 = vor.u32 %v13315_v36, %v10852_v52  ;;  %v11103_v19 = vor.u32 %v13377_v45, %v11100_v48  ;;  %v13403_v36 = vld [vmem:[%s14199_s17 + $0x13c4] sm:$0xf]  ;;  %v11004_v45 = vld [vmem:[%s14199_s17 + $0x1238] sm:$0xf0]  ;;  %v11071_v59 = vor.u32 %v13369_v17, %v11068_v2 }
 0x37c   : > { %8024 = vmatpush.bf16.msra.mxu0 %v10751_v50  ;;  %v13359_v50 = vld [vmem:[%s14199_s17 + $0x1264] sm:$0xf]  ;;  %v11007_v49 = vor.u32 %v13353_v37, %v11004_v45  ;;  %v13457_v37 = vld [vmem:[%s14199_s17 + $0x1574] sm:$0xf]  ;;  %v11420_v45 = vld [vmem:[%s14199_s17 + $0x1578] sm:$0xf0] }
 0x37d   : > { %8037 = vmatpush.bf16.msra.mxu1 %v10815_v62  ;;  %v11028_v62 = vld [vmem:[%s14199_s17 + $0x1268] sm:$0xf0]  ;;  %v11484_v2 = vld [vmem:[%s14199_s17 + $0x15f8] sm:$0xf0] }
 0x37e   : > { %8050 = vmatpush.bf16.msra.mxu2 %v10879_v23  ;;  %v13375_v23 = vld [vmem:[%s14199_s17 + $0x12e4] sm:$0xf]  ;;  %v11031_v15 = vor.u32 %v13359_v50, %v11028_v62 }
 0x37f   : > { %8063 = vmatpush.bf16.msra.mxu3 %v10943_v28  ;;  %v11156_v28 = vld [vmem:[%s14199_s17 + $0x1368] sm:$0xf0]  ;;  %v11095_v35 = vor.u32 %v13375_v23, %v11092_v25 }
 0x380   : > { %8025 = vmatpush.bf16.msra.mxu0 %v10743_v44  ;;  %v11159_v29 = vor.u32 %v13391_v32, %v11156_v28  ;;  %v11223_v44 = vor.u32 %v13407_v41, %v11220_v31  ;;  %v11060_v23 = vld [vmem:[%s14199_s17 + $0x12a8] sm:$0xf0]  ;;  %v13399_v41 = vld [vmem:[%s14199_s17 + $0x13a4] sm:$0xf] }
 0x381   : > { %8038 = vmatpush.bf16.msra.mxu1 %v10807_v11  ;;  %v13389_v11 = vld [vmem:[%s14199_s17 + $0x1354] sm:$0xf]  ;;  %v11124_v25 = vld [vmem:[%s14199_s17 + $0x1328] sm:$0xf0] }
 0x382   : > { %8051 = vmatpush.bf16.msra.mxu2 %v10871_v12  ;;  %v11148_v12 = vld [vmem:[%s14199_s17 + $0x1358] sm:$0xf0]  ;;  %v11188_v31 = vld [vmem:[%s14199_s17 + $0x13a8] sm:$0xf0] }
 0x383   : > { %8064 = vmatpush.bf16.msra.mxu3 %v10935_v57  ;;  %v11212_v57 = vld [vmem:[%s14199_s17 + $0x13d8] sm:$0xf0]  ;;  %v11151_v21 = vor.u32 %v13389_v11, %v11148_v12  ;;  %v11191_v11 = vor.u32 %v13399_v41, %v11188_v31  ;;  %v13437_v31 = vld [vmem:[%s14199_s17 + $0x14d4] sm:$0xf] }
 0x384   : > { %8026 = vmatpush.bf16.msra.mxu0 %v10735_v0  ;;  %v11012_v0 = vld [vmem:[%s14199_s17 + $0x1248] sm:$0xf0]  ;;  %v11215_v14 = vor.u32 %v13405_v27, %v11212_v57  ;;  %v11052_v12 = vld [vmem:[%s14199_s17 + $0x1298] sm:$0xf0]  ;;  %v13397_v27 = vld [vmem:[%s14199_s17 + $0x1394] sm:$0xf] }
 0x385   : > { %8039 = vmatpush.bf16.msra.mxu1 %v10799_v9  ;;  %v11076_v9 = vld [vmem:[%s14199_s17 + $0x12c8] sm:$0xf0]  ;;  %v11015_v3 = vor.u32 %v13355_v6, %v11012_v0  ;;  %v11180_v57 = vld [vmem:[%s14199_s17 + $0x1398] sm:$0xf0]  ;;  %v13363_v0 = vld [vmem:[%s14199_s17 + $0x1284] sm:$0xf] }
 0x386   : > { %8052 = vmatpush.bf16.msra.mxu2 %v10863_v5  ;;  %v13387_v5 = vld [vmem:[%s14199_s17 + $0x1344] sm:$0xf]  ;;  %v11079_v13 = vor.u32 %v13371_v53, %v11076_v9  ;;  %v11044_v53 = vld [vmem:[%s14199_s17 + $0x1288] sm:$0xf0]  ;;  %v11183_v9 = vor.u32 %v13397_v27, %v11180_v57  ;;  %v11276_v41 = vld [vmem:[%s14199_s17 + $0x1458] sm:$0xf0] }
 0x387   : > { %8065 = vmatpush.bf16.msra.mxu3 %v10927_v40  ;;  %v11204_v40 = vld [vmem:[%s14199_s17 + $0x13c8] sm:$0xf0]  ;;  %v11143_v8 = vor.u32 %v13387_v5, %v11140_v33  ;;  %v13395_v33 = vld [vmem:[%s14199_s17 + $0x1384] sm:$0xf]  ;;  %v11047_v17 = vor.u32 %v13363_v0, %v11044_v53 }
 0x388   : > { %8027 = vmatpush.bf16.msra.mxu0 %v10727_v46  ;;  %v7821_v34 = vpop.f32.mrf.mxu0  ;;  %v11207_v46 = vor.u32 %v13403_v36, %v11204_v40  ;;  %v11108_v5 = vld [vmem:[%s14199_s17 + $0x1308] sm:$0xf0]  ;;  %v13425_v40 = vld [vmem:[%s14199_s17 + $0x1474] sm:$0xf]  ;;  %v13419_v57 = vld [vmem:[%s14199_s17 + $0x1444] sm:$0xf] }
 0x389   : > { %8040 = vmatpush.bf16.msra.mxu1 %v10791_v20  ;;  %v7822_v52 = vadd.f32 %v7821_v34, %v16260_v7  ;;  %v7834_v10 = vpop.f32.mrf.mxu1  ;;  %v11132_v7 = vld [vmem:[%s14199_s17 + $0x1338] sm:$0xf0]  ;;  %v13401_v20 = vld [vmem:[%s14199_s17 + $0x13b4] sm:$0xf]  ;;  %v11172_v34 = vld [vmem:[%s14199_s17 + $0x1388] sm:$0xf0] }
 0x38a   : > { %8053 = vmatpush.bf16.msra.mxu2 %v10855_v58  ;;  %v11196_v58 = vld [vmem:[%s14199_s17 + $0x13b8] sm:$0xf0]  ;;  %v11396_v0 = vld [vmem:[%s14199_s17 + $0x1548] sm:$0xf0] }
 0x38b   : > { %8066 = vmatpush.bf16.msra.mxu3 %v10919_v60  ;;  %8028 = vmatmul.bf16.vlgmr.msra.gmra.mxu0 %v16871_v63  ;;  %v7835_v48 = vadd.f32 %v7834_v10, %v7822_v52  ;;  %v11135_v60 = vor.u32 %v13385_v39, %v11132_v7  ;;  %v11199_v50 = vor.u32 %v13401_v20, %v11196_v58  ;;  %v13349_v63 = vld [vmem:[%s14199_s17 + $0x1214] sm:$0xf]  ;;  %v11292_v52 = vld [vmem:[%s14199_s17 + $0x1478] sm:$0xf0] }
 0x38c   : > { %8072 = vmatpush.bf16.msrb.mxu0 %v11039_v55  ;;  %8041 = vmatmul.bf16.vlgmr.msra.gmra.mxu1 %v16873_v26  ;;  %v13351_v55 = vld [vmem:[%s14199_s17 + $0x1224] sm:$0xf]  ;;  %v11116_v26 = vld [vmem:[%s14199_s17 + $0x1318] sm:$0xf0]  ;;  %v11175_v39 = vor.u32 %v13395_v33, %v11172_v34  ;;  %v11295_v7 = vor.u32 %v13425_v40, %v11292_v52  ;;  %v11423_v58 = vor.u32 %v13457_v37, %v11420_v45  ;;  %v13417_v52 = vld [vmem:[%s14199_s17 + $0x1434] sm:$0xf] }
 0x38d   : > { %8085 = vmatpush.bf16.msrb.mxu1 %v11103_v19  ;;  %8054 = vmatmul.bf16.vlgmr.msra.gmra.mxu2 %v16872_v61  ;;  %v10996_v19 = vld [vmem:[%s14199_s17 + $0x1228] sm:$0xf0]  ;;  %v13381_v61 = vld [vmem:[%s14199_s17 + $0x1314] sm:$0xf]  ;;  %v11324_v37 = vld [vmem:[%s14199_s17 + $0x14b8] sm:$0xf0] }
 0x38e   : > { %8098 = vmatpush.bf16.msrb.mxu2 %v11167_v56  ;;  %8067 = vmatmul.bf16.vlgmr.msra.gmra.mxu3 %v16874_v1  ;;  %v13367_v56 = vld [vmem:[%s14199_s17 + $0x12a4] sm:$0xf]  ;;  %v11119_v6 = vor.u32 %v13381_v61, %v11116_v26  ;;  %v13449_v45 = vld [vmem:[%s14199_s17 + $0x1534] sm:$0xf] }
 0x38f   : > { %8111 = vmatpush.bf16.msrb.mxu3 %v11231_v22  ;;  %v13383_v22 = vld [vmem:[%s14199_s17 + $0x1324] sm:$0xf]  ;;  %v11063_v30 = vor.u32 %v13367_v56, %v11060_v23  ;;  %v11476_v23 = vld [vmem:[%s14199_s17 + $0x15e8] sm:$0xf0] }
 0x390   : > { %8073 = vmatpush.bf16.msrb.mxu0 %v11031_v15  ;;  %v7847_v62 = vpop.f32.mrf.mxu2  ;;  %v7823_v15 = vpop.f32.mrf.mxu0  ;;  %v11127_v42 = vor.u32 %v13383_v22, %v11124_v25  ;;  %v13455_v56 = vld [vmem:[%s14199_s17 + $0x1564] sm:$0xf] }
 0x391   : > { %8086 = vmatpush.bf16.msrb.mxu1 %v11095_v35  ;;  %v7848_v32 = vadd.f32 %v7847_v62, %v7835_v48  ;;  %v7860_v28 = vpop.f32.mrf.mxu3  ;;  %v10999_v35 = vor.u32 %v13351_v55, %v10996_v19  ;;  %v13473_v48 = vld [vmem:[%s14199_s17 + $0x15f4] sm:$0xf]  ;;  %v11348_v19 = vld [vmem:[%s14199_s17 + $0x14e8] sm:$0xf0]  ;;  %v13471_v62 = vld [vmem:[%s14199_s17 + $0x15e4] sm:$0xf] }
 0x392   : > { %8099 = vmatpush.bf16.msrb.mxu2 %v11159_v29  ;;  %v7836_v29 = vpop.f32.mrf.mxu1  ;;  %v11487_v55 = vor.u32 %v13473_v48, %v11484_v2  ;;  %v16875_v15 = vld [vmem:[#allocation18_spill] sm:$0xff] }
 0x393   : > { %8112 = vmatpush.bf16.msrb.mxu3 %v11223_v44  ;;  %v16331_v43 = vadd.f32 %v7860_v28, %v7848_v32  ;;  %v10988_v44 = vld [vmem:[%s14199_s17 + $0x1218] sm:$0xf0]  ;;  %v13421_v28 = vld [vmem:[%s14199_s17 + $0x1454] sm:$0xf] }
 0x394   : > { %8074 = vmatpush.bf16.msrb.mxu0 %v11023_v16  ;;  %v10991_v1 = vor.u32 %v13349_v63, %v10988_v44  ;;  %v13347_v16 = vld [vmem:[%s14199_s17 + $0x1204] sm:$0xf]  ;;  %v11340_v29 = vld [vmem:[%s14199_s17 + $0x14d8] sm:$0xf0]  ;;  %v11279_v61 = vor.u32 %v13421_v28, %v11276_v41 }
 0x395   : > { %8087 = vmatpush.bf16.msrb.mxu1 %v11087_v54  ;;  %v10980_v54 = vld [vmem:[%s14199_s17 + $0x1208] sm:$0xf0]  ;;  %v16876_v63 = vld [vmem:[#allocation19_spill] sm:$0xff]  ;;  %v16877_v44 = vld [vmem:[#allocation20_spill] sm:$0xff]  ;;  %v11343_v26 = vor.u32 %v13437_v31, %v11340_v29 }
 0x396   : > { %8100 = vmatpush.bf16.msrb.mxu2 %v11151_v21  ;;  %v11055_v21 = vor.u32 %v13365_v18, %v11052_v12  ;;  %v13469_v18 = vld [vmem:[%s14199_s17 + $0x15d4] sm:$0xf]  ;;  %v16878_v12 = vld [vmem:[#allocation21_spill] sm:$0xff] }
 0x397   : > { %8113 = vmatpush.bf16.msrb.mxu3 %v11215_v14  ;;  %v13379_v14 = vld [vmem:[%s14199_s17 + $0x1304] sm:$0xf]  ;;  %v13429_v29 = vld [vmem:[%s14199_s17 + $0x1494] sm:$0xf] }
 0x398   : > { %8075 = vmatpush.bf16.msrb.mxu0 %v11015_v3  ;;  %v7849_v36 = vpop.f32.mrf.mxu2  ;;  %v13441_v3 = vld [vmem:[%s14199_s17 + $0x14f4] sm:$0xf] }
 0x399   : > { %8088 = vmatpush.bf16.msrb.mxu1 %v11079_v13  ;;  %v7862_v10 = vpop.f32.mrf.mxu3  ;;  %v10983_v13 = vor.u32 %v13347_v16, %v10980_v54  ;;  %v13435_v16 = vld [vmem:[%s14199_s17 + $0x14c4] sm:$0xf] }
 0x39a   : > { %8101 = vmatpush.bf16.msrb.mxu2 %v11143_v8  ;;  %v11356_v8 = vld [vmem:[%s14199_s17 + $0x14f8] sm:$0xf0]  ;;  %v13433_v10 = vld [vmem:[%s14199_s17 + $0x14b4] sm:$0xf] }
 0x39b   : > { %8114 = vmatpush.bf16.msrb.mxu3 %v11207_v46  ;;  %v11111_v46 = vor.u32 %v13379_v14, %v11108_v5  ;;  %v11359_v20 = vor.u32 %v13441_v3, %v11356_v8  ;;  %v13467_v14 = vld [vmem:[%s14199_s17 + $0x15c4] sm:$0xf]  ;;  %v11260_v3 = vld [vmem:[%s14199_s17 + $0x1438] sm:$0xf0]  ;;  %v11327_v2 = vor.u32 %v13433_v10, %v11324_v37 }
 0x39c   : > { %8076 = vmatpush.bf16.msrb.mxu0 %v11007_v49  ;;  %v13423_v49 = vld [vmem:[%s14199_s17 + $0x1464] sm:$0xf]  ;;  %v11263_v48 = vor.u32 %v13417_v52, %v11260_v3  ;;  %v13521_v52 = vld [vmem:[%s14199_s17 + $0x1774] sm:$0xf]  ;;  %v11676_v3 = vld [vmem:[%s14199_s17 + $0x1778] sm:$0xf0] }
 0x39d   : > { %8089 = vmatpush.bf16.msrb.mxu1 %v11071_v59  ;;  %v11284_v59 = vld [vmem:[%s14199_s17 + $0x1468] sm:$0xf0]  ;;  %v11740_v37 = vld [vmem:[%s14199_s17 + $0x17f8] sm:$0xf0] }
 0x39e   : > { %8102 = vmatpush.bf16.msrb.mxu2 %v11135_v60  ;;  %v13439_v60 = vld [vmem:[%s14199_s17 + $0x14e4] sm:$0xf]  ;;  %v11287_v22 = vor.u32 %v13423_v49, %v11284_v59 }
 0x39f   : > { %8115 = vmatpush.bf16.msrb.mxu3 %v11199_v50  ;;  %v11412_v50 = vld [vmem:[%s14199_s17 + $0x1568] sm:$0xf0]  ;;  %v11351_v25 = vor.u32 %v13439_v60, %v11348_v19 }
 0x3a0   : > { %8077 = vmatpush.bf16.msrb.mxu0 %v10999_v35  ;;  %v11415_v32 = vor.u32 %v13455_v56, %v11412_v50  ;;  %v11479_v35 = vor.u32 %v13471_v62, %v11476_v23  ;;  %v11316_v60 = vld [vmem:[%s14199_s17 + $0x14a8] sm:$0xf0]  ;;  %v13463_v62 = vld [vmem:[%s14199_s17 + $0x15a4] sm:$0xf] }
 0x3a1   : > { %8090 = vmatpush.bf16.msrb.mxu1 %v11063_v30  ;;  %v13453_v30 = vld [vmem:[%s14199_s17 + $0x1554] sm:$0xf]  ;;  %v11380_v19 = vld [vmem:[%s14199_s17 + $0x1528] sm:$0xf0] }
 0x3a2   : > { %8103 = vmatpush.bf16.msrb.mxu2 %v11127_v42  ;;  %v11404_v42 = vld [vmem:[%s14199_s17 + $0x1558] sm:$0xf0]  ;;  %v11444_v23 = vld [vmem:[%s14199_s17 + $0x15a8] sm:$0xf0] }
 0x3a3   : > { %8116 = vmatpush.bf16.msrb.mxu3 %v11191_v11  ;;  %v11468_v11 = vld [vmem:[%s14199_s17 + $0x15d8] sm:$0xf0]  ;;  %v11407_v27 = vor.u32 %v13453_v30, %v11404_v42  ;;  %v11447_v30 = vor.u32 %v13463_v62, %v11444_v23  ;;  %v13501_v23 = vld [vmem:[%s14199_s17 + $0x16d4] sm:$0xf] }
 0x3a4   : > { %8078 = vmatpush.bf16.msrb.mxu0 %v10991_v1  ;;  %v11268_v1 = vld [vmem:[%s14199_s17 + $0x1448] sm:$0xf0]  ;;  %v11471_v54 = vor.u32 %v13469_v18, %v11468_v11  ;;  %v11308_v42 = vld [vmem:[%s14199_s17 + $0x1498] sm:$0xf0]  ;;  %v13461_v18 = vld [vmem:[%s14199_s17 + $0x1594] sm:$0xf] }
 0x3a5   : > { %8091 = vmatpush.bf16.msrb.mxu1 %v11055_v21  ;;  %v11332_v21 = vld [vmem:[%s14199_s17 + $0x14c8] sm:$0xf0]  ;;  %v11271_v33 = vor.u32 %v13419_v57, %v11268_v1  ;;  %v11436_v11 = vld [vmem:[%s14199_s17 + $0x1598] sm:$0xf0]  ;;  %v13427_v1 = vld [vmem:[%s14199_s17 + $0x1484] sm:$0xf] }
 0x3a6   : > { %8104 = vmatpush.bf16.msrb.mxu2 %v11119_v6  ;;  %v13451_v6 = vld [vmem:[%s14199_s17 + $0x1544] sm:$0xf]  ;;  %v11335_v36 = vor.u32 %v13435_v16, %v11332_v21  ;;  %v11300_v16 = vld [vmem:[%s14199_s17 + $0x1488] sm:$0xf0]  ;;  %v11439_v21 = vor.u32 %v13461_v18, %v11436_v11  ;;  %v11532_v62 = vld [vmem:[%s14199_s17 + $0x1658] sm:$0xf0] }
 0x3a7   : > { %8117 = vmatpush.bf16.msrb.mxu3 %v11183_v9  ;;  %v11460_v9 = vld [vmem:[%s14199_s17 + $0x15c8] sm:$0xf0]  ;;  %v11399_v40 = vor.u32 %v13451_v6, %v11396_v0  ;;  %v13459_v0 = vld [vmem:[%s14199_s17 + $0x1584] sm:$0xf]  ;;  %v11303_v10 = vor.u32 %v13427_v1, %v11300_v16 }
 0x3a8   : > { %8079 = vmatpush.bf16.msrb.mxu0 %v10983_v13  ;;  %v7873_v53 = vpop.f32.mrf.mxu0  ;;  %v11463_v13 = vor.u32 %v13467_v14, %v11460_v9  ;;  %v11364_v6 = vld [vmem:[%s14199_s17 + $0x1508] sm:$0xf0]  ;;  %v13489_v9 = vld [vmem:[%s14199_s17 + $0x1674] sm:$0xf]  ;;  %v13483_v11 = vld [vmem:[%s14199_s17 + $0x1644] sm:$0xf] }
 0x3a9   : > { %8092 = vmatpush.bf16.msrb.mxu1 %v11047_v17  ;;  %v7874_v5 = vadd.f32 %v7873_v53, %v16331_v43  ;;  %v7886_v34 = vpop.f32.mrf.mxu1  ;;  %v11388_v43 = vld [vmem:[%s14199_s17 + $0x1538] sm:$0xf0]  ;;  %v13465_v17 = vld [vmem:[%s14199_s17 + $0x15b4] sm:$0xf]  ;;  %v11428_v53 = vld [vmem:[%s14199_s17 + $0x1588] sm:$0xf0] }
 0x3aa   : > { %8105 = vmatpush.bf16.msrb.mxu2 %v11111_v46  ;;  %v11452_v46 = vld [vmem:[%s14199_s17 + $0x15b8] sm:$0xf0]  ;;  %v11652_v1 = vld [vmem:[%s14199_s17 + $0x1748] sm:$0xf0] }
 0x3ab   : > { %8118 = vmatpush.bf16.msrb.mxu3 %v11175_v39  ;;  %8080 = vmatmul.bf16.vlgmr.msrb.gmra.mxu0 %v16875_v15  ;;  %v7887_v8 = vadd.f32 %v7886_v34, %v7874_v5  ;;  %v11391_v39 = vor.u32 %v13449_v45, %v11388_v43  ;;  %v11455_v49 = vor.u32 %v13465_v17, %v11452_v46  ;;  %v13413_v15 = vld [vmem:[%s14199_s17 + $0x1414] sm:$0xf]  ;;  %v11548_v5 = vld [vmem:[%s14199_s17 + $0x1678] sm:$0xf0] }
 0x3ac   : > { %8124 = vmatpush.bf16.msra.mxu0 %v11295_v7  ;;  %8093 = vmatmul.bf16.vlgmr.msrb.gmra.mxu1 %v16877_v44  ;;  %v13415_v7 = vld [vmem:[%s14199_s17 + $0x1424] sm:$0xf]  ;;  %v11372_v44 = vld [vmem:[%s14199_s17 + $0x1518] sm:$0xf0]  ;;  %v11431_v45 = vor.u32 %v13459_v0, %v11428_v53  ;;  %v11551_v43 = vor.u32 %v13489_v9, %v11548_v5  ;;  %v11679_v46 = vor.u32 %v13521_v52, %v11676_v3  ;;  %v13481_v5 = vld [vmem:[%s14199_s17 + $0x1634] sm:$0xf] }
 0x3ad   : > { %8137 = vmatpush.bf16.msra.mxu1 %v11359_v20  ;;  %8106 = vmatmul.bf16.vlgmr.msrb.gmra.mxu2 %v16876_v63  ;;  %v11252_v20 = vld [vmem:[%s14199_s17 + $0x1428] sm:$0xf0]  ;;  %v13445_v63 = vld [vmem:[%s14199_s17 + $0x1514] sm:$0xf]  ;;  %v11580_v52 = vld [vmem:[%s14199_s17 + $0x16b8] sm:$0xf0] }
 0x3ae   : > { %8150 = vmatpush.bf16.msra.mxu2 %v11423_v58  ;;  %8119 = vmatmul.bf16.vlgmr.msrb.gmra.mxu3 %v16878_v12  ;;  %v13431_v58 = vld [vmem:[%s14199_s17 + $0x14a4] sm:$0xf]  ;;  %v11375_v57 = vor.u32 %v13445_v63, %v11372_v44  ;;  %v13513_v3 = vld [vmem:[%s14199_s17 + $0x1734] sm:$0xf] }
 0x3af   : > { %8163 = vmatpush.bf16.msra.mxu3 %v11487_v55  ;;  %v13447_v55 = vld [vmem:[%s14199_s17 + $0x1524] sm:$0xf]  ;;  %v11319_v41 = vor.u32 %v13431_v58, %v11316_v60  ;;  %v11732_v60 = vld [vmem:[%s14199_s17 + $0x17e8] sm:$0xf0] }
 0x3b0   : > { %8125 = vmatpush.bf16.msra.mxu0 %v11287_v22  ;;  %v7899_v59 = vpop.f32.mrf.mxu2  ;;  %v7875_v22 = vpop.f32.mrf.mxu0  ;;  %v11383_v31 = vor.u32 %v13447_v55, %v11380_v19  ;;  %v13519_v58 = vld [vmem:[%s14199_s17 + $0x1764] sm:$0xf] }
 0x3b1   : > { %8138 = vmatpush.bf16.msra.mxu1 %v11351_v25  ;;  %v7900_v56 = vadd.f32 %v7899_v59, %v7887_v8  ;;  %v7912_v50 = vpop.f32.mrf.mxu3  ;;  %v11255_v25 = vor.u32 %v13415_v7, %v11252_v20  ;;  %v13537_v8 = vld [vmem:[%s14199_s17 + $0x17f4] sm:$0xf]  ;;  %v11604_v20 = vld [vmem:[%s14199_s17 + $0x16e8] sm:$0xf0]  ;;  %v13535_v59 = vld [vmem:[%s14199_s17 + $0x17e4] sm:$0xf] }
 0x3b2   : > { %8151 = vmatpush.bf16.msra.mxu2 %v11415_v32  ;;  %v7888_v32 = vpop.f32.mrf.mxu1  ;;  %v11743_v7 = vor.u32 %v13537_v8, %v11740_v37  ;;  %v16879_v22 = vld [vmem:[#allocation22_spill] sm:$0xff] }
 0x3b3   : > { %8164 = vmatpush.bf16.msra.mxu3 %v11479_v35  ;;  %v16402_v28 = vadd.f32 %v7912_v50, %v7900_v56  ;;  %v11244_v35 = vld [vmem:[%s14199_s17 + $0x1418] sm:$0xf0]  ;;  %v13485_v50 = vld [vmem:[%s14199_s17 + $0x1654] sm:$0xf] }
 0x3b4   : > { %8126 = vmatpush.bf16.msra.mxu0 %v11279_v61  ;;  %v11247_v12 = vor.u32 %v13413_v15, %v11244_v35  ;;  %v13411_v61 = vld [vmem:[%s14199_s17 + $0x1404] sm:$0xf]  ;;  %v11596_v32 = vld [vmem:[%s14199_s17 + $0x16d8] sm:$0xf0]  ;;  %v11535_v63 = vor.u32 %v13485_v50, %v11532_v62 }
 0x3b5   : > { %8139 = vmatpush.bf16.msra.mxu1 %v11343_v26  ;;  %v11236_v26 = vld [vmem:[%s14199_s17 + $0x1408] sm:$0xf0]  ;;  %v16880_v15 = vld [vmem:[#allocation23_spill] sm:$0xff]  ;;  %v16881_v35 = vld [vmem:[#allocation24_spill] sm:$0xff]  ;;  %v11599_v44 = vor.u32 %v13501_v23, %v11596_v32 }
 0x3b6   : > { %8152 = vmatpush.bf16.msra.mxu2 %v11407_v27  ;;  %v11311_v27 = vor.u32 %v13429_v29, %v11308_v42  ;;  %v13533_v29 = vld [vmem:[%s14199_s17 + $0x17d4] sm:$0xf]  ;;  %v16882_v42 = vld [vmem:[#allocation25_spill] sm:$0xff] }
 0x3b7   : > { %8165 = vmatpush.bf16.msra.mxu3 %v11471_v54  ;;  %v13443_v54 = vld [vmem:[%s14199_s17 + $0x1504] sm:$0xf]  ;;  %v13493_v32 = vld [vmem:[%s14199_s17 + $0x1694] sm:$0xf] }
 0x3b8   : > { %8127 = vmatpush.bf16.msra.mxu0 %v11271_v33  ;;  %v7901_v14 = vpop.f32.mrf.mxu2  ;;  %v13505_v33 = vld [vmem:[%s14199_s17 + $0x16f4] sm:$0xf] }
 0x3b9   : > { %8140 = vmatpush.bf16.msra.mxu1 %v11335_v36  ;;  %v7914_v34 = vpop.f32.mrf.mxu3  ;;  %v11239_v36 = vor.u32 %v13411_v61, %v11236_v26  ;;  %v13499_v61 = vld [vmem:[%s14199_s17 + $0x16c4] sm:$0xf] }
 0x3ba   : > { %8153 = vmatpush.bf16.msra.mxu2 %v11399_v40  ;;  %v11612_v40 = vld [vmem:[%s14199_s17 + $0x16f8] sm:$0xf0]  ;;  %v13497_v34 = vld [vmem:[%s14199_s17 + $0x16b4] sm:$0xf] }
 0x3bb   : > { %8166 = vmatpush.bf16.msra.mxu3 %v11463_v13  ;;  %v11367_v13 = vor.u32 %v13443_v54, %v11364_v6  ;;  %v11615_v17 = vor.u32 %v13505_v33, %v11612_v40  ;;  %v13531_v54 = vld [vmem:[%s14199_s17 + $0x17c4] sm:$0xf]  ;;  %v11516_v33 = vld [vmem:[%s14199_s17 + $0x1638] sm:$0xf0]  ;;  %v11583_v37 = vor.u32 %v13497_v34, %v11580_v52 }
 0x3bc   : > { %8128 = vmatpush.bf16.msra.mxu0 %v11263_v48  ;;  %v13487_v48 = vld [vmem:[%s14199_s17 + $0x1664] sm:$0xf]  ;;  %v11519_v8 = vor.u32 %v13481_v5, %v11516_v33  ;;  %v13585_v5 = vld [vmem:[%s14199_s17 + $0x1974] sm:$0xf]  ;;  %v11932_v33 = vld [vmem:[%s14199_s17 + $0x1978] sm:$0xf0] }
 0x3bd   : > { %8141 = vmatpush.bf16.msra.mxu1 %v11327_v2  ;;  %v11540_v2 = vld [vmem:[%s14199_s17 + $0x1668] sm:$0xf0]  ;;  %v11996_v52 = vld [vmem:[%s14199_s17 + $0x19f8] sm:$0xf0] }
 0x3be   : > { %8154 = vmatpush.bf16.msra.mxu2 %v11391_v39  ;;  %v13503_v39 = vld [vmem:[%s14199_s17 + $0x16e4] sm:$0xf]  ;;  %v11543_v55 = vor.u32 %v13487_v48, %v11540_v2 }
 0x3bf   : > { %8167 = vmatpush.bf16.msra.mxu3 %v11455_v49  ;;  %v11668_v49 = vld [vmem:[%s14199_s17 + $0x1768] sm:$0xf0]  ;;  %v11607_v19 = vor.u32 %v13503_v39, %v11604_v20 }
 0x3c0   : > { %8129 = vmatpush.bf16.msra.mxu0 %v11255_v25  ;;  %v11671_v56 = vor.u32 %v13519_v58, %v11668_v49  ;;  %v11735_v25 = vor.u32 %v13535_v59, %v11732_v60  ;;  %v11572_v39 = vld [vmem:[%s14199_s17 + $0x16a8] sm:$0xf0]  ;;  %v13527_v59 = vld [vmem:[%s14199_s17 + $0x17a4] sm:$0xf] }
 0x3c1   : > { %8142 = vmatpush.bf16.msra.mxu1 %v11319_v41  ;;  %v13517_v41 = vld [vmem:[%s14199_s17 + $0x1754] sm:$0xf]  ;;  %v11636_v20 = vld [vmem:[%s14199_s17 + $0x1728] sm:$0xf0] }
 0x3c2   : > { %8155 = vmatpush.bf16.msra.mxu2 %v11383_v31  ;;  %v11660_v31 = vld [vmem:[%s14199_s17 + $0x1758] sm:$0xf0]  ;;  %v11700_v60 = vld [vmem:[%s14199_s17 + $0x17a8] sm:$0xf0] }
 0x3c3   : > { %8168 = vmatpush.bf16.msra.mxu3 %v11447_v30  ;;  %v11724_v30 = vld [vmem:[%s14199_s17 + $0x17d8] sm:$0xf0]  ;;  %v11663_v18 = vor.u32 %v13517_v41, %v11660_v31  ;;  %v11703_v41 = vor.u32 %v13527_v59, %v11700_v60  ;;  %v13565_v60 = vld [vmem:[%s14199_s17 + $0x18d4] sm:$0xf] }
 0x3c4   : > { %8130 = vmatpush.bf16.msra.mxu0 %v11247_v12  ;;  %v11524_v12 = vld [vmem:[%s14199_s17 + $0x1648] sm:$0xf0]  ;;  %v11727_v26 = vor.u32 %v13533_v29, %v11724_v30  ;;  %v11564_v31 = vld [vmem:[%s14199_s17 + $0x1698] sm:$0xf0]  ;;  %v13525_v29 = vld [vmem:[%s14199_s17 + $0x1794] sm:$0xf] }
 0x3c5   : > { %8143 = vmatpush.bf16.msra.mxu1 %v11311_v27  ;;  %v11588_v27 = vld [vmem:[%s14199_s17 + $0x16c8] sm:$0xf0]  ;;  %v11527_v0 = vor.u32 %v13483_v11, %v11524_v12  ;;  %v11692_v30 = vld [vmem:[%s14199_s17 + $0x1798] sm:$0xf0]  ;;  %v13491_v12 = vld [vmem:[%s14199_s17 + $0x1684] sm:$0xf] }
 0x3c6   : > { %8156 = vmatpush.bf16.msra.mxu2 %v11375_v57  ;;  %v13515_v57 = vld [vmem:[%s14199_s17 + $0x1744] sm:$0xf]  ;;  %v11591_v14 = vor.u32 %v13499_v61, %v11588_v27  ;;  %v11556_v61 = vld [vmem:[%s14199_s17 + $0x1688] sm:$0xf0]  ;;  %v11695_v27 = vor.u32 %v13525_v29, %v11692_v30  ;;  %v11788_v59 = vld [vmem:[%s14199_s17 + $0x1858] sm:$0xf0] }
 0x3c7   : > { %8169 = vmatpush.bf16.msra.mxu3 %v11439_v21  ;;  %v11716_v21 = vld [vmem:[%s14199_s17 + $0x17c8] sm:$0xf0]  ;;  %v11655_v9 = vor.u32 %v13515_v57, %v11652_v1  ;;  %v13523_v1 = vld [vmem:[%s14199_s17 + $0x1784] sm:$0xf]  ;;  %v11559_v34 = vor.u32 %v13491_v12, %v11556_v61 }
 0x3c8   : > { %8131 = vmatpush.bf16.msra.mxu0 %v11239_v36  ;;  %v7925_v16 = vpop.f32.mrf.mxu0  ;;  %v11719_v36 = vor.u32 %v13531_v54, %v11716_v21  ;;  %v11620_v57 = vld [vmem:[%s14199_s17 + $0x1708] sm:$0xf0]  ;;  %v13553_v21 = vld [vmem:[%s14199_s17 + $0x1874] sm:$0xf]  ;;  %v13547_v30 = vld [vmem:[%s14199_s17 + $0x1844] sm:$0xf] }
 0x3c9   : > { %8144 = vmatpush.bf16.msra.mxu1 %v11303_v10  ;;  %v7926_v6 = vadd.f32 %v7925_v16, %v16402_v28  ;;  %v7938_v53 = vpop.f32.mrf.mxu1  ;;  %v11644_v28 = vld [vmem:[%s14199_s17 + $0x1738] sm:$0xf0]  ;;  %v13529_v10 = vld [vmem:[%s14199_s17 + $0x17b4] sm:$0xf]  ;;  %v11684_v16 = vld [vmem:[%s14199_s17 + $0x1788] sm:$0xf0] }
 0x3ca   : > { %8157 = vmatpush.bf16.msra.mxu2 %v11367_v13  ;;  %v11708_v13 = vld [vmem:[%s14199_s17 + $0x17b8] sm:$0xf0]  ;;  %v11908_v12 = vld [vmem:[%s14199_s17 + $0x1948] sm:$0xf0] }
 0x3cb   : > { %8170 = vmatpush.bf16.msra.mxu3 %v11431_v45  ;;  %8132 = vmatmul.bf16.vlgmr.msra.gmra.mxu0 %v16879_v22  ;;  %v7939_v40 = vadd.f32 %v7938_v53, %v7926_v6  ;;  %v11647_v45 = vor.u32 %v13513_v3, %v11644_v28  ;;  %v11711_v48 = vor.u32 %v13529_v10, %v11708_v13  ;;  %v13477_v22 = vld [vmem:[%s14199_s17 + $0x1614] sm:$0xf]  ;;  %v11804_v6 = vld [vmem:[%s14199_s17 + $0x1878] sm:$0xf0] }
 0x3cc   : > { %8176 = vmatpush.bf16.msrb.mxu0 %v11551_v43  ;;  %8145 = vmatmul.bf16.vlgmr.msra.gmra.mxu1 %v16881_v35  ;;  %v13479_v43 = vld [vmem:[%s14199_s17 + $0x1624] sm:$0xf]  ;;  %v11628_v35 = vld [vmem:[%s14199_s17 + $0x1718] sm:$0xf0]  ;;  %v11687_v3 = vor.u32 %v13523_v1, %v11684_v16  ;;  %v11807_v28 = vor.u32 %v13553_v21, %v11804_v6  ;;  %v11935_v13 = vor.u32 %v13585_v5, %v11932_v33  ;;  %v13545_v6 = vld [vmem:[%s14199_s17 + $0x1834] sm:$0xf] }
 0x3cd   : > { %8189 = vmatpush.bf16.msrb.mxu1 %v11615_v17  ;;  %8158 = vmatmul.bf16.vlgmr.msra.gmra.mxu2 %v16880_v15  ;;  %v11508_v17 = vld [vmem:[%s14199_s17 + $0x1628] sm:$0xf0]  ;;  %v13509_v15 = vld [vmem:[%s14199_s17 + $0x1714] sm:$0xf]  ;;  %v11836_v5 = vld [vmem:[%s14199_s17 + $0x18b8] sm:$0xf0] }
 0x3ce   : > { %8202 = vmatpush.bf16.msrb.mxu2 %v11679_v46  ;;  %8171 = vmatmul.bf16.vlgmr.msra.gmra.mxu3 %v16882_v42  ;;  %v13495_v46 = vld [vmem:[%s14199_s17 + $0x16a4] sm:$0xf]  ;;  %v11631_v11 = vor.u32 %v13509_v15, %v11628_v35  ;;  %v13577_v33 = vld [vmem:[%s14199_s17 + $0x1934] sm:$0xf] }
 0x3cf   : > { %8215 = vmatpush.bf16.msrb.mxu3 %v11743_v7  ;;  %v13511_v7 = vld [vmem:[%s14199_s17 + $0x1724] sm:$0xf]  ;;  %v11575_v62 = vor.u32 %v13495_v46, %v11572_v39  ;;  %v11988_v39 = vld [vmem:[%s14199_s17 + $0x19e8] sm:$0xf0] }
 0x3d0   : > { %8177 = vmatpush.bf16.msrb.mxu0 %v11543_v55  ;;  %v7951_v2 = vpop.f32.mrf.mxu2  ;;  %v7927_v55 = vpop.f32.mrf.mxu0  ;;  %v11639_v23 = vor.u32 %v13511_v7, %v11636_v20  ;;  %v13583_v46 = vld [vmem:[%s14199_s17 + $0x1964] sm:$0xf] }
 0x3d1   : > { %8190 = vmatpush.bf16.msrb.mxu1 %v11607_v19  ;;  %v7952_v58 = vadd.f32 %v7951_v2, %v7939_v40  ;;  %v7964_v49 = vpop.f32.mrf.mxu3  ;;  %v11511_v19 = vor.u32 %v13479_v43, %v11508_v17  ;;  %v13601_v40 = vld [vmem:[%s14199_s17 + $0x19f4] sm:$0xf]  ;;  %v11860_v17 = vld [vmem:[%s14199_s17 + $0x18e8] sm:$0xf0]  ;;  %v13599_v2 = vld [vmem:[%s14199_s17 + $0x19e4] sm:$0xf] }
 0x3d2   : > { %8203 = vmatpush.bf16.msrb.mxu2 %v11671_v56  ;;  %v7940_v56 = vpop.f32.mrf.mxu1  ;;  %v11999_v43 = vor.u32 %v13601_v40, %v11996_v52  ;;  %v16883_v55 = vld [vmem:[#allocation26_spill] sm:$0xff] }
 0x3d3   : > { %8216 = vmatpush.bf16.msrb.mxu3 %v11735_v25  ;;  %v16473_v50 = vadd.f32 %v7964_v49, %v7952_v58  ;;  %v11500_v25 = vld [vmem:[%s14199_s17 + $0x1618] sm:$0xf0]  ;;  %v13549_v49 = vld [vmem:[%s14199_s17 + $0x1854] sm:$0xf] }
 0x3d4   : > { %8178 = vmatpush.bf16.msrb.mxu0 %v11535_v63  ;;  %v11503_v42 = vor.u32 %v13477_v22, %v11500_v25  ;;  %v13475_v63 = vld [vmem:[%s14199_s17 + $0x1604] sm:$0xf]  ;;  %v11852_v56 = vld [vmem:[%s14199_s17 + $0x18d8] sm:$0xf0]  ;;  %v11791_v15 = vor.u32 %v13549_v49, %v11788_v59 }
 0x3d5   : > { %8191 = vmatpush.bf16.msrb.mxu1 %v11599_v44  ;;  %v11492_v44 = vld [vmem:[%s14199_s17 + $0x1608] sm:$0xf0]  ;;  %v16884_v22 = vld [vmem:[#allocation27_spill] sm:$0xff]  ;;  %v16885_v25 = vld [vmem:[#allocation28_spill] sm:$0xff]  ;;  %v11855_v35 = vor.u32 %v13565_v60, %v11852_v56 }
 0x3d6   : > { %8204 = vmatpush.bf16.msrb.mxu2 %v11663_v18  ;;  %v11567_v18 = vor.u32 %v13493_v32, %v11564_v31  ;;  %v13597_v32 = vld [vmem:[%s14199_s17 + $0x19d4] sm:$0xf]  ;;  %v16886_v31 = vld [vmem:[#allocation29_spill] sm:$0xff] }
 0x3d7   : > { %8217 = vmatpush.bf16.msrb.mxu3 %v11727_v26  ;;  %v13507_v26 = vld [vmem:[%s14199_s17 + $0x1704] sm:$0xf]  ;;  %v13557_v56 = vld [vmem:[%s14199_s17 + $0x1894] sm:$0xf] }
 0x3d8   : > { %8179 = vmatpush.bf16.msrb.mxu0 %v11527_v0  ;;  %v7953_v54 = vpop.f32.mrf.mxu2  ;;  %v13569_v0 = vld [vmem:[%s14199_s17 + $0x18f4] sm:$0xf] }
 0x3d9   : > { %8192 = vmatpush.bf16.msrb.mxu1 %v11591_v14  ;;  %v7966_v53 = vpop.f32.mrf.mxu3  ;;  %v11495_v14 = vor.u32 %v13475_v63, %v11492_v44  ;;  %v13563_v63 = vld [vmem:[%s14199_s17 + $0x18c4] sm:$0xf] }
 0x3da   : > { %8205 = vmatpush.bf16.msrb.mxu2 %v11655_v9  ;;  %v11868_v9 = vld [vmem:[%s14199_s17 + $0x18f8] sm:$0xf0]  ;;  %v13561_v53 = vld [vmem:[%s14199_s17 + $0x18b4] sm:$0xf] }
 0x3db   : > { %8218 = vmatpush.bf16.msrb.mxu3 %v11719_v36  ;;  %v11623_v36 = vor.u32 %v13507_v26, %v11620_v57  ;;  %v11871_v10 = vor.u32 %v13569_v0, %v11868_v9  ;;  %v13595_v26 = vld [vmem:[%s14199_s17 + $0x19c4] sm:$0xf]  ;;  %v11772_v0 = vld [vmem:[%s14199_s17 + $0x1838] sm:$0xf0]  ;;  %v11839_v52 = vor.u32 %v13561_v53, %v11836_v5 }
 0x3dc   : > { %8180 = vmatpush.bf16.msrb.mxu0 %v11519_v8  ;;  %v13551_v8 = vld [vmem:[%s14199_s17 + $0x1864] sm:$0xf]  ;;  %v11775_v40 = vor.u32 %v13545_v6, %v11772_v0  ;;  %v13649_v6 = vld [vmem:[%s14199_s17 + $0x1b74] sm:$0xf]  ;;  %v12188_v0 = vld [vmem:[%s14199_s17 + $0x1b78] sm:$0xf0] }
 0x3dd   : > { %8193 = vmatpush.bf16.msrb.mxu1 %v11583_v37  ;;  %v11796_v37 = vld [vmem:[%s14199_s17 + $0x1868] sm:$0xf0]  ;;  %v12252_v5 = vld [vmem:[%s14199_s17 + $0x1bf8] sm:$0xf0] }
 0x3de   : > { %8206 = vmatpush.bf16.msrb.mxu2 %v11647_v45  ;;  %v13567_v45 = vld [vmem:[%s14199_s17 + $0x18e4] sm:$0xf]  ;;  %v11799_v7 = vor.u32 %v13551_v8, %v11796_v37 }
 0x3df   : > { %8219 = vmatpush.bf16.msrb.mxu3 %v11711_v48  ;;  %v11924_v48 = vld [vmem:[%s14199_s17 + $0x1968] sm:$0xf0]  ;;  %v11863_v20 = vor.u32 %v13567_v45, %v11860_v17 }
 0x3e0   : > { %8181 = vmatpush.bf16.msrb.mxu0 %v11511_v19  ;;  %v11927_v58 = vor.u32 %v13583_v46, %v11924_v48  ;;  %v11991_v19 = vor.u32 %v13599_v2, %v11988_v39  ;;  %v11828_v45 = vld [vmem:[%s14199_s17 + $0x18a8] sm:$0xf0]  ;;  %v13591_v2 = vld [vmem:[%s14199_s17 + $0x19a4] sm:$0xf] }
 0x3e1   : > { %8194 = vmatpush.bf16.msrb.mxu1 %v11575_v62  ;;  %v13581_v62 = vld [vmem:[%s14199_s17 + $0x1954] sm:$0xf]  ;;  %v11892_v17 = vld [vmem:[%s14199_s17 + $0x1928] sm:$0xf0] }
 0x3e2   : > { %8207 = vmatpush.bf16.msrb.mxu2 %v11639_v23  ;;  %v11916_v23 = vld [vmem:[%s14199_s17 + $0x1958] sm:$0xf0]  ;;  %v11956_v39 = vld [vmem:[%s14199_s17 + $0x19a8] sm:$0xf0] }
 0x3e3   : > { %8220 = vmatpush.bf16.msrb.mxu3 %v11703_v41  ;;  %v11980_v41 = vld [vmem:[%s14199_s17 + $0x19d8] sm:$0xf0]  ;;  %v11919_v29 = vor.u32 %v13581_v62, %v11916_v23  ;;  %v11959_v62 = vor.u32 %v13591_v2, %v11956_v39  ;;  %v13629_v39 = vld [vmem:[%s14199_s17 + $0x1ad4] sm:$0xf] }
 0x3e4   : > { %8182 = vmatpush.bf16.msrb.mxu0 %v11503_v42  ;;  %v11780_v42 = vld [vmem:[%s14199_s17 + $0x1848] sm:$0xf0]  ;;  %v11983_v44 = vor.u32 %v13597_v32, %v11980_v41  ;;  %v11820_v23 = vld [vmem:[%s14199_s17 + $0x1898] sm:$0xf0]  ;;  %v13589_v32 = vld [vmem:[%s14199_s17 + $0x1994] sm:$0xf] }
 0x3e5   : > { %8195 = vmatpush.bf16.msrb.mxu1 %v11567_v18  ;;  %v11844_v18 = vld [vmem:[%s14199_s17 + $0x18c8] sm:$0xf0]  ;;  %v11783_v1 = vor.u32 %v13547_v30, %v11780_v42  ;;  %v11948_v41 = vld [vmem:[%s14199_s17 + $0x1998] sm:$0xf0]  ;;  %v13555_v42 = vld [vmem:[%s14199_s17 + $0x1884] sm:$0xf] }
 0x3e6   : > { %8208 = vmatpush.bf16.msrb.mxu2 %v11631_v11  ;;  %v13579_v11 = vld [vmem:[%s14199_s17 + $0x1944] sm:$0xf]  ;;  %v11847_v54 = vor.u32 %v13563_v63, %v11844_v18  ;;  %v11812_v63 = vld [vmem:[%s14199_s17 + $0x1888] sm:$0xf0]  ;;  %v11951_v18 = vor.u32 %v13589_v32, %v11948_v41  ;;  %v12044_v2 = vld [vmem:[%s14199_s17 + $0x1a58] sm:$0xf0] }
 0x3e7   : > { %8221 = vmatpush.bf16.msrb.mxu3 %v11695_v27  ;;  %v11972_v27 = vld [vmem:[%s14199_s17 + $0x19c8] sm:$0xf0]  ;;  %v11911_v21 = vor.u32 %v13579_v11, %v11908_v12  ;;  %v13587_v12 = vld [vmem:[%s14199_s17 + $0x1984] sm:$0xf]  ;;  %v11815_v53 = vor.u32 %v13555_v42, %v11812_v63 }
 0x3e8   : > { %8183 = vmatpush.bf16.msrb.mxu0 %v11495_v14  ;;  %v7977_v61 = vpop.f32.mrf.mxu0  ;;  %v11975_v14 = vor.u32 %v13595_v26, %v11972_v27  ;;  %v11876_v11 = vld [vmem:[%s14199_s17 + $0x1908] sm:$0xf0]  ;;  %v13617_v27 = vld [vmem:[%s14199_s17 + $0x1a74] sm:$0xf]  ;;  %v13611_v41 = vld [vmem:[%s14199_s17 + $0x1a44] sm:$0xf] }
 0x3e9   : > { %8196 = vmatpush.bf16.msrb.mxu1 %v11559_v34  ;;  %v7978_v57 = vadd.f32 %v7977_v61, %v16473_v50  ;;  %v7990_v16 = vpop.f32.mrf.mxu1  ;;  %v11900_v50 = vld [vmem:[%s14199_s17 + $0x1938] sm:$0xf0]  ;;  %v13593_v34 = vld [vmem:[%s14199_s17 + $0x19b4] sm:$0xf]  ;;  %v11940_v61 = vld [vmem:[%s14199_s17 + $0x1988] sm:$0xf0] }
 0x3ea   : > { %8209 = vmatpush.bf16.msrb.mxu2 %v11623_v36  ;;  %v11964_v36 = vld [vmem:[%s14199_s17 + $0x19b8] sm:$0xf0]  ;;  %v12164_v42 = vld [vmem:[%s14199_s17 + $0x1b48] sm:$0xf0] }
 0x3eb   : > { %8222 = vmatpush.bf16.msrb.mxu3 %v11687_v3  ;;  %8184 = vmatmul.bf16.vlgmr.msrb.gmra.mxu0 %v16883_v55  ;;  %v7991_v9 = vadd.f32 %v7990_v16, %v7978_v57  ;;  %v11903_v3 = vor.u32 %v13577_v33, %v11900_v50  ;;  %v11967_v8 = vor.u32 %v13593_v34, %v11964_v36  ;;  %v13541_v55 = vld [vmem:[%s14199_s17 + $0x1814] sm:$0xf]  ;;  %v12060_v57 = vld [vmem:[%s14199_s17 + $0x1a78] sm:$0xf0] }
 0x3ec   : > { %8228 = vmatpush.bf16.msra.mxu0 %v11807_v28  ;;  %8197 = vmatmul.bf16.vlgmr.msrb.gmra.mxu1 %v16885_v25  ;;  %v13543_v28 = vld [vmem:[%s14199_s17 + $0x1824] sm:$0xf]  ;;  %v11884_v25 = vld [vmem:[%s14199_s17 + $0x1918] sm:$0xf0]  ;;  %v11943_v33 = vor.u32 %v13587_v12, %v11940_v61  ;;  %v12063_v50 = vor.u32 %v13617_v27, %v12060_v57  ;;  %v12191_v36 = vor.u32 %v13649_v6, %v12188_v0  ;;  %v13609_v57 = vld [vmem:[%s14199_s17 + $0x1a34] sm:$0xf] }
 0x3ed   : > { %8241 = vmatpush.bf16.msra.mxu1 %v11871_v10  ;;  %8210 = vmatmul.bf16.vlgmr.msrb.gmra.mxu2 %v16884_v22  ;;  %v11764_v10 = vld [vmem:[%s14199_s17 + $0x1828] sm:$0xf0]  ;;  %v13573_v22 = vld [vmem:[%s14199_s17 + $0x1914] sm:$0xf]  ;;  %v12092_v6 = vld [vmem:[%s14199_s17 + $0x1ab8] sm:$0xf0] }
 0x3ee   : > { %8254 = vmatpush.bf16.msra.mxu2 %v11935_v13  ;;  %8223 = vmatmul.bf16.vlgmr.msrb.gmra.mxu3 %v16886_v31  ;;  %v13559_v13 = vld [vmem:[%s14199_s17 + $0x18a4] sm:$0xf]  ;;  %v11887_v30 = vor.u32 %v13573_v22, %v11884_v25  ;;  %v13641_v0 = vld [vmem:[%s14199_s17 + $0x1b34] sm:$0xf] }
 0x3ef   : > { %8267 = vmatpush.bf16.msra.mxu3 %v11999_v43  ;;  %v13575_v43 = vld [vmem:[%s14199_s17 + $0x1924] sm:$0xf]  ;;  %v11831_v59 = vor.u32 %v13559_v13, %v11828_v45  ;;  %v12244_v45 = vld [vmem:[%s14199_s17 + $0x1be8] sm:$0xf0] }
 0x3f0   : > { %8229 = vmatpush.bf16.msra.mxu0 %v11799_v7  ;;  %v8003_v37 = vpop.f32.mrf.mxu2  ;;  %v7979_v7 = vpop.f32.mrf.mxu0  ;;  %v11895_v60 = vor.u32 %v13575_v43, %v11892_v17  ;;  %v13647_v13 = vld [vmem:[%s14199_s17 + $0x1b64] sm:$0xf] }
 0x3f1   : > { %8242 = vmatpush.bf16.msra.mxu1 %v11863_v20  ;;  %v8004_v46 = vadd.f32 %v8003_v37, %v7991_v9  ;;  %v8016_v48 = vpop.f32.mrf.mxu3  ;;  %v11767_v20 = vor.u32 %v13543_v28, %v11764_v10  ;;  %v13665_v9 = vld [vmem:[%s14199_s17 + $0x1bf4] sm:$0xf]  ;;  %v12116_v10 = vld [vmem:[%s14199_s17 + $0x1ae8] sm:$0xf0]  ;;  %v13663_v37 = vld [vmem:[%s14199_s17 + $0x1be4] sm:$0xf] }
 0x3f2   : > { %8255 = vmatpush.bf16.msra.mxu2 %v11927_v58  ;;  %v7992_v58 = vpop.f32.mrf.mxu1  ;;  %v12255_v28 = vor.u32 %v13665_v9, %v12252_v5  ;;  %v16887_v7 = vld [vmem:[#allocation30_spill] sm:$0xff] }
 0x3f3   : > { %8268 = vmatpush.bf16.msra.mxu3 %v11991_v19  ;;  %v16544_v49 = vadd.f32 %v8016_v48, %v8004_v46  ;;  %v11756_v19 = vld [vmem:[%s14199_s17 + $0x1818] sm:$0xf0]  ;;  %v13613_v48 = vld [vmem:[%s14199_s17 + $0x1a54] sm:$0xf] }
 0x3f4   : > { %8230 = vmatpush.bf16.msra.mxu0 %v11791_v15  ;;  %v11759_v31 = vor.u32 %v13541_v55, %v11756_v19  ;;  %v13539_v15 = vld [vmem:[%s14199_s17 + $0x1804] sm:$0xf]  ;;  %v12108_v58 = vld [vmem:[%s14199_s17 + $0x1ad8] sm:$0xf0]  ;;  %v12047_v22 = vor.u32 %v13613_v48, %v12044_v2 }
 0x3f5   : > { %8243 = vmatpush.bf16.msra.mxu1 %v11855_v35  ;;  %v11748_v35 = vld [vmem:[%s14199_s17 + $0x1808] sm:$0xf0]  ;;  %v16888_v55 = vld [vmem:[#allocation31_spill] sm:$0xff]  ;;  %v16889_v19 = vld [vmem:[#allocation32_spill] sm:$0xff]  ;;  %v12111_v25 = vor.u32 %v13629_v39, %v12108_v58 }
 0x3f6   : > { %8256 = vmatpush.bf16.msra.mxu2 %v11919_v29  ;;  %v11823_v29 = vor.u32 %v13557_v56, %v11820_v23  ;;  %v13661_v56 = vld [vmem:[%s14199_s17 + $0x1bd4] sm:$0xf]  ;;  %v16890_v23 = vld [vmem:[#allocation33_spill] sm:$0xff] }
 0x3f7   : > { %8269 = vmatpush.bf16.msra.mxu3 %v11983_v44  ;;  %v13571_v44 = vld [vmem:[%s14199_s17 + $0x1904] sm:$0xf]  ;;  %v13621_v58 = vld [vmem:[%s14199_s17 + $0x1a94] sm:$0xf] }
 0x3f8   : > { %8231 = vmatpush.bf16.msra.mxu0 %v11783_v1  ;;  %v8005_v26 = vpop.f32.mrf.mxu2  ;;  %v13633_v1 = vld [vmem:[%s14199_s17 + $0x1af4] sm:$0xf] }
 0x3f9   : > { %8244 = vmatpush.bf16.msra.mxu1 %v11847_v54  ;;  %v8018_v16 = vpop.f32.mrf.mxu3  ;;  %v11751_v54 = vor.u32 %v13539_v15, %v11748_v35  ;;  %v13627_v15 = vld [vmem:[%s14199_s17 + $0x1ac4] sm:$0xf] }
 0x3fa   : > { %8257 = vmatpush.bf16.msra.mxu2 %v11911_v21  ;;  %v12124_v21 = vld [vmem:[%s14199_s17 + $0x1af8] sm:$0xf0]  ;;  %v13625_v16 = vld [vmem:[%s14199_s17 + $0x1ab4] sm:$0xf] }
 0x3fb   : > { %8270 = vmatpush.bf16.msra.mxu3 %v11975_v14  ;;  %v11879_v14 = vor.u32 %v13571_v44, %v11876_v11  ;;  %v12127_v34 = vor.u32 %v13633_v1, %v12124_v21  ;;  %v13659_v44 = vld [vmem:[%s14199_s17 + $0x1bc4] sm:$0xf]  ;;  %v12028_v1 = vld [vmem:[%s14199_s17 + $0x1a38] sm:$0xf0]  ;;  %v12095_v5 = vor.u32 %v13625_v16, %v12092_v6 }
 0x3fc   : > { %8232 = vmatpush.bf16.msra.mxu0 %v11775_v40  ;;  %v13615_v40 = vld [vmem:[%s14199_s17 + $0x1a64] sm:$0xf]  ;;  %v12031_v9 = vor.u32 %v13609_v57, %v12028_v1  ;;  %v13713_v57 = vld [vmem:[%s14199_s17 + $0x1d74] sm:$0xf]  ;;  %v12444_v1 = vld [vmem:[%s14199_s17 + $0x1d78] sm:$0xf0] }
 0x3fd   : > { %8245 = vmatpush.bf16.msra.mxu1 %v11839_v52  ;;  %v12052_v52 = vld [vmem:[%s14199_s17 + $0x1a68] sm:$0xf0]  ;;  %v12508_v6 = vld [vmem:[%s14199_s17 + $0x1df8] sm:$0xf0] }
 0x3fe   : > { %8258 = vmatpush.bf16.msra.mxu2 %v11903_v3  ;;  %v13631_v3 = vld [vmem:[%s14199_s17 + $0x1ae4] sm:$0xf]  ;;  %v12055_v43 = vor.u32 %v13615_v40, %v12052_v52 }
 0x3ff   : > { %8271 = vmatpush.bf16.msra.mxu3 %v11967_v8  ;;  %v12180_v8 = vld [vmem:[%s14199_s17 + $0x1b68] sm:$0xf0]  ;;  %v12119_v17 = vor.u32 %v13631_v3, %v12116_v10 }
 0x400   : > { %8233 = vmatpush.bf16.msra.mxu0 %v11767_v20  ;;  %v12183_v46 = vor.u32 %v13647_v13, %v12180_v8  ;;  %v12247_v20 = vor.u32 %v13663_v37, %v12244_v45  ;;  %v12084_v3 = vld [vmem:[%s14199_s17 + $0x1aa8] sm:$0xf0]  ;;  %v13655_v37 = vld [vmem:[%s14199_s17 + $0x1ba4] sm:$0xf] }
 0x401   : > { %8246 = vmatpush.bf16.msra.mxu1 %v11831_v59  ;;  %v13645_v59 = vld [vmem:[%s14199_s17 + $0x1b54] sm:$0xf]  ;;  %v12148_v10 = vld [vmem:[%s14199_s17 + $0x1b28] sm:$0xf0] }
 0x402   : > { %8259 = vmatpush.bf16.msra.mxu2 %v11895_v60  ;;  %v12172_v60 = vld [vmem:[%s14199_s17 + $0x1b58] sm:$0xf0]  ;;  %v12212_v45 = vld [vmem:[%s14199_s17 + $0x1ba8] sm:$0xf0] }
 0x403   : > { %8272 = vmatpush.bf16.msra.mxu3 %v11959_v62  ;;  %v12236_v62 = vld [vmem:[%s14199_s17 + $0x1bd8] sm:$0xf0]  ;;  %v12175_v32 = vor.u32 %v13645_v59, %v12172_v60  ;;  %v12215_v59 = vor.u32 %v13655_v37, %v12212_v45  ;;  %v13693_v45 = vld [vmem:[%s14199_s17 + $0x1cd4] sm:$0xf] }
 0x404   : > { %8234 = vmatpush.bf16.msra.mxu0 %v11759_v31  ;;  %v12036_v31 = vld [vmem:[%s14199_s17 + $0x1a48] sm:$0xf0]  ;;  %v12239_v35 = vor.u32 %v13661_v56, %v12236_v62  ;;  %v12076_v60 = vld [vmem:[%s14199_s17 + $0x1a98] sm:$0xf0]  ;;  %v13653_v56 = vld [vmem:[%s14199_s17 + $0x1b94] sm:$0xf] }
 0x405   : > { %8247 = vmatpush.bf16.msra.mxu1 %v11823_v29  ;;  %v12100_v29 = vld [vmem:[%s14199_s17 + $0x1ac8] sm:$0xf0]  ;;  %v12039_v12 = vor.u32 %v13611_v41, %v12036_v31  ;;  %v12204_v62 = vld [vmem:[%s14199_s17 + $0x1b98] sm:$0xf0]  ;;  %v13619_v31 = vld [vmem:[%s14199_s17 + $0x1a84] sm:$0xf] }
 0x406   : > { %8260 = vmatpush.bf16.msra.mxu2 %v11887_v30  ;;  %v13643_v30 = vld [vmem:[%s14199_s17 + $0x1b44] sm:$0xf]  ;;  %v12103_v26 = vor.u32 %v13627_v15, %v12100_v29  ;;  %v12068_v15 = vld [vmem:[%s14199_s17 + $0x1a88] sm:$0xf0]  ;;  %v12207_v29 = vor.u32 %v13653_v56, %v12204_v62  ;;  %v12300_v37 = vld [vmem:[%s14199_s17 + $0x1c58] sm:$0xf0] }
 0x407   : > { %8273 = vmatpush.bf16.msra.mxu3 %v11951_v18  ;;  %v12228_v18 = vld [vmem:[%s14199_s17 + $0x1bc8] sm:$0xf0]  ;;  %v12167_v27 = vor.u32 %v13643_v30, %v12164_v42  ;;  %v13651_v42 = vld [vmem:[%s14199_s17 + $0x1b84] sm:$0xf]  ;;  %v12071_v16 = vor.u32 %v13619_v31, %v12068_v15 }
 0x408   : > { %8235 = vmatpush.bf16.msra.mxu0 %v11751_v54  ;;  %v8029_v63 = vpop.f32.mrf.mxu0  ;;  %v12231_v54 = vor.u32 %v13659_v44, %v12228_v18  ;;  %v12132_v30 = vld [vmem:[%s14199_s17 + $0x1b08] sm:$0xf0]  ;;  %v13681_v18 = vld [vmem:[%s14199_s17 + $0x1c74] sm:$0xf]  ;;  %v13675_v62 = vld [vmem:[%s14199_s17 + $0x1c44] sm:$0xf] }
 0x409   : > { %8248 = vmatpush.bf16.msra.mxu1 %v11815_v53  ;;  %v8030_v11 = vadd.f32 %v8029_v63, %v16544_v49  ;;  %v8042_v61 = vpop.f32.mrf.mxu1  ;;  %v12156_v49 = vld [vmem:[%s14199_s17 + $0x1b38] sm:$0xf0]  ;;  %v13657_v53 = vld [vmem:[%s14199_s17 + $0x1bb4] sm:$0xf]  ;;  %v12196_v63 = vld [vmem:[%s14199_s17 + $0x1b88] sm:$0xf0] }
 0x40a   : > { %8261 = vmatpush.bf16.msra.mxu2 %v11879_v14  ;;  %v12220_v14 = vld [vmem:[%s14199_s17 + $0x1bb8] sm:$0xf0]  ;;  %v12420_v31 = vld [vmem:[%s14199_s17 + $0x1d48] sm:$0xf0] }
 0x40b   : > { %8274 = vmatpush.bf16.msra.mxu3 %v11943_v33  ;;  %8236 = vmatmul.bf16.vlgmr.msra.gmra.mxu0 %v16887_v7  ;;  %v8043_v21 = vadd.f32 %v8042_v61, %v8030_v11  ;;  %v12159_v33 = vor.u32 %v13641_v0, %v12156_v49  ;;  %v12223_v40 = vor.u32 %v13657_v53, %v12220_v14  ;;  %v13605_v7 = vld [vmem:[%s14199_s17 + $0x1a14] sm:$0xf]  ;;  %v12316_v11 = vld [vmem:[%s14199_s17 + $0x1c78] sm:$0xf0] }
 0x40c   : > { %8280 = vmatpush.bf16.msrb.mxu0 %v12063_v50  ;;  %8249 = vmatmul.bf16.vlgmr.msra.gmra.mxu1 %v16889_v19  ;;  %v13607_v50 = vld [vmem:[%s14199_s17 + $0x1a24] sm:$0xf]  ;;  %v12140_v19 = vld [vmem:[%s14199_s17 + $0x1b18] sm:$0xf0]  ;;  %v12199_v0 = vor.u32 %v13651_v42, %v12196_v63  ;;  %v12319_v49 = vor.u32 %v13681_v18, %v12316_v11  ;;  %v12447_v14 = vor.u32 %v13713_v57, %v12444_v1  ;;  %v13673_v11 = vld [vmem:[%s14199_s17 + $0x1c34] sm:$0xf] }
 0x40d   : > { %8293 = vmatpush.bf16.msrb.mxu1 %v12127_v34  ;;  %8262 = vmatmul.bf16.vlgmr.msra.gmra.mxu2 %v16888_v55  ;;  %v12020_v34 = vld [vmem:[%s14199_s17 + $0x1a28] sm:$0xf0]  ;;  %v13637_v55 = vld [vmem:[%s14199_s17 + $0x1b14] sm:$0xf]  ;;  %v12348_v57 = vld [vmem:[%s14199_s17 + $0x1cb8] sm:$0xf0] }
 0x40e   : > { %8306 = vmatpush.bf16.msrb.mxu2 %v12191_v36  ;;  %8275 = vmatmul.bf16.vlgmr.msra.gmra.mxu3 %v16890_v23  ;;  %v13623_v36 = vld [vmem:[%s14199_s17 + $0x1aa4] sm:$0xf]  ;;  %v12143_v41 = vor.u32 %v13637_v55, %v12140_v19  ;;  %v13705_v1 = vld [vmem:[%s14199_s17 + $0x1d34] sm:$0xf] }
 0x40f   : > { %8319 = vmatpush.bf16.msrb.mxu3 %v12255_v28  ;;  %v13639_v28 = vld [vmem:[%s14199_s17 + $0x1b24] sm:$0xf]  ;;  %v12087_v2 = vor.u32 %v13623_v36, %v12084_v3  ;;  %v12500_v3 = vld [vmem:[%s14199_s17 + $0x1de8] sm:$0xf0] }
 0x410   : > { %8281 = vmatpush.bf16.msrb.mxu0 %v12055_v43  ;;  %v8055_v52 = vpop.f32.mrf.mxu2  ;;  %v8031_v43 = vpop.f32.mrf.mxu0  ;;  %v12151_v39 = vor.u32 %v13639_v28, %v12148_v10  ;;  %v13711_v36 = vld [vmem:[%s14199_s17 + $0x1d64] sm:$0xf] }
 0x411   : > { %8294 = vmatpush.bf16.msrb.mxu1 %v12119_v17  ;;  %v8056_v13 = vadd.f32 %v8055_v52, %v8043_v21  ;;  %v8068_v8 = vpop.f32.mrf.mxu3  ;;  %v12023_v17 = vor.u32 %v13607_v50, %v12020_v34  ;;  %v13729_v21 = vld [vmem:[%s14199_s17 + $0x1df4] sm:$0xf]  ;;  %v12372_v34 = vld [vmem:[%s14199_s17 + $0x1ce8] sm:$0xf0]  ;;  %v13727_v52 = vld [vmem:[%s14199_s17 + $0x1de4] sm:$0xf] }
 0x412   : > { %8307 = vmatpush.bf16.msrb.mxu2 %v12183_v46  ;;  %v8044_v46 = vpop.f32.mrf.mxu1  ;;  %v12511_v50 = vor.u32 %v13729_v21, %v12508_v6  ;;  %v16891_v43 = vld [vmem:[#allocation34_spill] sm:$0xff] }
 0x413   : > { %8320 = vmatpush.bf16.msrb.mxu3 %v12247_v20  ;;  %v16615_v48 = vadd.f32 %v8068_v8, %v8056_v13  ;;  %v12012_v20 = vld [vmem:[%s14199_s17 + $0x1a18] sm:$0xf0]  ;;  %v13677_v8 = vld [vmem:[%s14199_s17 + $0x1c54] sm:$0xf] }
 0x414   : > { %8282 = vmatpush.bf16.msrb.mxu0 %v12047_v22  ;;  %v12015_v23 = vor.u32 %v13605_v7, %v12012_v20  ;;  %v13603_v22 = vld [vmem:[%s14199_s17 + $0x1a04] sm:$0xf]  ;;  %v12364_v46 = vld [vmem:[%s14199_s17 + $0x1cd8] sm:$0xf0]  ;;  %v12303_v55 = vor.u32 %v13677_v8, %v12300_v37 }
 0x415   : > { %8295 = vmatpush.bf16.msrb.mxu1 %v12111_v25  ;;  %v12004_v25 = vld [vmem:[%s14199_s17 + $0x1a08] sm:$0xf0]  ;;  %v16892_v7 = vld [vmem:[#allocation35_spill] sm:$0xff]  ;;  %v16893_v20 = vld [vmem:[#allocation36_spill] sm:$0xff]  ;;  %v12367_v19 = vor.u32 %v13693_v45, %v12364_v46 }
 0x416   : > { %8308 = vmatpush.bf16.msrb.mxu2 %v12175_v32  ;;  %v12079_v32 = vor.u32 %v13621_v58, %v12076_v60  ;;  %v13725_v58 = vld [vmem:[%s14199_s17 + $0x1dd4] sm:$0xf]  ;;  %v16894_v60 = vld [vmem:[#allocation37_spill] sm:$0xff] }
 0x417   : > { %8321 = vmatpush.bf16.msrb.mxu3 %v12239_v35  ;;  %v13635_v35 = vld [vmem:[%s14199_s17 + $0x1b04] sm:$0xf]  ;;  %v13685_v46 = vld [vmem:[%s14199_s17 + $0x1c94] sm:$0xf] }
 0x418   : > { %8283 = vmatpush.bf16.msrb.mxu0 %v12039_v12  ;;  %v8057_v44 = vpop.f32.mrf.mxu2  ;;  %v13697_v12 = vld [vmem:[%s14199_s17 + $0x1cf4] sm:$0xf] }
 0x419   : > { %8296 = vmatpush.bf16.msrb.mxu1 %v12103_v26  ;;  %v8070_v61 = vpop.f32.mrf.mxu3  ;;  %v12007_v26 = vor.u32 %v13603_v22, %v12004_v25  ;;  %v13691_v22 = vld [vmem:[%s14199_s17 + $0x1cc4] sm:$0xf] }
 0x41a   : > { %8309 = vmatpush.bf16.msrb.mxu2 %v12167_v27  ;;  %v12380_v27 = vld [vmem:[%s14199_s17 + $0x1cf8] sm:$0xf0]  ;;  %v13689_v61 = vld [vmem:[%s14199_s17 + $0x1cb4] sm:$0xf] }
 0x41b   : > { %8322 = vmatpush.bf16.msrb.mxu3 %v12231_v54  ;;  %v12135_v54 = vor.u32 %v13635_v35, %v12132_v30  ;;  %v12383_v53 = vor.u32 %v13697_v12, %v12380_v27  ;;  %v13723_v35 = vld [vmem:[%s14199_s17 + $0x1dc4] sm:$0xf]  ;;  %v12284_v12 = vld [vmem:[%s14199_s17 + $0x1c38] sm:$0xf0]  ;;  %v12351_v6 = vor.u32 %v13689_v61, %v12348_v57 }
 0x41c   : > { %8284 = vmatpush.bf16.msrb.mxu0 %v12031_v9  ;;  %v13679_v9 = vld [vmem:[%s14199_s17 + $0x1c64] sm:$0xf]  ;;  %v12287_v21 = vor.u32 %v13673_v11, %v12284_v12  ;;  %v13777_v11 = vld [vmem:[%s14199_s17 + $0x1f74] sm:$0xf]  ;;  %v12700_v12 = vld [vmem:[%s14199_s17 + $0x1f78] sm:$0xf0] }
 0x41d   : > { %8297 = vmatpush.bf16.msrb.mxu1 %v12095_v5  ;;  %v12308_v5 = vld [vmem:[%s14199_s17 + $0x1c68] sm:$0xf0]  ;;  %v12764_v57 = vld [vmem:[%s14199_s17 + $0x1ff8] sm:$0xf0] }
 0x41e   : > { %8310 = vmatpush.bf16.msrb.mxu2 %v12159_v33  ;;  %v13695_v33 = vld [vmem:[%s14199_s17 + $0x1ce4] sm:$0xf]  ;;  %v12311_v28 = vor.u32 %v13679_v9, %v12308_v5 }
 0x41f   : > { %8323 = vmatpush.bf16.msrb.mxu3 %v12223_v40  ;;  %v12436_v40 = vld [vmem:[%s14199_s17 + $0x1d68] sm:$0xf0]  ;;  %v12375_v10 = vor.u32 %v13695_v33, %v12372_v34 }
 0x420   : > { %8285 = vmatpush.bf16.msrb.mxu0 %v12023_v17  ;;  %v12439_v13 = vor.u32 %v13711_v36, %v12436_v40  ;;  %v12503_v17 = vor.u32 %v13727_v52, %v12500_v3  ;;  %v12340_v33 = vld [vmem:[%s14199_s17 + $0x1ca8] sm:$0xf0]  ;;  %v13719_v52 = vld [vmem:[%s14199_s17 + $0x1da4] sm:$0xf] }
 0x421   : > { %8298 = vmatpush.bf16.msrb.mxu1 %v12087_v2  ;;  %v13709_v2 = vld [vmem:[%s14199_s17 + $0x1d54] sm:$0xf]  ;;  %v12404_v34 = vld [vmem:[%s14199_s17 + $0x1d28] sm:$0xf0] }
 0x422   : > { %8311 = vmatpush.bf16.msrb.mxu2 %v12151_v39  ;;  %v12428_v39 = vld [vmem:[%s14199_s17 + $0x1d58] sm:$0xf0]  ;;  %v12468_v3 = vld [vmem:[%s14199_s17 + $0x1da8] sm:$0xf0] }
 0x423   : > { %8324 = vmatpush.bf16.msrb.mxu3 %v12215_v59  ;;  %v12492_v59 = vld [vmem:[%s14199_s17 + $0x1dd8] sm:$0xf0]  ;;  %v12431_v56 = vor.u32 %v13709_v2, %v12428_v39  ;;  %v12471_v2 = vor.u32 %v13719_v52, %v12468_v3  ;;  %v13757_v3 = vld [vmem:[%s14199_s17 + $0x1ed4] sm:$0xf] }
 0x424   : > { %8286 = vmatpush.bf16.msrb.mxu0 %v12015_v23  ;;  %v12292_v23 = vld [vmem:[%s14199_s17 + $0x1c48] sm:$0xf0]  ;;  %v12495_v25 = vor.u32 %v13725_v58, %v12492_v59  ;;  %v12332_v39 = vld [vmem:[%s14199_s17 + $0x1c98] sm:$0xf0]  ;;  %v13717_v58 = vld [vmem:[%s14199_s17 + $0x1d94] sm:$0xf] }
 0x425   : > { %8299 = vmatpush.bf16.msrb.mxu1 %v12079_v32  ;;  %v12356_v32 = vld [vmem:[%s14199_s17 + $0x1cc8] sm:$0xf0]  ;;  %v12295_v42 = vor.u32 %v13675_v62, %v12292_v23  ;;  %v12460_v59 = vld [vmem:[%s14199_s17 + $0x1d98] sm:$0xf0]  ;;  %v13683_v23 = vld [vmem:[%s14199_s17 + $0x1c84] sm:$0xf] }
 0x426   : > { %8312 = vmatpush.bf16.msrb.mxu2 %v12143_v41  ;;  %v13707_v41 = vld [vmem:[%s14199_s17 + $0x1d44] sm:$0xf]  ;;  %v12359_v44 = vor.u32 %v13691_v22, %v12356_v32  ;;  %v12324_v22 = vld [vmem:[%s14199_s17 + $0x1c88] sm:$0xf0]  ;;  %v12463_v32 = vor.u32 %v13717_v58, %v12460_v59  ;;  %v12556_v52 = vld [vmem:[%s14199_s17 + $0x1e58] sm:$0xf0] }
 0x427   : > { %8325 = vmatpush.bf16.msrb.mxu3 %v12207_v29  ;;  %v12484_v29 = vld [vmem:[%s14199_s17 + $0x1dc8] sm:$0xf0]  ;;  %v12423_v18 = vor.u32 %v13707_v41, %v12420_v31  ;;  %v13715_v31 = vld [vmem:[%s14199_s17 + $0x1d84] sm:$0xf]  ;;  %v12327_v61 = vor.u32 %v13683_v23, %v12324_v22 }
 0x428   : > { %8287 = vmatpush.bf16.msrb.mxu0 %v12007_v26  ;;  %v8081_v15 = vpop.f32.mrf.mxu0  ;;  %v12487_v26 = vor.u32 %v13723_v35, %v12484_v29  ;;  %v12388_v41 = vld [vmem:[%s14199_s17 + $0x1d08] sm:$0xf0]  ;;  %v13745_v29 = vld [vmem:[%s14199_s17 + $0x1e74] sm:$0xf]  ;;  %v13739_v59 = vld [vmem:[%s14199_s17 + $0x1e44] sm:$0xf] }
 0x429   : > { %8300 = vmatpush.bf16.msrb.mxu1 %v12071_v16  ;;  %v8082_v30 = vadd.f32 %v8081_v15, %v16615_v48  ;;  %v8094_v63 = vpop.f32.mrf.mxu1  ;;  %v12412_v48 = vld [vmem:[%s14199_s17 + $0x1d38] sm:$0xf0]  ;;  %v13721_v16 = vld [vmem:[%s14199_s17 + $0x1db4] sm:$0xf]  ;;  %v12452_v15 = vld [vmem:[%s14199_s17 + $0x1d88] sm:$0xf0] }
 0x42a   : > { %8313 = vmatpush.bf16.msrb.mxu2 %v12135_v54  ;;  %v12476_v54 = vld [vmem:[%s14199_s17 + $0x1db8] sm:$0xf0]  ;;  %v12676_v23 = vld [vmem:[%s14199_s17 + $0x1f48] sm:$0xf0] }
 0x42b   : > { %8326 = vmatpush.bf16.msrb.mxu3 %v12199_v0  ;;  %8288 = vmatmul.bf16.vlgmr.msrb.gmra.mxu0 %v16891_v43  ;;  %v8095_v27 = vadd.f32 %v8094_v63, %v8082_v30  ;;  %v12415_v0 = vor.u32 %v13705_v1, %v12412_v48  ;;  %v12479_v9 = vor.u32 %v13721_v16, %v12476_v54  ;;  %v13669_v43 = vld [vmem:[%s14199_s17 + $0x1c14] sm:$0xf]  ;;  %v12572_v30 = vld [vmem:[%s14199_s17 + $0x1e78] sm:$0xf0] }
 0x42c   : > { %8332 = vmatpush.bf16.msra.mxu0 %v12319_v49  ;;  %8301 = vmatmul.bf16.vlgmr.msrb.gmra.mxu1 %v16893_v20  ;;  %v13671_v49 = vld [vmem:[%s14199_s17 + $0x1c24] sm:$0xf]  ;;  %v12396_v20 = vld [vmem:[%s14199_s17 + $0x1d18] sm:$0xf0]  ;;  %v12455_v1 = vor.u32 %v13715_v31, %v12452_v15  ;;  %v12575_v48 = vor.u32 %v13745_v29, %v12572_v30  ;;  %v12703_v54 = vor.u32 %v13777_v11, %v12700_v12  ;;  %v13737_v30 = vld [vmem:[%s14199_s17 + $0x1e34] sm:$0xf] }
 0x42d   : > { %8345 = vmatpush.bf16.msra.mxu1 %v12383_v53  ;;  %8314 = vmatmul.bf16.vlgmr.msrb.gmra.mxu2 %v16892_v7  ;;  %v12276_v53 = vld [vmem:[%s14199_s17 + $0x1c28] sm:$0xf0]  ;;  %v13701_v7 = vld [vmem:[%s14199_s17 + $0x1d14] sm:$0xf]  ;;  %v12604_v11 = vld [vmem:[%s14199_s17 + $0x1eb8] sm:$0xf0] }
 0x42e   : > { %8358 = vmatpush.bf16.msra.mxu2 %v12447_v14  ;;  %8327 = vmatmul.bf16.vlgmr.msrb.gmra.mxu3 %v16894_v60  ;;  %v13687_v14 = vld [vmem:[%s14199_s17 + $0x1ca4] sm:$0xf]  ;;  %v12399_v62 = vor.u32 %v13701_v7, %v12396_v20  ;;  %v13769_v12 = vld [vmem:[%s14199_s17 + $0x1f34] sm:$0xf] }
 0x42f   : > { %8371 = vmatpush.bf16.msra.mxu3 %v12511_v50  ;;  %v13703_v50 = vld [vmem:[%s14199_s17 + $0x1d24] sm:$0xf]  ;;  %v12343_v37 = vor.u32 %v13687_v14, %v12340_v33  ;;  %v12756_v33 = vld [vmem:[%s14199_s17 + $0x1fe8] sm:$0xf0] }
 0x430   : > { %8333 = vmatpush.bf16.msra.mxu0 %v12311_v28  ;;  %v8107_v5 = vpop.f32.mrf.mxu2  ;;  %v8083_v28 = vpop.f32.mrf.mxu0  ;;  %v12407_v45 = vor.u32 %v13703_v50, %v12404_v34  ;;  %v13775_v14 = vld [vmem:[%s14199_s17 + $0x1f64] sm:$0xf] }
 0x431   : > { %8346 = vmatpush.bf16.msra.mxu1 %v12375_v10  ;;  %v8108_v36 = vadd.f32 %v8107_v5, %v8095_v27  ;;  %v8120_v40 = vpop.f32.mrf.mxu3  ;;  %v12279_v10 = vor.u32 %v13671_v49, %v12276_v53  ;;  %v13793_v27 = vld [vmem:[%s14199_s17 + $0x1ff4] sm:$0xf]  ;;  %v12628_v53 = vld [vmem:[%s14199_s17 + $0x1ee8] sm:$0xf0]  ;;  %v13791_v5 = vld [vmem:[%s14199_s17 + $0x1fe4] sm:$0xf] }
 0x432   : > { %8359 = vmatpush.bf16.msra.mxu2 %v12439_v13  ;;  %v8096_v13 = vpop.f32.mrf.mxu1  ;;  %v12767_v49 = vor.u32 %v13793_v27, %v12764_v57  ;;  %v16895_v28 = vld [vmem:[#allocation38_spill] sm:$0xff] }
 0x433   : > { %8372 = vmatpush.bf16.msra.mxu3 %v12503_v17  ;;  %v16686_v8 = vadd.f32 %v8120_v40, %v8108_v36  ;;  %v12268_v17 = vld [vmem:[%s14199_s17 + $0x1c18] sm:$0xf0]  ;;  %v13741_v40 = vld [vmem:[%s14199_s17 + $0x1e54] sm:$0xf] }
 0x434   : > { %8334 = vmatpush.bf16.msra.mxu0 %v12303_v55  ;;  %v12271_v60 = vor.u32 %v13669_v43, %v12268_v17  ;;  %v13667_v55 = vld [vmem:[%s14199_s17 + $0x1c04] sm:$0xf]  ;;  %v12620_v13 = vld [vmem:[%s14199_s17 + $0x1ed8] sm:$0xf0]  ;;  %v12559_v7 = vor.u32 %v13741_v40, %v12556_v52 }
 0x435   : > { %8347 = vmatpush.bf16.msra.mxu1 %v12367_v19  ;;  %v12260_v19 = vld [vmem:[%s14199_s17 + $0x1c08] sm:$0xf0]  ;;  %v16896_v43 = vld [vmem:[#allocation39_spill] sm:$0xff]  ;;  %v16897_v17 = vld [vmem:[#allocation40_spill] sm:$0xff]  ;;  %v12623_v20 = vor.u32 %v13757_v3, %v12620_v13 }
 0x436   : > { %8360 = vmatpush.bf16.msra.mxu2 %v12431_v56  ;;  %v12335_v56 = vor.u32 %v13685_v46, %v12332_v39  ;;  %v13789_v46 = vld [vmem:[%s14199_s17 + $0x1fd4] sm:$0xf]  ;;  %v16898_v39 = vld [vmem:[#allocation41_spill] sm:$0xff] }
 0x437   : > { %8373 = vmatpush.bf16.msra.mxu3 %v12495_v25  ;;  %v13699_v25 = vld [vmem:[%s14199_s17 + $0x1d04] sm:$0xf]  ;;  %v13749_v13 = vld [vmem:[%s14199_s17 + $0x1e94] sm:$0xf] }
 0x438   : > { %8335 = vmatpush.bf16.msra.mxu0 %v12295_v42  ;;  %v8109_v35 = vpop.f32.mrf.mxu2  ;;  %v13761_v42 = vld [vmem:[%s14199_s17 + $0x1ef4] sm:$0xf] }
 0x439   : > { %8348 = vmatpush.bf16.msra.mxu1 %v12359_v44  ;;  %v8122_v63 = vpop.f32.mrf.mxu3  ;;  %v12263_v44 = vor.u32 %v13667_v55, %v12260_v19  ;;  %v13755_v55 = vld [vmem:[%s14199_s17 + $0x1ec4] sm:$0xf] }
 0x43a   : > { %8361 = vmatpush.bf16.msra.mxu2 %v12423_v18  ;;  %v12636_v18 = vld [vmem:[%s14199_s17 + $0x1ef8] sm:$0xf0]  ;;  %v13753_v63 = vld [vmem:[%s14199_s17 + $0x1eb4] sm:$0xf] }
 0x43b   : > { %8374 = vmatpush.bf16.msra.mxu3 %v12487_v26  ;;  %v12391_v26 = vor.u32 %v13699_v25, %v12388_v41  ;;  %v12639_v16 = vor.u32 %v13761_v42, %v12636_v18  ;;  %v13787_v25 = vld [vmem:[%s14199_s17 + $0x1fc4] sm:$0xf]  ;;  %v12540_v42 = vld [vmem:[%s14199_s17 + $0x1e38] sm:$0xf0]  ;;  %v12607_v57 = vor.u32 %v13753_v63, %v12604_v11 }
 0x43c   : > { %8336 = vmatpush.bf16.msra.mxu0 %v12287_v21  ;;  %v13743_v21 = vld [vmem:[%s14199_s17 + $0x1e64] sm:$0xf]  ;;  %v12543_v27 = vor.u32 %v13737_v30, %v12540_v42 }
 0x43d   : > { %8349 = vmatpush.bf16.msra.mxu1 %v12351_v6  ;;  %v12564_v6 = vld [vmem:[%s14199_s17 + $0x1e68] sm:$0xf0] }
 0x43e   : > { %8362 = vmatpush.bf16.msra.mxu2 %v12415_v0  ;;  %v13759_v0 = vld [vmem:[%s14199_s17 + $0x1ee4] sm:$0xf]  ;;  %v12567_v50 = vor.u32 %v13743_v21, %v12564_v6 }
 0x43f   : > { %8375 = vmatpush.bf16.msra.mxu3 %v12479_v9  ;;  %v12692_v9 = vld [vmem:[%s14199_s17 + $0x1f68] sm:$0xf0]  ;;  %v12631_v34 = vor.u32 %v13759_v0, %v12628_v53 }
 0x440   : > { %8337 = vmatpush.bf16.msra.mxu0 %v12279_v10  ;;  %v12695_v36 = vor.u32 %v13775_v14, %v12692_v9  ;;  %v12759_v10 = vor.u32 %v13791_v5, %v12756_v33  ;;  %v12596_v0 = vld [vmem:[%s14199_s17 + $0x1ea8] sm:$0xf0]  ;;  %v13783_v5 = vld [vmem:[%s14199_s17 + $0x1fa4] sm:$0xf] }
 0x441   : > { %8350 = vmatpush.bf16.msra.mxu1 %v12343_v37  ;;  %v13773_v37 = vld [vmem:[%s14199_s17 + $0x1f54] sm:$0xf]  ;;  %v12660_v53 = vld [vmem:[%s14199_s17 + $0x1f28] sm:$0xf0] }
 0x442   : > { %8363 = vmatpush.bf16.msra.mxu2 %v12407_v45  ;;  %v12684_v45 = vld [vmem:[%s14199_s17 + $0x1f58] sm:$0xf0]  ;;  %v12724_v33 = vld [vmem:[%s14199_s17 + $0x1fa8] sm:$0xf0] }
 0x443   : > { %8376 = vmatpush.bf16.msra.mxu3 %v12471_v2  ;;  %v12748_v2 = vld [vmem:[%s14199_s17 + $0x1fd8] sm:$0xf0]  ;;  %v12687_v58 = vor.u32 %v13773_v37, %v12684_v45  ;;  %v12727_v37 = vor.u32 %v13783_v5, %v12724_v33 }
 0x444   : > { %8338 = vmatpush.bf16.msra.mxu0 %v12271_v60  ;;  %v12548_v60 = vld [vmem:[%s14199_s17 + $0x1e48] sm:$0xf0]  ;;  %v12751_v19 = vor.u32 %v13789_v46, %v12748_v2  ;;  %v12588_v45 = vld [vmem:[%s14199_s17 + $0x1e98] sm:$0xf0]  ;;  %v13781_v46 = vld [vmem:[%s14199_s17 + $0x1f94] sm:$0xf] }
 0x445   : > { %8351 = vmatpush.bf16.msra.mxu1 %v12335_v56  ;;  %v12612_v56 = vld [vmem:[%s14199_s17 + $0x1ec8] sm:$0xf0]  ;;  %v12551_v31 = vor.u32 %v13739_v59, %v12548_v60  ;;  %v12716_v2 = vld [vmem:[%s14199_s17 + $0x1f98] sm:$0xf0]  ;;  %v13747_v60 = vld [vmem:[%s14199_s17 + $0x1e84] sm:$0xf] }
 0x446   : > { %8364 = vmatpush.bf16.msra.mxu2 %v12399_v62  ;;  %v13771_v62 = vld [vmem:[%s14199_s17 + $0x1f44] sm:$0xf]  ;;  %v12615_v35 = vor.u32 %v13755_v55, %v12612_v56  ;;  %v12516_v59 = vld [vmem:[%s14199_s17 + $0x1e08] sm:$0xf0]  ;;  %v12719_v55 = vor.u32 %v13781_v46, %v12716_v2 }
 0x447   : > { %8377 = vmatpush.bf16.msra.mxu3 %v12463_v32  ;;  %v12740_v32 = vld [vmem:[%s14199_s17 + $0x1fc8] sm:$0xf0]  ;;  %v12679_v29 = vor.u32 %v13771_v62, %v12676_v23  ;;  %v13763_v56 = vld [vmem:[%s14199_s17 + $0x1f04] sm:$0xf] }
 0x448   : > { %8339 = vmatpush.bf16.msra.mxu0 %v12263_v44  ;;  %v8133_v22 = vpop.f32.mrf.mxu0  ;;  %v12743_v44 = vor.u32 %v13787_v25, %v12740_v32  ;;  %v12644_v62 = vld [vmem:[%s14199_s17 + $0x1f08] sm:$0xf0] }
 0x449   : > { %8352 = vmatpush.bf16.msra.mxu1 %v12327_v61  ;;  %v8134_v41 = vadd.f32 %v8133_v22, %v16686_v8  ;;  %v8146_v15 = vpop.f32.mrf.mxu1  ;;  %v12668_v8 = vld [vmem:[%s14199_s17 + $0x1f38] sm:$0xf0]  ;;  %v13785_v61 = vld [vmem:[%s14199_s17 + $0x1fb4] sm:$0xf]  ;;  %v13779_v22 = vld [vmem:[%s14199_s17 + $0x1f84] sm:$0xf] }
 0x44a   : > { %8365 = vmatpush.bf16.msra.mxu2 %v12391_v26  ;;  %v12732_v26 = vld [vmem:[%s14199_s17 + $0x1fb8] sm:$0xf0]  ;;  %v12708_v25 = vld [vmem:[%s14199_s17 + $0x1f88] sm:$0xf0] }
 0x44b   : > { %8378 = vmatpush.bf16.msra.mxu3 %v12455_v1  ;;  %8340 = vmatmul.bf16.vlgmr.msra.gmra.mxu0 %v16895_v28  ;;  %v8147_v18 = vadd.f32 %v8146_v15, %v8134_v41  ;;  %v12671_v1 = vor.u32 %v13769_v12, %v12668_v8  ;;  %v12735_v21 = vor.u32 %v13785_v61, %v12732_v26  ;;  %v13733_v28 = vld [vmem:[%s14199_s17 + $0x1e14] sm:$0xf] }
 0x44c   : > { %8384 = vmatpush.bf16.msrb.mxu0 %v12575_v48  ;;  %8353 = vmatmul.bf16.vlgmr.msra.gmra.mxu1 %v16897_v17  ;;  %v13735_v48 = vld [vmem:[%s14199_s17 + $0x1e24] sm:$0xf]  ;;  %v12652_v17 = vld [vmem:[%s14199_s17 + $0x1f18] sm:$0xf0]  ;;  %v12647_v15 = vor.u32 %v13763_v56, %v12644_v62 }
 0x44d   : > { %8397 = vmatpush.bf16.msrb.mxu1 %v12639_v16  ;;  %8366 = vmatmul.bf16.vlgmr.msra.gmra.mxu2 %v16896_v43  ;;  %v12532_v16 = vld [vmem:[%s14199_s17 + $0x1e28] sm:$0xf0]  ;;  %v13765_v43 = vld [vmem:[%s14199_s17 + $0x1f14] sm:$0xf] }
 0x44e   : > { %8410 = vmatpush.bf16.msrb.mxu2 %v12703_v54  ;;  %8379 = vmatmul.bf16.vlgmr.msra.gmra.mxu3 %v16898_v39  ;;  %v13751_v54 = vld [vmem:[%s14199_s17 + $0x1ea4] sm:$0xf] }
 0x44f   : > { %8423 = vmatpush.bf16.msrb.mxu3 %v12767_v49  ;;  %v13767_v49 = vld [vmem:[%s14199_s17 + $0x1f24] sm:$0xf]  ;;  %v12599_v52 = vor.u32 %v13751_v54, %v12596_v0 }
 0x450   : > { %8385 = vmatpush.bf16.msrb.mxu0 %v12567_v50  ;;  %v8159_v6 = vpop.f32.mrf.mxu2  ;;  %v8135_v50 = vpop.f32.mrf.mxu0  ;;  %v12663_v3 = vor.u32 %v13767_v49, %v12660_v53 }
 0x451   : > { %8398 = vmatpush.bf16.msrb.mxu1 %v12631_v34  ;;  %v8160_v14 = vadd.f32 %v8159_v6, %v8147_v18  ;;  %v8172_v9 = vpop.f32.mrf.mxu3  ;;  %v12535_v34 = vor.u32 %v13735_v48, %v12532_v16 }
 0x452   : > { %8411 = vmatpush.bf16.msrb.mxu2 %v12695_v36  ;;  %v8148_v36 = vpop.f32.mrf.mxu1 }
 0x453   : > { %8424 = vmatpush.bf16.msrb.mxu3 %v12759_v10  ;;  %v8173_v40 = vadd.f32 %v8172_v9, %v8160_v14  ;;  %v12524_v10 = vld [vmem:[%s14199_s17 + $0x1e18] sm:$0xf0] }
 0x454   : > { %8386 = vmatpush.bf16.msrb.mxu0 %v12559_v7  ;;  %v12527_v39 = vor.u32 %v13733_v28, %v12524_v10  ;;  %v12591_v7 = vor.u32 %v13749_v13, %v12588_v45 }
 0x455   : > { %8399 = vmatpush.bf16.msrb.mxu1 %v12623_v20  ;;  %v12655_v20 = vor.u32 %v13765_v43, %v12652_v17 }
 0x456   : > { %8412 = vmatpush.bf16.msrb.mxu2 %v12687_v58  ;;  %v13731_v58 = vld [vmem:[%s14199_s17 + $0x1e04] sm:$0xf] }
 0x457   : > { %8425 = vmatpush.bf16.msrb.mxu3 %v12751_v19  ;;  %v12580_v19 = vld [vmem:[%s14199_s17 + $0x1e88] sm:$0xf0]  ;;  %v12519_v41 = vor.u32 %v13731_v58, %v12516_v59 }
 0x458   : > { %8387 = vmatpush.bf16.msrb.mxu0 %v12551_v31  ;;  %v8161_v23 = vpop.f32.mrf.mxu2  ;;  %v12583_v31 = vor.u32 %v13747_v60, %v12580_v19 }
 0x459   : > { %8400 = vmatpush.bf16.msrb.mxu1 %v12615_v35  ;;  %v8174_v32 = vpop.f32.mrf.mxu3  ;;  %v12711_v35 = vor.u32 %v13779_v22, %v12708_v25 }
 0x45a   : > { %8413 = vmatpush.bf16.msrb.mxu2 %v12679_v29 }
 0x45b   : > { %8426 = vmatpush.bf16.msrb.mxu3 %v12743_v44 }
 0x45c   : > { %8388 = vmatpush.bf16.msrb.mxu0 %v12543_v27 }
 0x45d   : > { %8401 = vmatpush.bf16.msrb.mxu1 %v12607_v57 }
 0x45e   : > { %8414 = vmatpush.bf16.msrb.mxu2 %v12671_v1 }
 0x45f   : > { %8427 = vmatpush.bf16.msrb.mxu3 %v12735_v21 }
 0x460   : > { %8389 = vmatpush.bf16.msrb.mxu0 %v12535_v34 }
 0x461   : > { %8402 = vmatpush.bf16.msrb.mxu1 %v12599_v52 }
 0x462   : > { %8415 = vmatpush.bf16.msrb.mxu2 %v12663_v3 }
 0x463   : > { %8428 = vmatpush.bf16.msrb.mxu3 %v12727_v37 }
 0x464   : > { %8390 = vmatpush.bf16.msrb.mxu0 %v12527_v39 }
 0x465   : > { %8403 = vmatpush.bf16.msrb.mxu1 %v12591_v7 }
 0x466   : > { %8416 = vmatpush.bf16.msrb.mxu2 %v12655_v20 }
 0x467   : > { %8429 = vmatpush.bf16.msrb.mxu3 %v12719_v55 }
 0x468   : > { %8391 = vmatpush.bf16.msrb.mxu0 %v12519_v41  ;;  %v8185_v29 = vpop.f32.mrf.mxu0 }
 0x469   : > { %8404 = vmatpush.bf16.msrb.mxu1 %v12583_v31  ;;  %v8186_v30 = vadd.f32 %v8185_v29, %v8173_v40  ;;  %v8198_v42 = vpop.f32.mrf.mxu1 }
 0x46a   : > { %8417 = vmatpush.bf16.msrb.mxu2 %v12647_v15 }
 0x46b   : > { %8430 = vmatpush.bf16.msrb.mxu3 %v12711_v35  ;;  %8392 = vmatmul.bf16.vlgmr.msrb.gmra.mxu0 %v15564_v24  ;;  %v8199_v63 = vadd.f32 %v8198_v42, %v8186_v30 }
 0x46c   : > { %8405 = vmatmul.bf16.vlgmr.msrb.gmra.mxu1 %v15571_v51 }
 0x46d   : > { %8418 = vmatmul.bf16.vlgmr.msrb.gmra.mxu2 %v15569_v47 }
 0x46e   : > { %8431 = vmatmul.bf16.vlgmr.msrb.gmra.mxu3 %v15575_v4 }
 0x470   : > { %v8211_v44 = vpop.f32.mrf.mxu2  ;;  %v8187_v12 = vpop.f32.mrf.mxu0 }
 0x471   : > { %v8212_v18 = vadd.f32 %v8211_v44, %v8199_v63  ;;  %v8224_v11 = vpop.f32.mrf.mxu3  ;;  %v8200_v8 = vpop.f32.mrf.mxu1 }
 0x473   : > { %v8225_v61 = vadd.f32 %v8224_v11, %v8212_v18 }
 0x478   : > { %v8213_v26 = vpop.f32.mrf.mxu2 }
 0x479   : > { %v8226_v27 = vpop.f32.mrf.mxu3 }
 0x488   : > { %v8237_v57 = vpop.f32.mrf.mxu0 }
 0x489   : > { %v8238_v24 = vadd.f32 %v8237_v57, %v8225_v61  ;;  %v8250_v1 = vpop.f32.mrf.mxu1 }
 0x48b   : > { %v8251_v51 = vadd.f32 %v8250_v1, %v8238_v24 }
 0x490   : > { %v8263_v48 = vpop.f32.mrf.mxu2  ;;  %v8239_v4 = vpop.f32.mrf.mxu0 }
 0x491   : > { %v8264_v47 = vadd.f32 %v8263_v48, %v8251_v51  ;;  %v8276_v16 = vpop.f32.mrf.mxu3  ;;  %v8252_v54 = vpop.f32.mrf.mxu1 }
 0x493   : > { %v8277_v21 = vadd.f32 %v8276_v16, %v8264_v47 }
 0x498   : > { %v8265_v6 = vpop.f32.mrf.mxu2 }
 0x499   : > { %v8278_v0 = vpop.f32.mrf.mxu3 }
 0x4a8   : > { %v8289_v49 = vpop.f32.mrf.mxu0 }
 0x4a9   : > { %v8302_v53 = vpop.f32.mrf.mxu1  ;;  %v8290_v52 = vadd.f32 %v8289_v49, %v8277_v21  ;;  %v13860_v21 = vld [vmem:[%s303_s26] sm:$0x3] }
 0x4aa   : > { %v8504_v6 = vperm.slane %v13860_v21, 1 }
 0x4ab   : > { %v8303_v37 = vadd.f32 %v8302_v53, %v8290_v52 }
 0x4b0   : > { %v8315_v14 = vpop.f32.mrf.mxu2  ;;  %v8291_v5 = vpop.f32.mrf.mxu0 }
 0x4b1   : > { %v8328_v9 = vpop.f32.mrf.mxu3  ;;  %v8304_v33 = vpop.f32.mrf.mxu1  ;;  %v8316_v45 = vadd.f32 %v8315_v14, %v8303_v37 }
 0x4b3   : > { %v8329_v46 = vadd.f32 %v8328_v9, %v8316_v45 }
 0x4b8   : > { %v8317_v50 = vpop.f32.mrf.mxu2 }
 0x4b9   : > { %v8330_v34 = vpop.f32.mrf.mxu3 }
 0x4c8   : > { %v8341_v36 = vpop.f32.mrf.mxu0 }
 0x4c9   : > { %v8354_v40 = vpop.f32.mrf.mxu1  ;;  %v8342_v2 = vadd.f32 %v8341_v36, %v8329_v46 }
 0x4cb   : > { %v8355_v39 = vadd.f32 %v8354_v40, %v8342_v2 }
 0x4d0   : > { %v8367_v3 = vpop.f32.mrf.mxu2  ;;  %v8343_v10 = vpop.f32.mrf.mxu0 }
 0x4d1   : > { %v8380_v28 = vpop.f32.mrf.mxu3  ;;  %v8356_v13 = vpop.f32.mrf.mxu1  ;;  %v8368_v7 = vadd.f32 %v8367_v3, %v8355_v39 }
 0x4d3   : > { %v8381_v20 = vadd.f32 %v8380_v28, %v8368_v7 }
 0x4d8   : > { %v8369_v43 = vpop.f32.mrf.mxu2 }
 0x4d9   : > { %v8382_v17 = vpop.f32.mrf.mxu3 }
 0x4e8   : > { %v8393_v58 = vpop.f32.mrf.mxu0 }
 0x4e9   : > { %v8406_v59 = vpop.f32.mrf.mxu1  ;;  %v8394_v60 = vadd.f32 %v8393_v58, %v8381_v20 }
 0x4eb   : > { %v8407_v55 = vadd.f32 %v8406_v59, %v8394_v60 }
 0x4f0   : > { %v8419_v19 = vpop.f32.mrf.mxu2  ;;  %v8395_v23 = vpop.f32.mrf.mxu0 }
 0x4f1   : > { %v8420_v56 = vadd.f32 %v8419_v19, %v8407_v55  ;;  %v8432_v62 = vpop.f32.mrf.mxu3  ;;  %v8408_v22 = vpop.f32.mrf.mxu1 }
 0x4f3   : > { %v8433_v25 = vadd.f32 %v8432_v62, %v8420_v56 }
 0x4f5   : > { %v8437_v32 = vmax.f32 %v8433_v25, 0.0 }
 0x4f7   : > { %v8444_v41 = vrot.slane %v8437_v32, 4 }
 0x4f8   : > { %v8421_v31 = vpop.f32.mrf.mxu2 }
 0x4f9   : > { %v8445_v15 = vadd.f32 %v8444_v41, %v8437_v32  ;;  %v8434_v35 = vpop.f32.mrf.mxu3 }
 0x4fb   : > { %v8446_v29 = vrot.slane %v8445_v15, 2 }
 0x4fd   : > { %v8447_v30 = vadd.f32 %v8446_v29, %v8445_v15 }
 0x4ff   : > { %v8448_v42 = vrot.slane %v8447_v30, 1 }
 0x501   : > { %v8449_v63 = vadd.f32 %v8448_v42, %v8447_v30 }
 0x503   : > { %v8458_v44 = vmul.f32 %v15961_v38, %v8449_v63 }
 0x505   : > { %v8460_v18 = vsub.f32 %v8437_v32, %v8458_v44 }
 0x507   : > { %v8462_v11 = vmul.f32 %v8460_v18, %v8460_v18 }
 0x509   : > { %v8469_v12 = vrot.slane %v8462_v11, 4 }
 0x50b   : > { %v8470_v8 = vadd.f32 %v8469_v12, %v8462_v11 }
 0x50d   : > { %v8471_v61 = vrot.slane %v8470_v8, 2 }
 0x50f   : > { %v8472_v26 = vadd.f32 %v8471_v61, %v8470_v8 }
 0x511   : > { %v8473_v27 = vrot.slane %v8472_v26, 1 }
 0x513   : > { %v8474_v57 = vadd.f32 %v8473_v27, %v8472_v26 }
 0x515   : > { %v8476_v24 = vmul.f32 %v8474_v57, %v15961_v38  ;;  %v13861_v38 = vld [vmem:[%s313_s1] sm:$0x3] }
 0x516   : > { %v8512_v53 = vperm.slane %v13861_v38, 1 }
 0x517   : > { %v8478_v1 = vadd.f32 1e-05, %v8476_v24 }
 0x519   : > { %13857 = vrsqrt.f32 %v8478_v1  ;;  %vm8495_vm5 = vweird.f32 %v8478_v1 }
 0x51f   : > { %v13858_v51 = vpop.eup %13857 }
 0x520   : > { %v8490_v48 = vmul.f32 %v13858_v51, %v8478_v1  ;;  %vm8496_vm4 = vweird.f32 %v13858_v51 }
 0x521   : > { %vm8497_vm6 = vmor %vm8495_vm5, %vm8496_vm4 }
 0x522   : > { %v8491_v47 = vmul.f32 %v13858_v51, %v8490_v48 }
 0x524   : > { %v8492_v16 = vmul.f32 0.5, %v8491_v47 }
 0x526   : > { %v8493_v4 = vsub.f32 1.5, %v8492_v16 }
 0x528   : > { %v8494_v54 = vmul.f32 %v13858_v51, %v8493_v4 }
 0x52a   : > { %v8498_v0 = vsel %vm8497_vm6, %v13858_v51, %v8494_v54 }
 0x52b   : > { %v8500_v49 = vmul.f32 %v8498_v0, %v8460_v18 }
 0x52d   : > { %v8508_v14 = vmul.f32 %v8504_v6, %v8500_v49 }
 0x52f   : > { %v8516_v9 = vadd.f32 %v8512_v53, %v8508_v14 }
 0x531   : > { %8518 = vst [vmem:[%s16115_s6 + $0x8] sm:$0xff] %v8516_v9 }
 0x532 PF: > { %s16899_s17 = sld [smem:[#allocation12_spill]]  ;;  %p21_p8 = scmp.ge.s32.totalorder %s14082_s23, 6  }
 0x533   : > { %s16900_s18 = smov %s14016_s19  ;;  %s16901_s19 = smov %s14020_s20 }
 0x534   : > { %s16903_s21 = smov %s14082_s23  ;;  %23 = sbr.rel (!%p21_p8) target bundleno = 10 (0xa), region = 117 }
 0x538   : > { %s16902_s20 = smov %s16899_s17 }
 0x539   :  { %8541 = vsyncpa [#allocation3], 1 }
 0x53a   :  { %8543 = vsyncpa [#allocation3 + $0x1], 1 }
 0x53b   :  { %8544 = vsyncpa [#allocation5], 1 }
 0x53c   :  { %8546 = vsyncpa [#allocation5 + $0x1], 1 }
 0x53d   :  { %8547 = vsyncpa [#allocation8], 1 }
 0x53e   :  { %8549 = vsyncpa [#allocation8 + $0x1], 1 }

</bundles_post_ra>
